<compile_context>
chip_gen: v5e
topology: v5e:2x2
jax: 0.10.0
libtpu: 0.0.40
codegen_flags: <defaults>
</compile_context>

<pallas_src>
import functools
import math

import jax
import jax.numpy as jnp
from jax.experimental import pallas as pl
from jax.experimental.pallas import tpu as pltpu


def _layernorm(x, gamma, beta, eps):
    # matches reference formula exactly (divide by unbiased variance, eps added after)
    n = x.shape[-1]
    mean = jnp.mean(x, axis=-1, keepdims=True)
    var = jnp.sum((x - mean) ** 2, axis=-1, keepdims=True) * (1.0 / (n - 1))
    inv_var = pl.reciprocal(var, approx=True)
    return ((x - mean) * inv_var + eps) * gamma + beta


def _mha(q_flat, kv_flat, batch, s_q, s_kv,
         wq_ref, bq_ref, wk_ref, bk_ref, wv_ref, bv_ref, wo_ref, bo_ref,
         num_heads):
    """Multi-head attention on batch-flattened activations.

    q_flat:  [batch*s_q,  D] f32      kv_flat: [batch*s_kv, D] f32
    wq/wk/wv refs: [H, D, dh] bf16    bq/bk/bv refs: [H, 1, dh] f32
    wo ref:        [H, dh, D] bf16    bo ref:        [1, D]     f32
    Per-head contributions are accumulated straight into the output projection
    (no concat, no in-kernel lane slicing, no explicit K transpose).
    """
    d_model = q_flat.shape[-1]
    dh = d_model // num_heads
    scale = 1.0 / math.sqrt(dh)  # reference scales by sqrt(values.size(3)) = head dim

    q_bf = q_flat.astype(jnp.bfloat16)
    kv_bf = kv_flat.astype(jnp.bfloat16)

    out = jnp.zeros((batch * s_q, d_model), jnp.float32)

    for h in range(num_heads):  # static unroll; H is small, live state stays bounded
        q_h = jnp.dot(q_bf, wq_ref[h], preferred_element_type=jnp.float32) + bq_ref[h]
        k_h = jnp.dot(kv_bf, wk_ref[h], preferred_element_type=jnp.float32) + bk_ref[h]
        v_h = jnp.dot(kv_bf, wv_ref[h], preferred_element_type=jnp.float32) + bv_ref[h]

        q3 = q_h.reshape(batch, s_q, dh).astype(jnp.bfloat16)
        k3 = k_h.reshape(batch, s_kv, dh).astype(jnp.bfloat16)
        v3 = v_h.reshape(batch, s_kv, dh).astype(jnp.bfloat16)

        # scores[b, i, j] = q3[b, i, :] . k3[b, j, :]   (K consumed untransposed)
        scores = jax.lax.dot_general(
            q3, k3, dimension_numbers=(((2,), (2,)), ((0,), (0,))),
            preferred_element_type=jnp.float32) * scale          # [B, s_q, s_kv] f32

        m = jnp.max(scores, axis=-1, keepdims=True)
        e = jnp.exp(scores - m)
        attn = e * pl.reciprocal(jnp.sum(e, axis=-1, keepdims=True), approx=True)

        ctx = jax.lax.dot_general(
            attn.astype(jnp.bfloat16), v3,
            dimension_numbers=(((2,), (1,)), ((0,), (0,))),
            preferred_element_type=jnp.float32)                  # [B, s_q, dh] f32

        ctx2 = ctx.reshape(batch * s_q, dh).astype(jnp.bfloat16)
        out = out + jnp.dot(ctx2, wo_ref[h], preferred_element_type=jnp.float32)

    return out + bo_ref[...]


def decoder_layer_kernel(
    x_ref, enc_ref,
    # self-attention params (head-split)
    wq1_ref, bq1_ref, wk1_ref, bk1_ref, wv1_ref, bv1_ref, wo1_ref, bo1_ref,
    # cross-attention params (head-split)
    wq2_ref, bq2_ref, wk2_ref, bk2_ref, wv2_ref, bv2_ref, wo2_ref, bo2_ref,
    # feed-forward params
    wf1_ref, bf1_ref, wf2_ref, bf2_ref,
    # layernorm params
    g1_ref, be1_ref, g2_ref, be2_ref, g3_ref, be3_ref,
    out_ref, *, batch, s_dec, s_enc, num_heads, eps,
):
    x = x_ref[...]      # [B*S_dec, D] f32
    enc = enc_ref[...]  # [B*S_enc, D] f32

    # --- decoder self-attention + residual + norm1 ---
    sa = _mha(x, x, batch, s_dec, s_dec,
              wq1_ref, bq1_ref, wk1_ref, bk1_ref, wv1_ref, bv1_ref, wo1_ref, bo1_ref,
              num_heads)
    x1 = _layernorm(x + sa, g1_ref[...], be1_ref[...], eps)

    # --- encoder (cross) attention + residual + norm2 ---
    ca = _mha(x1, enc, batch, s_dec, s_enc,
              wq2_ref, bq2_ref, wk2_ref, bk2_ref, wv2_ref, bv2_ref, wo2_ref, bo2_ref,
              num_heads)
    x2 = _layernorm(ca + x1, g2_ref[...], be2_ref[...], eps)

    # --- position-wise feed-forward + residual + norm3 ---
    h = jnp.dot(x2.astype(jnp.bfloat16), wf1_ref[...],
                preferred_element_type=jnp.float32) + bf1_ref[...]
    h = jnp.maximum(h, 0.0)
    ff = jnp.dot(h.astype(jnp.bfloat16), wf2_ref[...],
                 preferred_element_type=jnp.float32) + bf2_ref[...]
    x3 = _layernorm(ff + x2, g3_ref[...], be3_ref[...], eps)

    out_ref[...] = x3.astype(out_ref.dtype)


def _split_heads_in(w, b, num_heads):
    """[D_in, D_out], [1, D_out] -> [H, D_in, dh] (bf16), [H, 1, dh] (f32)."""
    d_in, d_out = w.shape
    dh = d_out // num_heads
    w_s = w.reshape(d_in, num_heads, dh).transpose(1, 0, 2).astype(jnp.bfloat16)
    b_s = b.reshape(1, num_heads, dh).transpose(1, 0, 2).astype(jnp.float32)
    return w_s, b_s


def _split_heads_out(w, num_heads):
    """[D_in, D_out] -> [H, dh, D_out] (bf16)."""
    d_in, d_out = w.shape
    dh = d_in // num_heads
    return w.reshape(num_heads, dh, d_out).astype(jnp.bfloat16)


def decoder_layer(x, enc, params, *, num_heads, eps=1e-12):
    """One DecoderLayer forward as a single fused Pallas kernel (one grid step)."""
    B, S_dec, D = x.shape
    _, S_enc, _ = enc.shape

    # Flatten batch into the matmul M dimension (free XLA reshape outside kernel).
    x_flat = x.reshape(B * S_dec, D).astype(jnp.float32)
    enc_flat = enc.reshape(B * S_enc, D).astype(jnp.float32)

    # Pre-split attention weights per head OUTSIDE the kernel (no in-kernel lane
    # slicing), cast matmul operands to bf16.
    wq1, bq1 = _split_heads_in(params["wq1"], params["bq1"], num_heads)
    wk1, bk1 = _split_heads_in(params["wk1"], params["bk1"], num_heads)
    wv1, bv1 = _split_heads_in(params["wv1"], params["bv1"], num_heads)
    wo1 = _split_heads_out(params["wo1"], num_heads)
    wq2, bq2 = _split_heads_in(params["wq2"], params["bq2"], num_heads)
    wk2, bk2 = _split_heads_in(params["wk2"], params["bk2"], num_heads)
    wv2, bv2 = _split_heads_in(params["wv2"], params["bv2"], num_heads)
    wo2 = _split_heads_out(params["wo2"], num_heads)

    ordered = [
        wq1, bq1, wk1, bk1, wv1, bv1, wo1, params["bo1"].astype(jnp.float32),
        wq2, bq2, wk2, bk2, wv2, bv2, wo2, params["bo2"].astype(jnp.float32),
        params["wf1"].astype(jnp.bfloat16), params["bf1"].astype(jnp.float32),
        params["wf2"].astype(jnp.bfloat16), params["bf2"].astype(jnp.float32),
        params["g1"], params["be1"], params["g2"], params["be2"],
        params["g3"], params["be3"],
    ]

    kernel = functools.partial(decoder_layer_kernel, batch=B, s_dec=S_dec,
                               s_enc=S_enc, num_heads=num_heads, eps=eps)

    out_flat = pl.pallas_call(
        kernel,
        out_shape=jax.ShapeDtypeStruct((B * S_dec, D), jnp.float32),
        # single-step invocation: whole (small) problem resident in VMEM; at
        # these sizes grid-step / launch overhead would dominate everything.
    )(x_flat, enc_flat, *ordered)
    return out_flat.reshape(B, S_dec, D)


def init_layer_params(key, D, hidden):
    ks = jax.random.split(key, 10)
    w = lambda k, i, o: (jax.random.normal(k, (i, o), jnp.float32) * 0.02)
    zeros = lambda n: jnp.zeros((1, n), jnp.float32)
    ones = lambda n: jnp.ones((1, n), jnp.float32)
    return {
        "wq1": w(ks[0], D, D), "bq1": zeros(D),
        "wk1": w(ks[1], D, D), "bk1": zeros(D),
        "wv1": w(ks[2], D, D), "bv1": zeros(D),
        "wo1": w(ks[3], D, D), "bo1": zeros(D),
        "wq2": w(ks[4], D, D), "bq2": zeros(D),
        "wk2": w(ks[5], D, D), "bk2": zeros(D),
        "wv2": w(ks[6], D, D), "bv2": zeros(D),
        "wo2": w(ks[7], D, D), "bo2": zeros(D),
        "wf1": w(ks[8], D, hidden), "bf1": zeros(hidden),
        "wf2": w(ks[9], hidden, D), "bf2": zeros(D),
        "g1": ones(D), "be1": zeros(D),
        "g2": ones(D), "be2": zeros(D),
        "g3": ones(D), "be3": zeros(D),
    }


def transformer_decoder(encoder_output, decoder_input, target_mask, layer_params, *, num_heads):
    # TODO(synk): target_mask is accepted for signature parity but the reference
    # forward never threads it into attention, so it is unused here as well.
    x = decoder_input
    for p in layer_params:
        x = decoder_layer(x, encoder_output, p, num_heads=num_heads)
    return x


if __name__ == "__main__":
    # Small but lane-dense config: D and HIDDEN are multiples of 128 and
    # B * S_DEC = 128 rows feed every projection / FFN matmul.
    B, S_DEC, S_ENC = 2, 64, 64
    D, HIDDEN, NUM_HEADS, NUM_LAYERS = 128, 256, 4, 2

    key = jax.random.PRNGKey(0)
    k_enc, k_dec, k_params = jax.random.split(key, 3)
    encoder_output = jax.random.normal(k_enc, (B, S_ENC, D), jnp.float32)
    decoder_input = jax.random.normal(k_dec, (B, S_DEC, D), jnp.float32)
    target_mask = jnp.ones((S_DEC, S_DEC), jnp.float32)  # unused (see note)

    layer_params = [
        init_layer_params(k, D, HIDDEN)
        for k in jax.random.split(k_params, NUM_LAYERS)
    ]

    out = transformer_decoder(encoder_output, decoder_input, target_mask,
                              layer_params, num_heads=NUM_HEADS)
    out = jax.block_until_ready(out)
    assert out.shape == (B, S_DEC, D) and out.dtype == jnp.float32
    print("KERNEL_OK")
</pallas_src>

<mosaic_0001>
module attributes {stable_mosaic.version = 11 : i64} {
  func.func @decoder_layer_kernel(%arg0: memref<128x128xf32, #tpu.memory_space<vmem>>, %arg1: memref<128x128xf32, #tpu.memory_space<vmem>>, %arg2: memref<4x128x32xbf16, #tpu.memory_space<vmem>>, %arg3: memref<4x1x32xf32, #tpu.memory_space<vmem>>, %arg4: memref<4x128x32xbf16, #tpu.memory_space<vmem>>, %arg5: memref<4x1x32xf32, #tpu.memory_space<vmem>>, %arg6: memref<4x128x32xbf16, #tpu.memory_space<vmem>>, %arg7: memref<4x1x32xf32, #tpu.memory_space<vmem>>, %arg8: memref<4x32x128xbf16, #tpu.memory_space<vmem>>, %arg9: memref<1x128xf32, #tpu.memory_space<vmem>>, %arg10: memref<4x128x32xbf16, #tpu.memory_space<vmem>>, %arg11: memref<4x1x32xf32, #tpu.memory_space<vmem>>, %arg12: memref<4x128x32xbf16, #tpu.memory_space<vmem>>, %arg13: memref<4x1x32xf32, #tpu.memory_space<vmem>>, %arg14: memref<4x128x32xbf16, #tpu.memory_space<vmem>>, %arg15: memref<4x1x32xf32, #tpu.memory_space<vmem>>, %arg16: memref<4x32x128xbf16, #tpu.memory_space<vmem>>, %arg17: memref<1x128xf32, #tpu.memory_space<vmem>>, %arg18: memref<128x256xbf16, #tpu.memory_space<vmem>>, %arg19: memref<1x256xf32, #tpu.memory_space<vmem>>, %arg20: memref<256x128xbf16, #tpu.memory_space<vmem>>, %arg21: memref<1x128xf32, #tpu.memory_space<vmem>>, %arg22: memref<1x128xf32, #tpu.memory_space<vmem>>, %arg23: memref<1x128xf32, #tpu.memory_space<vmem>>, %arg24: memref<1x128xf32, #tpu.memory_space<vmem>>, %arg25: memref<1x128xf32, #tpu.memory_space<vmem>>, %arg26: memref<1x128xf32, #tpu.memory_space<vmem>>, %arg27: memref<1x128xf32, #tpu.memory_space<vmem>>, %arg28: memref<128x128xf32, #tpu.memory_space<vmem>>) attributes {dimension_semantics = [], scalar_prefetch = 0 : i64, scratch_operands = 0 : i64, tpu.core_type = #tpu.core_type<tc>} {
    %c0 = arith.constant 0 : index
    %c0_0 = arith.constant 0 : index
    %0 = vector.load %arg0[%c0, %c0_0] : memref<128x128xf32, #tpu.memory_space<vmem>>, vector<128x128xf32>
    %c0_1 = arith.constant 0 : index
    %c0_2 = arith.constant 0 : index
    %1 = vector.load %arg1[%c0_1, %c0_2] : memref<128x128xf32, #tpu.memory_space<vmem>>, vector<128x128xf32>
    %2 = arith.truncf %0 : vector<128x128xf32> to vector<128x128xbf16>
    %3 = arith.truncf %0 : vector<128x128xf32> to vector<128x128xbf16>
    %cst = arith.constant 0.000000e+00 : f32
    %4 = vector.broadcast %cst : f32 to vector<128x128xf32>
    %c0_3 = arith.constant 0 : index
    %c0_4 = arith.constant 0 : index
    %c0_5 = arith.constant 0 : index
    %5 = vector.load %arg2[%c0_3, %c0_4, %c0_5] : memref<4x128x32xbf16, #tpu.memory_space<vmem>>, vector<1x128x32xbf16>
    %6 = vector.shape_cast %5 : vector<1x128x32xbf16> to vector<128x32xbf16>
    %cst_6 = arith.constant dense<0.000000e+00> : vector<128x32xf32>
    %7 = tpu.matmul %2, %6, %cst_6 {dimension_numbers = #tpu.dot_dimension_numbers<[1], [0], [0], [1], [0, 0, 1, 1], [], []>} : vector<128x128xbf16>, vector<128x32xbf16>, vector<128x32xf32> -> vector<128x32xf32>
    %c0_7 = arith.constant 0 : index
    %c0_8 = arith.constant 0 : index
    %c0_9 = arith.constant 0 : index
    %8 = vector.load %arg3[%c0_7, %c0_8, %c0_9] : memref<4x1x32xf32, #tpu.memory_space<vmem>>, vector<1x1x32xf32>
    %9 = vector.shape_cast %8 : vector<1x1x32xf32> to vector<1x32xf32>
    %10 = vector.broadcast %9 : vector<1x32xf32> to vector<128x32xf32>
    %11 = arith.addf %7, %10 : vector<128x32xf32>
    %c0_10 = arith.constant 0 : index
    %c0_11 = arith.constant 0 : index
    %c0_12 = arith.constant 0 : index
    %12 = vector.load %arg4[%c0_10, %c0_11, %c0_12] : memref<4x128x32xbf16, #tpu.memory_space<vmem>>, vector<1x128x32xbf16>
    %13 = vector.shape_cast %12 : vector<1x128x32xbf16> to vector<128x32xbf16>
    %cst_13 = arith.constant dense<0.000000e+00> : vector<128x32xf32>
    %14 = tpu.matmul %3, %13, %cst_13 {dimension_numbers = #tpu.dot_dimension_numbers<[1], [0], [0], [1], [0, 0, 1, 1], [], []>} : vector<128x128xbf16>, vector<128x32xbf16>, vector<128x32xf32> -> vector<128x32xf32>
    %c0_14 = arith.constant 0 : index
    %c0_15 = arith.constant 0 : index
    %c0_16 = arith.constant 0 : index
    %15 = vector.load %arg5[%c0_14, %c0_15, %c0_16] : memref<4x1x32xf32, #tpu.memory_space<vmem>>, vector<1x1x32xf32>
    %16 = vector.shape_cast %15 : vector<1x1x32xf32> to vector<1x32xf32>
    %17 = vector.broadcast %16 : vector<1x32xf32> to vector<128x32xf32>
    %18 = arith.addf %14, %17 : vector<128x32xf32>
    %c0_17 = arith.constant 0 : index
    %c0_18 = arith.constant 0 : index
    %c0_19 = arith.constant 0 : index
    %19 = vector.load %arg6[%c0_17, %c0_18, %c0_19] : memref<4x128x32xbf16, #tpu.memory_space<vmem>>, vector<1x128x32xbf16>
    %20 = vector.shape_cast %19 : vector<1x128x32xbf16> to vector<128x32xbf16>
    %cst_20 = arith.constant dense<0.000000e+00> : vector<128x32xf32>
    %21 = tpu.matmul %3, %20, %cst_20 {dimension_numbers = #tpu.dot_dimension_numbers<[1], [0], [0], [1], [0, 0, 1, 1], [], []>} : vector<128x128xbf16>, vector<128x32xbf16>, vector<128x32xf32> -> vector<128x32xf32>
    %c0_21 = arith.constant 0 : index
    %c0_22 = arith.constant 0 : index
    %c0_23 = arith.constant 0 : index
    %22 = vector.load %arg7[%c0_21, %c0_22, %c0_23] : memref<4x1x32xf32, #tpu.memory_space<vmem>>, vector<1x1x32xf32>
    %23 = vector.shape_cast %22 : vector<1x1x32xf32> to vector<1x32xf32>
    %24 = vector.broadcast %23 : vector<1x32xf32> to vector<128x32xf32>
    %25 = arith.addf %21, %24 : vector<128x32xf32>
    %26 = vector.shape_cast %11 : vector<128x32xf32> to vector<2x64x32xf32>
    %27 = arith.truncf %26 : vector<2x64x32xf32> to vector<2x64x32xbf16>
    %28 = vector.shape_cast %18 : vector<128x32xf32> to vector<2x64x32xf32>
    %29 = arith.truncf %28 : vector<2x64x32xf32> to vector<2x64x32xbf16>
    %30 = vector.shape_cast %25 : vector<128x32xf32> to vector<2x64x32xf32>
    %31 = arith.truncf %30 : vector<2x64x32xf32> to vector<2x64x32xbf16>
    %cst_24 = arith.constant dense<0.000000e+00> : vector<2x64x64xf32>
    %32 = tpu.matmul %27, %29, %cst_24 {dimension_numbers = #tpu.dot_dimension_numbers<[2], [2], [1], [1], [0, 0, 0, 1, 1, 1], [0], [0]>} : vector<2x64x32xbf16>, vector<2x64x32xbf16>, vector<2x64x64xf32> -> vector<2x64x64xf32>
    %cst_25 = arith.constant 0.176776692 : f32
    %33 = vector.broadcast %cst_25 : f32 to vector<2x64x64xf32>
    %34 = arith.mulf %32, %33 : vector<2x64x64xf32>
    %cst_26 = arith.constant dense<0xFF800000> : vector<2x64xf32>
    %35 = vector.multi_reduction <maximumf>, %34, %cst_26 [2] : vector<2x64x64xf32> to vector<2x64xf32>
    %36 = vector.shape_cast %35 : vector<2x64xf32> to vector<2x64x1xf32>
    %37 = vector.broadcast %36 : vector<2x64x1xf32> to vector<2x64x64xf32>
    %38 = arith.subf %34, %37 : vector<2x64x64xf32>
    %39 = math.exp %38 : vector<2x64x64xf32>
    %cst_27 = arith.constant dense<0.000000e+00> : vector<2x64xf32>
    %40 = vector.multi_reduction <add>, %39, %cst_27 [2] : vector<2x64x64xf32> to vector<2x64xf32>
    %41 = vector.shape_cast %40 : vector<2x64xf32> to vector<2x64x1xf32>
    %42 = tpu.reciprocal %41 {approx = true} : vector<2x64x1xf32> -> vector<2x64x1xf32>
    %43 = vector.broadcast %42 : vector<2x64x1xf32> to vector<2x64x64xf32>
    %44 = arith.mulf %39, %43 : vector<2x64x64xf32>
    %45 = arith.truncf %44 : vector<2x64x64xf32> to vector<2x64x64xbf16>
    %cst_28 = arith.constant dense<0.000000e+00> : vector<2x64x32xf32>
    %46 = tpu.matmul %45, %31, %cst_28 {dimension_numbers = #tpu.dot_dimension_numbers<[2], [1], [1], [2], [0, 0, 0, 1, 1, 2], [0], [0]>} : vector<2x64x64xbf16>, vector<2x64x32xbf16>, vector<2x64x32xf32> -> vector<2x64x32xf32>
    %47 = vector.shape_cast %46 : vector<2x64x32xf32> to vector<128x32xf32>
    %48 = arith.truncf %47 : vector<128x32xf32> to vector<128x32xbf16>
    %c0_29 = arith.constant 0 : index
    %c0_30 = arith.constant 0 : index
    %c0_31 = arith.constant 0 : index
    %49 = vector.load %arg8[%c0_29, %c0_30, %c0_31] : memref<4x32x128xbf16, #tpu.memory_space<vmem>>, vector<1x32x128xbf16>
    %50 = vector.shape_cast %49 : vector<1x32x128xbf16> to vector<32x128xbf16>
    %cst_32 = arith.constant dense<0.000000e+00> : vector<128x128xf32>
    %51 = tpu.matmul %48, %50, %cst_32 {dimension_numbers = #tpu.dot_dimension_numbers<[1], [0], [0], [1], [0, 0, 1, 1], [], []>} : vector<128x32xbf16>, vector<32x128xbf16>, vector<128x128xf32> -> vector<128x128xf32>
    %52 = arith.addf %4, %51 : vector<128x128xf32>
    %c1 = arith.constant 1 : index
    %c0_33 = arith.constant 0 : index
    %c0_34 = arith.constant 0 : index
    %53 = vector.load %arg2[%c1, %c0_33, %c0_34] : memref<4x128x32xbf16, #tpu.memory_space<vmem>>, vector<1x128x32xbf16>
    %54 = vector.shape_cast %53 : vector<1x128x32xbf16> to vector<128x32xbf16>
    %cst_35 = arith.constant dense<0.000000e+00> : vector<128x32xf32>
    %55 = tpu.matmul %2, %54, %cst_35 {dimension_numbers = #tpu.dot_dimension_numbers<[1], [0], [0], [1], [0, 0, 1, 1], [], []>} : vector<128x128xbf16>, vector<128x32xbf16>, vector<128x32xf32> -> vector<128x32xf32>
    %c1_36 = arith.constant 1 : index
    %c0_37 = arith.constant 0 : index
    %c0_38 = arith.constant 0 : index
    %56 = vector.load %arg3[%c1_36, %c0_37, %c0_38] : memref<4x1x32xf32, #tpu.memory_space<vmem>>, vector<1x1x32xf32>
    %57 = vector.shape_cast %56 : vector<1x1x32xf32> to vector<1x32xf32>
    %58 = vector.broadcast %57 : vector<1x32xf32> to vector<128x32xf32>
    %59 = arith.addf %55, %58 : vector<128x32xf32>
    %c1_39 = arith.constant 1 : index
    %c0_40 = arith.constant 0 : index
    %c0_41 = arith.constant 0 : index
    %60 = vector.load %arg4[%c1_39, %c0_40, %c0_41] : memref<4x128x32xbf16, #tpu.memory_space<vmem>>, vector<1x128x32xbf16>
    %61 = vector.shape_cast %60 : vector<1x128x32xbf16> to vector<128x32xbf16>
    %cst_42 = arith.constant dense<0.000000e+00> : vector<128x32xf32>
    %62 = tpu.matmul %3, %61, %cst_42 {dimension_numbers = #tpu.dot_dimension_numbers<[1], [0], [0], [1], [0, 0, 1, 1], [], []>} : vector<128x128xbf16>, vector<128x32xbf16>, vector<128x32xf32> -> vector<128x32xf32>
    %c1_43 = arith.constant 1 : index
    %c0_44 = arith.constant 0 : index
    %c0_45 = arith.constant 0 : index
    %63 = vector.load %arg5[%c1_43, %c0_44, %c0_45] : memref<4x1x32xf32, #tpu.memory_space<vmem>>, vector<1x1x32xf32>
    %64 = vector.shape_cast %63 : vector<1x1x32xf32> to vector<1x32xf32>
    %65 = vector.broadcast %64 : vector<1x32xf32> to vector<128x32xf32>
    %66 = arith.addf %62, %65 : vector<128x32xf32>
    %c1_46 = arith.constant 1 : index
    %c0_47 = arith.constant 0 : index
    %c0_48 = arith.constant 0 : index
    %67 = vector.load %arg6[%c1_46, %c0_47, %c0_48] : memref<4x128x32xbf16, #tpu.memory_space<vmem>>, vector<1x128x32xbf16>
    %68 = vector.shape_cast %67 : vector<1x128x32xbf16> to vector<128x32xbf16>
    %cst_49 = arith.constant dense<0.000000e+00> : vector<128x32xf32>
    %69 = tpu.matmul %3, %68, %cst_49 {dimension_numbers = #tpu.dot_dimension_numbers<[1], [0], [0], [1], [0, 0, 1, 1], [], []>} : vector<128x128xbf16>, vector<128x32xbf16>, vector<128x32xf32> -> vector<128x32xf32>
    %c1_50 = arith.constant 1 : index
    %c0_51 = arith.constant 0 : index
    %c0_52 = arith.constant 0 : index
    %70 = vector.load %arg7[%c1_50, %c0_51, %c0_52] : memref<4x1x32xf32, #tpu.memory_space<vmem>>, vector<1x1x32xf32>
    %71 = vector.shape_cast %70 : vector<1x1x32xf32> to vector<1x32xf32>
    %72 = vector.broadcast %71 : vector<1x32xf32> to vector<128x32xf32>
    %73 = arith.addf %69, %72 : vector<128x32xf32>
    %74 = vector.shape_cast %59 : vector<128x32xf32> to vector<2x64x32xf32>
    %75 = arith.truncf %74 : vector<2x64x32xf32> to vector<2x64x32xbf16>
    %76 = vector.shape_cast %66 : vector<128x32xf32> to vector<2x64x32xf32>
    %77 = arith.truncf %76 : vector<2x64x32xf32> to vector<2x64x32xbf16>
    %78 = vector.shape_cast %73 : vector<128x32xf32> to vector<2x64x32xf32>
    %79 = arith.truncf %78 : vector<2x64x32xf32> to vector<2x64x32xbf16>
    %cst_53 = arith.constant dense<0.000000e+00> : vector<2x64x64xf32>
    %80 = tpu.matmul %75, %77, %cst_53 {dimension_numbers = #tpu.dot_dimension_numbers<[2], [2], [1], [1], [0, 0, 0, 1, 1, 1], [0], [0]>} : vector<2x64x32xbf16>, vector<2x64x32xbf16>, vector<2x64x64xf32> -> vector<2x64x64xf32>
    %cst_54 = arith.constant 0.176776692 : f32
    %81 = vector.broadcast %cst_54 : f32 to vector<2x64x64xf32>
    %82 = arith.mulf %80, %81 : vector<2x64x64xf32>
    %cst_55 = arith.constant dense<0xFF800000> : vector<2x64xf32>
    %83 = vector.multi_reduction <maximumf>, %82, %cst_55 [2] : vector<2x64x64xf32> to vector<2x64xf32>
    %84 = vector.shape_cast %83 : vector<2x64xf32> to vector<2x64x1xf32>
    %85 = vector.broadcast %84 : vector<2x64x1xf32> to vector<2x64x64xf32>
    %86 = arith.subf %82, %85 : vector<2x64x64xf32>
    %87 = math.exp %86 : vector<2x64x64xf32>
    %cst_56 = arith.constant dense<0.000000e+00> : vector<2x64xf32>
    %88 = vector.multi_reduction <add>, %87, %cst_56 [2] : vector<2x64x64xf32> to vector<2x64xf32>
    %89 = vector.shape_cast %88 : vector<2x64xf32> to vector<2x64x1xf32>
    %90 = tpu.reciprocal %89 {approx = true} : vector<2x64x1xf32> -> vector<2x64x1xf32>
    %91 = vector.broadcast %90 : vector<2x64x1xf32> to vector<2x64x64xf32>
    %92 = arith.mulf %87, %91 : vector<2x64x64xf32>
    %93 = arith.truncf %92 : vector<2x64x64xf32> to vector<2x64x64xbf16>
    %cst_57 = arith.constant dense<0.000000e+00> : vector<2x64x32xf32>
    %94 = tpu.matmul %93, %79, %cst_57 {dimension_numbers = #tpu.dot_dimension_numbers<[2], [1], [1], [2], [0, 0, 0, 1, 1, 2], [0], [0]>} : vector<2x64x64xbf16>, vector<2x64x32xbf16>, vector<2x64x32xf32> -> vector<2x64x32xf32>
    %95 = vector.shape_cast %94 : vector<2x64x32xf32> to vector<128x32xf32>
    %96 = arith.truncf %95 : vector<128x32xf32> to vector<128x32xbf16>
    %c1_58 = arith.constant 1 : index
    %c0_59 = arith.constant 0 : index
    %c0_60 = arith.constant 0 : index
    %97 = vector.load %arg8[%c1_58, %c0_59, %c0_60] : memref<4x32x128xbf16, #tpu.memory_space<vmem>>, vector<1x32x128xbf16>
    %98 = vector.shape_cast %97 : vector<1x32x128xbf16> to vector<32x128xbf16>
    %cst_61 = arith.constant dense<0.000000e+00> : vector<128x128xf32>
    %99 = tpu.matmul %96, %98, %cst_61 {dimension_numbers = #tpu.dot_dimension_numbers<[1], [0], [0], [1], [0, 0, 1, 1], [], []>} : vector<128x32xbf16>, vector<32x128xbf16>, vector<128x128xf32> -> vector<128x128xf32>
    %100 = arith.addf %52, %99 : vector<128x128xf32>
    %c2 = arith.constant 2 : index
    %c0_62 = arith.constant 0 : index
    %c0_63 = arith.constant 0 : index
    %101 = vector.load %arg2[%c2, %c0_62, %c0_63] : memref<4x128x32xbf16, #tpu.memory_space<vmem>>, vector<1x128x32xbf16>
    %102 = vector.shape_cast %101 : vector<1x128x32xbf16> to vector<128x32xbf16>
    %cst_64 = arith.constant dense<0.000000e+00> : vector<128x32xf32>
    %103 = tpu.matmul %2, %102, %cst_64 {dimension_numbers = #tpu.dot_dimension_numbers<[1], [0], [0], [1], [0, 0, 1, 1], [], []>} : vector<128x128xbf16>, vector<128x32xbf16>, vector<128x32xf32> -> vector<128x32xf32>
    %c2_65 = arith.constant 2 : index
    %c0_66 = arith.constant 0 : index
    %c0_67 = arith.constant 0 : index
    %104 = vector.load %arg3[%c2_65, %c0_66, %c0_67] : memref<4x1x32xf32, #tpu.memory_space<vmem>>, vector<1x1x32xf32>
    %105 = vector.shape_cast %104 : vector<1x1x32xf32> to vector<1x32xf32>
    %106 = vector.broadcast %105 : vector<1x32xf32> to vector<128x32xf32>
    %107 = arith.addf %103, %106 : vector<128x32xf32>
    %c2_68 = arith.constant 2 : index
    %c0_69 = arith.constant 0 : index
    %c0_70 = arith.constant 0 : index
    %108 = vector.load %arg4[%c2_68, %c0_69, %c0_70] : memref<4x128x32xbf16, #tpu.memory_space<vmem>>, vector<1x128x32xbf16>
    %109 = vector.shape_cast %108 : vector<1x128x32xbf16> to vector<128x32xbf16>
    %cst_71 = arith.constant dense<0.000000e+00> : vector<128x32xf32>
    %110 = tpu.matmul %3, %109, %cst_71 {dimension_numbers = #tpu.dot_dimension_numbers<[1], [0], [0], [1], [0, 0, 1, 1], [], []>} : vector<128x128xbf16>, vector<128x32xbf16>, vector<128x32xf32> -> vector<128x32xf32>
    %c2_72 = arith.constant 2 : index
    %c0_73 = arith.constant 0 : index
    %c0_74 = arith.constant 0 : index
    %111 = vector.load %arg5[%c2_72, %c0_73, %c0_74] : memref<4x1x32xf32, #tpu.memory_space<vmem>>, vector<1x1x32xf32>
    %112 = vector.shape_cast %111 : vector<1x1x32xf32> to vector<1x32xf32>
    %113 = vector.broadcast %112 : vector<1x32xf32> to vector<128x32xf32>
    %114 = arith.addf %110, %113 : vector<128x32xf32>
    %c2_75 = arith.constant 2 : index
    %c0_76 = arith.constant 0 : index
    %c0_77 = arith.constant 0 : index
    %115 = vector.load %arg6[%c2_75, %c0_76, %c0_77] : memref<4x128x32xbf16, #tpu.memory_space<vmem>>, vector<1x128x32xbf16>
    %116 = vector.shape_cast %115 : vector<1x128x32xbf16> to vector<128x32xbf16>
    %cst_78 = arith.constant dense<0.000000e+00> : vector<128x32xf32>
    %117 = tpu.matmul %3, %116, %cst_78 {dimension_numbers = #tpu.dot_dimension_numbers<[1], [0], [0], [1], [0, 0, 1, 1], [], []>} : vector<128x128xbf16>, vector<128x32xbf16>, vector<128x32xf32> -> vector<128x32xf32>
    %c2_79 = arith.constant 2 : index
    %c0_80 = arith.constant 0 : index
    %c0_81 = arith.constant 0 : index
    %118 = vector.load %arg7[%c2_79, %c0_80, %c0_81] : memref<4x1x32xf32, #tpu.memory_space<vmem>>, vector<1x1x32xf32>
    %119 = vector.shape_cast %118 : vector<1x1x32xf32> to vector<1x32xf32>
    %120 = vector.broadcast %119 : vector<1x32xf32> to vector<128x32xf32>
    %121 = arith.addf %117, %120 : vector<128x32xf32>
    %122 = vector.shape_cast %107 : vector<128x32xf32> to vector<2x64x32xf32>
    %123 = arith.truncf %122 : vector<2x64x32xf32> to vector<2x64x32xbf16>
    %124 = vector.shape_cast %114 : vector<128x32xf32> to vector<2x64x32xf32>
    %125 = arith.truncf %124 : vector<2x64x32xf32> to vector<2x64x32xbf16>
    %126 = vector.shape_cast %121 : vector<128x32xf32> to vector<2x64x32xf32>
    %127 = arith.truncf %126 : vector<2x64x32xf32> to vector<2x64x32xbf16>
    %cst_82 = arith.constant dense<0.000000e+00> : vector<2x64x64xf32>
    %128 = tpu.matmul %123, %125, %cst_82 {dimension_numbers = #tpu.dot_dimension_numbers<[2], [2], [1], [1], [0, 0, 0, 1, 1, 1], [0], [0]>} : vector<2x64x32xbf16>, vector<2x64x32xbf16>, vector<2x64x64xf32> -> vector<2x64x64xf32>
    %cst_83 = arith.constant 0.176776692 : f32
    %129 = vector.broadcast %cst_83 : f32 to vector<2x64x64xf32>
    %130 = arith.mulf %128, %129 : vector<2x64x64xf32>
    %cst_84 = arith.constant dense<0xFF800000> : vector<2x64xf32>
    %131 = vector.multi_reduction <maximumf>, %130, %cst_84 [2] : vector<2x64x64xf32> to vector<2x64xf32>
    %132 = vector.shape_cast %131 : vector<2x64xf32> to vector<2x64x1xf32>
    %133 = vector.broadcast %132 : vector<2x64x1xf32> to vector<2x64x64xf32>
    %134 = arith.subf %130, %133 : vector<2x64x64xf32>
    %135 = math.exp %134 : vector<2x64x64xf32>
    %cst_85 = arith.constant dense<0.000000e+00> : vector<2x64xf32>
    %136 = vector.multi_reduction <add>, %135, %cst_85 [2] : vector<2x64x64xf32> to vector<2x64xf32>
    %137 = vector.shape_cast %136 : vector<2x64xf32> to vector<2x64x1xf32>
    %138 = tpu.reciprocal %137 {approx = true} : vector<2x64x1xf32> -> vector<2x64x1xf32>
    %139 = vector.broadcast %138 : vector<2x64x1xf32> to vector<2x64x64xf32>
    %140 = arith.mulf %135, %139 : vector<2x64x64xf32>
    %141 = arith.truncf %140 : vector<2x64x64xf32> to vector<2x64x64xbf16>
    %cst_86 = arith.constant dense<0.000000e+00> : vector<2x64x32xf32>
    %142 = tpu.matmul %141, %127, %cst_86 {dimension_numbers = #tpu.dot_dimension_numbers<[2], [1], [1], [2], [0, 0, 0, 1, 1, 2], [0], [0]>} : vector<2x64x64xbf16>, vector<2x64x32xbf16>, vector<2x64x32xf32> -> vector<2x64x32xf32>
    %143 = vector.shape_cast %142 : vector<2x64x32xf32> to vector<128x32xf32>
    %144 = arith.truncf %143 : vector<128x32xf32> to vector<128x32xbf16>
    %c2_87 = arith.constant 2 : index
    %c0_88 = arith.constant 0 : index
    %c0_89 = arith.constant 0 : index
    %145 = vector.load %arg8[%c2_87, %c0_88, %c0_89] : memref<4x32x128xbf16, #tpu.memory_space<vmem>>, vector<1x32x128xbf16>
    %146 = vector.shape_cast %145 : vector<1x32x128xbf16> to vector<32x128xbf16>
    %cst_90 = arith.constant dense<0.000000e+00> : vector<128x128xf32>
    %147 = tpu.matmul %144, %146, %cst_90 {dimension_numbers = #tpu.dot_dimension_numbers<[1], [0], [0], [1], [0, 0, 1, 1], [], []>} : vector<128x32xbf16>, vector<32x128xbf16>, vector<128x128xf32> -> vector<128x128xf32>
    %148 = arith.addf %100, %147 : vector<128x128xf32>
    %c3 = arith.constant 3 : index
    %c0_91 = arith.constant 0 : index
    %c0_92 = arith.constant 0 : index
    %149 = vector.load %arg2[%c3, %c0_91, %c0_92] : memref<4x128x32xbf16, #tpu.memory_space<vmem>>, vector<1x128x32xbf16>
    %150 = vector.shape_cast %149 : vector<1x128x32xbf16> to vector<128x32xbf16>
    %cst_93 = arith.constant dense<0.000000e+00> : vector<128x32xf32>
    %151 = tpu.matmul %2, %150, %cst_93 {dimension_numbers = #tpu.dot_dimension_numbers<[1], [0], [0], [1], [0, 0, 1, 1], [], []>} : vector<128x128xbf16>, vector<128x32xbf16>, vector<128x32xf32> -> vector<128x32xf32>
    %c3_94 = arith.constant 3 : index
    %c0_95 = arith.constant 0 : index
    %c0_96 = arith.constant 0 : index
    %152 = vector.load %arg3[%c3_94, %c0_95, %c0_96] : memref<4x1x32xf32, #tpu.memory_space<vmem>>, vector<1x1x32xf32>
    %153 = vector.shape_cast %152 : vector<1x1x32xf32> to vector<1x32xf32>
    %154 = vector.broadcast %153 : vector<1x32xf32> to vector<128x32xf32>
    %155 = arith.addf %151, %154 : vector<128x32xf32>
    %c3_97 = arith.constant 3 : index
    %c0_98 = arith.constant 0 : index
    %c0_99 = arith.constant 0 : index
    %156 = vector.load %arg4[%c3_97, %c0_98, %c0_99] : memref<4x128x32xbf16, #tpu.memory_space<vmem>>, vector<1x128x32xbf16>
    %157 = vector.shape_cast %156 : vector<1x128x32xbf16> to vector<128x32xbf16>
    %cst_100 = arith.constant dense<0.000000e+00> : vector<128x32xf32>
    %158 = tpu.matmul %3, %157, %cst_100 {dimension_numbers = #tpu.dot_dimension_numbers<[1], [0], [0], [1], [0, 0, 1, 1], [], []>} : vector<128x128xbf16>, vector<128x32xbf16>, vector<128x32xf32> -> vector<128x32xf32>
    %c3_101 = arith.constant 3 : index
    %c0_102 = arith.constant 0 : index
    %c0_103 = arith.constant 0 : index
    %159 = vector.load %arg5[%c3_101, %c0_102, %c0_103] : memref<4x1x32xf32, #tpu.memory_space<vmem>>, vector<1x1x32xf32>
    %160 = vector.shape_cast %159 : vector<1x1x32xf32> to vector<1x32xf32>
    %161 = vector.broadcast %160 : vector<1x32xf32> to vector<128x32xf32>
    %162 = arith.addf %158, %161 : vector<128x32xf32>
    %c3_104 = arith.constant 3 : index
    %c0_105 = arith.constant 0 : index
    %c0_106 = arith.constant 0 : index
    %163 = vector.load %arg6[%c3_104, %c0_105, %c0_106] : memref<4x128x32xbf16, #tpu.memory_space<vmem>>, vector<1x128x32xbf16>
    %164 = vector.shape_cast %163 : vector<1x128x32xbf16> to vector<128x32xbf16>
    %cst_107 = arith.constant dense<0.000000e+00> : vector<128x32xf32>
    %165 = tpu.matmul %3, %164, %cst_107 {dimension_numbers = #tpu.dot_dimension_numbers<[1], [0], [0], [1], [0, 0, 1, 1], [], []>} : vector<128x128xbf16>, vector<128x32xbf16>, vector<128x32xf32> -> vector<128x32xf32>
    %c3_108 = arith.constant 3 : index
    %c0_109 = arith.constant 0 : index
    %c0_110 = arith.constant 0 : index
    %166 = vector.load %arg7[%c3_108, %c0_109, %c0_110] : memref<4x1x32xf32, #tpu.memory_space<vmem>>, vector<1x1x32xf32>
    %167 = vector.shape_cast %166 : vector<1x1x32xf32> to vector<1x32xf32>
    %168 = vector.broadcast %167 : vector<1x32xf32> to vector<128x32xf32>
    %169 = arith.addf %165, %168 : vector<128x32xf32>
    %170 = vector.shape_cast %155 : vector<128x32xf32> to vector<2x64x32xf32>
    %171 = arith.truncf %170 : vector<2x64x32xf32> to vector<2x64x32xbf16>
    %172 = vector.shape_cast %162 : vector<128x32xf32> to vector<2x64x32xf32>
    %173 = arith.truncf %172 : vector<2x64x32xf32> to vector<2x64x32xbf16>
    %174 = vector.shape_cast %169 : vector<128x32xf32> to vector<2x64x32xf32>
    %175 = arith.truncf %174 : vector<2x64x32xf32> to vector<2x64x32xbf16>
    %cst_111 = arith.constant dense<0.000000e+00> : vector<2x64x64xf32>
    %176 = tpu.matmul %171, %173, %cst_111 {dimension_numbers = #tpu.dot_dimension_numbers<[2], [2], [1], [1], [0, 0, 0, 1, 1, 1], [0], [0]>} : vector<2x64x32xbf16>, vector<2x64x32xbf16>, vector<2x64x64xf32> -> vector<2x64x64xf32>
    %cst_112 = arith.constant 0.176776692 : f32
    %177 = vector.broadcast %cst_112 : f32 to vector<2x64x64xf32>
    %178 = arith.mulf %176, %177 : vector<2x64x64xf32>
    %cst_113 = arith.constant dense<0xFF800000> : vector<2x64xf32>
    %179 = vector.multi_reduction <maximumf>, %178, %cst_113 [2] : vector<2x64x64xf32> to vector<2x64xf32>
    %180 = vector.shape_cast %179 : vector<2x64xf32> to vector<2x64x1xf32>
    %181 = vector.broadcast %180 : vector<2x64x1xf32> to vector<2x64x64xf32>
    %182 = arith.subf %178, %181 : vector<2x64x64xf32>
    %183 = math.exp %182 : vector<2x64x64xf32>
    %cst_114 = arith.constant dense<0.000000e+00> : vector<2x64xf32>
    %184 = vector.multi_reduction <add>, %183, %cst_114 [2] : vector<2x64x64xf32> to vector<2x64xf32>
    %185 = vector.shape_cast %184 : vector<2x64xf32> to vector<2x64x1xf32>
    %186 = tpu.reciprocal %185 {approx = true} : vector<2x64x1xf32> -> vector<2x64x1xf32>
    %187 = vector.broadcast %186 : vector<2x64x1xf32> to vector<2x64x64xf32>
    %188 = arith.mulf %183, %187 : vector<2x64x64xf32>
    %189 = arith.truncf %188 : vector<2x64x64xf32> to vector<2x64x64xbf16>
    %cst_115 = arith.constant dense<0.000000e+00> : vector<2x64x32xf32>
    %190 = tpu.matmul %189, %175, %cst_115 {dimension_numbers = #tpu.dot_dimension_numbers<[2], [1], [1], [2], [0, 0, 0, 1, 1, 2], [0], [0]>} : vector<2x64x64xbf16>, vector<2x64x32xbf16>, vector<2x64x32xf32> -> vector<2x64x32xf32>
    %191 = vector.shape_cast %190 : vector<2x64x32xf32> to vector<128x32xf32>
    %192 = arith.truncf %191 : vector<128x32xf32> to vector<128x32xbf16>
    %c3_116 = arith.constant 3 : index
    %c0_117 = arith.constant 0 : index
    %c0_118 = arith.constant 0 : index
    %193 = vector.load %arg8[%c3_116, %c0_117, %c0_118] : memref<4x32x128xbf16, #tpu.memory_space<vmem>>, vector<1x32x128xbf16>
    %194 = vector.shape_cast %193 : vector<1x32x128xbf16> to vector<32x128xbf16>
    %cst_119 = arith.constant dense<0.000000e+00> : vector<128x128xf32>
    %195 = tpu.matmul %192, %194, %cst_119 {dimension_numbers = #tpu.dot_dimension_numbers<[1], [0], [0], [1], [0, 0, 1, 1], [], []>} : vector<128x32xbf16>, vector<32x128xbf16>, vector<128x128xf32> -> vector<128x128xf32>
    %196 = arith.addf %148, %195 : vector<128x128xf32>
    %c0_120 = arith.constant 0 : index
    %c0_121 = arith.constant 0 : index
    %197 = vector.load %arg9[%c0_120, %c0_121] : memref<1x128xf32, #tpu.memory_space<vmem>>, vector<1x128xf32>
    %198 = vector.broadcast %197 : vector<1x128xf32> to vector<128x128xf32>
    %199 = arith.addf %196, %198 : vector<128x128xf32>
    %200 = arith.addf %0, %199 : vector<128x128xf32>
    %c0_122 = arith.constant 0 : index
    %c0_123 = arith.constant 0 : index
    %201 = vector.load %arg22[%c0_122, %c0_123] : memref<1x128xf32, #tpu.memory_space<vmem>>, vector<1x128xf32>
    %c0_124 = arith.constant 0 : index
    %c0_125 = arith.constant 0 : index
    %202 = vector.load %arg23[%c0_124, %c0_125] : memref<1x128xf32, #tpu.memory_space<vmem>>, vector<1x128xf32>
    %cst_126 = arith.constant dense<0.000000e+00> : vector<128xf32>
    %203 = vector.multi_reduction <add>, %200, %cst_126 [1] : vector<128x128xf32> to vector<128xf32>
    %204 = vector.shape_cast %203 : vector<128xf32> to vector<128x1xf32>
    %cst_127 = arith.constant 1.280000e+02 : f32
    %205 = vector.broadcast %cst_127 : f32 to vector<128x1xf32>
    %206 = arith.divf %204, %205 : vector<128x1xf32>
    %207 = vector.broadcast %206 : vector<128x1xf32> to vector<128x128xf32>
    %208 = arith.subf %200, %207 : vector<128x128xf32>
    %209 = arith.mulf %208, %208 : vector<128x128xf32>
    %cst_128 = arith.constant dense<0.000000e+00> : vector<128xf32>
    %210 = vector.multi_reduction <add>, %209, %cst_128 [1] : vector<128x128xf32> to vector<128xf32>
    %211 = vector.shape_cast %210 : vector<128xf32> to vector<128x1xf32>
    %cst_129 = arith.constant 0.00787401571 : f32
    %212 = vector.broadcast %cst_129 : f32 to vector<128x1xf32>
    %213 = arith.mulf %211, %212 : vector<128x1xf32>
    %214 = tpu.reciprocal %213 {approx = true} : vector<128x1xf32> -> vector<128x1xf32>
    %215 = vector.broadcast %206 : vector<128x1xf32> to vector<128x128xf32>
    %216 = arith.subf %200, %215 : vector<128x128xf32>
    %217 = vector.broadcast %214 : vector<128x1xf32> to vector<128x128xf32>
    %218 = arith.mulf %216, %217 : vector<128x128xf32>
    %cst_130 = arith.constant 9.99999996E-13 : f32
    %219 = vector.broadcast %cst_130 : f32 to vector<128x128xf32>
    %220 = arith.addf %218, %219 : vector<128x128xf32>
    %221 = vector.broadcast %201 : vector<1x128xf32> to vector<128x128xf32>
    %222 = arith.mulf %220, %221 : vector<128x128xf32>
    %223 = vector.broadcast %202 : vector<1x128xf32> to vector<128x128xf32>
    %224 = arith.addf %222, %223 : vector<128x128xf32>
    %225 = arith.truncf %224 : vector<128x128xf32> to vector<128x128xbf16>
    %226 = arith.truncf %1 : vector<128x128xf32> to vector<128x128xbf16>
    %cst_131 = arith.constant 0.000000e+00 : f32
    %227 = vector.broadcast %cst_131 : f32 to vector<128x128xf32>
    %c0_132 = arith.constant 0 : index
    %c0_133 = arith.constant 0 : index
    %c0_134 = arith.constant 0 : index
    %228 = vector.load %arg10[%c0_132, %c0_133, %c0_134] : memref<4x128x32xbf16, #tpu.memory_space<vmem>>, vector<1x128x32xbf16>
    %229 = vector.shape_cast %228 : vector<1x128x32xbf16> to vector<128x32xbf16>
    %cst_135 = arith.constant dense<0.000000e+00> : vector<128x32xf32>
    %230 = tpu.matmul %225, %229, %cst_135 {dimension_numbers = #tpu.dot_dimension_numbers<[1], [0], [0], [1], [0, 0, 1, 1], [], []>} : vector<128x128xbf16>, vector<128x32xbf16>, vector<128x32xf32> -> vector<128x32xf32>
    %c0_136 = arith.constant 0 : index
    %c0_137 = arith.constant 0 : index
    %c0_138 = arith.constant 0 : index
    %231 = vector.load %arg11[%c0_136, %c0_137, %c0_138] : memref<4x1x32xf32, #tpu.memory_space<vmem>>, vector<1x1x32xf32>
    %232 = vector.shape_cast %231 : vector<1x1x32xf32> to vector<1x32xf32>
    %233 = vector.broadcast %232 : vector<1x32xf32> to vector<128x32xf32>
    %234 = arith.addf %230, %233 : vector<128x32xf32>
    %c0_139 = arith.constant 0 : index
    %c0_140 = arith.constant 0 : index
    %c0_141 = arith.constant 0 : index
    %235 = vector.load %arg12[%c0_139, %c0_140, %c0_141] : memref<4x128x32xbf16, #tpu.memory_space<vmem>>, vector<1x128x32xbf16>
    %236 = vector.shape_cast %235 : vector<1x128x32xbf16> to vector<128x32xbf16>
    %cst_142 = arith.constant dense<0.000000e+00> : vector<128x32xf32>
    %237 = tpu.matmul %226, %236, %cst_142 {dimension_numbers = #tpu.dot_dimension_numbers<[1], [0], [0], [1], [0, 0, 1, 1], [], []>} : vector<128x128xbf16>, vector<128x32xbf16>, vector<128x32xf32> -> vector<128x32xf32>
    %c0_143 = arith.constant 0 : index
    %c0_144 = arith.constant 0 : index
    %c0_145 = arith.constant 0 : index
    %238 = vector.load %arg13[%c0_143, %c0_144, %c0_145] : memref<4x1x32xf32, #tpu.memory_space<vmem>>, vector<1x1x32xf32>
    %239 = vector.shape_cast %238 : vector<1x1x32xf32> to vector<1x32xf32>
    %240 = vector.broadcast %239 : vector<1x32xf32> to vector<128x32xf32>
    %241 = arith.addf %237, %240 : vector<128x32xf32>
    %c0_146 = arith.constant 0 : index
    %c0_147 = arith.constant 0 : index
    %c0_148 = arith.constant 0 : index
    %242 = vector.load %arg14[%c0_146, %c0_147, %c0_148] : memref<4x128x32xbf16, #tpu.memory_space<vmem>>, vector<1x128x32xbf16>
    %243 = vector.shape_cast %242 : vector<1x128x32xbf16> to vector<128x32xbf16>
    %cst_149 = arith.constant dense<0.000000e+00> : vector<128x32xf32>
    %244 = tpu.matmul %226, %243, %cst_149 {dimension_numbers = #tpu.dot_dimension_numbers<[1], [0], [0], [1], [0, 0, 1, 1], [], []>} : vector<128x128xbf16>, vector<128x32xbf16>, vector<128x32xf32> -> vector<128x32xf32>
    %c0_150 = arith.constant 0 : index
    %c0_151 = arith.constant 0 : index
    %c0_152 = arith.constant 0 : index
    %245 = vector.load %arg15[%c0_150, %c0_151, %c0_152] : memref<4x1x32xf32, #tpu.memory_space<vmem>>, vector<1x1x32xf32>
    %246 = vector.shape_cast %245 : vector<1x1x32xf32> to vector<1x32xf32>
    %247 = vector.broadcast %246 : vector<1x32xf32> to vector<128x32xf32>
    %248 = arith.addf %244, %247 : vector<128x32xf32>
    %249 = vector.shape_cast %234 : vector<128x32xf32> to vector<2x64x32xf32>
    %250 = arith.truncf %249 : vector<2x64x32xf32> to vector<2x64x32xbf16>
    %251 = vector.shape_cast %241 : vector<128x32xf32> to vector<2x64x32xf32>
    %252 = arith.truncf %251 : vector<2x64x32xf32> to vector<2x64x32xbf16>
    %253 = vector.shape_cast %248 : vector<128x32xf32> to vector<2x64x32xf32>
    %254 = arith.truncf %253 : vector<2x64x32xf32> to vector<2x64x32xbf16>
    %cst_153 = arith.constant dense<0.000000e+00> : vector<2x64x64xf32>
    %255 = tpu.matmul %250, %252, %cst_153 {dimension_numbers = #tpu.dot_dimension_numbers<[2], [2], [1], [1], [0, 0, 0, 1, 1, 1], [0], [0]>} : vector<2x64x32xbf16>, vector<2x64x32xbf16>, vector<2x64x64xf32> -> vector<2x64x64xf32>
    %cst_154 = arith.constant 0.176776692 : f32
    %256 = vector.broadcast %cst_154 : f32 to vector<2x64x64xf32>
    %257 = arith.mulf %255, %256 : vector<2x64x64xf32>
    %cst_155 = arith.constant dense<0xFF800000> : vector<2x64xf32>
    %258 = vector.multi_reduction <maximumf>, %257, %cst_155 [2] : vector<2x64x64xf32> to vector<2x64xf32>
    %259 = vector.shape_cast %258 : vector<2x64xf32> to vector<2x64x1xf32>
    %260 = vector.broadcast %259 : vector<2x64x1xf32> to vector<2x64x64xf32>
    %261 = arith.subf %257, %260 : vector<2x64x64xf32>
    %262 = math.exp %261 : vector<2x64x64xf32>
    %cst_156 = arith.constant dense<0.000000e+00> : vector<2x64xf32>
    %263 = vector.multi_reduction <add>, %262, %cst_156 [2] : vector<2x64x64xf32> to vector<2x64xf32>
    %264 = vector.shape_cast %263 : vector<2x64xf32> to vector<2x64x1xf32>
    %265 = tpu.reciprocal %264 {approx = true} : vector<2x64x1xf32> -> vector<2x64x1xf32>
    %266 = vector.broadcast %265 : vector<2x64x1xf32> to vector<2x64x64xf32>
    %267 = arith.mulf %262, %266 : vector<2x64x64xf32>
    %268 = arith.truncf %267 : vector<2x64x64xf32> to vector<2x64x64xbf16>
    %cst_157 = arith.constant dense<0.000000e+00> : vector<2x64x32xf32>
    %269 = tpu.matmul %268, %254, %cst_157 {dimension_numbers = #tpu.dot_dimension_numbers<[2], [1], [1], [2], [0, 0, 0, 1, 1, 2], [0], [0]>} : vector<2x64x64xbf16>, vector<2x64x32xbf16>, vector<2x64x32xf32> -> vector<2x64x32xf32>
    %270 = vector.shape_cast %269 : vector<2x64x32xf32> to vector<128x32xf32>
    %271 = arith.truncf %270 : vector<128x32xf32> to vector<128x32xbf16>
    %c0_158 = arith.constant 0 : index
    %c0_159 = arith.constant 0 : index
    %c0_160 = arith.constant 0 : index
    %272 = vector.load %arg16[%c0_158, %c0_159, %c0_160] : memref<4x32x128xbf16, #tpu.memory_space<vmem>>, vector<1x32x128xbf16>
    %273 = vector.shape_cast %272 : vector<1x32x128xbf16> to vector<32x128xbf16>
    %cst_161 = arith.constant dense<0.000000e+00> : vector<128x128xf32>
    %274 = tpu.matmul %271, %273, %cst_161 {dimension_numbers = #tpu.dot_dimension_numbers<[1], [0], [0], [1], [0, 0, 1, 1], [], []>} : vector<128x32xbf16>, vector<32x128xbf16>, vector<128x128xf32> -> vector<128x128xf32>
    %275 = arith.addf %227, %274 : vector<128x128xf32>
    %c1_162 = arith.constant 1 : index
    %c0_163 = arith.constant 0 : index
    %c0_164 = arith.constant 0 : index
    %276 = vector.load %arg10[%c1_162, %c0_163, %c0_164] : memref<4x128x32xbf16, #tpu.memory_space<vmem>>, vector<1x128x32xbf16>
    %277 = vector.shape_cast %276 : vector<1x128x32xbf16> to vector<128x32xbf16>
    %cst_165 = arith.constant dense<0.000000e+00> : vector<128x32xf32>
    %278 = tpu.matmul %225, %277, %cst_165 {dimension_numbers = #tpu.dot_dimension_numbers<[1], [0], [0], [1], [0, 0, 1, 1], [], []>} : vector<128x128xbf16>, vector<128x32xbf16>, vector<128x32xf32> -> vector<128x32xf32>
    %c1_166 = arith.constant 1 : index
    %c0_167 = arith.constant 0 : index
    %c0_168 = arith.constant 0 : index
    %279 = vector.load %arg11[%c1_166, %c0_167, %c0_168] : memref<4x1x32xf32, #tpu.memory_space<vmem>>, vector<1x1x32xf32>
    %280 = vector.shape_cast %279 : vector<1x1x32xf32> to vector<1x32xf32>
    %281 = vector.broadcast %280 : vector<1x32xf32> to vector<128x32xf32>
    %282 = arith.addf %278, %281 : vector<128x32xf32>
    %c1_169 = arith.constant 1 : index
    %c0_170 = arith.constant 0 : index
    %c0_171 = arith.constant 0 : index
    %283 = vector.load %arg12[%c1_169, %c0_170, %c0_171] : memref<4x128x32xbf16, #tpu.memory_space<vmem>>, vector<1x128x32xbf16>
    %284 = vector.shape_cast %283 : vector<1x128x32xbf16> to vector<128x32xbf16>
    %cst_172 = arith.constant dense<0.000000e+00> : vector<128x32xf32>
    %285 = tpu.matmul %226, %284, %cst_172 {dimension_numbers = #tpu.dot_dimension_numbers<[1], [0], [0], [1], [0, 0, 1, 1], [], []>} : vector<128x128xbf16>, vector<128x32xbf16>, vector<128x32xf32> -> vector<128x32xf32>
    %c1_173 = arith.constant 1 : index
    %c0_174 = arith.constant 0 : index
    %c0_175 = arith.constant 0 : index
    %286 = vector.load %arg13[%c1_173, %c0_174, %c0_175] : memref<4x1x32xf32, #tpu.memory_space<vmem>>, vector<1x1x32xf32>
    %287 = vector.shape_cast %286 : vector<1x1x32xf32> to vector<1x32xf32>
    %288 = vector.broadcast %287 : vector<1x32xf32> to vector<128x32xf32>
    %289 = arith.addf %285, %288 : vector<128x32xf32>
    %c1_176 = arith.constant 1 : index
    %c0_177 = arith.constant 0 : index
    %c0_178 = arith.constant 0 : index
    %290 = vector.load %arg14[%c1_176, %c0_177, %c0_178] : memref<4x128x32xbf16, #tpu.memory_space<vmem>>, vector<1x128x32xbf16>
    %291 = vector.shape_cast %290 : vector<1x128x32xbf16> to vector<128x32xbf16>
    %cst_179 = arith.constant dense<0.000000e+00> : vector<128x32xf32>
    %292 = tpu.matmul %226, %291, %cst_179 {dimension_numbers = #tpu.dot_dimension_numbers<[1], [0], [0], [1], [0, 0, 1, 1], [], []>} : vector<128x128xbf16>, vector<128x32xbf16>, vector<128x32xf32> -> vector<128x32xf32>
    %c1_180 = arith.constant 1 : index
    %c0_181 = arith.constant 0 : index
    %c0_182 = arith.constant 0 : index
    %293 = vector.load %arg15[%c1_180, %c0_181, %c0_182] : memref<4x1x32xf32, #tpu.memory_space<vmem>>, vector<1x1x32xf32>
    %294 = vector.shape_cast %293 : vector<1x1x32xf32> to vector<1x32xf32>
    %295 = vector.broadcast %294 : vector<1x32xf32> to vector<128x32xf32>
    %296 = arith.addf %292, %295 : vector<128x32xf32>
    %297 = vector.shape_cast %282 : vector<128x32xf32> to vector<2x64x32xf32>
    %298 = arith.truncf %297 : vector<2x64x32xf32> to vector<2x64x32xbf16>
    %299 = vector.shape_cast %289 : vector<128x32xf32> to vector<2x64x32xf32>
    %300 = arith.truncf %299 : vector<2x64x32xf32> to vector<2x64x32xbf16>
    %301 = vector.shape_cast %296 : vector<128x32xf32> to vector<2x64x32xf32>
    %302 = arith.truncf %301 : vector<2x64x32xf32> to vector<2x64x32xbf16>
    %cst_183 = arith.constant dense<0.000000e+00> : vector<2x64x64xf32>
    %303 = tpu.matmul %298, %300, %cst_183 {dimension_numbers = #tpu.dot_dimension_numbers<[2], [2], [1], [1], [0, 0, 0, 1, 1, 1], [0], [0]>} : vector<2x64x32xbf16>, vector<2x64x32xbf16>, vector<2x64x64xf32> -> vector<2x64x64xf32>
    %cst_184 = arith.constant 0.176776692 : f32
    %304 = vector.broadcast %cst_184 : f32 to vector<2x64x64xf32>
    %305 = arith.mulf %303, %304 : vector<2x64x64xf32>
    %cst_185 = arith.constant dense<0xFF800000> : vector<2x64xf32>
    %306 = vector.multi_reduction <maximumf>, %305, %cst_185 [2] : vector<2x64x64xf32> to vector<2x64xf32>
    %307 = vector.shape_cast %306 : vector<2x64xf32> to vector<2x64x1xf32>
    %308 = vector.broadcast %307 : vector<2x64x1xf32> to vector<2x64x64xf32>
    %309 = arith.subf %305, %308 : vector<2x64x64xf32>
    %310 = math.exp %309 : vector<2x64x64xf32>
    %cst_186 = arith.constant dense<0.000000e+00> : vector<2x64xf32>
    %311 = vector.multi_reduction <add>, %310, %cst_186 [2] : vector<2x64x64xf32> to vector<2x64xf32>
    %312 = vector.shape_cast %311 : vector<2x64xf32> to vector<2x64x1xf32>
    %313 = tpu.reciprocal %312 {approx = true} : vector<2x64x1xf32> -> vector<2x64x1xf32>
    %314 = vector.broadcast %313 : vector<2x64x1xf32> to vector<2x64x64xf32>
    %315 = arith.mulf %310, %314 : vector<2x64x64xf32>
    %316 = arith.truncf %315 : vector<2x64x64xf32> to vector<2x64x64xbf16>
    %cst_187 = arith.constant dense<0.000000e+00> : vector<2x64x32xf32>
    %317 = tpu.matmul %316, %302, %cst_187 {dimension_numbers = #tpu.dot_dimension_numbers<[2], [1], [1], [2], [0, 0, 0, 1, 1, 2], [0], [0]>} : vector<2x64x64xbf16>, vector<2x64x32xbf16>, vector<2x64x32xf32> -> vector<2x64x32xf32>
    %318 = vector.shape_cast %317 : vector<2x64x32xf32> to vector<128x32xf32>
    %319 = arith.truncf %318 : vector<128x32xf32> to vector<128x32xbf16>
    %c1_188 = arith.constant 1 : index
    %c0_189 = arith.constant 0 : index
    %c0_190 = arith.constant 0 : index
    %320 = vector.load %arg16[%c1_188, %c0_189, %c0_190] : memref<4x32x128xbf16, #tpu.memory_space<vmem>>, vector<1x32x128xbf16>
    %321 = vector.shape_cast %320 : vector<1x32x128xbf16> to vector<32x128xbf16>
    %cst_191 = arith.constant dense<0.000000e+00> : vector<128x128xf32>
    %322 = tpu.matmul %319, %321, %cst_191 {dimension_numbers = #tpu.dot_dimension_numbers<[1], [0], [0], [1], [0, 0, 1, 1], [], []>} : vector<128x32xbf16>, vector<32x128xbf16>, vector<128x128xf32> -> vector<128x128xf32>
    %323 = arith.addf %275, %322 : vector<128x128xf32>
    %c2_192 = arith.constant 2 : index
    %c0_193 = arith.constant 0 : index
    %c0_194 = arith.constant 0 : index
    %324 = vector.load %arg10[%c2_192, %c0_193, %c0_194] : memref<4x128x32xbf16, #tpu.memory_space<vmem>>, vector<1x128x32xbf16>
    %325 = vector.shape_cast %324 : vector<1x128x32xbf16> to vector<128x32xbf16>
    %cst_195 = arith.constant dense<0.000000e+00> : vector<128x32xf32>
    %326 = tpu.matmul %225, %325, %cst_195 {dimension_numbers = #tpu.dot_dimension_numbers<[1], [0], [0], [1], [0, 0, 1, 1], [], []>} : vector<128x128xbf16>, vector<128x32xbf16>, vector<128x32xf32> -> vector<128x32xf32>
    %c2_196 = arith.constant 2 : index
    %c0_197 = arith.constant 0 : index
    %c0_198 = arith.constant 0 : index
    %327 = vector.load %arg11[%c2_196, %c0_197, %c0_198] : memref<4x1x32xf32, #tpu.memory_space<vmem>>, vector<1x1x32xf32>
    %328 = vector.shape_cast %327 : vector<1x1x32xf32> to vector<1x32xf32>
    %329 = vector.broadcast %328 : vector<1x32xf32> to vector<128x32xf32>
    %330 = arith.addf %326, %329 : vector<128x32xf32>
    %c2_199 = arith.constant 2 : index
    %c0_200 = arith.constant 0 : index
    %c0_201 = arith.constant 0 : index
    %331 = vector.load %arg12[%c2_199, %c0_200, %c0_201] : memref<4x128x32xbf16, #tpu.memory_space<vmem>>, vector<1x128x32xbf16>
    %332 = vector.shape_cast %331 : vector<1x128x32xbf16> to vector<128x32xbf16>
    %cst_202 = arith.constant dense<0.000000e+00> : vector<128x32xf32>
    %333 = tpu.matmul %226, %332, %cst_202 {dimension_numbers = #tpu.dot_dimension_numbers<[1], [0], [0], [1], [0, 0, 1, 1], [], []>} : vector<128x128xbf16>, vector<128x32xbf16>, vector<128x32xf32> -> vector<128x32xf32>
    %c2_203 = arith.constant 2 : index
    %c0_204 = arith.constant 0 : index
    %c0_205 = arith.constant 0 : index
    %334 = vector.load %arg13[%c2_203, %c0_204, %c0_205] : memref<4x1x32xf32, #tpu.memory_space<vmem>>, vector<1x1x32xf32>
    %335 = vector.shape_cast %334 : vector<1x1x32xf32> to vector<1x32xf32>
    %336 = vector.broadcast %335 : vector<1x32xf32> to vector<128x32xf32>
    %337 = arith.addf %333, %336 : vector<128x32xf32>
    %c2_206 = arith.constant 2 : index
    %c0_207 = arith.constant 0 : index
    %c0_208 = arith.constant 0 : index
    %338 = vector.load %arg14[%c2_206, %c0_207, %c0_208] : memref<4x128x32xbf16, #tpu.memory_space<vmem>>, vector<1x128x32xbf16>
    %339 = vector.shape_cast %338 : vector<1x128x32xbf16> to vector<128x32xbf16>
    %cst_209 = arith.constant dense<0.000000e+00> : vector<128x32xf32>
    %340 = tpu.matmul %226, %339, %cst_209 {dimension_numbers = #tpu.dot_dimension_numbers<[1], [0], [0], [1], [0, 0, 1, 1], [], []>} : vector<128x128xbf16>, vector<128x32xbf16>, vector<128x32xf32> -> vector<128x32xf32>
    %c2_210 = arith.constant 2 : index
    %c0_211 = arith.constant 0 : index
    %c0_212 = arith.constant 0 : index
    %341 = vector.load %arg15[%c2_210, %c0_211, %c0_212] : memref<4x1x32xf32, #tpu.memory_space<vmem>>, vector<1x1x32xf32>
    %342 = vector.shape_cast %341 : vector<1x1x32xf32> to vector<1x32xf32>
    %343 = vector.broadcast %342 : vector<1x32xf32> to vector<128x32xf32>
    %344 = arith.addf %340, %343 : vector<128x32xf32>
    %345 = vector.shape_cast %330 : vector<128x32xf32> to vector<2x64x32xf32>
    %346 = arith.truncf %345 : vector<2x64x32xf32> to vector<2x64x32xbf16>
    %347 = vector.shape_cast %337 : vector<128x32xf32> to vector<2x64x32xf32>
    %348 = arith.truncf %347 : vector<2x64x32xf32> to vector<2x64x32xbf16>
    %349 = vector.shape_cast %344 : vector<128x32xf32> to vector<2x64x32xf32>
    %350 = arith.truncf %349 : vector<2x64x32xf32> to vector<2x64x32xbf16>
    %cst_213 = arith.constant dense<0.000000e+00> : vector<2x64x64xf32>
    %351 = tpu.matmul %346, %348, %cst_213 {dimension_numbers = #tpu.dot_dimension_numbers<[2], [2], [1], [1], [0, 0, 0, 1, 1, 1], [0], [0]>} : vector<2x64x32xbf16>, vector<2x64x32xbf16>, vector<2x64x64xf32> -> vector<2x64x64xf32>
    %cst_214 = arith.constant 0.176776692 : f32
    %352 = vector.broadcast %cst_214 : f32 to vector<2x64x64xf32>
    %353 = arith.mulf %351, %352 : vector<2x64x64xf32>
    %cst_215 = arith.constant dense<0xFF800000> : vector<2x64xf32>
    %354 = vector.multi_reduction <maximumf>, %353, %cst_215 [2] : vector<2x64x64xf32> to vector<2x64xf32>
    %355 = vector.shape_cast %354 : vector<2x64xf32> to vector<2x64x1xf32>
    %356 = vector.broadcast %355 : vector<2x64x1xf32> to vector<2x64x64xf32>
    %357 = arith.subf %353, %356 : vector<2x64x64xf32>
    %358 = math.exp %357 : vector<2x64x64xf32>
    %cst_216 = arith.constant dense<0.000000e+00> : vector<2x64xf32>
    %359 = vector.multi_reduction <add>, %358, %cst_216 [2] : vector<2x64x64xf32> to vector<2x64xf32>
    %360 = vector.shape_cast %359 : vector<2x64xf32> to vector<2x64x1xf32>
    %361 = tpu.reciprocal %360 {approx = true} : vector<2x64x1xf32> -> vector<2x64x1xf32>
    %362 = vector.broadcast %361 : vector<2x64x1xf32> to vector<2x64x64xf32>
    %363 = arith.mulf %358, %362 : vector<2x64x64xf32>
    %364 = arith.truncf %363 : vector<2x64x64xf32> to vector<2x64x64xbf16>
    %cst_217 = arith.constant dense<0.000000e+00> : vector<2x64x32xf32>
    %365 = tpu.matmul %364, %350, %cst_217 {dimension_numbers = #tpu.dot_dimension_numbers<[2], [1], [1], [2], [0, 0, 0, 1, 1, 2], [0], [0]>} : vector<2x64x64xbf16>, vector<2x64x32xbf16>, vector<2x64x32xf32> -> vector<2x64x32xf32>
    %366 = vector.shape_cast %365 : vector<2x64x32xf32> to vector<128x32xf32>
    %367 = arith.truncf %366 : vector<128x32xf32> to vector<128x32xbf16>
    %c2_218 = arith.constant 2 : index
    %c0_219 = arith.constant 0 : index
    %c0_220 = arith.constant 0 : index
    %368 = vector.load %arg16[%c2_218, %c0_219, %c0_220] : memref<4x32x128xbf16, #tpu.memory_space<vmem>>, vector<1x32x128xbf16>
    %369 = vector.shape_cast %368 : vector<1x32x128xbf16> to vector<32x128xbf16>
    %cst_221 = arith.constant dense<0.000000e+00> : vector<128x128xf32>
    %370 = tpu.matmul %367, %369, %cst_221 {dimension_numbers = #tpu.dot_dimension_numbers<[1], [0], [0], [1], [0, 0, 1, 1], [], []>} : vector<128x32xbf16>, vector<32x128xbf16>, vector<128x128xf32> -> vector<128x128xf32>
    %371 = arith.addf %323, %370 : vector<128x128xf32>
    %c3_222 = arith.constant 3 : index
    %c0_223 = arith.constant 0 : index
    %c0_224 = arith.constant 0 : index
    %372 = vector.load %arg10[%c3_222, %c0_223, %c0_224] : memref<4x128x32xbf16, #tpu.memory_space<vmem>>, vector<1x128x32xbf16>
    %373 = vector.shape_cast %372 : vector<1x128x32xbf16> to vector<128x32xbf16>
    %cst_225 = arith.constant dense<0.000000e+00> : vector<128x32xf32>
    %374 = tpu.matmul %225, %373, %cst_225 {dimension_numbers = #tpu.dot_dimension_numbers<[1], [0], [0], [1], [0, 0, 1, 1], [], []>} : vector<128x128xbf16>, vector<128x32xbf16>, vector<128x32xf32> -> vector<128x32xf32>
    %c3_226 = arith.constant 3 : index
    %c0_227 = arith.constant 0 : index
    %c0_228 = arith.constant 0 : index
    %375 = vector.load %arg11[%c3_226, %c0_227, %c0_228] : memref<4x1x32xf32, #tpu.memory_space<vmem>>, vector<1x1x32xf32>
    %376 = vector.shape_cast %375 : vector<1x1x32xf32> to vector<1x32xf32>
    %377 = vector.broadcast %376 : vector<1x32xf32> to vector<128x32xf32>
    %378 = arith.addf %374, %377 : vector<128x32xf32>
    %c3_229 = arith.constant 3 : index
    %c0_230 = arith.constant 0 : index
    %c0_231 = arith.constant 0 : index
    %379 = vector.load %arg12[%c3_229, %c0_230, %c0_231] : memref<4x128x32xbf16, #tpu.memory_space<vmem>>, vector<1x128x32xbf16>
    %380 = vector.shape_cast %379 : vector<1x128x32xbf16> to vector<128x32xbf16>
    %cst_232 = arith.constant dense<0.000000e+00> : vector<128x32xf32>
    %381 = tpu.matmul %226, %380, %cst_232 {dimension_numbers = #tpu.dot_dimension_numbers<[1], [0], [0], [1], [0, 0, 1, 1], [], []>} : vector<128x128xbf16>, vector<128x32xbf16>, vector<128x32xf32> -> vector<128x32xf32>
    %c3_233 = arith.constant 3 : index
    %c0_234 = arith.constant 0 : index
    %c0_235 = arith.constant 0 : index
    %382 = vector.load %arg13[%c3_233, %c0_234, %c0_235] : memref<4x1x32xf32, #tpu.memory_space<vmem>>, vector<1x1x32xf32>
    %383 = vector.shape_cast %382 : vector<1x1x32xf32> to vector<1x32xf32>
    %384 = vector.broadcast %383 : vector<1x32xf32> to vector<128x32xf32>
    %385 = arith.addf %381, %384 : vector<128x32xf32>
    %c3_236 = arith.constant 3 : index
    %c0_237 = arith.constant 0 : index
    %c0_238 = arith.constant 0 : index
    %386 = vector.load %arg14[%c3_236, %c0_237, %c0_238] : memref<4x128x32xbf16, #tpu.memory_space<vmem>>, vector<1x128x32xbf16>
    %387 = vector.shape_cast %386 : vector<1x128x32xbf16> to vector<128x32xbf16>
    %cst_239 = arith.constant dense<0.000000e+00> : vector<128x32xf32>
    %388 = tpu.matmul %226, %387, %cst_239 {dimension_numbers = #tpu.dot_dimension_numbers<[1], [0], [0], [1], [0, 0, 1, 1], [], []>} : vector<128x128xbf16>, vector<128x32xbf16>, vector<128x32xf32> -> vector<128x32xf32>
    %c3_240 = arith.constant 3 : index
    %c0_241 = arith.constant 0 : index
    %c0_242 = arith.constant 0 : index
    %389 = vector.load %arg15[%c3_240, %c0_241, %c0_242] : memref<4x1x32xf32, #tpu.memory_space<vmem>>, vector<1x1x32xf32>
    %390 = vector.shape_cast %389 : vector<1x1x32xf32> to vector<1x32xf32>
    %391 = vector.broadcast %390 : vector<1x32xf32> to vector<128x32xf32>
    %392 = arith.addf %388, %391 : vector<128x32xf32>
    %393 = vector.shape_cast %378 : vector<128x32xf32> to vector<2x64x32xf32>
    %394 = arith.truncf %393 : vector<2x64x32xf32> to vector<2x64x32xbf16>
    %395 = vector.shape_cast %385 : vector<128x32xf32> to vector<2x64x32xf32>
    %396 = arith.truncf %395 : vector<2x64x32xf32> to vector<2x64x32xbf16>
    %397 = vector.shape_cast %392 : vector<128x32xf32> to vector<2x64x32xf32>
    %398 = arith.truncf %397 : vector<2x64x32xf32> to vector<2x64x32xbf16>
    %cst_243 = arith.constant dense<0.000000e+00> : vector<2x64x64xf32>
    %399 = tpu.matmul %394, %396, %cst_243 {dimension_numbers = #tpu.dot_dimension_numbers<[2], [2], [1], [1], [0, 0, 0, 1, 1, 1], [0], [0]>} : vector<2x64x32xbf16>, vector<2x64x32xbf16>, vector<2x64x64xf32> -> vector<2x64x64xf32>
    %cst_244 = arith.constant 0.176776692 : f32
    %400 = vector.broadcast %cst_244 : f32 to vector<2x64x64xf32>
    %401 = arith.mulf %399, %400 : vector<2x64x64xf32>
    %cst_245 = arith.constant dense<0xFF800000> : vector<2x64xf32>
    %402 = vector.multi_reduction <maximumf>, %401, %cst_245 [2] : vector<2x64x64xf32> to vector<2x64xf32>
    %403 = vector.shape_cast %402 : vector<2x64xf32> to vector<2x64x1xf32>
    %404 = vector.broadcast %403 : vector<2x64x1xf32> to vector<2x64x64xf32>
    %405 = arith.subf %401, %404 : vector<2x64x64xf32>
    %406 = math.exp %405 : vector<2x64x64xf32>
    %cst_246 = arith.constant dense<0.000000e+00> : vector<2x64xf32>
    %407 = vector.multi_reduction <add>, %406, %cst_246 [2] : vector<2x64x64xf32> to vector<2x64xf32>
    %408 = vector.shape_cast %407 : vector<2x64xf32> to vector<2x64x1xf32>
    %409 = tpu.reciprocal %408 {approx = true} : vector<2x64x1xf32> -> vector<2x64x1xf32>
    %410 = vector.broadcast %409 : vector<2x64x1xf32> to vector<2x64x64xf32>
    %411 = arith.mulf %406, %410 : vector<2x64x64xf32>
    %412 = arith.truncf %411 : vector<2x64x64xf32> to vector<2x64x64xbf16>
    %cst_247 = arith.constant dense<0.000000e+00> : vector<2x64x32xf32>
    %413 = tpu.matmul %412, %398, %cst_247 {dimension_numbers = #tpu.dot_dimension_numbers<[2], [1], [1], [2], [0, 0, 0, 1, 1, 2], [0], [0]>} : vector<2x64x64xbf16>, vector<2x64x32xbf16>, vector<2x64x32xf32> -> vector<2x64x32xf32>
    %414 = vector.shape_cast %413 : vector<2x64x32xf32> to vector<128x32xf32>
    %415 = arith.truncf %414 : vector<128x32xf32> to vector<128x32xbf16>
    %c3_248 = arith.constant 3 : index
    %c0_249 = arith.constant 0 : index
    %c0_250 = arith.constant 0 : index
    %416 = vector.load %arg16[%c3_248, %c0_249, %c0_250] : memref<4x32x128xbf16, #tpu.memory_space<vmem>>, vector<1x32x128xbf16>
    %417 = vector.shape_cast %416 : vector<1x32x128xbf16> to vector<32x128xbf16>
    %cst_251 = arith.constant dense<0.000000e+00> : vector<128x128xf32>
    %418 = tpu.matmul %415, %417, %cst_251 {dimension_numbers = #tpu.dot_dimension_numbers<[1], [0], [0], [1], [0, 0, 1, 1], [], []>} : vector<128x32xbf16>, vector<32x128xbf16>, vector<128x128xf32> -> vector<128x128xf32>
    %419 = arith.addf %371, %418 : vector<128x128xf32>
    %c0_252 = arith.constant 0 : index
    %c0_253 = arith.constant 0 : index
    %420 = vector.load %arg17[%c0_252, %c0_253] : memref<1x128xf32, #tpu.memory_space<vmem>>, vector<1x128xf32>
    %421 = vector.broadcast %420 : vector<1x128xf32> to vector<128x128xf32>
    %422 = arith.addf %419, %421 : vector<128x128xf32>
    %423 = arith.addf %422, %224 : vector<128x128xf32>
    %c0_254 = arith.constant 0 : index
    %c0_255 = arith.constant 0 : index
    %424 = vector.load %arg24[%c0_254, %c0_255] : memref<1x128xf32, #tpu.memory_space<vmem>>, vector<1x128xf32>
    %c0_256 = arith.constant 0 : index
    %c0_257 = arith.constant 0 : index
    %425 = vector.load %arg25[%c0_256, %c0_257] : memref<1x128xf32, #tpu.memory_space<vmem>>, vector<1x128xf32>
    %cst_258 = arith.constant dense<0.000000e+00> : vector<128xf32>
    %426 = vector.multi_reduction <add>, %423, %cst_258 [1] : vector<128x128xf32> to vector<128xf32>
    %427 = vector.shape_cast %426 : vector<128xf32> to vector<128x1xf32>
    %cst_259 = arith.constant 1.280000e+02 : f32
    %428 = vector.broadcast %cst_259 : f32 to vector<128x1xf32>
    %429 = arith.divf %427, %428 : vector<128x1xf32>
    %430 = vector.broadcast %429 : vector<128x1xf32> to vector<128x128xf32>
    %431 = arith.subf %423, %430 : vector<128x128xf32>
    %432 = arith.mulf %431, %431 : vector<128x128xf32>
    %cst_260 = arith.constant dense<0.000000e+00> : vector<128xf32>
    %433 = vector.multi_reduction <add>, %432, %cst_260 [1] : vector<128x128xf32> to vector<128xf32>
    %434 = vector.shape_cast %433 : vector<128xf32> to vector<128x1xf32>
    %cst_261 = arith.constant 0.00787401571 : f32
    %435 = vector.broadcast %cst_261 : f32 to vector<128x1xf32>
    %436 = arith.mulf %434, %435 : vector<128x1xf32>
    %437 = tpu.reciprocal %436 {approx = true} : vector<128x1xf32> -> vector<128x1xf32>
    %438 = vector.broadcast %429 : vector<128x1xf32> to vector<128x128xf32>
    %439 = arith.subf %423, %438 : vector<128x128xf32>
    %440 = vector.broadcast %437 : vector<128x1xf32> to vector<128x128xf32>
    %441 = arith.mulf %439, %440 : vector<128x128xf32>
    %cst_262 = arith.constant 9.99999996E-13 : f32
    %442 = vector.broadcast %cst_262 : f32 to vector<128x128xf32>
    %443 = arith.addf %441, %442 : vector<128x128xf32>
    %444 = vector.broadcast %424 : vector<1x128xf32> to vector<128x128xf32>
    %445 = arith.mulf %443, %444 : vector<128x128xf32>
    %446 = vector.broadcast %425 : vector<1x128xf32> to vector<128x128xf32>
    %447 = arith.addf %445, %446 : vector<128x128xf32>
    %448 = arith.truncf %447 : vector<128x128xf32> to vector<128x128xbf16>
    %c0_263 = arith.constant 0 : index
    %c0_264 = arith.constant 0 : index
    %449 = vector.load %arg18[%c0_263, %c0_264] : memref<128x256xbf16, #tpu.memory_space<vmem>>, vector<128x256xbf16>
    %cst_265 = arith.constant dense<0.000000e+00> : vector<128x256xf32>
    %450 = tpu.matmul %448, %449, %cst_265 {dimension_numbers = #tpu.dot_dimension_numbers<[1], [0], [0], [1], [0, 0, 1, 1], [], []>} : vector<128x128xbf16>, vector<128x256xbf16>, vector<128x256xf32> -> vector<128x256xf32>
    %c0_266 = arith.constant 0 : index
    %c0_267 = arith.constant 0 : index
    %451 = vector.load %arg19[%c0_266, %c0_267] : memref<1x256xf32, #tpu.memory_space<vmem>>, vector<1x256xf32>
    %452 = vector.broadcast %451 : vector<1x256xf32> to vector<128x256xf32>
    %453 = arith.addf %450, %452 : vector<128x256xf32>
    %cst_268 = arith.constant 0.000000e+00 : f32
    %454 = vector.broadcast %cst_268 : f32 to vector<128x256xf32>
    %455 = arith.maximumf %453, %454 : vector<128x256xf32>
    %456 = arith.truncf %455 : vector<128x256xf32> to vector<128x256xbf16>
    %c0_269 = arith.constant 0 : index
    %c0_270 = arith.constant 0 : index
    %457 = vector.load %arg20[%c0_269, %c0_270] : memref<256x128xbf16, #tpu.memory_space<vmem>>, vector<256x128xbf16>
    %cst_271 = arith.constant dense<0.000000e+00> : vector<128x128xf32>
    %458 = tpu.matmul %456, %457, %cst_271 {dimension_numbers = #tpu.dot_dimension_numbers<[1], [0], [0], [1], [0, 0, 1, 1], [], []>} : vector<128x256xbf16>, vector<256x128xbf16>, vector<128x128xf32> -> vector<128x128xf32>
    %c0_272 = arith.constant 0 : index
    %c0_273 = arith.constant 0 : index
    %459 = vector.load %arg21[%c0_272, %c0_273] : memref<1x128xf32, #tpu.memory_space<vmem>>, vector<1x128xf32>
    %460 = vector.broadcast %459 : vector<1x128xf32> to vector<128x128xf32>
    %461 = arith.addf %458, %460 : vector<128x128xf32>
    %462 = arith.addf %461, %447 : vector<128x128xf32>
    %c0_274 = arith.constant 0 : index
    %c0_275 = arith.constant 0 : index
    %463 = vector.load %arg26[%c0_274, %c0_275] : memref<1x128xf32, #tpu.memory_space<vmem>>, vector<1x128xf32>
    %c0_276 = arith.constant 0 : index
    %c0_277 = arith.constant 0 : index
    %464 = vector.load %arg27[%c0_276, %c0_277] : memref<1x128xf32, #tpu.memory_space<vmem>>, vector<1x128xf32>
    %cst_278 = arith.constant dense<0.000000e+00> : vector<128xf32>
    %465 = vector.multi_reduction <add>, %462, %cst_278 [1] : vector<128x128xf32> to vector<128xf32>
    %466 = vector.shape_cast %465 : vector<128xf32> to vector<128x1xf32>
    %cst_279 = arith.constant 1.280000e+02 : f32
    %467 = vector.broadcast %cst_279 : f32 to vector<128x1xf32>
    %468 = arith.divf %466, %467 : vector<128x1xf32>
    %469 = vector.broadcast %468 : vector<128x1xf32> to vector<128x128xf32>
    %470 = arith.subf %462, %469 : vector<128x128xf32>
    %471 = arith.mulf %470, %470 : vector<128x128xf32>
    %cst_280 = arith.constant dense<0.000000e+00> : vector<128xf32>
    %472 = vector.multi_reduction <add>, %471, %cst_280 [1] : vector<128x128xf32> to vector<128xf32>
    %473 = vector.shape_cast %472 : vector<128xf32> to vector<128x1xf32>
    %cst_281 = arith.constant 0.00787401571 : f32
    %474 = vector.broadcast %cst_281 : f32 to vector<128x1xf32>
    %475 = arith.mulf %473, %474 : vector<128x1xf32>
    %476 = tpu.reciprocal %475 {approx = true} : vector<128x1xf32> -> vector<128x1xf32>
    %477 = vector.broadcast %468 : vector<128x1xf32> to vector<128x128xf32>
    %478 = arith.subf %462, %477 : vector<128x128xf32>
    %479 = vector.broadcast %476 : vector<128x1xf32> to vector<128x128xf32>
    %480 = arith.mulf %478, %479 : vector<128x128xf32>
    %cst_282 = arith.constant 9.99999996E-13 : f32
    %481 = vector.broadcast %cst_282 : f32 to vector<128x128xf32>
    %482 = arith.addf %480, %481 : vector<128x128xf32>
    %483 = vector.broadcast %463 : vector<1x128xf32> to vector<128x128xf32>
    %484 = arith.mulf %482, %483 : vector<128x128xf32>
    %485 = vector.broadcast %464 : vector<1x128xf32> to vector<128x128xf32>
    %486 = arith.addf %484, %485 : vector<128x128xf32>
    %c0_283 = arith.constant 0 : index
    %c0_284 = arith.constant 0 : index
    %487 = vector.load %arg28[%c0_283, %c0_284] : memref<128x128xf32, #tpu.memory_space<vmem>>, vector<128x128xf32>
    tpu.vector_store %arg28[%c0_283, %c0_284], %486 {strides = array<i32>} : memref<128x128xf32, #tpu.memory_space<vmem>>, vector<128x128xf32>,
    return
  }
}

</mosaic_0001>

<bundles_post_ra>
// kernel: tpu_custom_call.1
= control target key start
LH: loop header
LB: loop body
LE: loop exit
PB: predicated region body
PF: predicated region fallthrough
CT: control target
= control target key end

     0   :  { %s17231_s0 = inlined_call_operand.vmem [shape: f32[128,128], index: 0, kind: input, shape index: {}]   ;;  %s17232_s1 = inlined_call_operand.vmem [shape: f32[128,128], index: 1, kind: input, shape index: {}]   ;;  %s17233_s2 = inlined_call_operand.vmem [shape: bf16[4,128,32], index: 2, kind: input, shape index: {}]   ;;  %s17234_s3 = inlined_call_operand.vmem [shape: f32[4,1,32], index: 3, kind: input, shape index: {}]   ;;  %s17235_s4 = inlined_call_operand.vmem [shape: bf16[4,128,32], index: 4, kind: input, shape index: {}]   ;;  %s17236_s5 = inlined_call_operand.vmem [shape: f32[4,1,32], index: 5, kind: input, shape index: {}]   ;;  %s17237_s6 = inlined_call_operand.vmem [shape: bf16[4,128,32], index: 6, kind: input, shape index: {}]   ;;  %s17238_s7 = inlined_call_operand.vmem [shape: f32[4,1,32], index: 7, kind: input, shape index: {}]   ;;  %s17239_s8 = inlined_call_operand.vmem [shape: bf16[4,32,128], index: 8, kind: input, shape index: {}]   ;;  %s17240_s9 = inlined_call_operand.vmem [shape: f32[1,128], index: 9, kind: input, shape index: {}]   ;;  %s17241_s10 = inlined_call_operand.vmem [shape: bf16[4,128,32], index: 10, kind: input, shape index: {}]   ;;  %s17242_s11 = inlined_call_operand.vmem [shape: f32[4,1,32], index: 11, kind: input, shape index: {}]   ;;  %s17243_s12 = inlined_call_operand.vmem [shape: bf16[4,128,32], index: 12, kind: input, shape index: {}]   ;;  %s17244_s13 = inlined_call_operand.vmem [shape: f32[4,1,32], index: 13, kind: input, shape index: {}]   ;;  %s17245_s14 = inlined_call_operand.vmem [shape: bf16[4,128,32], index: 14, kind: input, shape index: {}]   ;;  %s17246_s15 = inlined_call_operand.vmem [shape: f32[4,1,32], index: 15, kind: input, shape index: {}]   ;;  %s17247_s16 = inlined_call_operand.vmem [shape: bf16[4,32,128], index: 16, kind: input, shape index: {}]   ;;  %s17248_s17 = inlined_call_operand.vmem [shape: f32[1,128], index: 17, kind: input, shape index: {}]   ;;  %s17249_s18 = inlined_call_operand.vmem [shape: bf16[128,256], index: 18, kind: input, shape index: {}]   ;;  %s17250_s19 = inlined_call_operand.vmem [shape: f32[1,256], index: 19, kind: input, shape index: {}]   ;;  %s17251_s20 = inlined_call_operand.vmem [shape: bf16[256,128], index: 20, kind: input, shape index: {}]   ;;  %s17252_s21 = inlined_call_operand.vmem [shape: f32[1,128], index: 21, kind: input, shape index: {}]   ;;  %s17253_s22 = inlined_call_operand.vmem [shape: f32[1,128], index: 22, kind: input, shape index: {}]   ;;  %s17254_s23 = inlined_call_operand.vmem [shape: f32[1,128], index: 23, kind: input, shape index: {}]   ;;  %s17255_s24 = inlined_call_operand.vmem [shape: f32[1,128], index: 24, kind: input, shape index: {}]   ;;  %s17256_s25 = inlined_call_operand.vmem [shape: f32[1,128], index: 25, kind: input, shape index: {}]   ;;  %s17257_s26 = inlined_call_operand.vmem [shape: f32[1,128], index: 26, kind: input, shape index: {}]   ;;  %s17258_s27 = inlined_call_operand.vmem [shape: f32[1,128], index: 27, kind: input, shape index: {}]   ;;  %s17259_s28 = inlined_call_operand.hbm [shape: f32[128,128], index: 28, kind: output, shape index: {}]  }
   0x1   :  { %17290 = sst [smem:[#allocation43_spill]] %s17231_s0 }
   0x2   :  { %17291 = sst [smem:[#allocation44_spill]] %s17232_s1 }
   0x3   :  { %17292 = sst [smem:[#allocation45_spill]] %s17233_s2 }
   0x4   :  { %17293 = sst [smem:[#allocation46_spill]] %s17234_s3 }
   0x5   :  { %17294 = sst [smem:[#allocation47_spill]] %s17235_s4 }
   0x6   :  { %17295 = sst [smem:[#allocation48_spill]] %s17236_s5 }
   0x7   :  { %17296 = sst [smem:[#allocation49_spill]] %s17237_s6 }
   0x8   :  { %17297 = sst [smem:[#allocation50_spill]] %s17238_s7 }
   0x9   :  { %17298 = sst [smem:[#allocation51_spill]] %s17239_s8 }
   0xa   :  { %17299 = sst [smem:[#allocation52_spill]] %s17240_s9 }
   0xb   :  { %17300 = sst [smem:[#allocation53_spill]] %s17241_s10 }
   0xc   :  { %17301 = sst [smem:[#allocation54_spill]] %s17242_s11 }
   0xd   :  { %17302 = sst [smem:[#allocation55_spill]] %s17243_s12 }
   0xe   :  { %17303 = sst [smem:[#allocation56_spill]] %s17259_s28 }
   0xf   :  { %s17304_s9 = sld [smem:[#allocation47_spill]] }
  0x15   :  { %v11495_v0 = vld [vmem:[%s17304_s9 + $0x38] sm:$0xff]  ;;  %v11494_v1 = vld [vmem:[%s17304_s9 + $0x30] sm:$0xff]  ;;  %v11493_v2 = vld [vmem:[%s17304_s9 + $0x28] sm:$0xff] }
  0x16   :  { %316 = vmatpush.bf16.msra.mxu1 %v11495_v0  ;;  %v11492_v3 = vld [vmem:[%s17304_s9 + $0x20] sm:$0xff]  ;;  %v11491_v4 = vld [vmem:[%s17304_s9 + $0x18] sm:$0xff] }
  0x1a   :  { %317 = vmatpush.bf16.msra.mxu1 %v11494_v1 }
  0x1e   :  { %318 = vmatpush.bf16.msra.mxu1 %v11493_v2 }
  0x22   :  { %319 = vmatpush.bf16.msra.mxu1 %v11492_v3 }
  0x23   :  { %33 = vsyncpa [#allocation3], 0  ;;  %v11490_v5 = vld [vmem:[%s17304_s9 + $0x10] sm:$0xff]  ;;  %v11489_v6 = vld [vmem:[%s17304_s9 + $0x8] sm:$0xff]  ;;  %s17305_s6 = sld [smem:[#allocation43_spill]]  ;;  %vm570_vm0 = vcmask 261120  }
  0x24   :  { %v11488_v7 = vld [vmem:[%s17304_s9] sm:$0xff]  ;;  %s17306_s2 = sld [smem:[#allocation45_spill]]  ;;  %vm733_vm1 = vcmask 523264  }
  0x25   :  { %s17307_s11 = sld [smem:[#allocation49_spill]] }
  0x26   :  { %320 = vmatpush.bf16.msra.mxu1 %v11491_v4  ;;  %s17308_s5 = sld [smem:[#allocation48_spill]] }
  0x27   :  { %s17309_s10 = sld [smem:[#allocation46_spill]] }
  0x28   :  { %s17310_s7 = sld [smem:[#allocation50_spill]] }
  0x29   :  { %v91_v8 = vld [vmem:[%s17305_s6] sm:$0xff]  ;;  %v92_v9 = vld [vmem:[%s17305_s6 + $0x8] sm:$0xff]  ;;  %v93_v13 = vld [vmem:[%s17305_s6 + $0x10] sm:$0xff]  ;;  %s17311_s0 = sld [smem:[#allocation51_spill]] }
  0x2a   :  { %321 = vmatpush.bf16.msra.mxu1 %v11490_v5  ;;  %v12596_v10 = vpack.c.bf16 %v92_v9, %v91_v8  ;;  %v11487_v11 = vld [vmem:[%s17306_s2 + $0x38] sm:$0xff]  ;;  %v11486_v12 = vld [vmem:[%s17306_s2 + $0x30] sm:$0xff]  ;;  %v11485_v16 = vld [vmem:[%s17306_s2 + $0x28] sm:$0xff]  ;;  %s17325_s12 = sld [smem:[#allocation52_spill]] }
  0x2b   :  { %199 = vmatpush.bf16.msra.mxu0 %v11487_v11  ;;  %v94_v14 = vld [vmem:[%s17305_s6 + $0x18] sm:$0xff]  ;;  %v11484_v18 = vld [vmem:[%s17306_s2 + $0x20] sm:$0xff]  ;;  %v11502_v19 = vld [vmem:[%s17307_s11 + $0x30] sm:$0xff]  ;;  %s17338_s1 = sld [smem:[#allocation53_spill]] }
  0x2c   :  { %v12611_v15 = vpack.c.bf16 %v94_v14, %v93_v13  ;;  %v11503_v17 = vld [vmem:[%s17307_s11 + $0x38] sm:$0xff]  ;;  %v95_v21 = vld [vmem:[%s17305_s6 + $0x20] sm:$0xff]  ;;  %v96_v22 = vld [vmem:[%s17305_s6 + $0x28] sm:$0xff]  ;;  %s17351_s28 = sld [smem:[#allocation54_spill]] }
  0x2d   :  { %11720 = vmatpush.bf16.msra.mxu3 %v11503_v17  ;;  %433 = vmatpush.bf16.msra.mxu2 %v11503_v17  ;;  %v11483_v20 = vld [vmem:[%s17306_s2 + $0x18] sm:$0xff]  ;;  %v11482_v23 = vld [vmem:[%s17306_s2 + $0x10] sm:$0xff]  ;;  %v12638_v24 = vpack.c.bf16 %v96_v22, %v95_v21  ;;  %v11481_v25 = vld [vmem:[%s17306_s2 + $0x8] sm:$0xff]  ;;  %s17419_s3 = sld [smem:[#allocation56_spill]] }
  0x2e   :  { %322 = vmatpush.bf16.msra.mxu1 %v11489_v6  ;;  %v11501_v26 = vld [vmem:[%s17307_s11 + $0x28] sm:$0xff]  ;;  %v11480_v27 = vld [vmem:[%s17306_s2] sm:$0xff]  ;;  %v11499_v29 = vld [vmem:[%s17307_s11 + $0x18] sm:$0xff] }
  0x2f   :  { %200 = vmatpush.bf16.msra.mxu0 %v11486_v12  ;;  %v11500_v28 = vld [vmem:[%s17307_s11 + $0x20] sm:$0xff]  ;;  %v97_v30 = vld [vmem:[%s17305_s6 + $0x30] sm:$0xff]  ;;  %v98_v31 = vld [vmem:[%s17305_s6 + $0x38] sm:$0xff] }
  0x30   :  { %v11498_v32 = vld [vmem:[%s17307_s11 + $0x10] sm:$0xff]  ;;  %v12666_v33 = vpack.c.bf16 %v98_v31, %v97_v30  ;;  %v11497_v34 = vld [vmem:[%s17307_s11 + $0x8] sm:$0xff]  ;;  %v11496_v35 = vld [vmem:[%s17307_s11] sm:$0xff] }
  0x31   :  { %11721 = vmatpush.bf16.msra.mxu3 %v11502_v19  ;;  %434 = vmatpush.bf16.msra.mxu2 %v11502_v19  ;;  %v99_v36 = vld [vmem:[%s17305_s6 + $0x40] sm:$0xff]  ;;  %v100_v37 = vld [vmem:[%s17305_s6 + $0x48] sm:$0xff]  ;;  %v101_v39 = vld [vmem:[%s17305_s6 + $0x50] sm:$0xff] }
  0x32   :  { %323 = vmatpush.bf16.msra.mxu1 %v11488_v7  ;;  %v12681_v38 = vpack.c.bf16 %v100_v37, %v99_v36  ;;  %v102_v40 = vld [vmem:[%s17305_s6 + $0x58] sm:$0xff]  ;;  %v103_v42 = vld [vmem:[%s17305_s6 + $0x60] sm:$0xff]  ;;  %v104_v43 = vld [vmem:[%s17305_s6 + $0x68] sm:$0xff] }
  0x33   :  { %201 = vmatpush.bf16.msra.mxu0 %v11485_v16  ;;  %v12693_v41 = vpack.c.bf16 %v102_v40, %v101_v39  ;;  %v12705_v44 = vpack.c.bf16 %v104_v43, %v103_v42  ;;  %v105_v45 = vld [vmem:[%s17305_s6 + $0x70] sm:$0xff]  ;;  %v106_v46 = vld [vmem:[%s17305_s6 + $0x78] sm:$0xff]  ;;  %v12729_v56 = vld [vmem:[%s17308_s5] ss:$0 sm:$0xff] }
  0x34   :  { %v12717_v47 = vpack.c.bf16 %v106_v46, %v105_v45  ;;  %v12752_v31 = vld [vmem:[%s17309_s10] ss:$0 sm:$0xff] }
  0x35   :  { %324 = vmatmul.bf16.vlgmr.msra.gmra.mxu1 %v12596_v10  ;;  %11722 = vmatpush.bf16.msra.mxu3 %v11501_v26 }
  0x36   :  { %435 = vmatpush.bf16.msra.mxu2 %v11501_v26 }
  0x37   :  { %202 = vmatpush.bf16.msra.mxu0 %v11484_v18 }
  0x39   :  { %11723 = vmatpush.bf16.msra.mxu3 %v11500_v28 }
  0x3a   :  { %436 = vmatpush.bf16.msra.mxu2 %v11500_v28 }
  0x3b   :  { %203 = vmatpush.bf16.msra.mxu0 %v11483_v20 }
  0x3d   :  { %11724 = vmatpush.bf16.msra.mxu3 %v11499_v29 }
  0x3e   :  { %437 = vmatpush.bf16.msra.mxu2 %v11499_v29 }
  0x3f   :  { %204 = vmatpush.bf16.msra.mxu0 %v11482_v23 }
  0x41   :  { %11725 = vmatpush.bf16.msra.mxu3 %v11498_v32 }
  0x42   :  { %438 = vmatpush.bf16.msra.mxu2 %v11498_v32 }
  0x43   :  { %205 = vmatpush.bf16.msra.mxu0 %v11481_v25 }
  0x45   :  { %329 = vmatmul.bf16.gmra.mxu1 %v12611_v15  ;;  %11726 = vmatpush.bf16.msra.mxu3 %v11497_v34 }
  0x46   :  { %439 = vmatpush.bf16.msra.mxu2 %v11497_v34 }
  0x47   :  { %206 = vmatpush.bf16.msra.mxu0 %v11480_v27 }
  0x49   :  { %11727 = vmatpush.bf16.msra.mxu3 %v11496_v35 }
  0x4a   :  { %207 = vmatmul.bf16.vlgmr.msra.gmra.mxu0 %v12596_v10  ;;  %440 = vmatpush.bf16.msra.mxu2 %v11496_v35 }
  0x4c   :  { %461 = vmatmul.bf16.vlgmr.msra.gmra.mxu3 %v12681_v38 }
  0x4d   :  { %441 = vmatmul.bf16.vlgmr.msra.gmra.mxu2 %v12596_v10 }
  0x55   :  { %334 = vmatmul.bf16.gmra.mxu1 %v12638_v24 }
  0x5a   :  { %212 = vmatmul.bf16.gmra.mxu0 %v12611_v15 }
  0x5c   :  { %466 = vmatmul.bf16.gmra.mxu3 %v12693_v41 }
  0x5d   :  { %446 = vmatmul.bf16.gmra.mxu2 %v12611_v15 }
  0x65   :  { %339 = vmatmul.bf16.gmra.mxu1 %v12666_v33 }
  0x6a   :  { %217 = vmatmul.bf16.gmra.mxu0 %v12638_v24 }
  0x6c   :  { %471 = vmatmul.bf16.gmra.mxu3 %v12705_v44 }
  0x6d   :  { %451 = vmatmul.bf16.gmra.mxu2 %v12638_v24 }
  0x75   :  { %344 = vmatmul.bf16.gmra.mxu1 %v12681_v38 }
  0x7a   :  { %222 = vmatmul.bf16.gmra.mxu0 %v12666_v33 }
  0x7c   :  { %476 = vmatmul.bf16.gmra.mxu3 %v12717_v47 }
  0x7d   :  { %456 = vmatmul.bf16.gmra.mxu2 %v12666_v33 }
  0x85   :  { %349 = vmatmul.bf16.gmra.mxu1 %v12693_v41 }
  0x8a   :  { %227 = vmatmul.bf16.gmra.mxu0 %v12681_v38 }
  0x95   :  { %354 = vmatmul.bf16.gmra.mxu1 %v12705_v44 }
  0x9a   :  { %232 = vmatmul.bf16.gmra.mxu0 %v12693_v41 }
  0xa5   :  { %359 = vmatmul.bf16.gmra.mxu1 %v12717_v47 }
  0xaa   :  { %237 = vmatmul.bf16.gmra.mxu0 %v12705_v44 }
  0xb2   :  { %v325_v48 = vpop.f32.mrf.mxu1 }
  0xb3   :  { %v326_v26 = vadd.f32 %v12729_v56, %v325_v48 }
  0xb5   :  { %v498_v30 = vpack.c.bf16 %v326_v26, %v326_v26 }
  0xb7   :  { %v558_v39 = vunpack.c.l.b16 %v498_v30 }
  0xba   :  { %v327_v49 = vpop.f32.mrf.mxu1  ;;  %242 = vmatmul.bf16.gmra.mxu0 %v12717_v47 }
  0xbb   :  { %v328_v21 = vadd.f32 %v12729_v56, %v327_v49 }
  0xbd   :  { %v499_v28 = vpack.c.bf16 %v328_v21, %v328_v21 }
  0xbf   :  { %v559_v34 = vunpack.c.l.b16 %v499_v28 }
  0xc1   :  { %v566_v43 = vpack.c.b16 %v559_v34, %v558_v39 }
  0xc2   :  { %v330_v50 = vpop.f32.mrf.mxu1 }
  0xc3   :  { %v331_v13 = vadd.f32 %v12729_v56, %v330_v50  ;;  %v584_v49 = vsel %vm570_vm0, %v566_v43, 0 }
  0xc5   :  { %v500_v18 = vpack.c.bf16 %v331_v13, %v331_v13 }
  0xc7   :  { %v208_v54 = vpop.f32.mrf.mxu0  ;;  %v560_v27 = vunpack.c.l.b16 %v500_v18 }
  0xc8   :  { %v209_v40 = vadd.f32 %v12752_v31, %v208_v54 }
  0xca   :  { %v332_v51 = vpop.f32.mrf.mxu1  ;;  %v482_v45 = vpack.c.bf16 %v209_v40, %v209_v40 }
  0xcb   :  { %v333_v8 = vadd.f32 %v12729_v56, %v332_v51 }
  0xcc   :  { %v538_v51 = vunpack.c.l.b16 %v482_v45 }
  0xcd   :  { %v501_v16 = vpack.c.bf16 %v333_v8, %v333_v8 }
  0xcf   :  { %v210_v57 = vpop.f32.mrf.mxu0  ;;  %v12739_v12 = vpop.f32.mrf.mxu3  ;;  %v561_v22 = vunpack.c.l.b16 %v501_v16 }
  0xd0   :  { %v211_v42 = vadd.f32 %v12752_v31, %v210_v57 }
  0xd1   :  { %v567_v29 = vpack.c.b16 %v561_v22, %v560_v27 }
  0xd2   :  { %v335_v52 = vpop.f32.mrf.mxu1  ;;  %v483_v46 = vpack.c.bf16 %v211_v42, %v211_v42 }
  0xd3   :  { %v336_v63 = vadd.f32 %v12729_v56, %v335_v52  ;;  %v587_v35 = vsel %vm570_vm0, %v567_v29, 0 }
  0xd4   :  { %v539_v52 = vunpack.c.l.b16 %v483_v46 }
  0xd5   :  { %v502_v5 = vpack.c.bf16 %v336_v63, %v336_v63 }
  0xd7   :  { %v213_v4 = vpop.f32.mrf.mxu0  ;;  %v562_v14 = vunpack.c.l.b16 %v502_v5  ;;  %v12746_v25 = vpop.f32.mrf.mxu3  ;;  %v12770_v5 = vld [vmem:[%s17310_s7] ss:$0 sm:$0xff] }
  0xd8   :  { %v214_v54 = vadd.f32 %v12752_v31, %v213_v4  ;;  %v463_v46 = vadd.f32 %v12770_v5, %v12739_v12 }
  0xda   :  { %v337_v53 = vpop.f32.mrf.mxu1 }
  0xdb   :  { %v338_v60 = vadd.f32 %v12729_v56, %v337_v53 }
  0xdd   :  { %v503_v1 = vpack.c.bf16 %v338_v60, %v338_v60 }
  0xdf   :  { %v563_v9 = vunpack.c.l.b16 %v503_v1  ;;  %v215_v20 = vpop.f32.mrf.mxu0  ;;  %v467_v36 = vpop.f32.mrf.mxu3 }
  0xe0   :  { %v216_v57 = vadd.f32 %v12752_v31, %v215_v20  ;;  %v468_v27 = vadd.f32 %v12770_v5, %v467_v36  ;;  %v465_v36 = vadd.f32 %v12770_v5, %v12746_v25 }
  0xe1   :  { %v568_v17 = vpack.c.b16 %v563_v9, %v562_v14 }
  0xe2   :  { %v340_v55 = vpop.f32.mrf.mxu1 }
  0xe3   :  { %v341_v58 = vadd.f32 %v12729_v56, %v340_v55  ;;  %v590_v23 = vsel %vm570_vm0, %v568_v17, 0  ;;  %v546_v55 = vpack.c.b16 %v539_v52, %v538_v51 }
  0xe5   :  { %v504_v61 = vpack.c.bf16 %v341_v58, %v341_v58 }
  0xe7   :  { %v564_v2 = vunpack.c.l.b16 %v504_v61  ;;  %v218_v37 = vpop.f32.mrf.mxu0  ;;  %v469_v50 = vpop.f32.mrf.mxu3  ;;  %v484_v61 = vpack.c.bf16 %v214_v54, %v214_v54 }
  0xe8   :  { %v219_v9 = vadd.f32 %v12752_v31, %v218_v37  ;;  %v470_v30 = vadd.f32 %v12770_v5, %v469_v50 }
  0xe9   :  { %v540_v1 = vunpack.c.l.b16 %v484_v61 }
  0xea   :  { %v342_v59 = vpop.f32.mrf.mxu1  ;;  %v486_v18 = vpack.c.bf16 %v219_v9, %v219_v9 }
  0xeb   :  { %v343_v62 = vadd.f32 %v12729_v56, %v342_v59 }
  0xec   :  { %v542_v42 = vunpack.c.l.b16 %v486_v18 }
  0xed   :  { %v505_v0 = vpack.c.bf16 %v343_v62, %v343_v62  ;;  %v485_v62 = vpack.c.bf16 %v216_v57, %v216_v57 }
  0xef   :  { %v565_v3 = vunpack.c.l.b16 %v505_v0  ;;  %v220_v53 = vpop.f32.mrf.mxu0  ;;  %v472_v59 = vpop.f32.mrf.mxu3 }
  0xf0   :  { %v473_v16 = vadd.f32 %v12770_v5, %v472_v59  ;;  %v525_v59 = vpack.c.bf16 %v470_v30, %v470_v30 }
  0xf1   :  { %v569_v6 = vpack.c.b16 %v565_v3, %v564_v2  ;;  %v541_v2 = vunpack.c.l.b16 %v485_v62 }
  0xf2   :  { %v12735_v7 = vpop.f32.mrf.mxu1  ;;  %v526_v34 = vpack.c.bf16 %v473_v16, %v473_v16 }
  0xf3   :  { %v593_v11 = vsel %vm570_vm0, %v569_v6, 0  ;;  %v547_v3 = vpack.c.b16 %v541_v2, %v540_v1  ;;  %v522_v1 = vpack.c.bf16 %v463_v46, %v463_v46 }
  0xf4   :  { %599 = vmatpush.bf16.xpose.msrb.mxu3 %v593_v11  ;;  %v221_v11 = vadd.f32 %v12752_v31, %v220_v53  ;;  %v524_v53 = vpack.c.bf16 %v468_v27, %v468_v27  ;;  %v1043_v54 = vunpack.c.l.b16 %v526_v34 }
  0xf6   :  { %v487_v20 = vpack.c.bf16 %v221_v11, %v221_v11 }
  0xf7   :  { %v12765_v60 = vpop.f32.mrf.mxu0  ;;  %v474_v0 = vpop.f32.mrf.mxu3 }
  0xf8   :  { %v475_v17 = vadd.f32 %v12770_v5, %v474_v0  ;;  %v543_v43 = vunpack.c.l.b16 %v487_v20  ;;  %v1039_v20 = vunpack.c.l.b16 %v522_v1 }
  0xfa   :  { %v12742_v19 = vpop.f32.mrf.mxu1  ;;  %v527_v37 = vpack.c.bf16 %v475_v17, %v475_v17 }
  0xfc   :  { %600 = vmatpush.bf16.xpose.msrb.mxu3 %v590_v23  ;;  %v1044_v57 = vunpack.c.l.b16 %v527_v37 }
  0xfe   :  { %v1049_v9 = vpack.c.b16 %v1044_v57, %v1043_v54 }
  0xff   :  { %v225_v8 = vpop.f32.mrf.mxu0  ;;  %v477_v4 = vpop.f32.mrf.mxu3 }
 0x100   :  { %v478_v13 = vadd.f32 %v12770_v5, %v477_v4  ;;  %v1042_v4 = vunpack.c.l.b16 %v525_v59 }
 0x102   :  { %v12754_v32 = vpop.f32.mrf.mxu1  ;;  %v528_v22 = vpack.c.bf16 %v478_v13, %v478_v13 }
 0x103   :  { %v351_v11 = vadd.f32 %v12729_v56, %v12754_v32 }
 0x104   :  { %601 = vmatpush.bf16.xpose.msrb.mxu3 %v587_v35 }
 0x107   :  { %v479_v29 = vpop.f32.mrf.mxu3  ;;  %v12783_v35 = vpop.f32.mrf.mxu0 }
 0x108   :  { %v480_v39 = vadd.f32 %v12770_v5, %v479_v29 }
 0x10a   :  { %v12759_v48 = vpop.f32.mrf.mxu1  ;;  %v529_v51 = vpack.c.bf16 %v480_v39, %v480_v39 }
 0x10b   :  { %v353_v12 = vadd.f32 %v12729_v56, %v12759_v48  ;;  %v226_v48 = vadd.f32 %v12752_v31, %v225_v8  ;;  %v346_v8 = vadd.f32 %v12729_v56, %v12735_v7 }
 0x10c   :  { %602 = vmatpush.bf16.xpose.msrb.mxu3 %v584_v49  ;;  %v1045_v49 = vunpack.c.l.b16 %v528_v22  ;;  %v1046_v61 = vunpack.c.l.b16 %v529_v51 }
 0x10d   :  { %v509_v17 = vpack.c.bf16 %v353_v12, %v353_v12  ;;  %v489_v27 = vpack.c.bf16 %v226_v48, %v226_v48 }
 0x10e   :  { %v1050_v0 = vpack.c.b16 %v1046_v61, %v1045_v49  ;;  %v229_v49 = vadd.f32 %v12752_v31, %v12783_v35 }
 0x10f   :  { %v230_v16 = vpop.f32.mrf.mxu0  ;;  %v655_v32 = vunpack.c.l.b16 %v509_v17  ;;  %v545_v37 = vunpack.c.l.b16 %v489_v27 }
 0x110   :  { %1071 = vmatpush.bf16.msrb.mxu1 %v1050_v0  ;;  %v490_v51 = vpack.c.bf16 %v229_v49, %v229_v49 }
 0x112   :  { %v355_v58 = vpop.f32.mrf.mxu1 }
 0x113   :  { %10094 = vmatmul.msk.bf16.vlgmr.msrb.gmra.mxu3 %vm570_vm0, %v546_v55  ;;  %v356_v40 = vadd.f32 %v12729_v56, %v355_v58 }
 0x114   :  { %1072 = vmatpush.bf16.msrb.mxu1 %v1049_v9 }
 0x115   :  { %v510_v58 = vpack.c.bf16 %v356_v40, %v356_v40 }
 0x117   :  { %v656_v13 = vunpack.c.l.b16 %v510_v58 }
 0x11a   :  { %v357_v63 = vpop.f32.mrf.mxu1 }
 0x11b   :  { %v358_v23 = vadd.f32 %v12729_v56, %v357_v63  ;;  %v548_v63 = vpack.c.b16 %v543_v43, %v542_v42  ;;  %v233_v42 = vpop.f32.mrf.mxu0  ;;  %v506_v43 = vpack.c.bf16 %v346_v8, %v346_v8  ;;  %v11518_v8 = vld [vmem:[%s17304_s9 + $0x60] sm:$0xff] }
 0x11c   :  { %v234_v61 = vadd.f32 %v12752_v31, %v233_v42  ;;  %v11514_v42 = vld [vmem:[%s17304_s9 + $0x40] sm:$0xff] }
 0x11d   :  { %v511_v50 = vpack.c.bf16 %v358_v23, %v358_v23  ;;  %v508_v23 = vpack.c.bf16 %v351_v11, %v351_v11 }
 0x11e   :  { %v492_v35 = vpack.c.bf16 %v234_v61, %v234_v61 }
 0x11f   :  { %v657_v2 = vunpack.c.l.b16 %v511_v50  ;;  %v654_v30 = vunpack.c.l.b16 %v508_v23 }
 0x121   :  { %v662_v18 = vpack.c.b16 %v657_v2, %v656_v13  ;;  %v661_v40 = vpack.c.b16 %v655_v32, %v654_v30  ;;  %v11521_v32 = vld [vmem:[%s17304_s9 + $0x78] sm:$0xff] }
 0x122   :  { %v360_v6 = vpop.f32.mrf.mxu1 }
 0x123   :  { %10095 = vmatmul.msk.bf16.gmra.mxu3 %vm570_vm0, %v547_v3  ;;  %v361_v14 = vadd.f32 %v12729_v56, %v360_v6  ;;  %v523_v3 = vpack.c.bf16 %v465_v36, %v465_v36  ;;  %v1041_v6 = vunpack.c.l.b16 %v524_v53  ;;  %v683_v29 = vsel %vm570_vm0, %v662_v18, 0 }
 0x124   :  { %v652_v36 = vunpack.c.l.b16 %v506_v43 }
 0x125   :  { %v512_v26 = vpack.c.bf16 %v361_v14, %v361_v14  ;;  %v224_v14 = vadd.f32 %v12752_v31, %v12765_v60  ;;  %v1048_v22 = vpack.c.b16 %v1042_v4, %v1041_v6 }
 0x127   :  { %v658_v52 = vunpack.c.l.b16 %v512_v26  ;;  %v488_v26 = vpack.c.bf16 %v224_v14, %v224_v14  ;;  %1073 = vmatpush.bf16.msrb.mxu1 %v1048_v22 }
 0x129   :  { %v544_v34 = vunpack.c.l.b16 %v488_v26 }
 0x12a   :  { %v362_v21 = vpop.f32.mrf.mxu1 }
 0x12b   :  { %v363_v28 = vadd.f32 %v12729_v56, %v362_v21  ;;  %v1040_v21 = vunpack.c.l.b16 %v523_v3 }
 0x12d   :  { %v513_v45 = vpack.c.bf16 %v363_v28, %v363_v28  ;;  %v348_v28 = vadd.f32 %v12729_v56, %v12742_v19  ;;  %v1047_v60 = vpack.c.b16 %v1040_v21, %v1039_v20  ;;  %v680_v19 = vsel %vm570_vm0, %v661_v40, 0  ;;  %v11515_v40 = vld [vmem:[%s17304_s9 + $0x48] sm:$0xff] }
 0x12e   :  { %v231_v56 = vadd.f32 %v12752_v31, %v230_v16 }
 0x12f   :  { %v659_v55 = vunpack.c.l.b16 %v513_v45  ;;  %v507_v39 = vpack.c.bf16 %v348_v28, %v348_v28  ;;  %1074 = vmatpush.bf16.msrb.mxu1 %v1047_v60  ;;  %v549_v45 = vpack.c.b16 %v545_v37, %v544_v34  ;;  %v11519_v60 = vld [vmem:[%s17304_s9 + $0x68] sm:$0xff]  ;;  %v11517_v34 = vld [vmem:[%s17304_s9 + $0x58] sm:$0xff]  ;;  %v11516_v37 = vld [vmem:[%s17304_s9 + $0x50] sm:$0xff] }
 0x130   :  { %v491_v50 = vpack.c.bf16 %v231_v56, %v231_v56 }
 0x131   :  { %v663_v62 = vpack.c.b16 %v659_v55, %v658_v52  ;;  %v653_v46 = vunpack.c.l.b16 %v507_v39  ;;  %v235_v52 = vpop.f32.mrf.mxu0  ;;  %v632_v55 = vunpack.c.l.b16 %v490_v51 }
 0x132   :  { %v633_v59 = vunpack.c.l.b16 %v491_v50  ;;  %v236_v58 = vadd.f32 %v12752_v31, %v235_v52 }
 0x133   :  { %10096 = vmatmul.msk.bf16.gmra.mxu3 %vm570_vm0, %v548_v63  ;;  %v686_v25 = vsel %vm570_vm0, %v663_v62, 0  ;;  %v660_v7 = vpack.c.b16 %v653_v46, %v652_v36  ;;  %v634_v63 = vunpack.c.l.b16 %v492_v35 }
 0x134   :  { %692 = vmatpush.bf16.xpose.msra.mxu3 %v686_v25  ;;  %v640_v54 = vpack.c.b16 %v633_v59, %v632_v55  ;;  %v493_v62 = vpack.c.bf16 %v236_v58, %v236_v58 }
 0x135   :  { %v677_v53 = vsel %vm570_vm0, %v660_v7, 0 }
 0x136   :  { %v635_v0 = vunpack.c.l.b16 %v493_v62 }
 0x138   :  { %v641_v1 = vpack.c.b16 %v635_v0, %v634_v63 }
 0x139   :  { %v238_v57 = vpop.f32.mrf.mxu0 }
 0x13a   :  { %v239_v2 = vadd.f32 %v12752_v31, %v238_v57 }
 0x13c   :  { %693 = vmatpush.bf16.xpose.msra.mxu3 %v683_v29  ;;  %v494_v6 = vpack.c.bf16 %v239_v2, %v239_v2 }
 0x13e   :  { %v636_v9 = vunpack.c.l.b16 %v494_v6 }
 0x141   :  { %v240_v12 = vpop.f32.mrf.mxu0 }
 0x142   :  { %v241_v25 = vadd.f32 %v12752_v31, %v240_v12 }
 0x143   :  { %10097 = vmatmul.msk.bf16.gmra.mxu3 %vm570_vm0, %v549_v45 }
 0x144   :  { %694 = vmatpush.bf16.xpose.msra.mxu3 %v680_v19  ;;  %v495_v4 = vpack.c.bf16 %v241_v25, %v241_v25 }
 0x146   :  { %v637_v11 = vunpack.c.l.b16 %v495_v4 }
 0x148   :  { %v642_v13 = vpack.c.b16 %v637_v11, %v636_v9 }
 0x149   :  { %v243_v3 = vpop.f32.mrf.mxu0 }
 0x14a   :  { %v244_v48 = vadd.f32 %v12752_v31, %v243_v3 }
 0x14c   :  { %695 = vmatpush.bf16.xpose.msra.mxu3 %v677_v53  ;;  %v496_v17 = vpack.c.bf16 %v244_v48, %v244_v48  ;;  %v11512_v48 = vld [vmem:[%s17306_s2 + $0x70] sm:$0xff] }
 0x14e   :  { %v638_v20 = vunpack.c.l.b16 %v496_v17 }
 0x151   :  { %v245_v14 = vpop.f32.mrf.mxu0 }
 0x152   :  { %v246_v16 = vadd.f32 %v12752_v31, %v245_v14  ;;  %v11520_v31 = vld [vmem:[%s17304_s9 + $0x70] sm:$0xff] }
 0x153   :  { %10098 = vmatmul.msk.bf16.vlgmr.msra.gmra.mxu3 %vm570_vm0, %v640_v54 }
 0x154   :  { %v497_v18 = vpack.c.bf16 %v246_v16, %v246_v16  ;;  %1297 = vmatpush.bf16.msrb.mxu3 %v11521_v32 }
 0x156   :  { %v639_v21 = vunpack.c.l.b16 %v497_v18  ;;  %v11511_v18 = vld [vmem:[%s17306_s2 + $0x68] sm:$0xff] }
 0x158   :  { %v643_v22 = vpack.c.b16 %v639_v21, %v638_v20  ;;  %1298 = vmatpush.bf16.msrb.mxu3 %v11520_v31  ;;  %v11509_v31 = vld [vmem:[%s17306_s2 + $0x58] sm:$0xff] }
 0x15c   :  { %1299 = vmatpush.bf16.msrb.mxu3 %v11519_v60 }
 0x160   :  { %1300 = vmatpush.bf16.msrb.mxu3 %v11518_v8 }
 0x163   :  { %10099 = vmatmul.msk.bf16.gmra.mxu3 %vm570_vm0, %v641_v1 }
 0x164   :  { %1301 = vmatpush.bf16.msrb.mxu3 %v11517_v34 }
 0x168   :  { %1302 = vmatpush.bf16.msrb.mxu3 %v11516_v37  ;;  %v11508_v37 = vld [vmem:[%s17306_s2 + $0x50] sm:$0xff] }
 0x16c   :  { %1303 = vmatpush.bf16.msrb.mxu3 %v11515_v40 }
 0x170   :  { %1304 = vmatpush.bf16.msrb.mxu3 %v11514_v42 }
 0x173   :  { %10100 = vmatmul.msk.bf16.gmra.mxu3 %vm570_vm0, %v642_v13  ;;  %v11513_v13 = vld [vmem:[%s17306_s2 + $0x78] sm:$0xff] }
 0x174   :  { %1178 = vmatpush.bf16.msrb.mxu2 %v11513_v13 }
 0x178   :  { %1179 = vmatpush.bf16.msrb.mxu2 %v11512_v48 }
 0x17c   :  { %1180 = vmatpush.bf16.msrb.mxu2 %v11511_v18 }
 0x183   :  { %10101 = vmatmul.msk.bf16.gmra.mxu3 %vm570_vm0, %v643_v22  ;;  %v11510_v22 = vld [vmem:[%s17306_s2 + $0x60] sm:$0xff] }
 0x184   :  { %1181 = vmatpush.bf16.msrb.mxu2 %v11510_v22 }
 0x188   :  { %1182 = vmatpush.bf16.msrb.mxu2 %v11509_v31 }
 0x18c   :  { %1183 = vmatpush.bf16.msrb.mxu2 %v11508_v37 }
 0x193   :  { %1305 = vmatmul.bf16.vlgmr.msrb.gmra.mxu3 %v12596_v10 }
 0x196   :  { %v604_v23 = vpop.f32.mrf.mxu3 }
 0x197   :  { %v12861_v7 = vmul.f32 0.17677669, %v604_v23 }
 0x199   :  { %v734_v52 = vsel %vm733_vm1, %v12861_v7, -inf }
 0x19e   :  { %v606_v26 = vpop.f32.mrf.mxu3 }
 0x19f   :  { %v12874_v57 = vmul.f32 0.17677669, %v606_v26 }
 0x1a1   :  { %v737_v35 = vsel %vm733_vm1, %v12874_v57, -inf }
 0x1a3   :  { %1310 = vmatmul.bf16.gmra.mxu3 %v12611_v15 }
 0x1a6   :  { %v12821_v27 = vpop.f32.mrf.mxu3 }
 0x1a7   :  { %v12897_v9 = vmul.f32 0.17677669, %v12821_v27 }
 0x1a9   :  { %v740_v11 = vsel %vm733_vm1, %v12897_v9, -inf }
 0x1ae   :  { %v12823_v28 = vpop.f32.mrf.mxu3 }
 0x1af   :  { %v12928_v8 = vmul.f32 0.17677669, %v12823_v28  ;;  %v11507_v28 = vld [vmem:[%s17306_s2 + $0x48] sm:$0xff] }
 0x1b0   :  { %1184 = vmatpush.bf16.msrb.mxu2 %v11507_v28 }
 0x1b3   :  { %1315 = vmatmul.bf16.gmra.mxu3 %v12638_v24 }
 0x1b6   :  { %v12831_v29 = vpop.f32.mrf.mxu3 }
 0x1be   :  { %v12839_v30 = vpop.f32.mrf.mxu3 }
 0x1c3   :  { %1320 = vmatmul.bf16.gmra.mxu3 %v12666_v33 }
 0x1c6   :  { %v12847_v39 = vpop.f32.mrf.mxu3 }
 0x1ce   :  { %v12855_v43 = vpop.f32.mrf.mxu3 }
 0x1d3   :  { %1325 = vmatmul.bf16.gmra.mxu3 %v12681_v38 }
 0x1d6   :  { %v697_v45 = vpop.f32.mrf.mxu3 }
 0x1d7   :  { %v725_v46 = vmul.f32 0.17677669, %v697_v45 }
 0x1d9   :  { %v758_v19 = vsel %vm733_vm1, %v725_v46, -inf }
 0x1da   :  { %759 = vmax.xlane.f32.xlu0 %v758_v19 }
 0x1de   :  { %v699_v36 = vpop.f32.mrf.mxu3 }
 0x1df   :  { %v726_v49 = vmul.f32 0.17677669, %v699_v36 }
 0x1e1   :  { %v761_v56 = vsel %vm733_vm1, %v726_v49, -inf }
 0x1e2   :  { %762 = vmax.xlane.f32.xlu0 %v761_v56 }
 0x1e3   :  { %1330 = vmatmul.bf16.gmra.mxu3 %v12693_v41 }
 0x1e6   :  { %v702_v51 = vpop.f32.mrf.mxu3 }
 0x1e7   :  { %v12863_v50 = vmul.f32 0.17677669, %v702_v51  ;;  %v11506_v51 = vld [vmem:[%s17306_s2 + $0x40] sm:$0xff] }
 0x1e8   :  { %1185 = vmatpush.bf16.msrb.mxu2 %v11506_v51 }
 0x1e9   :  { %v764_v53 = vsel %vm733_vm1, %v12863_v50, -inf }
 0x1ea   :  { %735 = vmax.xlane.f32.xlu0 %v734_v52  ;;  %765 = vmax.xlane.f32.xlu1 %v764_v53 }
 0x1eb   :  { %1186 = vmatmul.bf16.vlgmr.msrb.gmra.mxu2 %v12596_v10 }
 0x1ee   :  { %v704_v55 = vpop.f32.mrf.mxu3 }
 0x1ef   :  { %v12869_v59 = vmul.f32 0.17677669, %v704_v55 }
 0x1f1   :  { %v767_v54 = vsel %vm733_vm1, %v12869_v59, -inf }
 0x1f2   :  { %768 = vmax.xlane.f32.xlu1 %v767_v54 }
 0x1f3   :  { %1335 = vmatmul.bf16.gmra.mxu3 %v12705_v44 }
 0x1f6   :  { %v707_v61 = vpop.f32.mrf.mxu3 }
 0x1f7   :  { %v12876_v58 = vmul.f32 0.17677669, %v707_v61 }
 0x1f9   :  { %v770_v62 = vsel %vm733_vm1, %v12876_v58, -inf }
 0x1fa   :  { %738 = vmax.xlane.f32.xlu1 %v737_v35  ;;  %771 = vmax.xlane.f32.xlu2 %v770_v62 }
 0x1fb   :  { %1191 = vmatmul.bf16.gmra.mxu2 %v12611_v15 }
 0x1fe   :  { %v709_v63 = vpop.f32.mrf.mxu3 }
 0x1ff   :  { %v12882_v0 = vmul.f32 0.17677669, %v709_v63 }
 0x201   :  { %v773_v12 = vsel %vm733_vm1, %v12882_v0, -inf }
 0x202   :  { %774 = vmax.xlane.f32.xlu2 %v773_v12 }
 0x203   :  { %1340 = vmatmul.bf16.gmra.mxu3 %v12717_v47 }
 0x206   :  { %v712_v1 = vpop.f32.mrf.mxu3 }
 0x207   :  { %v12887_v2 = vmul.f32 0.17677669, %v712_v1 }
 0x209   :  { %v776_v25 = vsel %vm733_vm1, %v12887_v2, -inf }
 0x20a   :  { %777 = vmax.xlane.f32.xlu2 %v776_v25 }
 0x20b   :  { %1196 = vmatmul.bf16.gmra.mxu2 %v12638_v24 }
 0x20e   :  { %v714_v3 = vpop.f32.mrf.mxu3 }
 0x20f   :  { %v12891_v6 = vmul.f32 0.17677669, %v714_v3  ;;  %v12970_v3 = vpop.f32.mrf.mxu2 }
 0x211   :  { %v779_v4 = vsel %vm733_vm1, %v12891_v6, -inf }
 0x212   :  { %780 = vmax.xlane.f32.xlu0 %v779_v4 }
 0x216   :  { %v12913_v20 = vpop.f32.mrf.mxu3 }
 0x217   :  { %v12981_v18 = vpop.f32.mrf.mxu2 }
 0x21a   :  { %741 = vmax.xlane.f32.xlu0 %v740_v11 }
 0x21b   :  { %1201 = vmatmul.bf16.gmra.mxu2 %v12666_v33 }
 0x21e   :  { %v12925_v60 = vpop.f32.mrf.mxu3 }
 0x226   :  { %v12943_v36 = vpop.f32.mrf.mxu3 }
 0x22b   :  { %1206 = vmatmul.bf16.gmra.mxu2 %v12681_v38 }
 0x22e   :  { %v12959_v54 = vpop.f32.mrf.mxu3 }
 0x23b   :  { %1211 = vmatmul.bf16.gmra.mxu2 %v12693_v41 }
 0x24b   :  { %1216 = vmatmul.bf16.gmra.mxu2 %v12705_v44 }
 0x24d   :  { %v760_v14 = vpop.xlane.xlu0 %759 }
 0x24e   :  { %v790_v16 = vsub.f32 %v725_v46, %v760_v14  ;;  %v743_v46 = vsel %vm733_vm1, %v12928_v8, -inf  ;;  %v12975_v14 = vmul.f32 0.17677669, %v12847_v39 }
 0x250   :  { %v814_v17 = vmul.f32 1.442695, %v790_v16 }
 0x252   :  { %11765 = vpow2.f32 %v814_v17 }
 0x255   :  { %v763_v21 = vpop.xlane.xlu0 %762 }
 0x256   :  { %v791_v23 = vsub.f32 %v726_v49, %v763_v21  ;;  %v12946_v49 = vmul.f32 0.17677669, %v12831_v29  ;;  %v752_v21 = vsel %vm733_vm1, %v12975_v14, -inf }
 0x258   :  { %v12918_v26 = vpop.eup %11765  ;;  %v816_v27 = vmul.f32 1.442695, %v791_v23  ;;  %v746_v55 = vsel %vm733_vm1, %v12946_v49, -inf  ;;  %v12989_v23 = vmul.f32 0.17677669, %v12855_v43 }
 0x259   :  { %v854_v32 = vsel %vm733_vm1, %v12918_v26, 0.0 }
 0x25a   :  { %11767 = vpow2.f32 %v816_v27  ;;  %855 = vadd.xlane.f32.xlu1 %v854_v32  ;;  %v755_v43 = vsel %vm733_vm1, %v12989_v23, -inf }
 0x25b   :  { %1221 = vmatmul.bf16.gmra.mxu2 %v12717_v47 }
 0x25d   :  { %v766_v34 = vpop.xlane.xlu1 %765  ;;  %v736_v11 = vpop.xlane.xlu0 %735 }
 0x25e   :  { %v792_v40 = vsub.f32 %v12863_v50, %v766_v34  ;;  %v782_v48 = vsub.f32 %v12861_v7, %v736_v11 }
 0x260   :  { %v12934_v42 = vpop.eup %11767  ;;  %v818_v45 = vmul.f32 1.442695, %v792_v40  ;;  %v798_v39 = vmul.f32 1.442695, %v782_v48  ;;  %v12998_v40 = vpop.f32.mrf.mxu2 }
 0x261   :  { %v857_v19 = vsel %vm733_vm1, %v12934_v42, 0.0 }
 0x262   :  { %744 = vmax.xlane.f32.xlu1 %v743_v46  ;;  %858 = vadd.xlane.f32.xlu2 %v857_v19  ;;  %11769 = vpow2.f32 %v818_v45 }
 0x265   :  { %v769_v56 = vpop.xlane.xlu1 %768 }
 0x266   :  { %v793_v50 = vsub.f32 %v12869_v59, %v769_v56  ;;  %v12962_v59 = vmul.f32 0.17677669, %v12839_v30  ;;  %v1316_v30 = vpop.f32.mrf.mxu3 }
 0x268   :  { %v820_v52 = vmul.f32 1.442695, %v793_v50  ;;  %v12952_v53 = vpop.eup %11769  ;;  %v749_v4 = vsel %vm733_vm1, %v12962_v59, -inf }
 0x269   :  { %v860_v29 = vsel %vm733_vm1, %v12952_v53, 0.0 }
 0x26a   :  { %11771 = vpow2.f32 %v820_v52  ;;  %747 = vmax.xlane.f32.xlu1 %v746_v55  ;;  %861 = vadd.xlane.f32.xlu2 %v860_v29 }
 0x26d   :  { %v772_v61 = vpop.xlane.xlu2 %771  ;;  %v739_v35 = vpop.xlane.xlu1 %738 }
 0x26e   :  { %v794_v62 = vsub.f32 %v12876_v58, %v772_v61  ;;  %v783_v1 = vsub.f32 %v12874_v57, %v739_v35  ;;  %v13019_v61 = vpop.f32.mrf.mxu2 }
 0x270   :  { %v12965_v63 = vpop.eup %11771  ;;  %v822_v12 = vmul.f32 1.442695, %v794_v62  ;;  %v800_v13 = vmul.f32 1.442695, %v783_v1 }
 0x271   :  { %v863_v25 = vsel %vm733_vm1, %v12965_v63, 0.0 }
 0x272   :  { %864 = vadd.xlane.f32.xlu0 %v863_v25  ;;  %11773 = vpow2.f32 %v822_v12  ;;  %750 = vmax.xlane.f32.xlu2 %v749_v4 }
 0x273   :  { %11775 = vpow2.f32 %v800_v13 }
 0x275   :  { %v775_v58 = vpop.xlane.xlu2 %774 }
 0x276   :  { %v795_v57 = vsub.f32 %v12882_v0, %v775_v58  ;;  %v1318_v0 = vpop.f32.mrf.mxu3 }
 0x278   :  { %v824_v16 = vmul.f32 1.442695, %v795_v57  ;;  %v12979_v17 = vpop.eup %11773 }
 0x279   :  { %v866_v22 = vsel %vm733_vm1, %v12979_v17, 0.0  ;;  %v12992_v32 = vpop.eup %11775 }
 0x27a   :  { %11777 = vpow2.f32 %v824_v16  ;;  %753 = vmax.xlane.f32.xlu2 %v752_v21  ;;  %867 = vadd.xlane.f32.xlu0 %v866_v22  ;;  %v833_v45 = vsel %vm733_vm1, %v12992_v32, 0.0  ;;  %v452_v22 = vpop.f32.mrf.mxu2 }
 0x27b   :  { %11779 = vpow2.f32 %v798_v39 }
 0x27d   :  { %v778_v7 = vpop.xlane.xlu2 %777 }
 0x27e   :  { %v796_v27 = vsub.f32 %v12887_v2, %v778_v7  ;;  %v13007_v2 = vld [vmem:[%s17308_s5 + $0x1] ss:$0 sm:$0xff]  ;;  %v1321_v46 = vpop.f32.mrf.mxu3 }
 0x27f   :  { %v1322_v51 = vadd.f32 %v13007_v2, %v1321_v46  ;;  %v1319_v35 = vadd.f32 %v13007_v2, %v1318_v0  ;;  %v1312_v39 = vadd.f32 %v13007_v2, %v12943_v36 }
 0x280   :  { %v12994_v31 = vpop.eup %11777  ;;  %v826_v34 = vmul.f32 1.442695, %v796_v27 }
 0x281   :  { %v869_v37 = vsel %vm733_vm1, %v12994_v31, 0.0  ;;  %v13009_v28 = vpop.eup %11779  ;;  %v1487_v62 = vpack.c.bf16 %v1322_v51, %v1322_v51  ;;  %v1486_v13 = vpack.c.bf16 %v1319_v35, %v1319_v35  ;;  %v1309_v35 = vadd.f32 %v13007_v2, %v12925_v60 }
 0x282   :  { %11781 = vpow2.f32 %v826_v34  ;;  %870 = vadd.xlane.f32.xlu1 %v869_v37  ;;  %834 = vadd.xlane.f32.xlu2 %v833_v45  ;;  %v830_v55 = vsel %vm733_vm1, %v13009_v28, 0.0  ;;  %v1483_v45 = vpack.c.bf16 %v1312_v39, %v1312_v39  ;;  %v450_v39 = vadd.f32 %v12770_v5, %v13019_v61 }
 0x283   :  { %756 = vmax.xlane.f32.xlu0 %v755_v43  ;;  %v1547_v58 = vunpack.c.l.b16 %v1487_v62  ;;  %v1546_v7 = vunpack.c.l.b16 %v1486_v13  ;;  %v453_v13 = vadd.f32 %v12770_v5, %v452_v22 }
 0x285   :  { %v781_v19 = vpop.xlane.xlu0 %780 }
 0x286   :  { %v797_v56 = vsub.f32 %v12891_v6, %v781_v19  ;;  %v1317_v6 = vadd.f32 %v13007_v2, %v1316_v30  ;;  %v1323_v12 = vpop.f32.mrf.mxu3 }
 0x287   :  { %v1324_v25 = vadd.f32 %v13007_v2, %v1323_v12 }
 0x288   :  { %v13013_v50 = vpop.eup %11781  ;;  %v828_v52 = vmul.f32 1.442695, %v797_v56  ;;  %v1485_v11 = vpack.c.bf16 %v1317_v6, %v1317_v6  ;;  %v454_v56 = vpop.f32.mrf.mxu2  ;;  %v1307_v6 = vadd.f32 %v13007_v2, %v12913_v20 }
 0x289   :  { %v872_v29 = vsel %vm733_vm1, %v13013_v50, 0.0  ;;  %v1488_v57 = vpack.c.bf16 %v1324_v25, %v1324_v25  ;;  %v1482_v25 = vpack.c.bf16 %v1309_v35, %v1309_v35 }
 0x28a   :  { %11783 = vpow2.f32 %v828_v52  ;;  %831 = vadd.xlane.f32.xlu1 %v830_v55  ;;  %v1545_v0 = vunpack.c.l.b16 %v1485_v11 }
 0x28b   :  { %873 = vadd.xlane.f32.xlu0 %v872_v29  ;;  %v1548_v30 = vunpack.c.l.b16 %v1488_v57  ;;  %v1542_v57 = vunpack.c.l.b16 %v1482_v25 }
 0x28c   :  { %v1551_v46 = vpack.c.b16 %v1546_v7, %v1545_v0 }
 0x28d   :  { %v742_v1 = vpop.xlane.xlu0 %741  ;;  %v1552_v27 = vpack.c.b16 %v1548_v30, %v1547_v58  ;;  %v448_v30 = vadd.f32 %v12770_v5, %v12998_v40 }
 0x28e   :  { %v784_v4 = vsub.f32 %v12897_v9, %v742_v1  ;;  %v1314_v9 = vadd.f32 %v13007_v2, %v12959_v54  ;;  %v13034_v34 = vpop.f32.mrf.mxu3  ;;  %v1543_v54 = vunpack.c.l.b16 %v1483_v45  ;;  %v1572_v52 = vsel %vm570_vm0, %v1551_v46, 0 }
 0x28f   :  { %v1575_v37 = vsel %vm570_vm0, %v1552_v27, 0  ;;  %v1481_v1 = vpack.c.bf16 %v1307_v6, %v1307_v6  ;;  %v443_v46 = vadd.f32 %v12770_v5, %v12970_v3  ;;  %v516_v40 = vpack.c.bf16 %v448_v30, %v448_v30 }
 0x290   :  { %v13026_v48 = vpop.eup %11783  ;;  %v802_v16 = vmul.f32 1.442695, %v784_v4  ;;  %1581 = vmatpush.bf16.xpose.msra.mxu1 %v1575_v37  ;;  %v1484_v43 = vpack.c.bf16 %v1314_v9, %v1314_v9  ;;  %v457_v62 = vpop.f32.mrf.mxu2  ;;  %v518_v9 = vpack.c.bf16 %v453_v13, %v453_v13 }
 0x291   :  { %v875_v21 = vsel %vm733_vm1, %v13026_v48, 0.0  ;;  %v458_v4 = vadd.f32 %v12770_v5, %v457_v62  ;;  %v1541_v58 = vunpack.c.l.b16 %v1481_v1  ;;  %v956_v6 = vunpack.c.l.b16 %v516_v40 }
 0x292   :  { %11785 = vpow2.f32 %v802_v16  ;;  %876 = vadd.xlane.f32.xlu1 %v875_v21  ;;  %v1544_v51 = vunpack.c.l.b16 %v1484_v43  ;;  %v455_v16 = vadd.f32 %v12770_v5, %v454_v56  ;;  %v517_v56 = vpack.c.bf16 %v450_v39, %v450_v39 }
 0x293   :  { %v520_v20 = vpack.c.bf16 %v458_v4, %v458_v4  ;;  %v1549_v37 = vpack.c.b16 %v1542_v57, %v1541_v58  ;;  %v958_v61 = vunpack.c.l.b16 %v518_v9 }
 0x294   :  { %v1550_v29 = vpack.c.b16 %v1544_v51, %v1543_v54  ;;  %v519_v0 = vpack.c.bf16 %v455_v16, %v455_v16  ;;  %v957_v35 = vunpack.c.l.b16 %v517_v56 }
 0x295   :  { %v960_v7 = vunpack.c.l.b16 %v520_v20  ;;  %v1566_v43 = vsel %vm570_vm0, %v1549_v37, 0 }
 0x296   :  { %v13043_v55 = vpop.f32.mrf.mxu3  ;;  %v1569_v12 = vsel %vm570_vm0, %v1550_v29, 0  ;;  %v959_v54 = vunpack.c.l.b16 %v519_v0  ;;  %v963_v3 = vpack.c.b16 %v957_v35, %v956_v6 }
 0x298   :  { %v13037_v19 = vpop.eup %11785  ;;  %1582 = vmatpush.bf16.xpose.msra.mxu1 %v1572_v52  ;;  %v459_v21 = vpop.f32.mrf.mxu2  ;;  %v514_v52 = vpack.c.bf16 %v443_v46, %v443_v46  ;;  %v964_v62 = vpack.c.b16 %v959_v54, %v958_v61 }
 0x299   :  { %v836_v36 = vsel %vm733_vm1, %v13037_v19, 0.0  ;;  %v460_v60 = vadd.f32 %v12770_v5, %v459_v21 }
 0x29a   :  { %837 = vadd.xlane.f32.xlu2 %v836_v36  ;;  %v445_v36 = vadd.f32 %v12770_v5, %v12981_v18  ;;  %v954_v1 = vunpack.c.l.b16 %v514_v52 }
 0x29b   :  { %v521_v22 = vpack.c.bf16 %v460_v60, %v460_v60 }
 0x29c   :  { %v515_v29 = vpack.c.bf16 %v445_v36, %v445_v36 }
 0x29d   :  { %v961_v45 = vunpack.c.l.b16 %v521_v22 }
 0x29e   :  { %v13051_v11 = vpop.f32.mrf.mxu3  ;;  %v955_v25 = vunpack.c.l.b16 %v515_v29 }
 0x29f   :  { %v965_v51 = vpack.c.b16 %v961_v45, %v960_v7 }
 0x2a0   :  { %1583 = vmatpush.bf16.xpose.msra.mxu1 %v1569_v12  ;;  %v962_v5 = vpack.c.b16 %v955_v25, %v954_v1 }
 0x2a1   :  { %986 = vmatpush.bf16.msrb.mxu0 %v965_v51 }
 0x2a5   :  { %987 = vmatpush.bf16.msrb.mxu0 %v964_v62 }
 0x2a6   :  { %v13061_v27 = vpop.f32.mrf.mxu3 }
 0x2a8   :  { %1584 = vmatpush.bf16.xpose.msra.mxu1 %v1566_v43 }
 0x2a9   :  { %988 = vmatpush.bf16.msrb.mxu0 %v963_v3 }
 0x2ad   :  { %989 = vmatpush.bf16.msrb.mxu0 %v962_v5 }
 0x2ae   :  { %v1336_v12 = vpop.f32.mrf.mxu3 }
 0x2af   :  { %v1337_v22 = vadd.f32 %v13007_v2, %v1336_v12 }
 0x2b1   :  { %v1493_v54 = vpack.c.bf16 %v1337_v22, %v1337_v22 }
 0x2b3   :  { %v1638_v1 = vunpack.c.l.b16 %v1493_v54 }
 0x2b6   :  { %v1338_v18 = vpop.f32.mrf.mxu3 }
 0x2b7   :  { %v1339_v37 = vadd.f32 %v13007_v2, %v1338_v18 }
 0x2be   :  { %v1341_v4 = vpop.f32.mrf.mxu3 }
 0x2bf   :  { %v1342_v57 = vadd.f32 %v13007_v2, %v1341_v4 }
 0x2c1   :  { %v1495_v39 = vpack.c.bf16 %v1342_v57, %v1342_v57 }
 0x2c3   :  { %v1640_v45 = vunpack.c.l.b16 %v1495_v39  ;;  %v1329_v39 = vadd.f32 %v13007_v2, %v13043_v55 }
 0x2c6   :  { %v1343_v58 = vpop.f32.mrf.mxu3 }
 0x2c7   :  { %v1344_v16 = vadd.f32 %v13007_v2, %v1343_v58 }
 0x2c9   :  { %v1496_v9 = vpack.c.bf16 %v1344_v16, %v1344_v16 }
 0x2cb   :  { %v1641_v43 = vunpack.c.l.b16 %v1496_v9 }
 0x2cd   :  { %v856_v13 = vpop.xlane.xlu1 %855  ;;  %v1645_v52 = vpack.c.b16 %v1641_v43, %v1640_v45  ;;  %v13101_v45 = vpop.f32.mrf.mxu2 }
 0x2ce   :  { %11787 = vrcp.f32 %v856_v13 }
 0x2cf   :  { %v1668_v5 = vsel %vm570_vm0, %v1645_v52, 0 }
 0x2d4   :  { %v11788_v60 = vpop.eup %11787 }
 0x2d5   :  { %v745_v20 = vpop.xlane.xlu1 %744  ;;  %v859_v21 = vpop.xlane.xlu2 %858  ;;  %v902_v7 = vmul.f32 %v11788_v60, %v12918_v26  ;;  %v1494_v26 = vpack.c.bf16 %v1339_v37, %v1339_v37 }
 0x2d6   :  { %v785_v30 = vsub.f32 %v12928_v8, %v745_v20  ;;  %11789 = vrcp.f32 %v859_v21 }
 0x2d7   :  { %v918_v36 = vpack.c.bf16 %v902_v7, %v902_v7  ;;  %v1639_v25 = vunpack.c.l.b16 %v1494_v26 }
 0x2d8   :  { %v804_v0 = vmul.f32 1.442695, %v785_v30  ;;  %v1327_v30 = vadd.f32 %v13007_v2, %v13034_v34  ;;  %v1490_v34 = vpack.c.bf16 %v1329_v39, %v1329_v39 }
 0x2d9   :  { %v1019_v62 = vunpack.c.l.b16 %v918_v36  ;;  %v1644_v16 = vpack.c.b16 %v1639_v25, %v1638_v1 }
 0x2da   :  { %11791 = vpow2.f32 %v804_v0  ;;  %v1489_v43 = vpack.c.bf16 %v1327_v30, %v1327_v30 }
 0x2dc   :  { %v11790_v46 = vpop.eup %11789  ;;  %v1634_v54 = vunpack.c.l.b16 %v1489_v43 }
 0x2dd   :  { %v903_v40 = vmul.f32 %v11790_v46, %v12934_v42  ;;  %v748_v8 = vpop.xlane.xlu1 %747  ;;  %v862_v61 = vpop.xlane.xlu2 %861  ;;  %v1332_v42 = vadd.f32 %v13007_v2, %v13051_v11 }
 0x2de   :  { %v786_v56 = vsub.f32 %v12946_v49, %v748_v8  ;;  %11793 = vrcp.f32 %v862_v61  ;;  %v1334_v49 = vadd.f32 %v13007_v2, %v13061_v27 }
 0x2df   :  { %v919_v51 = vpack.c.bf16 %v903_v40, %v903_v40  ;;  %v1491_v58 = vpack.c.bf16 %v1332_v42, %v1332_v42 }
 0x2e0   :  { %v13079_v29 = vpop.eup %11791  ;;  %v806_v6 = vmul.f32 1.442695, %v786_v56  ;;  %v1492_v57 = vpack.c.bf16 %v1334_v49, %v1334_v49  ;;  %v1189_v49 = vpop.f32.mrf.mxu2 }
 0x2e1   :  { %v839_v35 = vsel %vm733_vm1, %v13079_v29, 0.0  ;;  %v1020_v12 = vunpack.c.l.b16 %v919_v51  ;;  %v1636_v9 = vunpack.c.l.b16 %v1491_v58  ;;  %v1635_v51 = vunpack.c.l.b16 %v1490_v34 }
 0x2e2   :  { %11795 = vpow2.f32 %v806_v6  ;;  %840 = vadd.xlane.f32.xlu0 %v839_v35  ;;  %v1637_v0 = vunpack.c.l.b16 %v1492_v57 }
 0x2e3   :  { %v1027_v3 = vpack.c.b16 %v1020_v12, %v1019_v62  ;;  %v1642_v42 = vpack.c.b16 %v1635_v51, %v1634_v54 }
 0x2e4   :  { %v11794_v4 = vpop.eup %11793  ;;  %v1643_v55 = vpack.c.b16 %v1637_v0, %v1636_v9 }
 0x2e5   :  { %10106 = vmatmul.msk.bf16.vlgmr.msrb.gmra.mxu1 %vm733_vm1, %v1027_v3  ;;  %v865_v18 = vpop.xlane.xlu0 %864  ;;  %v751_v13 = vpop.xlane.xlu2 %750  ;;  %v904_v60 = vmul.f32 %v11794_v4, %v12952_v53 }
 0x2e6   :  { %11797 = vrcp.f32 %v865_v18  ;;  %1674 = vmatpush.bf16.xpose.msrb.mxu1 %v1668_v5  ;;  %v787_v11 = vsub.f32 %v12962_v59, %v751_v13  ;;  %v1665_v59 = vsel %vm570_vm0, %v1644_v16, 0  ;;  %v1662_v52 = vsel %vm570_vm0, %v1643_v55, 0 }
 0x2e7   :  { %v920_v37 = vpack.c.bf16 %v904_v60, %v904_v60  ;;  %v1659_v18 = vsel %vm570_vm0, %v1642_v42, 0 }
 0x2e8   :  { %v13090_v27 = vpop.eup %11795  ;;  %v808_v20 = vmul.f32 1.442695, %v787_v11  ;;  %v1192_v39 = vpop.f32.mrf.mxu2 }
 0x2e9   :  { %v842_v21 = vsel %vm733_vm1, %v13090_v27, 0.0  ;;  %v1021_v56 = vunpack.c.l.b16 %v920_v37 }
 0x2ea   :  { %843 = vadd.xlane.f32.xlu1 %v842_v21  ;;  %11799 = vpow2.f32 %v808_v20 }
 0x2ec   :  { %v11798_v7 = vpop.eup %11797 }
 0x2ed   :  { %v905_v22 = vmul.f32 %v11798_v7, %v12965_v63  ;;  %v754_v53 = vpop.xlane.xlu2 %753  ;;  %v868_v46 = vpop.xlane.xlu0 %867 }
 0x2ee   :  { %1675 = vmatpush.bf16.xpose.msrb.mxu1 %v1665_v59  ;;  %v788_v36 = vsub.f32 %v12975_v14, %v754_v53  ;;  %11801 = vrcp.f32 %v868_v46 }
 0x2ef   :  { %v921_v2 = vpack.c.bf16 %v905_v22, %v905_v22 }
 0x2f0   :  { %v13104_v40 = vpop.eup %11799  ;;  %v810_v8 = vmul.f32 1.442695, %v788_v36  ;;  %v1194_v36 = vpop.f32.mrf.mxu2 }
 0x2f1   :  { %v1022_v61 = vunpack.c.l.b16 %v921_v2  ;;  %v845_v63 = vsel %vm733_vm1, %v13104_v40, 0.0 }
 0x2f2   :  { %11803 = vpow2.f32 %v810_v8  ;;  %846 = vadd.xlane.f32.xlu2 %v845_v63 }
 0x2f3   :  { %v1028_v26 = vpack.c.b16 %v1022_v61, %v1021_v56  ;;  %v13131_v61 = vld [vmem:[%s17309_s10 + $0x1] ss:$0 sm:$0xff] }
 0x2f4   :  { %v11802_v14 = vpop.eup %11801  ;;  %v1188_v63 = vadd.f32 %v13131_v61, %v13101_v45  ;;  %v1190_v51 = vadd.f32 %v13131_v61, %v1189_v49 }
 0x2f5   :  { %v871_v6 = vpop.xlane.xlu1 %870  ;;  %10107 = vmatmul.msk.bf16.gmra.mxu1 %vm733_vm1, %v1028_v26  ;;  %v835_v35 = vpop.xlane.xlu2 %834  ;;  %v906_v3 = vmul.f32 %v11802_v14, %v12979_v17 }
 0x2f6   :  { %11805 = vrcp.f32 %v871_v6  ;;  %v757_v62 = vpop.xlane.xlu0 %756  ;;  %1676 = vmatpush.bf16.xpose.msrb.mxu1 %v1662_v52  ;;  %v1465_v26 = vpack.c.bf16 %v1188_v63, %v1188_v63 }
 0x2f7   :  { %v789_v12 = vsub.f32 %v12989_v23, %v757_v62  ;;  %11807 = vrcp.f32 %v835_v35  ;;  %v922_v23 = vpack.c.bf16 %v906_v3, %v906_v3  ;;  %v1193_v62 = vadd.f32 %v13131_v61, %v1192_v39 }
 0x2f8   :  { %v13111_v1 = vpop.eup %11803  ;;  %v1521_v52 = vunpack.c.l.b16 %v1465_v26 }
 0x2f9   :  { %v812_v25 = vmul.f32 1.442695, %v789_v12  ;;  %v848_v5 = vsel %vm733_vm1, %v13111_v1, 0.0  ;;  %v1023_v21 = vunpack.c.l.b16 %v922_v23  ;;  %v1195_v12 = vadd.f32 %v13131_v61, %v1194_v36 }
 0x2fa   :  { %849 = vadd.xlane.f32.xlu0 %v848_v5 }
 0x2fb   :  { %11809 = vpow2.f32 %v812_v25  ;;  %v1467_v25 = vpack.c.bf16 %v1193_v62, %v1193_v62  ;;  %v1468_v3 = vpack.c.bf16 %v1195_v12, %v1195_v12 }
 0x2fc   :  { %v11806_v4 = vpop.eup %11805 }
 0x2fd   :  { %v832_v13 = vpop.xlane.xlu1 %831  ;;  %v907_v58 = vmul.f32 %v11806_v4, %v12994_v31  ;;  %v11808_v57 = vpop.eup %11807  ;;  %v1523_v5 = vunpack.c.l.b16 %v1467_v25 }
 0x2fe   :  { %11811 = vrcp.f32 %v832_v13  ;;  %v874_v11 = vpop.xlane.xlu0 %873  ;;  %1677 = vmatpush.bf16.xpose.msrb.mxu1 %v1659_v18  ;;  %v895_v17 = vmul.f32 %v11808_v57, %v12992_v32  ;;  %v1524_v18 = vunpack.c.l.b16 %v1468_v3 }
 0x2ff   :  { %v923_v16 = vpack.c.bf16 %v907_v58, %v907_v58  ;;  %11813 = vrcp.f32 %v874_v11 }
 0x300   :  { %v911_v0 = vpack.c.bf16 %v895_v17, %v895_v17  ;;  %v1530_v45 = vpack.c.b16 %v1524_v18, %v1523_v5 }
 0x301   :  { %v13118_v20 = vpop.eup %11809  ;;  %v1024_v60 = vunpack.c.l.b16 %v923_v16 }
 0x302   :  { %v851_v30 = vsel %vm733_vm1, %v13118_v20, 0.0  ;;  %v935_v32 = vunpack.c.l.b16 %v911_v0 }
 0x303   :  { %852 = vadd.xlane.f32.xlu1 %v851_v30  ;;  %v1029_v9 = vpack.c.b16 %v1024_v60, %v1023_v21 }
 0x304   :  { %v11812_v31 = vpop.eup %11811 }
 0x305   :  { %v894_v59 = vmul.f32 %v11812_v31, %v13009_v28  ;;  %v877_v7 = vpop.xlane.xlu1 %876  ;;  %10108 = vmatmul.msk.bf16.gmra.mxu1 %vm733_vm1, %v1029_v9  ;;  %v11814_v22 = vpop.eup %11813 }
 0x306   :  { %11815 = vrcp.f32 %v877_v7  ;;  %v908_v53 = vmul.f32 %v11814_v22, %v13013_v50  ;;  %v1197_v50 = vpop.f32.mrf.mxu2 }
 0x307   :  { %v910_v37 = vpack.c.bf16 %v894_v59, %v894_v59  ;;  %v1198_v49 = vadd.f32 %v13131_v61, %v1197_v50  ;;  %v11527_v50 = vld [vmem:[%s17307_s11 + $0x68] sm:$0xff] }
 0x308   :  { %v924_v55 = vpack.c.bf16 %v908_v53, %v908_v53 }
 0x309   :  { %v934_v43 = vunpack.c.l.b16 %v910_v37  ;;  %v1469_v58 = vpack.c.bf16 %v1198_v49, %v1198_v49 }
 0x30a   :  { %v1025_v28 = vunpack.c.l.b16 %v924_v55  ;;  %v11528_v55 = vld [vmem:[%s17307_s11 + $0x70] sm:$0xff] }
 0x30b   :  { %v942_v46 = vpack.c.b16 %v935_v32, %v934_v43  ;;  %v1525_v11 = vunpack.c.l.b16 %v1469_v58  ;;  %v11524_v58 = vld [vmem:[%s17307_s11 + $0x50] sm:$0xff] }
 0x30c   :  { %v11816_v34 = vpop.eup %11815 }
 0x30d   :  { %10102 = vmatmul.msk.bf16.vlgmr.msrb.gmra.mxu0 %vm733_vm1, %v942_v46  ;;  %v909_v2 = vmul.f32 %v11816_v34, %v13026_v48  ;;  %v1466_v48 = vpack.c.bf16 %v1190_v51, %v1190_v51  ;;  %v838_v31 = vpop.xlane.xlu2 %837  ;;  %v11529_v46 = vld [vmem:[%s17307_s11 + $0x78] sm:$0xff] }
 0x30e   :  { %v1199_v14 = vpop.f32.mrf.mxu2  ;;  %11817 = vrcp.f32 %v838_v31  ;;  %1416 = vmatpush.bf16.msra.mxu0 %v11529_v46 }
 0x30f   :  { %v925_v8 = vpack.c.bf16 %v909_v2, %v909_v2  ;;  %v1522_v6 = vunpack.c.l.b16 %v1466_v48  ;;  %v1200_v13 = vadd.f32 %v13131_v61, %v1199_v14 }
 0x311   :  { %v1026_v56 = vunpack.c.l.b16 %v925_v8  ;;  %v1529_v35 = vpack.c.b16 %v1522_v6, %v1521_v52  ;;  %v1470_v23 = vpack.c.bf16 %v1200_v13, %v1200_v13 }
 0x312   :  { %1417 = vmatpush.bf16.msra.mxu0 %v11528_v55 }
 0x313   :  { %v1030_v54 = vpack.c.b16 %v1026_v56, %v1025_v28  ;;  %v1526_v16 = vunpack.c.l.b16 %v1470_v23 }
 0x314   :  { %v11818_v43 = vpop.eup %11817 }
 0x315   :  { %10109 = vmatmul.msk.bf16.gmra.mxu1 %vm733_vm1, %v1030_v54  ;;  %v1531_v17 = vpack.c.b16 %v1526_v16, %v1525_v11  ;;  %v896_v34 = vmul.f32 %v11818_v43, %v13037_v19 }
 0x316   :  { %v1202_v42 = vpop.f32.mrf.mxu2  ;;  %1418 = vmatpush.bf16.msra.mxu0 %v11527_v50 }
 0x317   :  { %v1203_v21 = vadd.f32 %v13131_v61, %v1202_v42  ;;  %v912_v54 = vpack.c.bf16 %v896_v34, %v896_v34  ;;  %v11525_v42 = vld [vmem:[%s17307_s11 + $0x58] sm:$0xff] }
 0x319   :  { %v1471_v39 = vpack.c.bf16 %v1203_v21, %v1203_v21  ;;  %v936_v48 = vunpack.c.l.b16 %v912_v54 }
 0x31b   :  { %v1527_v0 = vunpack.c.l.b16 %v1471_v39 }
 0x31e   :  { %v1204_v4 = vpop.f32.mrf.mxu2 }
 0x31f   :  { %v1205_v60 = vadd.f32 %v13131_v61, %v1204_v4 }
 0x321   :  { %v1472_v9 = vpack.c.bf16 %v1205_v60, %v1205_v60 }
 0x323   :  { %v1528_v59 = vunpack.c.l.b16 %v1472_v9 }
 0x325   :  { %10257 = vmatmul.msk.bf16.vlgmr.msra.gmra.mxu1 %vm570_vm0, %v1529_v35  ;;  %v1532_v22 = vpack.c.b16 %v1528_v59, %v1527_v0 }
 0x326   :  { %v1207_v57 = vpop.f32.mrf.mxu2 }
 0x327   :  { %v1208_v32 = vadd.f32 %v13131_v61, %v1207_v57 }
 0x329   :  { %v1473_v36 = vpack.c.bf16 %v1208_v32, %v1208_v32 }
 0x32b   :  { %v1614_v51 = vunpack.c.l.b16 %v1473_v36 }
 0x32e   :  { %v1209_v30 = vpop.f32.mrf.mxu2 }
 0x32f   :  { %v1210_v53 = vadd.f32 %v13131_v61, %v1209_v30 }
 0x331   :  { %v1474_v2 = vpack.c.bf16 %v1210_v53, %v1210_v53 }
 0x333   :  { %v1615_v19 = vunpack.c.l.b16 %v1474_v2  ;;  %v11505_v2 = vld [vmem:[%s17311_s0 + $0x8] sm:$0xff] }
 0x334   :  { %2217 = vmatpush.bf16.msra.mxu1 %v11505_v2 }
 0x335   :  { %10258 = vmatmul.msk.bf16.gmra.mxu1 %vm570_vm0, %v1530_v45  ;;  %v1622_v14 = vpack.c.b16 %v1615_v19, %v1614_v51 }
 0x336   :  { %v1212_v7 = vpop.f32.mrf.mxu2 }
 0x337   :  { %v1213_v3 = vadd.f32 %v13131_v61, %v1212_v7 }
 0x339   :  { %v1475_v4 = vpack.c.bf16 %v1213_v3, %v1213_v3 }
 0x33e   :  { %v1214_v28 = vpop.f32.mrf.mxu2 }
 0x33f   :  { %v1215_v5 = vadd.f32 %v13131_v61, %v1214_v28 }
 0x341   :  { %v1476_v49 = vpack.c.bf16 %v1215_v5, %v1215_v5 }
 0x343   :  { %v1617_v21 = vunpack.c.l.b16 %v1476_v49 }
 0x345   :  { %10259 = vmatmul.msk.bf16.gmra.mxu1 %vm570_vm0, %v1531_v17  ;;  %v1616_v17 = vunpack.c.l.b16 %v1475_v4 }
 0x346   :  { %v1217_v12 = vpop.f32.mrf.mxu2 }
 0x347   :  { %v1623_v0 = vpack.c.b16 %v1617_v21, %v1616_v17 }
 0x34e   :  { %v1219_v60 = vpop.f32.mrf.mxu2 }
 0x34f   :  { %v1220_v43 = vadd.f32 %v13131_v61, %v1219_v60 }
 0x351   :  { %v1478_v36 = vpack.c.bf16 %v1220_v43, %v1220_v43 }
 0x353   :  { %v1619_v54 = vunpack.c.l.b16 %v1478_v36 }
 0x355   :  { %10260 = vmatmul.msk.bf16.gmra.mxu1 %vm570_vm0, %v1532_v22  ;;  %v841_v37 = vpop.xlane.xlu0 %840 }
 0x356   :  { %11819 = vrcp.f32 %v841_v37  ;;  %v1218_v37 = vadd.f32 %v13131_v61, %v1217_v12  ;;  %v1222_v53 = vpop.f32.mrf.mxu2 }
 0x358   :  { %v1477_v34 = vpack.c.bf16 %v1218_v37, %v1218_v37 }
 0x35c   :  { %v11820_v8 = vpop.eup %11819 }
 0x35d   :  { %v897_v56 = vmul.f32 %v11820_v8, %v13079_v29  ;;  %v844_v63 = vpop.xlane.xlu1 %843  ;;  %v11526_v29 = vld [vmem:[%s17307_s11 + $0x60] sm:$0xff] }
 0x35e   :  { %11821 = vrcp.f32 %v844_v63  ;;  %1419 = vmatpush.bf16.msra.mxu0 %v11526_v29  ;;  %v11504_v63 = vld [vmem:[%s17311_s0] sm:$0xff] }
 0x35f   :  { %v913_v26 = vpack.c.bf16 %v897_v56, %v897_v56  ;;  %v1618_v56 = vunpack.c.l.b16 %v1477_v34  ;;  %2218 = vmatpush.bf16.msra.mxu1 %v11504_v63 }
 0x361   :  { %v937_v52 = vunpack.c.l.b16 %v913_v26  ;;  %v1624_v26 = vpack.c.b16 %v1619_v54, %v1618_v56 }
 0x362   :  { %v13160_v6 = vpop.f32.mrf.mxu1  ;;  %1420 = vmatpush.bf16.msra.mxu0 %v11525_v42 }
 0x363   :  { %v943_v35 = vpack.c.b16 %v937_v52, %v936_v48  ;;  %v1224_v48 = vpop.f32.mrf.mxu2 }
 0x364   :  { %v11822_v25 = vpop.eup %11821  ;;  %v1225_v29 = vadd.f32 %v13131_v61, %v1224_v48 }
 0x365   :  { %10103 = vmatmul.msk.bf16.gmra.mxu0 %vm733_vm1, %v943_v35  ;;  %10261 = vmatmul.msk.bf16.vlgmr.msrb.gmra.mxu1 %vm570_vm0, %v1622_v14  ;;  %v847_v62 = vpop.xlane.xlu2 %846  ;;  %v898_v45 = vmul.f32 %v11822_v25, %v13090_v27  ;;  %v11523_v27 = vld [vmem:[%s17307_s11 + $0x48] sm:$0xff] }
 0x366   :  { %11823 = vrcp.f32 %v847_v62  ;;  %1421 = vmatpush.bf16.msra.mxu0 %v11524_v58  ;;  %v1480_v62 = vpack.c.bf16 %v1225_v29, %v1225_v29 }
 0x367   :  { %v914_v16 = vpack.c.bf16 %v898_v45, %v898_v45 }
 0x368   :  { %v1621_v42 = vunpack.c.l.b16 %v1480_v62 }
 0x369   :  { %v938_v9 = vunpack.c.l.b16 %v914_v16 }
 0x36a   :  { %v13172_v18 = vpop.f32.mrf.mxu1  ;;  %1422 = vmatpush.bf16.msra.mxu0 %v11523_v27 }
 0x36b   :  { %v1100_v13 = vpack.c.bf16 %v13172_v18, %v13160_v6  ;;  %v13294_v18 = vld [vmem:[%s17310_s7 + $0x1] ss:$0 sm:$0xff] }
 0x36c   :  { %v11824_v23 = vpop.eup %11823 }
 0x36d   :  { %v850_v57 = vpop.xlane.xlu0 %849  ;;  %v899_v11 = vmul.f32 %v11824_v23, %v13104_v40  ;;  %v11522_v40 = vld [vmem:[%s17307_s11 + $0x40] sm:$0xff] }
 0x36e   :  { %11825 = vrcp.f32 %v850_v57  ;;  %1423 = vmatpush.bf16.msra.mxu0 %v11522_v40 }
 0x36f   :  { %v915_v30 = vpack.c.bf16 %v899_v11, %v899_v11 }
 0x371   :  { %v939_v31 = vunpack.c.l.b16 %v915_v30 }
 0x372   :  { %v13184_v39 = vpop.f32.mrf.mxu1 }
 0x373   :  { %v944_v59 = vpack.c.b16 %v939_v31, %v938_v9 }
 0x374   :  { %v11826_v22 = vpop.eup %11825 }
 0x375   :  { %10262 = vmatmul.msk.bf16.gmra.mxu1 %vm570_vm0, %v1623_v0  ;;  %10104 = vmatmul.msk.bf16.gmra.mxu0 %vm733_vm1, %v944_v59  ;;  %v900_v46 = vmul.f32 %v11826_v22, %v13111_v1 }
 0x376   :  { %v853_v7 = vpop.xlane.xlu1 %852 }
 0x377   :  { %11827 = vrcp.f32 %v853_v7  ;;  %v916_v28 = vpack.c.bf16 %v900_v46, %v900_v46 }
 0x379   :  { %v940_v1 = vunpack.c.l.b16 %v916_v28 }
 0x37a   :  { %v13193_v32 = vpop.f32.mrf.mxu1 }
 0x37d   :  { %v11828_v55 = vpop.eup %11827 }
 0x37e   :  { %v901_v8 = vmul.f32 %v11828_v55, %v13118_v20  ;;  %v1223_v20 = vadd.f32 %v13131_v61, %v1222_v53 }
 0x380   :  { %v917_v50 = vpack.c.bf16 %v901_v8, %v901_v8  ;;  %v1479_v35 = vpack.c.bf16 %v1223_v20, %v1223_v20 }
 0x382   :  { %v13203_v51 = vpop.f32.mrf.mxu1  ;;  %v941_v19 = vunpack.c.l.b16 %v917_v50  ;;  %v1620_v12 = vunpack.c.l.b16 %v1479_v35 }
 0x384   :  { %v945_v52 = vpack.c.b16 %v941_v19, %v940_v1  ;;  %v1625_v3 = vpack.c.b16 %v1621_v42, %v1620_v12 }
 0x385   :  { %10263 = vmatmul.msk.bf16.gmra.mxu1 %vm570_vm0, %v1624_v26 }
 0x386   :  { %10105 = vmatmul.msk.bf16.gmra.mxu0 %vm733_vm1, %v945_v52 }
 0x38a   :  { %v13209_v14 = vpop.f32.mrf.mxu1  ;;  %v991_v5 = vpop.f32.mrf.mxu0 }
 0x38b   :  { %v1102_v6 = vpack.c.bf16 %v13209_v14, %v13203_v51 }
 0x392   :  { %v13211_v25 = vpop.f32.mrf.mxu1  ;;  %v993_v4 = vpop.f32.mrf.mxu0 }
 0x393   :  { %v1096_v61 = vpack.c.bf16 %v993_v4, %v991_v5 }
 0x395   :  { %10264 = vmatmul.msk.bf16.gmra.mxu1 %vm570_vm0, %v1625_v3 }
 0x396   :  { %1424 = vmatmul.bf16.vlgmr.msra.gmra.mxu0 %v12596_v10 }
 0x39a   :  { %v13215_v45 = vpop.f32.mrf.mxu1 }
 0x3a2   :  { %v13217_v49 = vpop.f32.mrf.mxu1 }
 0x3a3   :  { %v13281_v3 = vmul.f32 0.17677669, %v13217_v49 }
 0x3a5   :  { %10301 = vmatmul.msk.bf16.vlgmr.msra.gmra.mxu1 %vm570_vm0, %v1096_v61  ;;  %v1715_v4 = vsel %vm733_vm1, %v13281_v3, -inf }
 0x3a6   :  { %1429 = vmatmul.bf16.gmra.mxu0 %v12611_v15 }
 0x3aa   :  { %v13221_v58 = vpop.f32.mrf.mxu1 }
 0x3b2   :  { %v13223_v23 = vpop.f32.mrf.mxu1 }
 0x3b6   :  { %1434 = vmatmul.bf16.gmra.mxu0 %v12638_v24 }
 0x3ba   :  { %v13226_v57 = vpop.f32.mrf.mxu1 }
 0x3c2   :  { %v13228_v11 = vpop.f32.mrf.mxu1 }
 0x3c6   :  { %1439 = vmatmul.bf16.gmra.mxu0 %v12666_v33 }
 0x3ca   :  { %v13231_v16 = vpop.f32.mrf.mxu1 }
 0x3d2   :  { %v13233_v27 = vpop.f32.mrf.mxu1 }
 0x3d6   :  { %1444 = vmatmul.bf16.gmra.mxu0 %v12681_v38 }
 0x3da   :  { %v13236_v17 = vpop.f32.mrf.mxu1 }
 0x3e2   :  { %v996_v21 = vpop.f32.mrf.mxu0  ;;  %v1679_v60 = vpop.f32.mrf.mxu1 }
 0x3e3   :  { %v13238_v30 = vmul.f32 0.17677669, %v1679_v60 }
 0x3e5   :  { %v1739_v9 = vsel %vm733_vm1, %v13238_v30, -inf }
 0x3e6   :  { %1449 = vmatmul.bf16.gmra.mxu0 %v12693_v41  ;;  %1740 = vmax.xlane.f32.xlu2 %v1739_v9 }
 0x3ea   :  { %v998_v31 = vpop.f32.mrf.mxu0  ;;  %v1681_v0 = vpop.f32.mrf.mxu1 }
 0x3eb   :  { %v1097_v40 = vpack.c.bf16 %v998_v31, %v996_v21  ;;  %v13243_v59 = vmul.f32 0.17677669, %v1681_v0  ;;  %v1101_v21 = vpack.c.bf16 %v13193_v32, %v13184_v39  ;;  %v1103_v0 = vpack.c.bf16 %v13215_v45, %v13211_v25 }
 0x3ed   :  { %10302 = vmatmul.msk.bf16.gmra.mxu1 %vm570_vm0, %v1097_v40  ;;  %v1742_v7 = vsel %vm733_vm1, %v13243_v59, -inf }
 0x3ee   :  { %1743 = vmax.xlane.f32.xlu0 %v1742_v7 }
 0x3f2   :  { %v1684_v22 = vpop.f32.mrf.mxu1  ;;  %v1001_v37 = vpop.f32.mrf.mxu0 }
 0x3f3   :  { %v13248_v43 = vmul.f32 0.17677669, %v1684_v22 }
 0x3f5   :  { %v1745_v53 = vsel %vm733_vm1, %v13248_v43, -inf }
 0x3f6   :  { %1454 = vmatmul.bf16.gmra.mxu0 %v12705_v44  ;;  %1746 = vmax.xlane.f32.xlu1 %v1745_v53 }
 0x3fa   :  { %v1686_v46 = vpop.f32.mrf.mxu1  ;;  %v1003_v34 = vpop.f32.mrf.mxu0 }
 0x3fb   :  { %v13253_v36 = vmul.f32 0.17677669, %v1686_v46  ;;  %v1098_v2 = vpack.c.bf16 %v1003_v34, %v1001_v37 }
 0x3fd   :  { %v1748_v55 = vsel %vm733_vm1, %v13253_v36, -inf  ;;  %10303 = vmatmul.msk.bf16.gmra.mxu1 %vm570_vm0, %v1098_v2 }
 0x3fe   :  { %1749 = vmax.xlane.f32.xlu2 %v1748_v55 }
 0x402   :  { %v1689_v8 = vpop.f32.mrf.mxu1 }
 0x403   :  { %v1006_v28 = vpop.f32.mrf.mxu0  ;;  %v13258_v56 = vmul.f32 0.17677669, %v1689_v8 }
 0x405   :  { %v1751_v54 = vsel %vm733_vm1, %v13258_v56, -inf }
 0x406   :  { %1459 = vmatmul.bf16.gmra.mxu0 %v12717_v47  ;;  %1752 = vmax.xlane.f32.xlu0 %v1751_v54 }
 0x40a   :  { %v1691_v50 = vpop.f32.mrf.mxu1 }
 0x40b   :  { %v1008_v63 = vpop.f32.mrf.mxu0  ;;  %v13263_v1 = vmul.f32 0.17677669, %v1691_v50 }
 0x40c   :  { %v1099_v19 = vpack.c.bf16 %v1008_v63, %v1006_v28 }
 0x40d   :  { %v1754_v26 = vsel %vm733_vm1, %v13263_v1, -inf }
 0x40e   :  { %10304 = vmatmul.msk.bf16.gmra.mxu1 %vm570_vm0, %v1099_v19  ;;  %1755 = vmax.xlane.f32.xlu1 %v1754_v26 }
 0x412   :  { %v1694_v48 = vpop.f32.mrf.mxu1 }
 0x413   :  { %v1425_v52 = vpop.f32.mrf.mxu0  ;;  %v13268_v20 = vmul.f32 0.17677669, %v1694_v48 }
 0x414   :  { %v1426_v34 = vadd.f32 %v13294_v18, %v1425_v52 }
 0x415   :  { %v1757_v29 = vsel %vm733_vm1, %v13268_v20, -inf }
 0x416   :  { %1758 = vmax.xlane.f32.xlu2 %v1757_v29  ;;  %v1497_v50 = vpack.c.bf16 %v1426_v34, %v1426_v34 }
 0x41a   :  { %v1696_v35 = vpop.f32.mrf.mxu1 }
 0x41b   :  { %v1427_v62 = vpop.f32.mrf.mxu0  ;;  %v13272_v12 = vmul.f32 0.17677669, %v1696_v35  ;;  %v1935_v35 = vunpack.c.l.b16 %v1497_v50 }
 0x41c   :  { %v1428_v2 = vadd.f32 %v13294_v18, %v1427_v62 }
 0x41d   :  { %v1760_v42 = vsel %vm733_vm1, %v13272_v12, -inf }
 0x41e   :  { %10305 = vmatmul.msk.bf16.gmra.mxu1 %vm570_vm0, %v1100_v13  ;;  %1761 = vmax.xlane.f32.xlu0 %v1760_v42  ;;  %v1498_v19 = vpack.c.bf16 %v1428_v2, %v1428_v2  ;;  %v13338_v2 = vmul.f32 0.17677669, %v13226_v57 }
 0x420   :  { %v1936_v42 = vunpack.c.l.b16 %v1498_v19 }
 0x423   :  { %v1430_v5 = vpop.f32.mrf.mxu0 }
 0x424   :  { %v1431_v51 = vadd.f32 %v13294_v18, %v1430_v5 }
 0x426   :  { %1716 = vmax.xlane.f32.xlu0 %v1715_v4  ;;  %v1499_v55 = vpack.c.bf16 %v1431_v51, %v1431_v51 }
 0x428   :  { %v1937_v26 = vunpack.c.l.b16 %v1499_v55 }
 0x42b   :  { %v1432_v61 = vpop.f32.mrf.mxu0 }
 0x42c   :  { %v1433_v40 = vadd.f32 %v13294_v18, %v1432_v61 }
 0x42e   :  { %10306 = vmatmul.msk.bf16.gmra.mxu1 %vm570_vm0, %v1101_v21  ;;  %v1500_v8 = vpack.c.bf16 %v1433_v40, %v1433_v40  ;;  %v1943_v21 = vpack.c.b16 %v1936_v42, %v1935_v35 }
 0x430   :  { %v1938_v48 = vunpack.c.l.b16 %v1500_v8 }
 0x432   :  { %v1944_v52 = vpack.c.b16 %v1938_v48, %v1937_v26 }
 0x433   :  { %v1435_v60 = vpop.f32.mrf.mxu0 }
 0x434   :  { %v1436_v31 = vadd.f32 %v13294_v18, %v1435_v60 }
 0x436   :  { %v1501_v7 = vpack.c.bf16 %v1436_v31, %v1436_v31 }
 0x438   :  { %v1939_v25 = vunpack.c.l.b16 %v1501_v7  ;;  %v13328_v7 = vmul.f32 0.17677669, %v13223_v23 }
 0x43b   :  { %v1437_v9 = vpop.f32.mrf.mxu0 }
 0x43c   :  { %v1438_v39 = vadd.f32 %v13294_v18, %v1437_v9 }
 0x43e   :  { %10307 = vmatmul.msk.bf16.gmra.mxu1 %vm570_vm0, %v1102_v6  ;;  %v1502_v22 = vpack.c.bf16 %v1438_v39, %v1438_v39 }
 0x440   :  { %v1940_v45 = vunpack.c.l.b16 %v1502_v22 }
 0x442   :  { %v1945_v29 = vpack.c.b16 %v1940_v45, %v1939_v25 }
 0x443   :  { %v1440_v13 = vpop.f32.mrf.mxu0 }
 0x444   :  { %v1441_v49 = vadd.f32 %v13294_v18, %v1440_v13 }
 0x446   :  { %v1503_v32 = vpack.c.bf16 %v1441_v49, %v1441_v49 }
 0x448   :  { %v1941_v53 = vunpack.c.l.b16 %v1503_v32 }
 0x44b   :  { %v1442_v14 = vpop.f32.mrf.mxu0 }
 0x44c   :  { %v1443_v37 = vadd.f32 %v13294_v18, %v1442_v14 }
 0x44e   :  { %v1504_v46 = vpack.c.bf16 %v1443_v37, %v1443_v37  ;;  %10308 = vmatmul.msk.bf16.gmra.mxu1 %vm570_vm0, %v1103_v0 }
 0x450   :  { %v1942_v28 = vunpack.c.l.b16 %v1504_v46  ;;  %v1721_v46 = vsel %vm733_vm1, %v13328_v7, -inf }
 0x452   :  { %v1946_v54 = vpack.c.b16 %v1942_v28, %v1941_v53  ;;  %v1724_v28 = vsel %vm733_vm1, %v13338_v2, -inf }
 0x453   :  { %v13307_v63 = vpop.f32.mrf.mxu0 }
 0x454   :  { %1967 = vmatpush.bf16.msra.mxu2 %v1946_v54  ;;  %v13348_v54 = vmul.f32 0.17677669, %v13228_v11 }
 0x456   :  { %v1727_v48 = vsel %vm733_vm1, %v13348_v54, -inf }
 0x458   :  { %1968 = vmatpush.bf16.msra.mxu2 %v1945_v29 }
 0x459   :  { %v1741_v5 = vpop.xlane.xlu2 %1740 }
 0x45a   :  { %v1771_v62 = vsub.f32 %v13238_v30, %v1741_v5  ;;  %v13318_v30 = vmul.f32 0.17677669, %v13221_v58 }
 0x45b   :  { %v13310_v4 = vpop.f32.mrf.mxu0 }
 0x45c   :  { %v1795_v61 = vmul.f32 1.442695, %v1771_v62  ;;  %1969 = vmatpush.bf16.msra.mxu2 %v1944_v52 }
 0x45e   :  { %11829 = vpow2.f32 %v1795_v61 }
 0x460   :  { %1970 = vmatpush.bf16.msra.mxu2 %v1943_v21 }
 0x461   :  { %v1744_v60 = vpop.xlane.xlu0 %1743 }
 0x462   :  { %v1772_v9 = vsub.f32 %v13243_v59, %v1744_v60  ;;  %v1718_v59 = vsel %vm733_vm1, %v13318_v30, -inf }
 0x463   :  { %v1450_v6 = vpop.f32.mrf.mxu0 }
 0x464   :  { %v13313_v13 = vpop.eup %11829  ;;  %v1797_v49 = vmul.f32 1.442695, %v1772_v9  ;;  %v1451_v61 = vadd.f32 %v13294_v18, %v1450_v6  ;;  %v1446_v6 = vadd.f32 %v13294_v18, %v13307_v63 }
 0x465   :  { %v1835_v31 = vsel %vm733_vm1, %v13313_v13, 0.0 }
 0x466   :  { %11831 = vpow2.f32 %v1797_v49  ;;  %1836 = vadd.xlane.f32.xlu1 %v1835_v31 }
 0x469   :  { %v1747_v39 = vpop.xlane.xlu1 %1746 }
 0x46a   :  { %v1773_v32 = vsub.f32 %v13248_v43, %v1747_v39 }
 0x46b   :  { %v1452_v0 = vpop.f32.mrf.mxu0 }
 0x46c   :  { %v13321_v51 = vpop.eup %11831  ;;  %v1799_v14 = vmul.f32 1.442695, %v1773_v32  ;;  %v1453_v21 = vadd.f32 %v13294_v18, %v1452_v0  ;;  %v1448_v0 = vadd.f32 %v13294_v18, %v13310_v4 }
 0x46d   :  { %v1838_v40 = vsel %vm733_vm1, %v13321_v51, 0.0 }
 0x46e   :  { %11833 = vpow2.f32 %v1799_v14  ;;  %1719 = vmax.xlane.f32.xlu1 %v1718_v59  ;;  %1839 = vadd.xlane.f32.xlu2 %v1838_v40  ;;  %v1507_v40 = vpack.c.bf16 %v1451_v61, %v1451_v61 }
 0x470   :  { %v2022_v63 = vunpack.c.l.b16 %v1507_v40 }
 0x471   :  { %v1750_v58 = vpop.xlane.xlu2 %1749 }
 0x472   :  { %v1774_v22 = vsub.f32 %v13253_v36, %v1750_v58  ;;  %v1508_v58 = vpack.c.bf16 %v1453_v21, %v1453_v21 }
 0x473   :  { %v1455_v43 = vpop.f32.mrf.mxu0 }
 0x474   :  { %v13331_v37 = vpop.eup %11833  ;;  %v1801_v53 = vmul.f32 1.442695, %v1774_v22  ;;  %v1456_v11 = vadd.f32 %v13294_v18, %v1455_v43 }
 0x475   :  { %v1841_v34 = vsel %vm733_vm1, %v13331_v37, 0.0 }
 0x476   :  { %11835 = vpow2.f32 %v1801_v53  ;;  %1722 = vmax.xlane.f32.xlu1 %v1721_v46  ;;  %1842 = vadd.xlane.f32.xlu2 %v1841_v34  ;;  %v1509_v49 = vpack.c.bf16 %v1456_v11, %v1456_v11  ;;  %v13378_v46 = vmul.f32 0.17677669, %v13233_v27 }
 0x478   :  { %v2024_v22 = vunpack.c.l.b16 %v1509_v49  ;;  %v1733_v27 = vsel %vm733_vm1, %v13378_v46, -inf }
 0x479   :  { %v1753_v23 = vpop.xlane.xlu0 %1752 }
 0x47a   :  { %v1775_v55 = vsub.f32 %v13258_v56, %v1753_v23 }
 0x47b   :  { %v1457_v36 = vpop.f32.mrf.mxu0 }
 0x47c   :  { %v13341_v8 = vpop.eup %11835  ;;  %v1803_v25 = vmul.f32 1.442695, %v1775_v55  ;;  %v1458_v42 = vadd.f32 %v13294_v18, %v1457_v36  ;;  %v1505_v36 = vpack.c.bf16 %v1446_v6, %v1446_v6 }
 0x47d   :  { %v1844_v45 = vsel %vm733_vm1, %v13341_v8, 0.0 }
 0x47e   :  { %11837 = vpow2.f32 %v1803_v25  ;;  %1845 = vadd.xlane.f32.xlu0 %v1844_v45  ;;  %1725 = vmax.xlane.f32.xlu2 %v1724_v28  ;;  %v1510_v31 = vpack.c.bf16 %v1458_v42, %v1458_v42  ;;  %v1506_v25 = vpack.c.bf16 %v1448_v0, %v1448_v0  ;;  %v2023_v28 = vunpack.c.l.b16 %v1508_v58 }
 0x480   :  { %v2025_v43 = vunpack.c.l.b16 %v1510_v31 }
 0x481   :  { %v1756_v57 = vpop.xlane.xlu1 %1755 }
 0x482   :  { %v1776_v50 = vsub.f32 %v13263_v1, %v1756_v57  ;;  %v13361_v1 = vmul.f32 0.17677669, %v13231_v16 }
 0x483   :  { %v1460_v56 = vpop.f32.mrf.mxu0 }
 0x484   :  { %v13351_v19 = vpop.eup %11837  ;;  %v1805_v26 = vmul.f32 1.442695, %v1776_v50  ;;  %v1461_v35 = vadd.f32 %v13294_v18, %v1460_v56  ;;  %v1730_v14 = vsel %vm733_vm1, %v13361_v1, -inf  ;;  %v2020_v50 = vunpack.c.l.b16 %v1505_v36 }
 0x485   :  { %v1847_v29 = vsel %vm733_vm1, %v13351_v19, 0.0  ;;  %v2029_v56 = vpack.c.b16 %v2023_v28, %v2022_v63  ;;  %v11546_v28 = vld [vmem:[%s17304_s9 + $0xb0] sm:$0xff] }
 0x486   :  { %11839 = vpow2.f32 %v1805_v26  ;;  %1728 = vmax.xlane.f32.xlu2 %v1727_v48  ;;  %1848 = vadd.xlane.f32.xlu0 %v1847_v29  ;;  %v1511_v5 = vpack.c.bf16 %v1461_v35, %v1461_v35  ;;  %v13388_v26 = vmul.f32 0.17677669, %v13236_v17 }
 0x488   :  { %v2026_v59 = vunpack.c.l.b16 %v1511_v5 }
 0x489   :  { %v1759_v52 = vpop.xlane.xlu2 %1758 }
 0x48a   :  { %v1777_v62 = vsub.f32 %v13268_v20, %v1759_v52  ;;  %v1736_v52 = vsel %vm733_vm1, %v13388_v26, -inf }
 0x48b   :  { %v1462_v60 = vpop.f32.mrf.mxu0 }
 0x48c   :  { %v13366_v9 = vpop.eup %11839  ;;  %v1807_v39 = vmul.f32 1.442695, %v1777_v62  ;;  %v1463_v32 = vadd.f32 %v13294_v18, %v1462_v60  ;;  %v2030_v18 = vpack.c.b16 %v2025_v43, %v2024_v22 }
 0x48d   :  { %v1850_v16 = vsel %vm733_vm1, %v13366_v9, 0.0 }
 0x48e   :  { %11841 = vpow2.f32 %v1807_v39  ;;  %v1512_v20 = vpack.c.bf16 %v1463_v32, %v1463_v32  ;;  %1851 = vadd.xlane.f32.xlu1 %v1850_v16  ;;  %1731 = vmax.xlane.f32.xlu0 %v1730_v14 }
 0x490   :  { %v2027_v53 = vunpack.c.l.b16 %v1512_v20 }
 0x491   :  { %v1762_v34 = vpop.xlane.xlu0 %1761 }
 0x492   :  { %v2031_v23 = vpack.c.b16 %v2027_v53, %v2026_v59  ;;  %v1778_v55 = vsub.f32 %v13272_v12, %v1762_v34  ;;  %v2021_v12 = vunpack.c.l.b16 %v1506_v25 }
 0x494   :  { %v13381_v45 = vpop.eup %11841  ;;  %v1809_v57 = vmul.f32 1.442695, %v1778_v55  ;;  %2052 = vmatpush.bf16.msra.mxu3 %v2031_v23  ;;  %v2028_v42 = vpack.c.b16 %v2021_v12, %v2020_v50 }
 0x495   :  { %v1853_v4 = vsel %vm733_vm1, %v13381_v45, 0.0 }
 0x496   :  { %11843 = vpow2.f32 %v1809_v57  ;;  %1854 = vadd.xlane.f32.xlu1 %v1853_v4  ;;  %1734 = vmax.xlane.f32.xlu0 %v1733_v27 }
 0x498   :  { %2053 = vmatpush.bf16.msra.mxu3 %v2030_v18 }
 0x499   :  { %v1717_v48 = vpop.xlane.xlu0 %1716 }
 0x49a   :  { %v1763_v29 = vsub.f32 %v13281_v3, %v1717_v48 }
 0x49c   :  { %v13391_v35 = vpop.eup %11843  ;;  %v1779_v11 = vmul.f32 1.442695, %v1763_v29  ;;  %2054 = vmatpush.bf16.msra.mxu3 %v2029_v56 }
 0x49d   :  { %v1856_v5 = vsel %vm733_vm1, %v13391_v35, 0.0 }
 0x49e   :  { %11845 = vpow2.f32 %v1779_v11  ;;  %1737 = vmax.xlane.f32.xlu1 %v1736_v52  ;;  %1857 = vadd.xlane.f32.xlu2 %v1856_v5 }
 0x4a0   :  { %2055 = vmatpush.bf16.msra.mxu3 %v2028_v42 }
 0x4a4   :  { %v13397_v17 = vpop.eup %11845 }
 0x4a5   :  { %v1811_v3 = vsel %vm733_vm1, %v13397_v17, 0.0 }
 0x4a6   :  { %1812 = vadd.xlane.f32.xlu2 %v1811_v3  ;;  %v11543_v3 = vld [vmem:[%s17304_s9 + $0x98] sm:$0xff] }
 0x4d9   :  { %v1837_v62 = vpop.xlane.xlu1 %1836 }
 0x4da   :  { %11847 = vrcp.f32 %v1837_v62 }
 0x4e0   :  { %v11848_v60 = vpop.eup %11847 }
 0x4e1   :  { %v1720_v61 = vpop.xlane.xlu1 %1719  ;;  %v1840_v21 = vpop.xlane.xlu2 %1839  ;;  %v1883_v39 = vmul.f32 %v11848_v60, %v13313_v13 }
 0x4e2   :  { %v1764_v49 = vsub.f32 %v13318_v30, %v1720_v61  ;;  %11849 = vrcp.f32 %v1840_v21 }
 0x4e3   :  { %v1899_v16 = vpack.c.bf16 %v1883_v39, %v1883_v39  ;;  %v11542_v39 = vld [vmem:[%s17304_s9 + $0x90] sm:$0xff] }
 0x4e4   :  { %v1781_v31 = vmul.f32 1.442695, %v1764_v49 }
 0x4e5   :  { %v2000_v22 = vunpack.c.l.b16 %v1899_v16 }
 0x4e6   :  { %11851 = vpow2.f32 %v1781_v31 }
 0x4e8   :  { %v11850_v32 = vpop.eup %11849 }
 0x4e9   :  { %v1884_v14 = vmul.f32 %v11850_v32, %v13321_v51  ;;  %v1723_v59 = vpop.xlane.xlu1 %1722  ;;  %v1843_v20 = vpop.xlane.xlu2 %1842 }
 0x4ea   :  { %v1765_v6 = vsub.f32 %v13328_v7, %v1723_v59  ;;  %11853 = vrcp.f32 %v1843_v20  ;;  %v11547_v7 = vld [vmem:[%s17304_s9 + $0xb8] sm:$0xff] }
 0x4eb   :  { %v1900_v0 = vpack.c.bf16 %v1884_v14, %v1884_v14  ;;  %2449 = vmatpush.bf16.msrb.mxu3 %v11547_v7 }
 0x4ec   :  { %v13405_v40 = vpop.eup %11851  ;;  %v1783_v58 = vmul.f32 1.442695, %v1765_v6 }
 0x4ed   :  { %v2001_v30 = vunpack.c.l.b16 %v1900_v0  ;;  %v1814_v43 = vsel %vm733_vm1, %v13405_v40, 0.0  ;;  %v11540_v0 = vld [vmem:[%s17304_s9 + $0x80] sm:$0xff] }
 0x4ee   :  { %11855 = vpow2.f32 %v1783_v58  ;;  %1815 = vadd.xlane.f32.xlu0 %v1814_v43 }
 0x4ef   :  { %v2008_v13 = vpack.c.b16 %v2001_v30, %v2000_v22  ;;  %2450 = vmatpush.bf16.msrb.mxu3 %v11546_v28 }
 0x4f0   :  { %v11854_v34 = vpop.eup %11853 }
 0x4f1   :  { %10269 = vmatmul.msk.bf16.vlgmr.msra.gmra.mxu3 %vm733_vm1, %v2008_v13  ;;  %v1726_v51 = vpop.xlane.xlu2 %1725  ;;  %v1846_v53 = vpop.xlane.xlu0 %1845  ;;  %v1885_v25 = vmul.f32 %v11854_v34, %v13331_v37  ;;  %v11545_v37 = vld [vmem:[%s17304_s9 + $0xa8] sm:$0xff] }
 0x4f2   :  { %v1766_v23 = vsub.f32 %v13338_v2, %v1726_v51  ;;  %11857 = vrcp.f32 %v1846_v53 }
 0x4f3   :  { %v1901_v18 = vpack.c.bf16 %v1885_v25, %v1885_v25  ;;  %2451 = vmatpush.bf16.msrb.mxu3 %v11545_v37 }
 0x4f4   :  { %v13414_v55 = vpop.eup %11855  ;;  %v1785_v36 = vmul.f32 1.442695, %v1766_v23 }
 0x4f5   :  { %v1817_v63 = vsel %vm733_vm1, %v13414_v55, 0.0  ;;  %v2002_v11 = vunpack.c.l.b16 %v1901_v18 }
 0x4f6   :  { %11859 = vpow2.f32 %v1785_v36  ;;  %1818 = vadd.xlane.f32.xlu1 %v1817_v63 }
 0x4f8   :  { %v11858_v57 = vpop.eup %11857 }
 0x4f9   :  { %v1886_v2 = vmul.f32 %v11858_v57, %v13341_v8  ;;  %v1729_v4 = vpop.xlane.xlu2 %1728  ;;  %v1849_v27 = vpop.xlane.xlu0 %1848  ;;  %v11544_v8 = vld [vmem:[%s17304_s9 + $0xa0] sm:$0xff] }
 0x4fa   :  { %v1767_v50 = vsub.f32 %v13348_v54, %v1729_v4  ;;  %11861 = vrcp.f32 %v1849_v27  ;;  %2452 = vmatpush.bf16.msrb.mxu3 %v11544_v8 }
 0x4fb   :  { %v1902_v12 = vpack.c.bf16 %v1886_v2, %v1886_v2 }
 0x4fc   :  { %v13427_v56 = vpop.eup %11859  ;;  %v1787_v48 = vmul.f32 1.442695, %v1767_v50 }
 0x4fd   :  { %v1820_v29 = vsel %vm733_vm1, %v13427_v56, 0.0  ;;  %v2003_v42 = vunpack.c.l.b16 %v1902_v12 }
 0x4fe   :  { %11863 = vpow2.f32 %v1787_v48  ;;  %1821 = vadd.xlane.f32.xlu2 %v1820_v29  ;;  %2453 = vmatpush.bf16.msrb.mxu3 %v11543_v3 }
 0x4ff   :  { %v2009_v52 = vpack.c.b16 %v2003_v42, %v2002_v11 }
 0x500   :  { %v11862_v62 = vpop.eup %11861 }
 0x501   :  { %v1852_v54 = vpop.xlane.xlu1 %1851  ;;  %10270 = vmatmul.msk.bf16.gmra.mxu3 %vm733_vm1, %v2009_v52  ;;  %v1732_v5 = vpop.xlane.xlu0 %1731  ;;  %v1887_v49 = vmul.f32 %v11862_v62, %v13351_v19  ;;  %v11539_v62 = vld [vmem:[%s17306_s2 + $0xb8] sm:$0xff] }
 0x502   :  { %11865 = vrcp.f32 %v1852_v54  ;;  %v1768_v61 = vsub.f32 %v13361_v1, %v1732_v5  ;;  %2454 = vmatpush.bf16.msrb.mxu3 %v11542_v39  ;;  %v11541_v1 = vld [vmem:[%s17304_s9 + $0x88] sm:$0xff]  ;;  %2330 = vmatpush.bf16.msrb.mxu2 %v11539_v62  ;;  %v13545_v62 = vld [vmem:[%s17308_s5 + $0x2] ss:$0 sm:$0xff] }
 0x503   :  { %v1903_v16 = vpack.c.bf16 %v1887_v49, %v1887_v49 }
 0x504   :  { %v13439_v21 = vpop.eup %11863  ;;  %v1789_v60 = vmul.f32 1.442695, %v1768_v61 }
 0x505   :  { %v1823_v31 = vsel %vm733_vm1, %v13439_v21, 0.0  ;;  %v2004_v43 = vunpack.c.l.b16 %v1903_v16 }
 0x506   :  { %11867 = vpow2.f32 %v1789_v60  ;;  %1824 = vadd.xlane.f32.xlu0 %v1823_v31  ;;  %2455 = vmatpush.bf16.msrb.mxu3 %v11541_v1  ;;  %v11538_v60 = vld [vmem:[%s17306_s2 + $0xb0] sm:$0xff] }
 0x507   :  { %2331 = vmatpush.bf16.msrb.mxu2 %v11538_v60 }
 0x508   :  { %v11866_v32 = vpop.eup %11865 }
 0x509   :  { %v1888_v14 = vmul.f32 %v11866_v32, %v13366_v9  ;;  %v1855_v59 = vpop.xlane.xlu1 %1854  ;;  %v1735_v19 = vpop.xlane.xlu0 %1734  ;;  %v11537_v32 = vld [vmem:[%s17306_s2 + $0xa8] sm:$0xff] }
 0x50a   :  { %v1769_v20 = vsub.f32 %v13378_v46, %v1735_v19  ;;  %11869 = vrcp.f32 %v1855_v59  ;;  %2456 = vmatpush.bf16.msrb.mxu3 %v11540_v0  ;;  %v11536_v19 = vld [vmem:[%s17306_s2 + $0xa0] sm:$0xff] }
 0x50b   :  { %v1904_v6 = vpack.c.bf16 %v1888_v14, %v1888_v14  ;;  %2332 = vmatpush.bf16.msrb.mxu2 %v11537_v32 }
 0x50c   :  { %v13455_v58 = vpop.eup %11867  ;;  %v1791_v22 = vmul.f32 1.442695, %v1769_v20 }
 0x50d   :  { %v1826_v30 = vsel %vm733_vm1, %v13455_v58, 0.0  ;;  %v2005_v13 = vunpack.c.l.b16 %v1904_v6  ;;  %v11535_v6 = vld [vmem:[%s17306_s2 + $0x98] sm:$0xff] }
 0x50e   :  { %11871 = vpow2.f32 %v1791_v22  ;;  %1827 = vadd.xlane.f32.xlu1 %v1826_v30  ;;  %v11534_v30 = vld [vmem:[%s17306_s2 + $0x90] sm:$0xff] }
 0x50f   :  { %v2010_v9 = vpack.c.b16 %v2005_v13, %v2004_v43  ;;  %2333 = vmatpush.bf16.msrb.mxu2 %v11536_v19  ;;  %v11533_v13 = vld [vmem:[%s17306_s2 + $0x88] sm:$0xff] }
 0x510   :  { %v11870_v53 = vpop.eup %11869 }
 0x511   :  { %v1738_v46 = vpop.xlane.xlu1 %1737  ;;  %v1858_v51 = vpop.xlane.xlu2 %1857  ;;  %10271 = vmatmul.msk.bf16.gmra.mxu3 %vm733_vm1, %v2010_v9  ;;  %v1889_v36 = vmul.f32 %v11870_v53, %v13381_v45 }
 0x512   :  { %v1770_v7 = vsub.f32 %v13388_v26, %v1738_v46  ;;  %11873 = vrcp.f32 %v1858_v51 }
 0x513   :  { %v1905_v28 = vpack.c.bf16 %v1889_v36, %v1889_v36  ;;  %2334 = vmatpush.bf16.msrb.mxu2 %v11535_v6 }
 0x514   :  { %v13461_v34 = vpop.eup %11871  ;;  %v1793_v23 = vmul.f32 1.442695, %v1770_v7 }
 0x515   :  { %v1829_v25 = vsel %vm733_vm1, %v13461_v34, 0.0  ;;  %v2006_v4 = vunpack.c.l.b16 %v1905_v28 }
 0x516   :  { %11875 = vpow2.f32 %v1793_v23  ;;  %1830 = vadd.xlane.f32.xlu2 %v1829_v25 }
 0x517   :  { %2335 = vmatpush.bf16.msrb.mxu2 %v11534_v30 }
 0x518   :  { %v11874_v63 = vpop.eup %11873 }
 0x519   :  { %v1890_v57 = vmul.f32 %v11874_v63, %v13391_v35  ;;  %v1813_v45 = vpop.xlane.xlu2 %1812 }
 0x51a   :  { %11877 = vrcp.f32 %v1813_v45 }
 0x51b   :  { %v1906_v18 = vpack.c.bf16 %v1890_v57, %v1890_v57  ;;  %2336 = vmatpush.bf16.msrb.mxu2 %v11533_v13 }
 0x51c   :  { %v13467_v2 = vpop.eup %11875 }
 0x51d   :  { %v1832_v26 = vsel %vm733_vm1, %v13467_v2, 0.0  ;;  %v2007_v27 = vunpack.c.l.b16 %v1906_v18 }
 0x51e   :  { %1833 = vadd.xlane.f32.xlu0 %v1832_v26 }
 0x51f   :  { %v2011_v37 = vpack.c.b16 %v2007_v27, %v2006_v4 }
 0x520   :  { %v11878_v50 = vpop.eup %11877 }
 0x521   :  { %10272 = vmatmul.msk.bf16.gmra.mxu3 %vm733_vm1, %v2011_v37  ;;  %v1875_v12 = vmul.f32 %v11878_v50, %v13397_v17 }
 0x523   :  { %v1891_v29 = vpack.c.bf16 %v1875_v12, %v1875_v12 }
 0x525   :  { %v1915_v52 = vunpack.c.l.b16 %v1891_v29 }
 0x531   :  { %2457 = vmatmul.bf16.vlgmr.msrb.gmra.mxu3 %v12596_v10 }
 0x541   :  { %2462 = vmatmul.bf16.gmra.mxu3 %v12611_v15 }
 0x551   :  { %2467 = vmatmul.bf16.gmra.mxu3 %v12638_v24 }
 0x561   :  { %2472 = vmatmul.bf16.gmra.mxu3 %v12666_v33  ;;  %v1816_v35 = vpop.xlane.xlu0 %1815 }
 0x562   :  { %11879 = vrcp.f32 %v1816_v35 }
 0x568   :  { %v11880_v48 = vpop.eup %11879 }
 0x569   :  { %v1876_v11 = vmul.f32 %v11880_v48, %v13405_v40  ;;  %v1819_v42 = vpop.xlane.xlu1 %1818 }
 0x56a   :  { %11881 = vrcp.f32 %v1819_v42 }
 0x56b   :  { %v1892_v8 = vpack.c.bf16 %v1876_v11, %v1876_v11 }
 0x56d   :  { %v1916_v54 = vunpack.c.l.b16 %v1892_v8 }
 0x56f   :  { %v1923_v5 = vpack.c.b16 %v1916_v54, %v1915_v52  ;;  %v11531_v52 = vld [vmem:[%s17311_s0 + $0x18] sm:$0xff]  ;;  %v11530_v54 = vld [vmem:[%s17311_s0 + $0x10] sm:$0xff] }
 0x570   :  { %v11882_v17 = vpop.eup %11881  ;;  %2132 = vmatpush.bf16.msrb.mxu0 %v11531_v52 }
 0x571   :  { %v1822_v3 = vpop.xlane.xlu2 %1821  ;;  %10265 = vmatmul.msk.bf16.vlgmr.msra.gmra.mxu2 %vm733_vm1, %v1923_v5  ;;  %2477 = vmatmul.bf16.gmra.mxu3 %v12681_v38  ;;  %v1877_v40 = vmul.f32 %v11882_v17, %v13414_v55 }
 0x572   :  { %11883 = vrcp.f32 %v1822_v3 }
 0x573   :  { %v1893_v31 = vpack.c.bf16 %v1877_v40, %v1877_v40 }
 0x574   :  { %v13483_v61 = vpop.f32.mrf.mxu3  ;;  %2133 = vmatpush.bf16.msrb.mxu0 %v11530_v54 }
 0x575   :  { %v1917_v55 = vunpack.c.l.b16 %v1893_v31 }
 0x578   :  { %v11884_v49 = vpop.eup %11883 }
 0x579   :  { %v1878_v39 = vmul.f32 %v11884_v49, %v13427_v56  ;;  %v1825_v1 = vpop.xlane.xlu0 %1824 }
 0x57a   :  { %11885 = vrcp.f32 %v1825_v1 }
 0x57b   :  { %v1894_v16 = vpack.c.bf16 %v1878_v39, %v1878_v39 }
 0x57c   :  { %v13493_v14 = vpop.f32.mrf.mxu3 }
 0x57d   :  { %v1918_v59 = vunpack.c.l.b16 %v1894_v16 }
 0x57f   :  { %v1924_v20 = vpack.c.b16 %v1918_v59, %v1917_v55 }
 0x580   :  { %v11886_v0 = vpop.eup %11885 }
 0x581   :  { %2482 = vmatmul.bf16.gmra.mxu3 %v12693_v41  ;;  %v1828_v56 = vpop.xlane.xlu1 %1827  ;;  %10266 = vmatmul.msk.bf16.gmra.mxu2 %vm733_vm1, %v1924_v20  ;;  %v1879_v43 = vmul.f32 %v11886_v0, %v13439_v21  ;;  %v11532_v21 = vld [vmem:[%s17306_s2 + $0x80] sm:$0xff] }
 0x582   :  { %11887 = vrcp.f32 %v1828_v56  ;;  %2337 = vmatpush.bf16.msrb.mxu2 %v11532_v21 }
 0x583   :  { %v1895_v46 = vpack.c.bf16 %v1879_v43, %v1879_v43 }
 0x584   :  { %v13503_v22 = vpop.f32.mrf.mxu3 }
 0x585   :  { %v1919_v36 = vunpack.c.l.b16 %v1895_v46 }
 0x588   :  { %v11888_v9 = vpop.eup %11887 }
 0x589   :  { %v1880_v51 = vmul.f32 %v11888_v9, %v13455_v58  ;;  %v1831_v53 = vpop.xlane.xlu2 %1830 }
 0x58a   :  { %11889 = vrcp.f32 %v1831_v53 }
 0x58b   :  { %v1896_v7 = vpack.c.bf16 %v1880_v51, %v1880_v51 }
 0x58c   :  { %v13513_v23 = vpop.f32.mrf.mxu3 }
 0x58d   :  { %v1920_v25 = vunpack.c.l.b16 %v1896_v7 }
 0x58f   :  { %v1925_v63 = vpack.c.b16 %v1920_v25, %v1919_v36 }
 0x590   :  { %v11890_v58 = vpop.eup %11889 }
 0x591   :  { %10267 = vmatmul.msk.bf16.gmra.mxu2 %vm733_vm1, %v1925_v63  ;;  %2487 = vmatmul.bf16.gmra.mxu3 %v12705_v44  ;;  %v1834_v28 = vpop.xlane.xlu0 %1833  ;;  %v1881_v18 = vmul.f32 %v11890_v58, %v13461_v34 }
 0x592   :  { %11891 = vrcp.f32 %v1834_v28 }
 0x593   :  { %v1897_v4 = vpack.c.bf16 %v1881_v18, %v1881_v18 }
 0x594   :  { %v13520_v57 = vpop.f32.mrf.mxu3 }
 0x595   :  { %v1921_v35 = vunpack.c.l.b16 %v1897_v4 }
 0x598   :  { %v11892_v26 = vpop.eup %11891 }
 0x599   :  { %v1882_v27 = vmul.f32 %v11892_v26, %v13467_v2 }
 0x59b   :  { %v1898_v37 = vpack.c.bf16 %v1882_v27, %v1882_v27 }
 0x59c   :  { %v13524_v45 = vpop.f32.mrf.mxu3 }
 0x59d   :  { %v1922_v50 = vunpack.c.l.b16 %v1898_v37 }
 0x59f   :  { %v1926_v12 = vpack.c.b16 %v1922_v50, %v1921_v35 }
 0x5a1   :  { %10268 = vmatmul.msk.bf16.gmra.mxu2 %vm733_vm1, %v1926_v12  ;;  %2492 = vmatmul.bf16.gmra.mxu3 %v12717_v47 }
 0x5a4   :  { %v13528_v48 = vpop.f32.mrf.mxu3 }
 0x5ac   :  { %v13530_v29 = vpop.f32.mrf.mxu3 }
 0x5b1   :  { %2338 = vmatmul.bf16.vlgmr.msrb.gmra.mxu2 %v12596_v10 }
 0x5b4   :  { %v2458_v34 = vpop.f32.mrf.mxu3 }
 0x5b5   :  { %v2459_v7 = vadd.f32 %v13545_v62, %v2458_v34 }
 0x5b7   :  { %v2633_v18 = vpack.c.bf16 %v2459_v7, %v2459_v7 }
 0x5b9   :  { %v2693_v35 = vunpack.c.l.b16 %v2633_v18 }
 0x5bc   :  { %v2460_v11 = vpop.f32.mrf.mxu3 }
 0x5bd   :  { %v2461_v21 = vadd.f32 %v13545_v62, %v2460_v11 }
 0x5bf   :  { %v2634_v26 = vpack.c.bf16 %v2461_v21, %v2461_v21  ;;  %v13584_v21 = vld [vmem:[%s17309_s10 + $0x2] ss:$0 sm:$0xff] }
 0x5c1   :  { %2343 = vmatmul.bf16.gmra.mxu2 %v12611_v15  ;;  %v2694_v50 = vunpack.c.l.b16 %v2634_v26 }
 0x5c3   :  { %v2701_v34 = vpack.c.b16 %v2694_v50, %v2693_v35 }
 0x5c4   :  { %v2463_v2 = vpop.f32.mrf.mxu3 }
 0x5c5   :  { %v2464_v30 = vadd.f32 %v13545_v62, %v2463_v2 }
 0x5c7   :  { %v2635_v46 = vpack.c.bf16 %v2464_v30, %v2464_v30 }
 0x5c9   :  { %v2695_v63 = vunpack.c.l.b16 %v2635_v46 }
 0x5cc   :  { %v2465_v42 = vpop.f32.mrf.mxu3 }
 0x5cd   :  { %v2466_v43 = vadd.f32 %v13545_v62, %v2465_v42 }
 0x5cf   :  { %v2636_v51 = vpack.c.bf16 %v2466_v43, %v2466_v43 }
 0x5d1   :  { %2348 = vmatmul.bf16.gmra.mxu2 %v12638_v24  ;;  %v2696_v28 = vunpack.c.l.b16 %v2636_v51 }
 0x5d3   :  { %v2702_v4 = vpack.c.b16 %v2696_v28, %v2695_v63 }
 0x5d4   :  { %v2468_v8 = vpop.f32.mrf.mxu3 }
 0x5d5   :  { %v2469_v40 = vadd.f32 %v13545_v62, %v2468_v8  ;;  %v2721_v12 = vsel %vm570_vm0, %v2702_v4, 0  ;;  %v2718_v8 = vsel %vm570_vm0, %v2701_v34, 0 }
 0x5d7   :  { %v2637_v1 = vpack.c.bf16 %v2469_v40, %v2469_v40 }
 0x5d9   :  { %v2697_v19 = vunpack.c.l.b16 %v2637_v1 }
 0x5dc   :  { %v2470_v5 = vpop.f32.mrf.mxu3 }
 0x5dd   :  { %v2471_v60 = vadd.f32 %v13545_v62, %v2470_v5 }
 0x5df   :  { %v2638_v32 = vpack.c.bf16 %v2471_v60, %v2471_v60 }
 0x5e1   :  { %2353 = vmatmul.bf16.gmra.mxu2 %v12666_v33  ;;  %v2698_v20 = vunpack.c.l.b16 %v2638_v32 }
 0x5e3   :  { %v2703_v9 = vpack.c.b16 %v2698_v20, %v2697_v19 }
 0x5e4   :  { %v2473_v3 = vpop.f32.mrf.mxu3 }
 0x5e5   :  { %v2474_v17 = vadd.f32 %v13545_v62, %v2473_v3  ;;  %v2724_v53 = vsel %vm570_vm0, %v2703_v9, 0 }
 0x5e7   :  { %v2639_v49 = vpack.c.bf16 %v2474_v17, %v2474_v17 }
 0x5e9   :  { %v2699_v16 = vunpack.c.l.b16 %v2639_v49  ;;  %v13570_v49 = vpop.f32.mrf.mxu1 }
 0x5ec   :  { %v2475_v31 = vpop.f32.mrf.mxu3 }
 0x5ed   :  { %v2476_v39 = vadd.f32 %v13545_v62, %v2475_v31 }
 0x5ef   :  { %v2640_v55 = vpack.c.bf16 %v2476_v39, %v2476_v39 }
 0x5f1   :  { %v2700_v59 = vunpack.c.l.b16 %v2640_v55  ;;  %2358 = vmatmul.bf16.gmra.mxu2 %v12681_v38  ;;  %v13577_v43 = vpop.f32.mrf.mxu1 }
 0x5f3   :  { %v2704_v56 = vpack.c.b16 %v2700_v59, %v2699_v16 }
 0x5f4   :  { %v1972_v6 = vpop.f32.mrf.mxu2  ;;  %v13552_v0 = vpop.f32.mrf.mxu3 }
 0x5f5   :  { %v2727_v13 = vsel %vm570_vm0, %v2704_v56, 0 }
 0x5f6   :  { %2733 = vmatpush.bf16.xpose.msrb.mxu1 %v2727_v13 }
 0x5f9   :  { %v13587_v26 = vpop.f32.mrf.mxu1 }
 0x5fc   :  { %v1974_v36 = vpop.f32.mrf.mxu2  ;;  %v13559_v25 = vpop.f32.mrf.mxu3 }
 0x5fd   :  { %v2077_v58 = vpack.c.bf16 %v1974_v36, %v1972_v6 }
 0x5fe   :  { %2734 = vmatpush.bf16.xpose.msrb.mxu1 %v2724_v53 }
 0x5ff   :  { %10285 = vmatmul.msk.bf16.vlgmr.msrb.gmra.mxu0 %vm570_vm0, %v2077_v58 }
 0x601   :  { %2363 = vmatmul.bf16.gmra.mxu2 %v12693_v41 }
 0x604   :  { %v1977_v27 = vpop.f32.mrf.mxu2  ;;  %v2483_v37 = vpop.f32.mrf.mxu3 }
 0x605   :  { %v2484_v9 = vadd.f32 %v13545_v62, %v2483_v37  ;;  %v2481_v37 = vadd.f32 %v13545_v62, %v13559_v25  ;;  %v13599_v25 = vpop.f32.mrf.mxu1 }
 0x606   :  { %2735 = vmatpush.bf16.xpose.msrb.mxu1 %v2721_v12  ;;  %17312 = vst [vmem:[#allocation5_spill] sm:$0xff] %v13599_v25 }
 0x607   :  { %v2643_v28 = vpack.c.bf16 %v2484_v9, %v2484_v9 }
 0x609   :  { %v2788_v35 = vunpack.c.l.b16 %v2643_v28 }
 0x60c   :  { %v1979_v11 = vpop.f32.mrf.mxu2  ;;  %v2485_v2 = vpop.f32.mrf.mxu3 }
 0x60d   :  { %v2078_v42 = vpack.c.bf16 %v1979_v11, %v1977_v27  ;;  %v2486_v46 = vadd.f32 %v13545_v62, %v2485_v2  ;;  %v2479_v27 = vadd.f32 %v13545_v62, %v13552_v0  ;;  %v2081_v11 = vpack.c.bf16 %v13493_v14, %v13483_v61 }
 0x60e   :  { %2736 = vmatpush.bf16.xpose.msrb.mxu1 %v2718_v8 }
 0x60f   :  { %10286 = vmatmul.msk.bf16.gmra.mxu0 %vm570_vm0, %v2078_v42  ;;  %v2644_v58 = vpack.c.bf16 %v2486_v46, %v2486_v46  ;;  %v2641_v8 = vpack.c.bf16 %v2479_v27, %v2479_v27 }
 0x611   :  { %2368 = vmatmul.bf16.gmra.mxu2 %v12705_v44  ;;  %v2789_v50 = vunpack.c.l.b16 %v2644_v58 }
 0x613   :  { %v2795_v0 = vpack.c.b16 %v2789_v50, %v2788_v35 }
 0x614   :  { %v1982_v52 = vpop.f32.mrf.mxu2  ;;  %v2488_v54 = vpop.f32.mrf.mxu3 }
 0x615   :  { %v2489_v39 = vadd.f32 %v13545_v62, %v2488_v54 }
 0x617   :  { %v2645_v20 = vpack.c.bf16 %v2489_v39, %v2489_v39 }
 0x619   :  { %v2790_v51 = vunpack.c.l.b16 %v2645_v20 }
 0x61c   :  { %v1984_v5 = vpop.f32.mrf.mxu2  ;;  %v2490_v3 = vpop.f32.mrf.mxu3 }
 0x61d   :  { %v2079_v17 = vpack.c.bf16 %v1984_v5, %v1982_v52  ;;  %v2491_v1 = vadd.f32 %v13545_v62, %v2490_v3  ;;  %v2642_v52 = vpack.c.bf16 %v2481_v37, %v2481_v37  ;;  %v2786_v3 = vunpack.c.l.b16 %v2641_v8 }
 0x61f   :  { %10287 = vmatmul.msk.bf16.gmra.mxu0 %vm570_vm0, %v2079_v17  ;;  %v2646_v56 = vpack.c.bf16 %v2491_v1, %v2491_v1  ;;  %v2787_v17 = vunpack.c.l.b16 %v2642_v52  ;;  %v13605_v1 = vpop.f32.mrf.mxu1  ;;  %v11554_v52 = vld [vmem:[%s17307_s11 + $0xb0] sm:$0xff] }
 0x621   :  { %2373 = vmatmul.bf16.gmra.mxu2 %v12717_v47  ;;  %v2791_v53 = vunpack.c.l.b16 %v2646_v56  ;;  %v2794_v14 = vpack.c.b16 %v2787_v17, %v2786_v3 }
 0x623   :  { %v2796_v18 = vpack.c.b16 %v2791_v53, %v2790_v51  ;;  %v2811_v39 = vsel %vm570_vm0, %v2794_v14, 0 }
 0x624   :  { %v1987_v40 = vpop.f32.mrf.mxu2  ;;  %v2493_v60 = vpop.f32.mrf.mxu3 }
 0x625   :  { %v2494_v31 = vadd.f32 %v13545_v62, %v2493_v60  ;;  %v2817_v12 = vsel %vm570_vm0, %v2796_v18, 0  ;;  %v2814_v60 = vsel %vm570_vm0, %v2795_v0, 0 }
 0x627   :  { %v2647_v32 = vpack.c.bf16 %v2494_v31, %v2494_v31 }
 0x629   :  { %v2792_v6 = vunpack.c.l.b16 %v2647_v32 }
 0x62c   :  { %v1989_v16 = vpop.f32.mrf.mxu2  ;;  %v2495_v55 = vpop.f32.mrf.mxu3 }
 0x62d   :  { %v2080_v59 = vpack.c.bf16 %v1989_v16, %v1987_v40  ;;  %v2496_v19 = vadd.f32 %v13545_v62, %v2495_v55  ;;  %v2082_v16 = vpack.c.bf16 %v13513_v23, %v13503_v22  ;;  %v2083_v22 = vpack.c.bf16 %v13524_v45, %v13520_v57 }
 0x62e   :  { %v2084_v57 = vpack.c.bf16 %v13530_v29, %v13528_v48 }
 0x62f   :  { %v2648_v30 = vpack.c.bf16 %v2496_v19, %v2496_v19  ;;  %10288 = vmatmul.msk.bf16.gmra.mxu0 %vm570_vm0, %v2080_v59 }
 0x631   :  { %v2793_v13 = vunpack.c.l.b16 %v2648_v30 }
 0x633   :  { %v2797_v7 = vpack.c.b16 %v2793_v13, %v2792_v6  ;;  %v13612_v13 = vpop.f32.mrf.mxu1 }
 0x634   :  { %v2339_v36 = vpop.f32.mrf.mxu2  ;;  %17313 = vst [vmem:[#allocation6_spill] sm:$0xff] %v13612_v13 }
 0x635   :  { %v2820_v63 = vsel %vm570_vm0, %v2797_v7, 0  ;;  %v2340_v4 = vadd.f32 %v13584_v21, %v2339_v36 }
 0x636   :  { %2826 = vmatpush.bf16.xpose.msra.mxu2 %v2820_v63 }
 0x637   :  { %v2617_v2 = vpack.c.bf16 %v2340_v4, %v2340_v4 }
 0x639   :  { %v2673_v5 = vunpack.c.l.b16 %v2617_v2 }
 0x63b   :  { %v13619_v7 = vpop.f32.mrf.mxu1 }
 0x63c   :  { %v2341_v34 = vpop.f32.mrf.mxu2 }
 0x63d   :  { %v2342_v42 = vadd.f32 %v13584_v21, %v2341_v34 }
 0x63e   :  { %2827 = vmatpush.bf16.xpose.msra.mxu2 %v2817_v12 }
 0x63f   :  { %v2618_v54 = vpack.c.bf16 %v2342_v42, %v2342_v42  ;;  %10289 = vmatmul.msk.bf16.gmra.mxu0 %vm570_vm0, %v2081_v11  ;;  %v11555_v42 = vld [vmem:[%s17307_s11 + $0xb8] sm:$0xff] }
 0x640   :  { %2568 = vmatpush.bf16.msra.mxu0 %v11555_v42 }
 0x641   :  { %v2674_v62 = vunpack.c.l.b16 %v2618_v54  ;;  %v11553_v54 = vld [vmem:[%s17307_s11 + $0xa8] sm:$0xff] }
 0x643   :  { %v2681_v40 = vpack.c.b16 %v2674_v62, %v2673_v5  ;;  %v13623_v4 = vpop.f32.mrf.mxu1 }
 0x644   :  { %v2344_v61 = vpop.f32.mrf.mxu2  ;;  %17314 = vst [vmem:[#allocation7_spill] sm:$0xff] %v13623_v4  ;;  %2569 = vmatpush.bf16.msra.mxu0 %v11554_v52 }
 0x645   :  { %10456 = vmatmul.msk.bf16.vlgmr.msrb.gmra.mxu1 %vm570_vm0, %v2681_v40  ;;  %v2345_v31 = vadd.f32 %v13584_v21, %v2344_v61  ;;  %v11552_v40 = vld [vmem:[%s17307_s11 + $0xa0] sm:$0xff]  ;;  %v11551_v61 = vld [vmem:[%s17307_s11 + $0x98] sm:$0xff] }
 0x646   :  { %2828 = vmatpush.bf16.xpose.msra.mxu2 %v2814_v60 }
 0x647   :  { %v2619_v55 = vpack.c.bf16 %v2345_v31, %v2345_v31 }
 0x648   :  { %2570 = vmatpush.bf16.msra.mxu0 %v11553_v54 }
 0x649   :  { %v2675_v20 = vunpack.c.l.b16 %v2619_v55 }
 0x64b   :  { %v13629_v11 = vpop.f32.mrf.mxu1 }
 0x64c   :  { %v2346_v32 = vpop.f32.mrf.mxu2  ;;  %2571 = vmatpush.bf16.msra.mxu0 %v11552_v40 }
 0x64d   :  { %v2347_v59 = vadd.f32 %v13584_v21, %v2346_v32 }
 0x64e   :  { %2829 = vmatpush.bf16.xpose.msra.mxu2 %v2811_v39 }
 0x64f   :  { %v2620_v19 = vpack.c.bf16 %v2347_v59, %v2347_v59  ;;  %10290 = vmatmul.msk.bf16.gmra.mxu0 %vm570_vm0, %v2082_v16  ;;  %v11550_v59 = vld [vmem:[%s17307_s11 + $0x90] sm:$0xff] }
 0x650   :  { %2572 = vmatpush.bf16.msra.mxu0 %v11551_v61 }
 0x651   :  { %v2676_v56 = vunpack.c.l.b16 %v2620_v19 }
 0x653   :  { %v2682_v6 = vpack.c.b16 %v2676_v56, %v2675_v20  ;;  %v13632_v2 = vpop.f32.mrf.mxu1  ;;  %v11549_v56 = vld [vmem:[%s17307_s11 + $0x88] sm:$0xff] }
 0x654   :  { %v2349_v30 = vpop.f32.mrf.mxu2  ;;  %17315 = vst [vmem:[#allocation8_spill] sm:$0xff] %v13632_v2  ;;  %2573 = vmatpush.bf16.msra.mxu0 %v11550_v59 }
 0x655   :  { %10457 = vmatmul.msk.bf16.gmra.mxu1 %vm570_vm0, %v2682_v6  ;;  %v2350_v9 = vadd.f32 %v13584_v21, %v2349_v30 }
 0x657   :  { %v2621_v23 = vpack.c.bf16 %v2350_v9, %v2350_v9 }
 0x658   :  { %2574 = vmatpush.bf16.msra.mxu0 %v11549_v56 }
 0x659   :  { %v2677_v36 = vunpack.c.l.b16 %v2621_v23 }
 0x65b   :  { %v13637_v48 = vpop.f32.mrf.mxu1 }
 0x65c   :  { %v2351_v46 = vpop.f32.mrf.mxu2 }
 0x65d   :  { %v2352_v51 = vadd.f32 %v13584_v21, %v2351_v46 }
 0x65f   :  { %v2622_v53 = vpack.c.bf16 %v2352_v51, %v2352_v51  ;;  %10291 = vmatmul.msk.bf16.gmra.mxu0 %vm570_vm0, %v2083_v22  ;;  %v11548_v22 = vld [vmem:[%s17307_s11 + $0x80] sm:$0xff] }
 0x660   :  { %2575 = vmatpush.bf16.msra.mxu0 %v11548_v22 }
 0x661   :  { %v2678_v63 = vunpack.c.l.b16 %v2622_v53 }
 0x663   :  { %v2683_v28 = vpack.c.b16 %v2678_v63, %v2677_v36  ;;  %v13648_v5 = vpop.f32.mrf.mxu1 }
 0x664   :  { %v2354_v58 = vpop.f32.mrf.mxu2  ;;  %17316 = vst [vmem:[#allocation9_spill] sm:$0xff] %v13648_v5 }
 0x665   :  { %10458 = vmatmul.msk.bf16.gmra.mxu1 %vm570_vm0, %v2683_v28  ;;  %v2355_v18 = vadd.f32 %v13584_v21, %v2354_v58 }
 0x667   :  { %v2623_v45 = vpack.c.bf16 %v2355_v18, %v2355_v18 }
 0x669   :  { %v2679_v50 = vunpack.c.l.b16 %v2623_v45 }
 0x66b   :  { %v13659_v32 = vpop.f32.mrf.mxu1 }
 0x66c   :  { %v2356_v27 = vpop.f32.mrf.mxu2 }
 0x66d   :  { %v2357_v37 = vadd.f32 %v13584_v21, %v2356_v27 }
 0x66f   :  { %v2624_v35 = vpack.c.bf16 %v2357_v37, %v2357_v37  ;;  %10292 = vmatmul.msk.bf16.gmra.mxu0 %vm570_vm0, %v2084_v57 }
 0x671   :  { %v2680_v12 = vunpack.c.l.b16 %v2624_v35 }
 0x673   :  { %v2684_v34 = vpack.c.b16 %v2680_v12, %v2679_v50  ;;  %v13671_v9 = vpop.f32.mrf.mxu1 }
 0x674   :  { %v2359_v8 = vpop.f32.mrf.mxu2  ;;  %17317 = vst [vmem:[#allocation10_spill] sm:$0xff] %v13671_v9 }
 0x675   :  { %10459 = vmatmul.msk.bf16.gmra.mxu1 %vm570_vm0, %v2684_v34  ;;  %v2360_v0 = vadd.f32 %v13584_v21, %v2359_v8 }
 0x677   :  { %v2625_v62 = vpack.c.bf16 %v2360_v0, %v2360_v0 }
 0x679   :  { %v2766_v14 = vunpack.c.l.b16 %v2625_v62 }
 0x67b   :  { %v13681_v58 = vpop.f32.mrf.mxu1 }
 0x67c   :  { %v13639_v29 = vpop.f32.mrf.mxu0  ;;  %v2361_v17 = vpop.f32.mrf.mxu2 }
 0x67d   :  { %v2362_v60 = vadd.f32 %v13584_v21, %v2361_v17 }
 0x67f   :  { %v2626_v31 = vpack.c.bf16 %v2362_v60, %v2362_v60  ;;  %2576 = vmatmul.bf16.vlgmr.msra.gmra.mxu0 %v12596_v10 }
 0x681   :  { %v2767_v39 = vunpack.c.l.b16 %v2626_v31 }
 0x683   :  { %v2774_v16 = vpack.c.b16 %v2767_v39, %v2766_v14  ;;  %v13687_v12 = vpop.f32.mrf.mxu1 }
 0x684   :  { %v13650_v3 = vpop.f32.mrf.mxu0  ;;  %v2364_v55 = vpop.f32.mrf.mxu2  ;;  %17318 = vst [vmem:[#allocation11_spill] sm:$0xff] %v13687_v12 }
 0x685   :  { %10460 = vmatmul.msk.bf16.vlgmr.msra.gmra.mxu2 %vm570_vm0, %v2774_v16  ;;  %v2365_v20 = vadd.f32 %v13584_v21, %v2364_v55 }
 0x687   :  { %v2627_v6 = vpack.c.bf16 %v2365_v20, %v2365_v20 }
 0x689   :  { %v2768_v23 = vunpack.c.l.b16 %v2627_v6 }
 0x68c   :  { %v13665_v19 = vpop.f32.mrf.mxu0  ;;  %v2366_v30 = vpop.f32.mrf.mxu2 }
 0x68d   :  { %v2367_v46 = vadd.f32 %v13584_v21, %v2366_v30 }
 0x68f   :  { %v2628_v51 = vpack.c.bf16 %v2367_v46, %v2367_v46  ;;  %2581 = vmatmul.bf16.gmra.mxu0 %v12611_v15 }
 0x691   :  { %v2769_v36 = vunpack.c.l.b16 %v2628_v51 }
 0x693   :  { %v2775_v63 = vpack.c.b16 %v2769_v36, %v2768_v23 }
 0x694   :  { %v13677_v53 = vpop.f32.mrf.mxu0  ;;  %v2369_v28 = vpop.f32.mrf.mxu2 }
 0x695   :  { %10461 = vmatmul.msk.bf16.gmra.mxu2 %vm570_vm0, %v2775_v63  ;;  %v2370_v18 = vadd.f32 %v13584_v21, %v2369_v28 }
 0x697   :  { %v2629_v57 = vpack.c.bf16 %v2370_v18, %v2370_v18 }
 0x699   :  { %v2770_v35 = vunpack.c.l.b16 %v2629_v57 }
 0x69c   :  { %v13684_v27 = vpop.f32.mrf.mxu0  ;;  %v2371_v45 = vpop.f32.mrf.mxu2 }
 0x69d   :  { %v2372_v37 = vadd.f32 %v13584_v21, %v2371_v45 }
 0x69f   :  { %v2630_v50 = vpack.c.bf16 %v2372_v37, %v2372_v37  ;;  %2586 = vmatmul.bf16.gmra.mxu0 %v12638_v24 }
 0x6a1   :  { %v2771_v34 = vunpack.c.l.b16 %v2630_v50 }
 0x6a3   :  { %v2776_v42 = vpack.c.b16 %v2771_v34, %v2770_v35 }
 0x6a4   :  { %v13690_v8 = vpop.f32.mrf.mxu0  ;;  %v2374_v52 = vpop.f32.mrf.mxu2 }
 0x6a5   :  { %17319 = vst [vmem:[#allocation12_spill] sm:$0xff] %v13690_v8  ;;  %10462 = vmatmul.msk.bf16.gmra.mxu2 %vm570_vm0, %v2776_v42  ;;  %v2375_v54 = vadd.f32 %v13584_v21, %v2374_v52 }
 0x6a7   :  { %v2631_v17 = vpack.c.bf16 %v2375_v54, %v2375_v54 }
 0x6a9   :  { %v2772_v31 = vunpack.c.l.b16 %v2631_v17 }
 0x6ac   :  { %v2376_v60 = vpop.f32.mrf.mxu2  ;;  %v13696_v14 = vpop.f32.mrf.mxu0 }
 0x6ad   :  { %v2377_v61 = vadd.f32 %v13584_v21, %v2376_v60 }
 0x6af   :  { %v2632_v39 = vpack.c.bf16 %v2377_v61, %v2377_v61  ;;  %2591 = vmatmul.bf16.gmra.mxu0 %v12666_v33 }
 0x6b1   :  { %v2773_v55 = vunpack.c.l.b16 %v2632_v39 }
 0x6b3   :  { %v2777_v20 = vpack.c.b16 %v2773_v55, %v2772_v31 }
 0x6b4   :  { %v13701_v6 = vpop.f32.mrf.mxu0 }
 0x6b5   :  { %10463 = vmatmul.msk.bf16.gmra.mxu2 %vm570_vm0, %v2777_v20  ;;  %17320 = vst [vmem:[#allocation13_spill] sm:$0xff] %v13701_v6 }
 0x6bc   :  { %v13704_v23 = vpop.f32.mrf.mxu0 }
 0x6bf   :  { %2596 = vmatmul.bf16.gmra.mxu0 %v12681_v38 }
 0x6c2   :  { %v2738_v0 = vpop.f32.mrf.mxu1 }
 0x6c3   :  { %v2851_v62 = vmul.f32 0.17677669, %v2738_v0 }
 0x6c4   :  { %v13713_v18 = vpop.f32.mrf.mxu0 }
 0x6c5   :  { %v2867_v40 = vsel %vm733_vm1, %v2851_v62, -inf  ;;  %17321 = vst [vmem:[#allocation14_spill] sm:$0xff] %v13713_v18 }
 0x6c6   :  { %2868 = vmax.xlane.f32.xlu1 %v2867_v40 }
 0x6ca   :  { %v2740_v16 = vpop.f32.mrf.mxu1 }
 0x6cb   :  { %v2852_v59 = vmul.f32 0.17677669, %v2740_v16 }
 0x6cc   :  { %v13722_v50 = vpop.f32.mrf.mxu0 }
 0x6cd   :  { %v2870_v56 = vsel %vm733_vm1, %v2852_v59, -inf }
 0x6ce   :  { %2871 = vmax.xlane.f32.xlu2 %v2870_v56 }
 0x6cf   :  { %2601 = vmatmul.bf16.gmra.mxu0 %v12693_v41 }
 0x6d2   :  { %v2743_v30 = vpop.f32.mrf.mxu1 }
 0x6d3   :  { %v2853_v46 = vmul.f32 0.17677669, %v2743_v30 }
 0x6d4   :  { %v13728_v54 = vpop.f32.mrf.mxu0 }
 0x6d5   :  { %v2873_v21 = vsel %vm733_vm1, %v2853_v46, -inf  ;;  %17322 = vst [vmem:[#allocation15_spill] sm:$0xff] %v13728_v54 }
 0x6d6   :  { %2874 = vmax.xlane.f32.xlu0 %v2873_v21 }
 0x6da   :  { %v2745_v22 = vpop.f32.mrf.mxu1 }
 0x6db   :  { %v13706_v51 = vmul.f32 0.17677669, %v2745_v22 }
 0x6dc   :  { %v13735_v60 = vpop.f32.mrf.mxu0 }
 0x6dd   :  { %v2876_v36 = vsel %vm733_vm1, %v13706_v51, -inf }
 0x6de   :  { %2877 = vmax.xlane.f32.xlu1 %v2876_v36 }
 0x6df   :  { %2606 = vmatmul.bf16.gmra.mxu0 %v12705_v44 }
 0x6e2   :  { %v2748_v63 = vpop.f32.mrf.mxu1 }
 0x6e3   :  { %v13711_v28 = vmul.f32 0.17677669, %v2748_v63 }
 0x6e4   :  { %v13738_v61 = vpop.f32.mrf.mxu0 }
 0x6e5   :  { %v2879_v57 = vsel %vm733_vm1, %v13711_v28, -inf  ;;  %17323 = vst [vmem:[#allocation16_spill] sm:$0xff] %v13738_v61 }
 0x6e6   :  { %2880 = vmax.xlane.f32.xlu2 %v2879_v57 }
 0x6ea   :  { %v2750_v45 = vpop.f32.mrf.mxu1 }
 0x6eb   :  { %v13717_v37 = vmul.f32 0.17677669, %v2750_v45 }
 0x6ec   :  { %v13740_v31 = vpop.f32.mrf.mxu0 }
 0x6ed   :  { %v2882_v35 = vsel %vm733_vm1, %v13717_v37, -inf }
 0x6ee   :  { %2883 = vmax.xlane.f32.xlu0 %v2882_v35 }
 0x6ef   :  { %2611 = vmatmul.bf16.gmra.mxu0 %v12717_v47 }
 0x6f2   :  { %v2753_v34 = vpop.f32.mrf.mxu1 }
 0x6f3   :  { %v13724_v42 = vmul.f32 0.17677669, %v2753_v34 }
 0x6f4   :  { %v13743_v39 = vpop.f32.mrf.mxu0 }
 0x6f5   :  { %v2885_v52 = vsel %vm733_vm1, %v13724_v42, -inf  ;;  %17324 = vst [vmem:[#allocation17_spill] sm:$0xff] %v13743_v39 }
 0x6f6   :  { %2886 = vmax.xlane.f32.xlu1 %v2885_v52 }
 0x6fa   :  { %v2755_v0 = vpop.f32.mrf.mxu1 }
 0x6fb   :  { %v13730_v17 = vmul.f32 0.17677669, %v2755_v0 }
 0x6fc   :  { %v13745_v16 = vpop.f32.mrf.mxu0 }
 0x6fd   :  { %v2888_v40 = vsel %vm733_vm1, %v13730_v17, -inf }
 0x6fe   :  { %2889 = vmax.xlane.f32.xlu2 %v2888_v40 }
 0x704   :  { %v13747_v20 = vpop.f32.mrf.mxu0 }
 0x708   :  { %v2831_v55 = vpop.f32.mrf.mxu2 }
 0x70c   :  { %v2582_v21 = vpop.f32.mrf.mxu0 }
 0x710   :  { %v2833_v56 = vpop.f32.mrf.mxu2 }
 0x714   :  { %v2584_v57 = vpop.f32.mrf.mxu0 }
 0x718   :  { %v2836_v35 = vpop.f32.mrf.mxu2 }
 0x71c   :  { %v2587_v12 = vpop.f32.mrf.mxu0 }
 0x739   :  { %v2869_v30 = vpop.xlane.xlu1 %2868 }
 0x73a   :  { %v2915_v22 = vsub.f32 %v2851_v62, %v2869_v30  ;;  %v2838_v30 = vpop.f32.mrf.mxu2 }
 0x73c   :  { %v2931_v36 = vmul.f32 1.442695, %v2915_v22 }
 0x73e   :  { %11893 = vpow2.f32 %v2931_v36 }
 0x741   :  { %v2872_v63 = vpop.xlane.xlu2 %2871 }
 0x742   :  { %v2916_v45 = vsub.f32 %v2852_v59, %v2872_v63  ;;  %v13757_v59 = vmul.f32 0.17677669, %v2831_v55  ;;  %v2589_v63 = vpop.f32.mrf.mxu0  ;;  %v13771_v55 = vld [vmem:[%s17310_s7 + $0x2] ss:$0 sm:$0xff] }
 0x743   :  { %v2590_v5 = vadd.f32 %v13771_v55, %v2589_v63  ;;  %v2583_v4 = vadd.f32 %v13771_v55, %v2582_v21  ;;  %v2580_v21 = vadd.f32 %v13771_v55, %v13747_v20 }
 0x744   :  { %v13749_v34 = vpop.eup %11893  ;;  %v2933_v52 = vmul.f32 1.442695, %v2916_v45 }
 0x745   :  { %v2963_v0 = vsel %vm733_vm1, %v13749_v34, 0.0 }
 0x746   :  { %11895 = vpow2.f32 %v2933_v52  ;;  %2964 = vadd.xlane.f32.xlu0 %v2963_v0 }
 0x749   :  { %v2875_v40 = vpop.xlane.xlu0 %2874 }
 0x74a   :  { %v2917_v39 = vsub.f32 %v2853_v46, %v2875_v40  ;;  %v2891_v46 = vsel %vm733_vm1, %v13757_v59, -inf  ;;  %v13766_v40 = vpop.f32.mrf.mxu2 }
 0x74c   :  { %v13753_v9 = vpop.eup %11895  ;;  %v2935_v62 = vmul.f32 1.442695, %v2917_v39 }
 0x74d   :  { %v2966_v22 = vsel %vm733_vm1, %v13753_v9, 0.0 }
 0x74e   :  { %11897 = vpow2.f32 %v2935_v62  ;;  %2967 = vadd.xlane.f32.xlu1 %v2966_v22  ;;  %v2592_v22 = vpop.f32.mrf.mxu0 }
 0x751   :  { %v2878_v36 = vpop.xlane.xlu1 %2877 }
 0x752   :  { %v2918_v45 = vsub.f32 %v13706_v51, %v2878_v36  ;;  %v13773_v51 = vmul.f32 0.17677669, %v2833_v56  ;;  %v2588_v56 = vadd.f32 %v13771_v55, %v2587_v12  ;;  %v13785_v54 = vpop.f32.mrf.mxu2 }
 0x754   :  { %v13760_v52 = vpop.eup %11897  ;;  %v2937_v0 = vmul.f32 1.442695, %v2918_v45 }
 0x755   :  { %v2969_v39 = vsel %vm733_vm1, %v13760_v52, 0.0 }
 0x756   :  { %11899 = vpow2.f32 %v2937_v0  ;;  %2892 = vmax.xlane.f32.xlu1 %v2891_v46  ;;  %2970 = vadd.xlane.f32.xlu2 %v2969_v39  ;;  %v2593_v0 = vadd.f32 %v13771_v55, %v2592_v22  ;;  %v2894_v39 = vsel %vm733_vm1, %v13773_v51, -inf  ;;  %v2594_v22 = vpop.f32.mrf.mxu0 }
 0x757   :  { %v2595_v18 = vadd.f32 %v13771_v55, %v2594_v22  ;;  %v13806_v22 = vmul.f32 0.17677669, %v2838_v30 }
 0x759   :  { %v2881_v62 = vpop.xlane.xlu2 %2880  ;;  %v2656_v13 = vpack.c.bf16 %v2595_v18, %v2595_v18  ;;  %v2900_v30 = vsel %vm733_vm1, %v13806_v22, -inf }
 0x75a   :  { %v2919_v36 = vsub.f32 %v13711_v28, %v2881_v62  ;;  %v2655_v28 = vpack.c.bf16 %v2593_v0, %v2593_v0  ;;  %v13787_v62 = vmul.f32 0.17677669, %v2836_v35 }
 0x75c   :  { %v13776_v45 = vpop.eup %11899  ;;  %v2939_v61 = vmul.f32 1.442695, %v2919_v36  ;;  %v3093_v6 = vunpack.c.l.b16 %v2655_v28  ;;  %v2897_v0 = vsel %vm733_vm1, %v13787_v62, -inf  ;;  %v11573_v28 = vld [vmem:[%s17304_s9 + $0xf8] sm:$0xff] }
 0x75d   :  { %v2972_v46 = vsel %vm733_vm1, %v13776_v45, 0.0  ;;  %3532 = vmatpush.bf16.msrb.mxu0 %v11573_v28 }
 0x75e   :  { %11901 = vpow2.f32 %v2939_v61  ;;  %2973 = vadd.xlane.f32.xlu0 %v2972_v46  ;;  %2895 = vmax.xlane.f32.xlu2 %v2894_v39  ;;  %v2585_v61 = vadd.f32 %v13771_v55, %v2584_v57  ;;  %v2653_v46 = vpack.c.bf16 %v2588_v56, %v2588_v56  ;;  %v2654_v39 = vpack.c.bf16 %v2590_v5, %v2590_v5 }
 0x75f   :  { %v3094_v5 = vunpack.c.l.b16 %v2656_v13  ;;  %v2651_v57 = vpack.c.bf16 %v2583_v4, %v2583_v4  ;;  %v2846_v4 = vpop.f32.mrf.mxu2 }
 0x760   :  { %v3091_v56 = vunpack.c.l.b16 %v2653_v46  ;;  %v3092_v18 = vunpack.c.l.b16 %v2654_v39 }
 0x761   :  { %v2884_v36 = vpop.xlane.xlu0 %2883  ;;  %v3089_v46 = vunpack.c.l.b16 %v2651_v57 }
 0x762   :  { %v2920_v2 = vsub.f32 %v13717_v37, %v2884_v36  ;;  %v2578_v37 = vadd.f32 %v13771_v55, %v13745_v16  ;;  %v3098_v36 = vpack.c.b16 %v3094_v5, %v3093_v6  ;;  %v11572_v16 = vld [vmem:[%s17304_s9 + $0xf0] sm:$0xff]  ;;  %v13822_v5 = vmul.f32 0.17677669, %v13766_v40 }
 0x763   :  { %3533 = vmatpush.bf16.msrb.mxu0 %v11572_v16 }
 0x764   :  { %v13793_v12 = vpop.eup %11901  ;;  %v2941_v63 = vmul.f32 1.442695, %v2920_v2  ;;  %v2652_v2 = vpack.c.bf16 %v2585_v61, %v2585_v61  ;;  %v2649_v20 = vpack.c.bf16 %v2578_v37, %v2578_v37  ;;  %3119 = vmatpush.bf16.msra.mxu3 %v3098_v36  ;;  %v2650_v61 = vpack.c.bf16 %v2580_v21, %v2580_v21 }
 0x765   :  { %v2975_v35 = vsel %vm733_vm1, %v13793_v12, 0.0 }
 0x766   :  { %11903 = vpow2.f32 %v2941_v63  ;;  %2976 = vadd.xlane.f32.xlu0 %v2975_v35  ;;  %2898 = vmax.xlane.f32.xlu2 %v2897_v0  ;;  %v3090_v39 = vunpack.c.l.b16 %v2652_v2  ;;  %v3097_v63 = vpack.c.b16 %v3092_v18, %v3091_v56  ;;  %v3088_v37 = vunpack.c.l.b16 %v2650_v61  ;;  %v11570_v2 = vld [vmem:[%s17304_s9 + $0xe0] sm:$0xff] }
 0x767   :  { %v2848_v16 = vpop.f32.mrf.mxu2 }
 0x768   :  { %3120 = vmatpush.bf16.msra.mxu3 %v3097_v63  ;;  %v3096_v21 = vpack.c.b16 %v3090_v39, %v3089_v46 }
 0x769   :  { %v2887_v8 = vpop.xlane.xlu1 %2886 }
 0x76a   :  { %v2921_v13 = vsub.f32 %v13724_v42, %v2887_v8  ;;  %v11571_v8 = vld [vmem:[%s17304_s9 + $0xe8] sm:$0xff]  ;;  %v3087_v42 = vunpack.c.l.b16 %v2649_v20  ;;  %v2903_v20 = vsel %vm733_vm1, %v13822_v5, -inf }
 0x76b   :  { %3534 = vmatpush.bf16.msrb.mxu0 %v11571_v8  ;;  %v13857_v8 = vpop.f32.mrf.mxu0 }
 0x76c   :  { %v13812_v35 = vpop.eup %11903  ;;  %v2943_v6 = vmul.f32 1.442695, %v2921_v13  ;;  %3121 = vmatpush.bf16.msra.mxu3 %v3096_v21  ;;  %v3095_v18 = vpack.c.b16 %v3088_v37, %v3087_v42  ;;  %v13834_v13 = vmul.f32 0.17677669, %v2848_v16  ;;  %v11566_v42 = vld [vmem:[%s17304_s9 + $0xc0] sm:$0xff] }
 0x76d   :  { %v2978_v0 = vsel %vm733_vm1, %v13812_v35, 0.0 }
 0x76e   :  { %11905 = vpow2.f32 %v2943_v6  ;;  %2901 = vmax.xlane.f32.xlu0 %v2900_v30  ;;  %2979 = vadd.xlane.f32.xlu1 %v2978_v0  ;;  %v2912_v61 = vsel %vm733_vm1, %v13834_v13, -inf  ;;  %v13847_v6 = vmul.f32 0.17677669, %v2846_v4  ;;  %v11569_v30 = vld [vmem:[%s17304_s9 + $0xd8] sm:$0xff]  ;;  %v11568_v0 = vld [vmem:[%s17304_s9 + $0xd0] sm:$0xff]  ;;  %v11567_v4 = vld [vmem:[%s17304_s9 + $0xc8] sm:$0xff] }
 0x76f   :  { %3535 = vmatpush.bf16.msrb.mxu0 %v11570_v2  ;;  %s12420_s9 = smov 8  }
 0x770   :  { %3122 = vmatpush.bf16.msra.mxu3 %v3095_v18 }
 0x771   :  { %v2890_v57 = vpop.xlane.xlu2 %2889 }
 0x772   :  { %v2922_v56 = vsub.f32 %v13730_v17, %v2890_v57  ;;  %v13837_v17 = vmul.f32 0.17677669, %v13785_v54  ;;  %v2909_v54 = vsel %vm733_vm1, %v13847_v6, -inf }
 0x773   :  { %3536 = vmatpush.bf16.msrb.mxu0 %v11569_v30  ;;  %v13865_v37 = vpop.f32.mrf.mxu0 }
 0x774   :  { %v13828_v28 = vpop.eup %11905  ;;  %v2945_v36 = vmul.f32 1.442695, %v2922_v56  ;;  %v2906_v39 = vsel %vm733_vm1, %v13837_v17, -inf }
 0x775   :  { %v2981_v40 = vsel %vm733_vm1, %v13828_v28, 0.0 }
 0x776   :  { %11907 = vpow2.f32 %v2945_v36  ;;  %2904 = vmax.xlane.f32.xlu0 %v2903_v20  ;;  %2982 = vadd.xlane.f32.xlu1 %v2981_v40 }
 0x777   :  { %3537 = vmatpush.bf16.msrb.mxu0 %v11568_v0 }
 0x77b   :  { %3538 = vmatpush.bf16.msrb.mxu0 %v11567_v4  ;;  %v13868_v57 = vpop.f32.mrf.mxu0 }
 0x77c   :  { %v13841_v46 = vpop.eup %11907 }
 0x77d   :  { %v2984_v63 = vsel %vm733_vm1, %v13841_v46, 0.0 }
 0x77e   :  { %2913 = vmax.xlane.f32.xlu0 %v2912_v61  ;;  %2907 = vmax.xlane.f32.xlu1 %v2906_v39 }
 0x77f   :  { %2985 = vadd.xlane.f32.xlu2 %v2984_v63  ;;  %3539 = vmatpush.bf16.msrb.mxu0 %v11566_v42 }
 0x782   :  { %3540 = vmatmul.bf16.vlgmr.msrb.gmra.mxu0 %v12596_v10 }
 0x783   :  { %v13871_v36 = vpop.f32.mrf.mxu0 }
 0x787   :  { %2910 = vmax.xlane.f32.xlu2 %v2909_v54 }
 0x78b   :  { %v2607_v42 = vpop.f32.mrf.mxu0 }
 0x792   :  { %3545 = vmatmul.bf16.gmra.mxu0 %v12611_v15 }
 0x7a2   :  { %3550 = vmatmul.bf16.gmra.mxu0 %v12638_v24 }
 0x7b2   :  { %3555 = vmatmul.bf16.gmra.mxu0 %v12666_v33 }
 0x7b9   :  { %v2965_v21 = vpop.xlane.xlu0 %2964 }
 0x7ba   :  { %11909 = vrcp.f32 %v2965_v21 }
 0x7c0   :  { %v11910_v56 = vpop.eup %11909 }
 0x7c1   :  { %v2968_v2 = vpop.xlane.xlu1 %2967  ;;  %v3027_v18 = vmul.f32 %v11910_v56, %v13749_v34 }
 0x7c2   :  { %11911 = vrcp.f32 %v2968_v2  ;;  %3560 = vmatmul.bf16.gmra.mxu0 %v12681_v38 }
 0x7c3   :  { %v3043_v20 = vpack.c.bf16 %v3027_v18, %v3027_v18 }
 0x7c5   :  { %v3067_v0 = vunpack.c.l.b16 %v3043_v20 }
 0x7c8   :  { %v11912_v16 = vpop.eup %11911 }
 0x7c9   :  { %v3028_v40 = vmul.f32 %v11912_v16, %v13753_v9  ;;  %v2893_v61 = vpop.xlane.xlu1 %2892  ;;  %v2971_v39 = vpop.xlane.xlu2 %2970 }
 0x7ca   :  { %v2923_v63 = vsub.f32 %v13757_v59, %v2893_v61  ;;  %11913 = vrcp.f32 %v2971_v39 }
 0x7cb   :  { %v3044_v54 = vpack.c.bf16 %v3028_v40, %v3028_v40  ;;  %v2609_v40 = vpop.f32.mrf.mxu0 }
 0x7cc   :  { %v2947_v30 = vmul.f32 1.442695, %v2923_v63 }
 0x7cd   :  { %v3068_v4 = vunpack.c.l.b16 %v3044_v54 }
 0x7ce   :  { %11915 = vpow2.f32 %v2947_v30 }
 0x7cf   :  { %v3075_v34 = vpack.c.b16 %v3068_v4, %v3067_v0 }
 0x7d0   :  { %v11914_v56 = vpop.eup %11913 }
 0x7d1   :  { %v2974_v21 = vpop.xlane.xlu0 %2973  ;;  %v2896_v2 = vpop.xlane.xlu2 %2895  ;;  %10464 = vmatmul.msk.bf16.vlgmr.msra.gmra.mxu3 %vm733_vm1, %v3075_v34  ;;  %v3029_v59 = vmul.f32 %v11914_v56, %v13760_v52 }
 0x7d2   :  { %11917 = vrcp.f32 %v2974_v21  ;;  %v2924_v9 = vsub.f32 %v13773_v51, %v2896_v2  ;;  %3565 = vmatmul.bf16.gmra.mxu0 %v12693_v41 }
 0x7d3   :  { %v3045_v39 = vpack.c.bf16 %v3029_v59, %v3029_v59  ;;  %v2612_v56 = vpop.f32.mrf.mxu0 }
 0x7d4   :  { %v13878_v18 = vpop.eup %11915  ;;  %v2949_v16 = vmul.f32 1.442695, %v2924_v9 }
 0x7d5   :  { %v2987_v20 = vsel %vm733_vm1, %v13878_v18, 0.0  ;;  %v3069_v21 = vunpack.c.l.b16 %v3045_v39 }
 0x7d6   :  { %11919 = vpow2.f32 %v2949_v16  ;;  %2988 = vadd.xlane.f32.xlu1 %v2987_v20 }
 0x7d8   :  { %v11918_v61 = vpop.eup %11917 }
 0x7d9   :  { %v3030_v63 = vmul.f32 %v11918_v61, %v13776_v45  ;;  %v2977_v54 = vpop.xlane.xlu0 %2976  ;;  %v2899_v30 = vpop.xlane.xlu2 %2898  ;;  %v2608_v61 = vadd.f32 %v13771_v55, %v2607_v42 }
 0x7da   :  { %v2925_v51 = vsub.f32 %v13787_v62, %v2899_v30  ;;  %11921 = vrcp.f32 %v2977_v54  ;;  %v2613_v62 = vadd.f32 %v13771_v55, %v2612_v56  ;;  %v2598_v56 = vadd.f32 %v13771_v55, %v13857_v8 }
 0x7db   :  { %v3046_v0 = vpack.c.bf16 %v3030_v63, %v3030_v63  ;;  %v2610_v63 = vadd.f32 %v13771_v55, %v2609_v40  ;;  %v2614_v42 = vpop.f32.mrf.mxu0 }
 0x7dc   :  { %v13886_v4 = vpop.eup %11919  ;;  %v2951_v52 = vmul.f32 1.442695, %v2925_v51 }
 0x7dd   :  { %v2990_v34 = vsel %vm733_vm1, %v13886_v4, 0.0  ;;  %v3070_v2 = vunpack.c.l.b16 %v3046_v0  ;;  %v2663_v0 = vpack.c.bf16 %v2613_v62, %v2613_v62  ;;  %v2662_v40 = vpack.c.bf16 %v2610_v63, %v2610_v63 }
 0x7de   :  { %11923 = vpow2.f32 %v2951_v52  ;;  %2991 = vadd.xlane.f32.xlu2 %v2990_v34  ;;  %v2603_v52 = vadd.f32 %v13771_v55, %v13868_v57  ;;  %v2661_v34 = vpack.c.bf16 %v2608_v61, %v2608_v61 }
 0x7df   :  { %v3076_v9 = vpack.c.b16 %v3070_v2, %v3069_v21  ;;  %v2615_v21 = vadd.f32 %v13771_v55, %v2614_v42 }
 0x7e0   :  { %v11922_v16 = vpop.eup %11921  ;;  %v2659_v62 = vpack.c.bf16 %v2603_v52, %v2603_v52 }
 0x7e1   :  { %v2902_v45 = vpop.xlane.xlu0 %2901  ;;  %v2980_v59 = vpop.xlane.xlu1 %2979  ;;  %10465 = vmatmul.msk.bf16.gmra.mxu3 %vm733_vm1, %v3076_v9  ;;  %v3031_v54 = vmul.f32 %v11922_v16, %v13793_v12 }
 0x7e2   :  { %v2926_v20 = vsub.f32 %v13806_v22, %v2902_v45  ;;  %11925 = vrcp.f32 %v2980_v59  ;;  %v2605_v22 = vadd.f32 %v13771_v55, %v13871_v36  ;;  %v3178_v45 = vunpack.c.l.b16 %v2663_v0  ;;  %3570 = vmatmul.bf16.gmra.mxu0 %v12705_v44 }
 0x7e3   :  { %v3047_v12 = vpack.c.bf16 %v3031_v54, %v3031_v54  ;;  %v2664_v59 = vpack.c.bf16 %v2615_v21, %v2615_v21  ;;  %v2600_v36 = vadd.f32 %v13771_v55, %v13865_v37  ;;  %v3176_v54 = vunpack.c.l.b16 %v2661_v34 }
 0x7e4   :  { %v13895_v39 = vpop.eup %11923  ;;  %v2953_v30 = vmul.f32 1.442695, %v2926_v20  ;;  %v2660_v20 = vpack.c.bf16 %v2605_v22, %v2605_v22  ;;  %v3174_v37 = vunpack.c.l.b16 %v2659_v62 }
 0x7e5   :  { %v2993_v51 = vsel %vm733_vm1, %v13895_v39, 0.0  ;;  %v3071_v25 = vunpack.c.l.b16 %v3047_v12  ;;  %v2658_v55 = vpack.c.bf16 %v2600_v36, %v2600_v36 }
 0x7e6   :  { %11927 = vpow2.f32 %v2953_v30  ;;  %2994 = vadd.xlane.f32.xlu0 %v2993_v51  ;;  %v3177_v30 = vunpack.c.l.b16 %v2662_v40  ;;  %v3179_v51 = vunpack.c.l.b16 %v2664_v59 }
 0x7e8   :  { %v11926_v2 = vpop.eup %11925  ;;  %v3183_v21 = vpack.c.b16 %v3179_v51, %v3178_v45  ;;  %v3182_v22 = vpack.c.b16 %v3177_v30, %v3176_v54 }
 0x7e9   :  { %v3032_v9 = vmul.f32 %v11926_v2, %v13812_v35  ;;  %v2905_v57 = vpop.xlane.xlu0 %2904  ;;  %v2983_v16 = vpop.xlane.xlu1 %2982  ;;  %v2657_v2 = vpack.c.bf16 %v2598_v56, %v2598_v56  ;;  %v3173_v56 = vunpack.c.l.b16 %v2658_v55 }
 0x7ea   :  { %v2927_v61 = vsub.f32 %v13822_v5, %v2905_v57  ;;  %11929 = vrcp.f32 %v2983_v16  ;;  %v3175_v5 = vunpack.c.l.b16 %v2660_v20  ;;  %3204 = vmatpush.bf16.msra.mxu1 %v3183_v21 }
 0x7eb   :  { %v3048_v63 = vpack.c.bf16 %v3032_v9, %v3032_v9  ;;  %v3172_v45 = vunpack.c.l.b16 %v2657_v2 }
 0x7ec   :  { %v13912_v42 = vpop.eup %11927  ;;  %v2955_v8 = vmul.f32 1.442695, %v2927_v61  ;;  %v3181_v59 = vpack.c.b16 %v3175_v5, %v3174_v37 }
 0x7ed   :  { %v2996_v35 = vsel %vm733_vm1, %v13912_v42, 0.0  ;;  %v3072_v0 = vunpack.c.l.b16 %v3048_v63 }
 0x7ee   :  { %11931 = vpow2.f32 %v2955_v8  ;;  %2997 = vadd.xlane.f32.xlu1 %v2996_v35  ;;  %3205 = vmatpush.bf16.msra.mxu1 %v3182_v22  ;;  %v11557_v22 = vld [vmem:[%s17311_s0 + $0x28] sm:$0xff] }
 0x7ef   :  { %v3077_v52 = vpack.c.b16 %v3072_v0, %v3071_v25  ;;  %3284 = vmatpush.bf16.msrb.mxu2 %v11557_v22  ;;  %v13982_v22 = vld [vmem:[%s17308_s5 + $0x3] ss:$0 sm:$0xff]  ;;  %s17332_s5 = sld [smem:[#allocation55_spill]] }
 0x7f0   :  { %v11930_v16 = vpop.eup %11929 }
 0x7f1   :  { %v2914_v34 = vpop.xlane.xlu0 %2913  ;;  %v2908_v40 = vpop.xlane.xlu1 %2907  ;;  %10466 = vmatmul.msk.bf16.gmra.mxu3 %vm733_vm1, %v3077_v52  ;;  %v3033_v61 = vmul.f32 %v11930_v16, %v13828_v28  ;;  %v11565_v16 = vld [vmem:[%s17306_s2 + $0xf8] sm:$0xff] }
 0x7f2   :  { %v2930_v12 = vsub.f32 %v13834_v13, %v2914_v34  ;;  %v2928_v9 = vsub.f32 %v13837_v17, %v2908_v40  ;;  %v2986_v57 = vpop.xlane.xlu2 %2985  ;;  %3206 = vmatpush.bf16.msra.mxu1 %v3181_v59  ;;  %v3180_v13 = vpack.c.b16 %v3173_v56, %v3172_v45  ;;  %3575 = vmatmul.bf16.gmra.mxu0 %v12717_v47  ;;  %v11556_v34 = vld [vmem:[%s17311_s0 + $0x20] sm:$0xff]  ;;  %v11564_v56 = vld [vmem:[%s17306_s2 + $0xf0] sm:$0xff] }
 0x7f3   :  { %11933 = vrcp.f32 %v2986_v57  ;;  %v3049_v63 = vpack.c.bf16 %v3033_v61, %v3033_v61  ;;  %3285 = vmatpush.bf16.msrb.mxu2 %v11556_v34  ;;  %3413 = vmatpush.bf16.msrb.mxu3 %v11565_v16  ;;  %v11563_v61 = vld [vmem:[%s17306_s2 + $0xe8] sm:$0xff] }
 0x7f4   :  { %v13919_v36 = vpop.eup %11931  ;;  %v2961_v25 = vmul.f32 1.442695, %v2930_v12  ;;  %v2957_v62 = vmul.f32 1.442695, %v2928_v9 }
 0x7f5   :  { %v2999_v20 = vsel %vm733_vm1, %v13919_v36, 0.0  ;;  %v3073_v55 = vunpack.c.l.b16 %v3049_v63 }
 0x7f6   :  { %11935 = vpow2.f32 %v2961_v25  ;;  %3000 = vadd.xlane.f32.xlu2 %v2999_v20  ;;  %3207 = vmatpush.bf16.msra.mxu1 %v3180_v13 }
 0x7f7   :  { %11937 = vpow2.f32 %v2957_v62  ;;  %3414 = vmatpush.bf16.msrb.mxu3 %v11564_v56  ;;  %v11558_v56 = vld [vmem:[%s17306_s2 + $0xc0] sm:$0xff] }
 0x7f9   :  { %v11934_v17 = vpop.eup %11933 }
 0x7fa   :  { %v3034_v54 = vmul.f32 %v11934_v17, %v13841_v46  ;;  %v2911_v30 = vpop.xlane.xlu2 %2910 }
 0x7fb   :  { %v2929_v51 = vsub.f32 %v13847_v6, %v2911_v30  ;;  %3415 = vmatpush.bf16.msrb.mxu3 %v11563_v61  ;;  %v11562_v30 = vld [vmem:[%s17306_s2 + $0xe0] sm:$0xff] }
 0x7fc   :  { %v13927_v8 = vpop.eup %11935  ;;  %v3050_v35 = vpack.c.bf16 %v3034_v54, %v3034_v54 }
 0x7fd   :  { %v13929_v0 = vpop.eup %11937  ;;  %v2959_v28 = vmul.f32 1.442695, %v2929_v51  ;;  %v3008_v21 = vsel %vm733_vm1, %v13927_v8, 0.0 }
 0x7fe   :  { %3009 = vadd.xlane.f32.xlu2 %v3008_v21  ;;  %v3002_v2 = vsel %vm733_vm1, %v13929_v0, 0.0  ;;  %v3074_v37 = vunpack.c.l.b16 %v3050_v35 }
 0x7ff   :  { %11939 = vpow2.f32 %v2959_v28  ;;  %3003 = vadd.xlane.f32.xlu0 %v3002_v2  ;;  %v13943_v52 = vpop.f32.mrf.mxu0  ;;  %3416 = vmatpush.bf16.msrb.mxu3 %v11562_v30 }
 0x800   :  { %v3078_v46 = vpack.c.b16 %v3074_v37, %v3073_v55  ;;  %v11561_v55 = vld [vmem:[%s17306_s2 + $0xd8] sm:$0xff] }
 0x802   :  { %10467 = vmatmul.msk.bf16.gmra.mxu3 %vm733_vm1, %v3078_v46  ;;  %v11560_v46 = vld [vmem:[%s17306_s2 + $0xd0] sm:$0xff] }
 0x803   :  { %3417 = vmatpush.bf16.msrb.mxu3 %v11561_v55 }
 0x805   :  { %v13936_v6 = vpop.eup %11939 }
 0x806   :  { %v3005_v5 = vsel %vm733_vm1, %v13936_v6, 0.0 }
 0x807   :  { %3006 = vadd.xlane.f32.xlu1 %v3005_v5  ;;  %v13951_v40 = vpop.f32.mrf.mxu0  ;;  %3418 = vmatpush.bf16.msrb.mxu3 %v11560_v46 }
 0x80f   :  { %v13953_v12 = vpop.f32.mrf.mxu0 }
 0x817   :  { %v13955_v57 = vpop.f32.mrf.mxu0 }
 0x81f   :  { %v3551_v20 = vpop.f32.mrf.mxu0 }
 0x827   :  { %v3553_v2 = vpop.f32.mrf.mxu0 }
 0x82f   :  { %v3556_v16 = vpop.f32.mrf.mxu0 }
 0x849   :  { %v2989_v9 = vpop.xlane.xlu1 %2988 }
 0x84a   :  { %11941 = vrcp.f32 %v2989_v9 }
 0x850   :  { %v11942_v59 = vpop.eup %11941 }
 0x851   :  { %v2992_v45 = vpop.xlane.xlu2 %2991  ;;  %v3035_v62 = vmul.f32 %v11942_v59, %v13878_v18 }
 0x852   :  { %11943 = vrcp.f32 %v2992_v45  ;;  %v11559_v45 = vld [vmem:[%s17306_s2 + $0xc8] sm:$0xff] }
 0x853   :  { %v3051_v17 = vpack.c.bf16 %v3035_v62, %v3035_v62  ;;  %3419 = vmatpush.bf16.msrb.mxu3 %v11559_v45  ;;  %v3549_v45 = vadd.f32 %v13982_v22, %v13955_v57 }
 0x854   :  { %v3124_v25 = vpop.f32.mrf.mxu3 }
 0x855   :  { %v3152_v18 = vunpack.c.l.b16 %v3051_v17 }
 0x857   :  { %3420 = vmatpush.bf16.msrb.mxu3 %v11558_v56 }
 0x858   :  { %v11944_v13 = vpop.eup %11943 }
 0x859   :  { %v3036_v63 = vmul.f32 %v11944_v13, %v13886_v4  ;;  %v2995_v54 = vpop.xlane.xlu0 %2994 }
 0x85a   :  { %11945 = vrcp.f32 %v2995_v54  ;;  %v3554_v54 = vadd.f32 %v13982_v22, %v3553_v2  ;;  %3421 = vmatmul.bf16.vlgmr.msrb.gmra.mxu3 %v12596_v10 }
 0x85b   :  { %v3052_v51 = vpack.c.bf16 %v3036_v63, %v3036_v63 }
 0x85c   :  { %v3126_v35 = vpop.f32.mrf.mxu3 }
 0x85d   :  { %v3153_v28 = vunpack.c.l.b16 %v3052_v51  ;;  %v3229_v21 = vpack.c.bf16 %v3126_v35, %v3124_v25  ;;  %v3557_v25 = vadd.f32 %v13982_v22, %v3556_v16 }
 0x85f   :  { %v3160_v37 = vpack.c.b16 %v3153_v28, %v3152_v18  ;;  %10484 = vmatmul.msk.bf16.vlgmr.msrb.gmra.mxu2 %vm570_vm0, %v3229_v21  ;;  %v3722_v30 = vpack.c.bf16 %v3557_v25, %v3557_v25  ;;  %v3558_v28 = vpop.f32.mrf.mxu0 }
 0x860   :  { %v11946_v5 = vpop.eup %11945  ;;  %v3559_v21 = vadd.f32 %v13982_v22, %v3558_v28 }
 0x861   :  { %v2998_v4 = vpop.xlane.xlu1 %2997  ;;  %10468 = vmatmul.msk.bf16.vlgmr.msra.gmra.mxu1 %vm733_vm1, %v3160_v37  ;;  %v3037_v9 = vmul.f32 %v11946_v5, %v13895_v39  ;;  %v3552_v39 = vadd.f32 %v13982_v22, %v3551_v20  ;;  %v3782_v55 = vunpack.c.l.b16 %v3722_v30  ;;  %v3721_v20 = vpack.c.bf16 %v3554_v54, %v3554_v54 }
 0x862   :  { %11947 = vrcp.f32 %v2998_v4  ;;  %v3723_v37 = vpack.c.bf16 %v3559_v21, %v3559_v21  ;;  %v3542_v21 = vadd.f32 %v13982_v22, %v13943_v52 }
 0x863   :  { %v3053_v62 = vpack.c.bf16 %v3037_v9, %v3037_v9  ;;  %v3720_v4 = vpack.c.bf16 %v3552_v39, %v3552_v39 }
 0x864   :  { %v3129_v34 = vpop.f32.mrf.mxu3  ;;  %v3783_v46 = vunpack.c.l.b16 %v3723_v37 }
 0x865   :  { %v3154_v35 = vunpack.c.l.b16 %v3053_v62  ;;  %v3780_v56 = vunpack.c.l.b16 %v3720_v4 }
 0x866   :  { %v3787_v16 = vpack.c.b16 %v3783_v46, %v3782_v55 }
 0x868   :  { %v11948_v59 = vpop.eup %11947  ;;  %v3810_v62 = vsel %vm570_vm0, %v3787_v16, 0 }
 0x869   :  { %v3038_v61 = vmul.f32 %v11948_v59, %v13912_v42  ;;  %v3001_v13 = vpop.xlane.xlu2 %3000  ;;  %v3781_v59 = vunpack.c.l.b16 %v3721_v20  ;;  %3816 = vmatpush.bf16.xpose.msra.mxu2 %v3810_v62 }
 0x86a   :  { %11949 = vrcp.f32 %v3001_v13  ;;  %3426 = vmatmul.bf16.gmra.mxu3 %v12611_v15 }
 0x86b   :  { %v3054_v17 = vpack.c.bf16 %v3038_v61, %v3038_v61  ;;  %v3786_v39 = vpack.c.b16 %v3781_v59, %v3780_v56 }
 0x86c   :  { %v3131_v63 = vpop.f32.mrf.mxu3 }
 0x86d   :  { %v3230_v51 = vpack.c.bf16 %v3131_v63, %v3129_v34  ;;  %v3155_v18 = vunpack.c.l.b16 %v3054_v17  ;;  %v3547_v34 = vadd.f32 %v13982_v22, %v13953_v12  ;;  %v3719_v17 = vpack.c.bf16 %v3549_v45, %v3549_v45 }
 0x86f   :  { %10485 = vmatmul.msk.bf16.gmra.mxu2 %vm570_vm0, %v3230_v51  ;;  %v3161_v42 = vpack.c.b16 %v3155_v18, %v3154_v35  ;;  %v3718_v61 = vpack.c.bf16 %v3547_v34, %v3547_v34  ;;  %v3779_v18 = vunpack.c.l.b16 %v3719_v17 }
 0x870   :  { %v11950_v5 = vpop.eup %11949 }
 0x871   :  { %10469 = vmatmul.msk.bf16.gmra.mxu1 %vm733_vm1, %v3161_v42  ;;  %v3039_v25 = vmul.f32 %v11950_v5, %v13919_v36  ;;  %v3010_v12 = vpop.xlane.xlu2 %3009  ;;  %v3778_v51 = vunpack.c.l.b16 %v3718_v61  ;;  %v3807_v36 = vsel %vm570_vm0, %v3786_v39, 0  ;;  %v3544_v42 = vadd.f32 %v13982_v22, %v13951_v40 }
 0x872   :  { %v3004_v2 = vpop.xlane.xlu0 %3003  ;;  %3817 = vmatpush.bf16.xpose.msra.mxu2 %v3807_v36 }
 0x873   :  { %11951 = vrcp.f32 %v3004_v2  ;;  %v3055_v63 = vpack.c.bf16 %v3039_v25, %v3039_v25  ;;  %v3785_v20 = vpack.c.b16 %v3779_v18, %v3778_v51  ;;  %v3716_v2 = vpack.c.bf16 %v3542_v21, %v3542_v21 }
 0x874   :  { %v3134_v9 = vpop.f32.mrf.mxu3  ;;  %v3717_v46 = vpack.c.bf16 %v3544_v42, %v3544_v42 }
 0x875   :  { %v3156_v55 = vunpack.c.l.b16 %v3055_v63  ;;  %v3804_v40 = vsel %vm570_vm0, %v3785_v20, 0 }
 0x876   :  { %v3777_v16 = vunpack.c.l.b16 %v3717_v46 }
 0x879   :  { %v11952_v13 = vpop.eup %11951 }
 0x87a   :  { %v3040_v54 = vmul.f32 %v11952_v13, %v13929_v0  ;;  %v3007_v30 = vpop.xlane.xlu1 %3006  ;;  %3818 = vmatpush.bf16.xpose.msra.mxu2 %v3804_v40  ;;  %3431 = vmatmul.bf16.gmra.mxu3 %v12638_v24 }
 0x87b   :  { %11953 = vrcp.f32 %v3007_v30 }
 0x87c   :  { %v3056_v35 = vpack.c.bf16 %v3040_v54, %v3040_v54  ;;  %v3136_v57 = vpop.f32.mrf.mxu3  ;;  %11955 = vrcp.f32 %v3010_v12 }
 0x87d   :  { %v3231_v28 = vpack.c.bf16 %v3136_v57, %v3134_v9  ;;  %v3776_v9 = vunpack.c.l.b16 %v3716_v2  ;;  %v2221_v57 = vadd.f32 %v13570_v49, %v13639_v29 }
 0x87e   :  { %v3157_v37 = vunpack.c.l.b16 %v3056_v35 }
 0x87f   :  { %10486 = vmatmul.msk.bf16.gmra.mxu2 %vm570_vm0, %v3231_v28  ;;  %v3784_v25 = vpack.c.b16 %v3777_v16, %v3776_v9 }
 0x880   :  { %v3162_v0 = vpack.c.b16 %v3157_v37, %v3156_v55 }
 0x881   :  { %v11954_v4 = vpop.eup %11953  ;;  %v3801_v39 = vsel %vm570_vm0, %v3784_v25, 0 }
 0x882   :  { %10470 = vmatmul.msk.bf16.gmra.mxu1 %vm733_vm1, %v3162_v0  ;;  %v11956_v5 = vpop.eup %11955  ;;  %v3041_v52 = vmul.f32 %v11954_v4, %v13936_v6  ;;  %3819 = vmatpush.bf16.xpose.msra.mxu2 %v3801_v39 }
 0x883   :  { %v3042_v45 = vmul.f32 %v11956_v5, %v13927_v8  ;;  %v3561_v8 = vpop.f32.mrf.mxu0 }
 0x884   :  { %v3057_v56 = vpack.c.bf16 %v3041_v52, %v3041_v52 }
 0x885   :  { %v3139_v34 = vpop.f32.mrf.mxu3  ;;  %v3058_v59 = vpack.c.bf16 %v3042_v45, %v3042_v45 }
 0x886   :  { %v3158_v62 = vunpack.c.l.b16 %v3057_v56 }
 0x887   :  { %v3159_v17 = vunpack.c.l.b16 %v3058_v59 }
 0x889   :  { %v3163_v6 = vpack.c.b16 %v3159_v17, %v3158_v62 }
 0x88a   :  { %3436 = vmatmul.bf16.gmra.mxu3 %v12666_v33 }
 0x88b   :  { %v3563_v63 = vpop.f32.mrf.mxu0 }
 0x88d   :  { %v3141_v61 = vpop.f32.mrf.mxu3 }
 0x88e   :  { %v3232_v13 = vpack.c.bf16 %v3141_v61, %v3139_v34  ;;  %v2226_v34 = vadd.f32 %v13587_v26, %v13665_v19 }
 0x890   :  { %10487 = vmatmul.msk.bf16.gmra.mxu2 %vm570_vm0, %v3232_v13 }
 0x892   :  { %10471 = vmatmul.msk.bf16.gmra.mxu1 %vm733_vm1, %v3163_v6 }
 0x893   :  { %v3566_v54 = vpop.f32.mrf.mxu0 }
 0x894   :  { %v3567_v45 = vadd.f32 %v13982_v22, %v3566_v54 }
 0x896   :  { %v3726_v39 = vpack.c.bf16 %v3567_v45, %v3567_v45 }
 0x898   :  { %v3871_v54 = vunpack.c.l.b16 %v3726_v39 }
 0x89a   :  { %3441 = vmatmul.bf16.gmra.mxu3 %v12681_v38 }
 0x89b   :  { %v3568_v12 = vpop.f32.mrf.mxu0 }
 0x89c   :  { %v3569_v59 = vadd.f32 %v13982_v22, %v3568_v12  ;;  %v3562_v12 = vadd.f32 %v13982_v22, %v3561_v8 }
 0x89e   :  { %v3727_v6 = vpack.c.bf16 %v3569_v59, %v3569_v59 }
 0x8a3   :  { %v3571_v30 = vpop.f32.mrf.mxu0 }
 0x8a4   :  { %v3572_v49 = vadd.f32 %v13982_v22, %v3571_v30 }
 0x8a6   :  { %v3728_v25 = vpack.c.bf16 %v3572_v49, %v3572_v49 }
 0x8a8   :  { %v3873_v30 = vunpack.c.l.b16 %v3728_v25 }
 0x8aa   :  { %3446 = vmatmul.bf16.gmra.mxu3 %v12693_v41 }
 0x8ab   :  { %v3573_v51 = vpop.f32.mrf.mxu0 }
 0x8ac   :  { %v3574_v29 = vadd.f32 %v13982_v22, %v3573_v51 }
 0x8ae   :  { %v3729_v62 = vpack.c.bf16 %v3574_v29, %v3574_v29 }
 0x8b0   :  { %v3874_v26 = vunpack.c.l.b16 %v3729_v62  ;;  %v14066_v62 = vld [vmem:[%s17309_s10 + $0x3] ss:$0 sm:$0xff] }
 0x8b3   :  { %v3576_v36 = vpop.f32.mrf.mxu0 }
 0x8b4   :  { %v3577_v42 = vadd.f32 %v13982_v22, %v3576_v36 }
 0x8b6   :  { %v3730_v0 = vpack.c.bf16 %v3577_v42, %v3577_v42 }
 0x8b8   :  { %v3875_v46 = vunpack.c.l.b16 %v3730_v0 }
 0x8ba   :  { %3451 = vmatmul.bf16.gmra.mxu3 %v12705_v44 }
 0x8bb   :  { %v3578_v4 = vpop.f32.mrf.mxu0 }
 0x8bc   :  { %v3579_v20 = vadd.f32 %v13982_v22, %v3578_v4  ;;  %v3724_v4 = vpack.c.bf16 %v3562_v12, %v3562_v12  ;;  %v11581_v12 = vld [vmem:[%s17307_s11 + $0xf8] sm:$0xff] }
 0x8bd   :  { %3651 = vmatpush.bf16.msrb.mxu1 %v11581_v12 }
 0x8be   :  { %v3731_v5 = vpack.c.bf16 %v3579_v20, %v3579_v20  ;;  %v3869_v49 = vunpack.c.l.b16 %v3724_v4  ;;  %v11578_v4 = vld [vmem:[%s17307_s11 + $0xe0] sm:$0xff] }
 0x8c0   :  { %v3876_v52 = vunpack.c.l.b16 %v3731_v5 }
 0x8c2   :  { %v3880_v16 = vpack.c.b16 %v3876_v52, %v3875_v46 }
 0x8c4   :  { %v3903_v61 = vsel %vm570_vm0, %v3880_v16, 0 }
 0x8c5   :  { %3909 = vmatpush.bf16.xpose.msra.mxu3 %v3903_v61 }
 0x8ca   :  { %3456 = vmatmul.bf16.gmra.mxu3 %v12717_v47 }
 0x8dd   :  { %v3422_v40 = vpop.f32.mrf.mxu3 }
 0x8de   :  { %v3209_v35 = vpop.f32.mrf.mxu1 }
 0x8e2   :  { %v3287_v18 = vpop.f32.mrf.mxu2 }
 0x8e3   :  { %v14028_v28 = vadd.f32 %v3287_v18, %v2221_v57  ;;  %v3879_v57 = vpack.c.b16 %v3874_v26, %v3873_v30  ;;  %v3564_v18 = vadd.f32 %v13982_v22, %v3563_v63 }
 0x8e5   :  { %v3424_v19 = vpop.f32.mrf.mxu3  ;;  %v3900_v36 = vsel %vm570_vm0, %v3879_v57, 0  ;;  %v3725_v20 = vpack.c.bf16 %v3564_v18, %v3564_v18 }
 0x8e6   :  { %v3211_v21 = vpop.f32.mrf.mxu1  ;;  %3910 = vmatpush.bf16.xpose.msra.mxu3 %v3900_v36  ;;  %v3425_v39 = vadd.f32 %v14066_v62, %v3424_v19 }
 0x8e7   :  { %v3233_v55 = vpack.c.bf16 %v3211_v21, %v3209_v35  ;;  %v3872_v35 = vunpack.c.l.b16 %v3727_v6  ;;  %v3870_v8 = vunpack.c.l.b16 %v3725_v20 }
 0x8e9   :  { %10488 = vmatmul.msk.bf16.gmra.mxu2 %vm570_vm0, %v3233_v55  ;;  %v3878_v42 = vpack.c.b16 %v3872_v35, %v3871_v54  ;;  %v2231_v55 = vadd.f32 %v13605_v1, %v13684_v27  ;;  %v3877_v52 = vpack.c.b16 %v3870_v8, %v3869_v49 }
 0x8ea   :  { %v14032_v37 = vpop.f32.mrf.mxu2 }
 0x8eb   :  { %v3897_v5 = vsel %vm570_vm0, %v3878_v42, 0  ;;  %v3894_v1 = vsel %vm570_vm0, %v3877_v52, 0 }
 0x8ed   :  { %v3427_v0 = vpop.f32.mrf.mxu3 }
 0x8ee   :  { %v3214_v2 = vpop.f32.mrf.mxu1  ;;  %3911 = vmatpush.bf16.xpose.msra.mxu3 %v3897_v5  ;;  %v3428_v35 = vadd.f32 %v14066_v62, %v3427_v0 }
 0x8f0   :  { %v3702_v19 = vpack.c.bf16 %v3428_v35, %v3428_v35 }
 0x8f2   :  { %v3292_v9 = vpop.f32.mrf.mxu2  ;;  %v3758_v42 = vunpack.c.l.b16 %v3702_v19 }
 0x8f3   :  { %v14040_v56 = vadd.f32 %v3292_v9, %v2226_v34  ;;  %v2236_v9 = vadd.f32 %v13619_v7, %v13696_v14  ;;  %v3701_v7 = vpack.c.bf16 %v3425_v39, %v3425_v39  ;;  %v11574_v39 = vld [vmem:[%s17307_s11 + $0xc0] sm:$0xff] }
 0x8f5   :  { %v3429_v34 = vpop.f32.mrf.mxu3  ;;  %v3757_v26 = vunpack.c.l.b16 %v3701_v7 }
 0x8f6   :  { %v3216_v13 = vpop.f32.mrf.mxu1  ;;  %3912 = vmatpush.bf16.xpose.msra.mxu3 %v3894_v1  ;;  %v3430_v57 = vadd.f32 %v14066_v62, %v3429_v34  ;;  %v11576_v34 = vld [vmem:[%s17307_s11 + $0xd0] sm:$0xff] }
 0x8f7   :  { %v3234_v17 = vpack.c.bf16 %v3216_v13, %v3214_v2 }
 0x8f8   :  { %v3703_v36 = vpack.c.bf16 %v3430_v57, %v3430_v57 }
 0x8f9   :  { %10489 = vmatmul.msk.bf16.gmra.mxu2 %vm570_vm0, %v3234_v17  ;;  %v3423_v17 = vadd.f32 %v14066_v62, %v3422_v40  ;;  %v11580_v40 = vld [vmem:[%s17307_s11 + $0xf0] sm:$0xff] }
 0x8fa   :  { %v14045_v51 = vpop.f32.mrf.mxu2  ;;  %3652 = vmatpush.bf16.msrb.mxu1 %v11580_v40 }
 0x8fb   :  { %v3700_v6 = vpack.c.bf16 %v3423_v17, %v3423_v17 }
 0x8fd   :  { %v3432_v16 = vpop.f32.mrf.mxu3  ;;  %v3756_v30 = vunpack.c.l.b16 %v3700_v6 }
 0x8fe   :  { %v3433_v49 = vadd.f32 %v14066_v62, %v3432_v16 }
 0x8ff   :  { %v3219_v21 = vpop.f32.mrf.mxu1  ;;  %v3764_v54 = vpack.c.b16 %v3757_v26, %v3756_v30 }
 0x902   :  { %v3297_v2 = vpop.f32.mrf.mxu2 }
 0x903   :  { %v14052_v46 = vadd.f32 %v3297_v2, %v2231_v55  ;;  %v3759_v55 = vunpack.c.l.b16 %v3703_v36  ;;  %v2246_v36 = vadd.f32 %v13637_v48, %v13722_v50 }
 0x905   :  { %v3434_v13 = vpop.f32.mrf.mxu3  ;;  %v3765_v2 = vpack.c.b16 %v3759_v55, %v3758_v42 }
 0x906   :  { %v3435_v8 = vadd.f32 %v14066_v62, %v3434_v13 }
 0x907   :  { %v3221_v29 = vpop.f32.mrf.mxu1 }
 0x908   :  { %v3235_v22 = vpack.c.bf16 %v3221_v29, %v3219_v21  ;;  %v11579_v21 = vld [vmem:[%s17307_s11 + $0xe8] sm:$0xff]  ;;  %v11577_v29 = vld [vmem:[%s17307_s11 + $0xd8] sm:$0xff]  ;;  %v3705_v16 = vpack.c.bf16 %v3435_v8, %v3435_v8 }
 0x909   :  { %3653 = vmatpush.bf16.msrb.mxu1 %v11579_v21 }
 0x90a   :  { %10490 = vmatmul.msk.bf16.gmra.mxu2 %vm570_vm0, %v3235_v22  ;;  %v14056_v63 = vpop.f32.mrf.mxu2  ;;  %v3761_v17 = vunpack.c.l.b16 %v3705_v16 }
 0x90d   :  { %v3437_v14 = vpop.f32.mrf.mxu3  ;;  %3654 = vmatpush.bf16.msrb.mxu1 %v11578_v4 }
 0x90e   :  { %v3438_v7 = vadd.f32 %v14066_v62, %v3437_v14  ;;  %v2241_v14 = vadd.f32 %v13629_v11, %v13704_v23 }
 0x90f   :  { %v3224_v27 = vpop.f32.mrf.mxu1 }
 0x910   :  { %v3706_v26 = vpack.c.bf16 %v3438_v7, %v3438_v7 }
 0x911   :  { %3655 = vmatpush.bf16.msrb.mxu1 %v11577_v29 }
 0x912   :  { %v3762_v35 = vunpack.c.l.b16 %v3706_v26 }
 0x913   :  { %v3302_v45 = vpop.f32.mrf.mxu2 }
 0x914   :  { %v14061_v59 = vadd.f32 %v3302_v45, %v2236_v9  ;;  %v3704_v9 = vpack.c.bf16 %v3433_v49, %v3433_v49 }
 0x915   :  { %v3439_v18 = vpop.f32.mrf.mxu3  ;;  %3656 = vmatpush.bf16.msrb.mxu1 %v11576_v34 }
 0x916   :  { %v3760_v13 = vunpack.c.l.b16 %v3704_v9  ;;  %v3440_v30 = vadd.f32 %v14066_v62, %v3439_v18 }
 0x917   :  { %v3226_v25 = vpop.f32.mrf.mxu1 }
 0x918   :  { %v3236_v61 = vpack.c.bf16 %v3226_v25, %v3224_v27  ;;  %v11575_v25 = vld [vmem:[%s17307_s11 + $0xc8] sm:$0xff]  ;;  %v3766_v6 = vpack.c.b16 %v3761_v17, %v3760_v13 }
 0x919   :  { %3657 = vmatpush.bf16.msrb.mxu1 %v11575_v25 }
 0x91a   :  { %10491 = vmatmul.msk.bf16.gmra.mxu2 %vm570_vm0, %v3236_v61 }
 0x91b   :  { %v14110_v40 = vpop.f32.mrf.mxu2 }
 0x91d   :  { %v3442_v0 = vpop.f32.mrf.mxu3  ;;  %3658 = vmatpush.bf16.msrb.mxu1 %v11574_v39 }
 0x91e   :  { %v3443_v20 = vadd.f32 %v14066_v62, %v3442_v0 }
 0x920   :  { %v3708_v5 = vpack.c.bf16 %v3443_v20, %v3443_v20  ;;  %3659 = vmatmul.bf16.vlgmr.msrb.gmra.mxu1 %v12596_v10 }
 0x922   :  { %v3849_v1 = vunpack.c.l.b16 %v3708_v5 }
 0x925   :  { %v3444_v22 = vpop.f32.mrf.mxu3 }
 0x926   :  { %v3445_v52 = vadd.f32 %v14066_v62, %v3444_v22 }
 0x928   :  { %v3709_v27 = vpack.c.bf16 %v3445_v52, %v3445_v52 }
 0x92a   :  { %10639 = vmatmul.msk.bf16.vlgmr.msra.gmra.mxu2 %vm570_vm0, %v3764_v54  ;;  %v3850_v45 = vunpack.c.l.b16 %v3709_v27  ;;  %v3707_v54 = vpack.c.bf16 %v3440_v30, %v3440_v30 }
 0x92c   :  { %v3857_v61 = vpack.c.b16 %v3850_v45, %v3849_v1  ;;  %v3763_v57 = vunpack.c.l.b16 %v3707_v54 }
 0x92d   :  { %v3447_v55 = vpop.f32.mrf.mxu3 }
 0x92e   :  { %10643 = vmatmul.msk.bf16.vlgmr.msra.gmra.mxu3 %vm570_vm0, %v3857_v61  ;;  %v3767_v12 = vpack.c.b16 %v3763_v57, %v3762_v35  ;;  %v3448_v11 = vadd.f32 %v14066_v62, %v3447_v55 }
 0x930   :  { %3664 = vmatmul.bf16.gmra.mxu1 %v12611_v15  ;;  %v3710_v0 = vpack.c.bf16 %v3448_v11, %v3448_v11 }
 0x932   :  { %v3851_v50 = vunpack.c.l.b16 %v3710_v0 }
 0x935   :  { %v3449_v48 = vpop.f32.mrf.mxu3 }
 0x93a   :  { %10640 = vmatmul.msk.bf16.gmra.mxu2 %vm570_vm0, %v3765_v2 }
 0x93d   :  { %v3452_v8 = vpop.f32.mrf.mxu3 }
 0x940   :  { %3669 = vmatmul.bf16.gmra.mxu1 %v12638_v24  ;;  %v2251_v24 = vadd.f32 %v13659_v32, %v13735_v60  ;;  %v2256_v32 = vadd.f32 %v13681_v58, %v13740_v31 }
 0x945   :  { %v3454_v52 = vpop.f32.mrf.mxu3 }
 0x946   :  { %v3455_v34 = vadd.f32 %v14066_v62, %v3454_v52 }
 0x948   :  { %v3713_v27 = vpack.c.bf16 %v3455_v34, %v3455_v34 }
 0x94a   :  { %10641 = vmatmul.msk.bf16.gmra.mxu2 %vm570_vm0, %v3766_v6  ;;  %v3854_v9 = vunpack.c.l.b16 %v3713_v27  ;;  %v14190_v27 = vld [vmem:[%s17310_s7 + $0x3] ss:$0 sm:$0xff] }
 0x94d   :  { %v3457_v25 = vpop.f32.mrf.mxu3 }
 0x950   :  { %3674 = vmatmul.bf16.gmra.mxu1 %v12666_v33  ;;  %v3450_v33 = vadd.f32 %v14066_v62, %v3449_v48 }
 0x952   :  { %v3711_v20 = vpack.c.bf16 %v3450_v33, %v3450_v33 }
 0x954   :  { %v3852_v2 = vunpack.c.l.b16 %v3711_v20 }
 0x955   :  { %v3459_v13 = vpop.f32.mrf.mxu3 }
 0x956   :  { %v3858_v49 = vpack.c.b16 %v3852_v2, %v3851_v50  ;;  %v3460_v17 = vadd.f32 %v14066_v62, %v3459_v13 }
 0x958   :  { %10644 = vmatmul.msk.bf16.gmra.mxu3 %vm570_vm0, %v3858_v49  ;;  %v3715_v7 = vpack.c.bf16 %v3460_v17, %v3460_v17 }
 0x95a   :  { %10642 = vmatmul.msk.bf16.gmra.mxu2 %vm570_vm0, %v3767_v12  ;;  %v3856_v30 = vunpack.c.l.b16 %v3715_v7 }
 0x960   :  { %3679 = vmatmul.bf16.gmra.mxu1 %v12681_v38  ;;  %v3453_v38 = vadd.f32 %v14066_v62, %v3452_v8 }
 0x962   :  { %v3712_v29 = vpack.c.bf16 %v3453_v38, %v3453_v38 }
 0x964   :  { %v3853_v1 = vunpack.c.l.b16 %v3712_v29 }
 0x966   :  { %v3859_v45 = vpack.c.b16 %v3854_v9, %v3853_v1 }
 0x968   :  { %10645 = vmatmul.msk.bf16.gmra.mxu3 %vm570_vm0, %v3859_v45 }
 0x96c   :  { %v3307_v19 = vpop.f32.mrf.mxu2 }
 0x96d   :  { %v14115_v18 = vadd.f32 %v3307_v19, %v2241_v14 }
 0x970   :  { %3684 = vmatmul.bf16.gmra.mxu1 %v12693_v41  ;;  %v3458_v41 = vadd.f32 %v14066_v62, %v3457_v25 }
 0x972   :  { %v3714_v31 = vpack.c.bf16 %v3458_v41, %v3458_v41 }
 0x974   :  { %v14117_v10 = vpop.f32.mrf.mxu2  ;;  %v3855_v6 = vunpack.c.l.b16 %v3714_v31 }
 0x976   :  { %v3860_v54 = vpack.c.b16 %v3856_v30, %v3855_v6 }
 0x978   :  { %10646 = vmatmul.msk.bf16.gmra.mxu3 %vm570_vm0, %v3860_v54 }
 0x97c   :  { %v3312_v21 = vpop.f32.mrf.mxu2 }
 0x97d   :  { %v14122_v42 = vadd.f32 %v3312_v21, %v2246_v36 }
 0x980   :  { %3689 = vmatmul.bf16.gmra.mxu1 %v12705_v44 }
 0x984   :  { %v14124_v15 = vpop.f32.mrf.mxu2 }
 0x98d   :  { %v3317_v23 = vpop.f32.mrf.mxu2 }
 0x98e   :  { %v14130_v4 = vadd.f32 %v3317_v23, %v2251_v24 }
 0x990   :  { %3694 = vmatmul.bf16.gmra.mxu1 %v12717_v47 }
 0x995   :  { %v14133_v5 = vpop.f32.mrf.mxu2 }
 0x99d   :  { %v3322_v60 = vpop.f32.mrf.mxu2  ;;  %v3660_v21 = vpop.f32.mrf.mxu1 }
 0x99e   :  { %v14140_v22 = vadd.f32 %v3322_v60, %v2256_v32 }
 0x9a5   :  { %v14143_v16 = vpop.f32.mrf.mxu2  ;;  %v3662_v24 = vpop.f32.mrf.mxu1 }
 0x9ad   :  { %v3821_v58 = vpop.f32.mrf.mxu2  ;;  %v3665_v33 = vpop.f32.mrf.mxu1 }
 0x9ae   :  { %v14148_v61 = vmul.f32 0.17677669, %v3821_v58  ;;  %v3666_v7 = vadd.f32 %v14190_v27, %v3665_v33 }
 0x9b0   :  { %v3950_v39 = vsel %vm733_vm1, %v14148_v61, -inf }
 0x9b1   :  { %3951 = vmax.xlane.f32.xlu0 %v3950_v39  ;;  %v3914_v32 = vpop.f32.mrf.mxu3 }
 0x9b2   :  { %v14183_v52 = vmul.f32 0.17677669, %v3914_v32 }
 0x9b4   :  { %v3974_v34 = vsel %vm733_vm1, %v14183_v52, -inf }
 0x9b5   :  { %v3823_v26 = vpop.f32.mrf.mxu2  ;;  %v3667_v49 = vpop.f32.mrf.mxu1 }
 0x9b6   :  { %v14153_v35 = vmul.f32 0.17677669, %v3823_v26  ;;  %v3668_v30 = vadd.f32 %v14190_v27, %v3667_v49 }
 0x9b8   :  { %v3953_v44 = vsel %vm733_vm1, %v14153_v35, -inf }
 0x9b9   :  { %3954 = vmax.xlane.f32.xlu1 %v3953_v44 }
 0x9bd   :  { %v3826_v62 = vpop.f32.mrf.mxu2  ;;  %v3670_v29 = vpop.f32.mrf.mxu1 }
 0x9be   :  { %v14159_v57 = vmul.f32 0.17677669, %v3826_v62  ;;  %v3671_v17 = vadd.f32 %v14190_v27, %v3670_v29  ;;  %v3734_v62 = vpack.c.bf16 %v3666_v7, %v3666_v7 }
 0x9c0   :  { %v3956_v12 = vsel %vm733_vm1, %v14159_v57, -inf  ;;  %v3736_v54 = vpack.c.bf16 %v3671_v17, %v3671_v17 }
 0x9c1   :  { %3957 = vmax.xlane.f32.xlu2 %v3956_v12  ;;  %v3735_v12 = vpack.c.bf16 %v3668_v30, %v3668_v30 }
 0x9c5   :  { %v3828_v14 = vpop.f32.mrf.mxu2  ;;  %v3672_v1 = vpop.f32.mrf.mxu1 }
 0x9c6   :  { %v14163_v19 = vmul.f32 0.17677669, %v3828_v14  ;;  %v3673_v39 = vadd.f32 %v14190_v27, %v3672_v1  ;;  %v3661_v14 = vadd.f32 %v14190_v27, %v3660_v21  ;;  %v3916_v21 = vpop.f32.mrf.mxu3 }
 0x9c8   :  { %v3959_v36 = vsel %vm733_vm1, %v14163_v19, -inf  ;;  %v3737_v44 = vpack.c.bf16 %v3673_v39, %v3673_v39 }
 0x9c9   :  { %3960 = vmax.xlane.f32.xlu0 %v3959_v36  ;;  %v3663_v36 = vadd.f32 %v14190_v27, %v3662_v24 }
 0x9cd   :  { %v3831_v55 = vpop.f32.mrf.mxu2  ;;  %v3675_v9 = vpop.f32.mrf.mxu1 }
 0x9ce   :  { %v14167_v11 = vmul.f32 0.17677669, %v3831_v55  ;;  %v3676_v45 = vadd.f32 %v14190_v27, %v3675_v9  ;;  %v4174_v55 = vunpack.c.l.b16 %v3736_v54 }
 0x9d0   :  { %v3962_v47 = vsel %vm733_vm1, %v14167_v11, -inf  ;;  %v3738_v25 = vpack.c.bf16 %v3676_v45, %v3676_v45 }
 0x9d1   :  { %3963 = vmax.xlane.f32.xlu1 %v3962_v47  ;;  %v4175_v47 = vunpack.c.l.b16 %v3737_v44 }
 0x9d2   :  { %v4176_v31 = vunpack.c.l.b16 %v3738_v25 }
 0x9d5   :  { %v3833_v23 = vpop.f32.mrf.mxu2  ;;  %v3677_v41 = vpop.f32.mrf.mxu1 }
 0x9d6   :  { %v14171_v0 = vmul.f32 0.17677669, %v3833_v23  ;;  %v3678_v58 = vadd.f32 %v14190_v27, %v3677_v41  ;;  %v4172_v23 = vunpack.c.l.b16 %v3734_v62 }
 0x9d8   :  { %v3965_v48 = vsel %vm733_vm1, %v14171_v0, -inf  ;;  %v3739_v13 = vpack.c.bf16 %v3678_v58, %v3678_v58 }
 0x9d9   :  { %3966 = vmax.xlane.f32.xlu2 %v3965_v48  ;;  %v4173_v48 = vunpack.c.l.b16 %v3735_v12 }
 0x9da   :  { %v4177_v6 = vunpack.c.l.b16 %v3739_v13 }
 0x9db   :  { %v4179_v33 = vpack.c.b16 %v4173_v48, %v4172_v23  ;;  %v3919_v45 = vpop.f32.mrf.mxu3 }
 0x9dc   :  { %v4181_v26 = vpack.c.b16 %v4177_v6, %v4176_v31  ;;  %v14206_v31 = vmul.f32 0.17677669, %v3916_v21  ;;  %v14215_v30 = vmul.f32 0.17677669, %v3919_v45 }
 0x9dd   :  { %v3836_v50 = vpop.f32.mrf.mxu2 }
 0x9de   :  { %v14175_v20 = vmul.f32 0.17677669, %v3836_v50  ;;  %4202 = vmatpush.bf16.msra.mxu0 %v4181_v26  ;;  %v3732_v50 = vpack.c.bf16 %v3661_v14, %v3661_v14 }
 0x9e0   :  { %v3968_v2 = vsel %vm733_vm1, %v14175_v20, -inf  ;;  %v4170_v49 = vunpack.c.l.b16 %v3732_v50 }
 0x9e1   :  { %3969 = vmax.xlane.f32.xlu0 %v3968_v2  ;;  %v3733_v2 = vpack.c.bf16 %v3663_v36, %v3663_v36 }
 0x9e3   :  { %v4171_v32 = vunpack.c.l.b16 %v3733_v2  ;;  %v3921_v6 = vpop.f32.mrf.mxu3 }
 0x9e4   :  { %v14224_v36 = vmul.f32 0.17677669, %v3921_v6 }
 0x9e5   :  { %v3838_v8 = vpop.f32.mrf.mxu2 }
 0x9e6   :  { %v14179_v38 = vmul.f32 0.17677669, %v3838_v8  ;;  %v4180_v8 = vpack.c.b16 %v4175_v47, %v4174_v55 }
 0x9e8   :  { %v3971_v60 = vsel %vm733_vm1, %v14179_v38, -inf  ;;  %4203 = vmatpush.bf16.msra.mxu0 %v4180_v8 }
 0x9e9   :  { %3972 = vmax.xlane.f32.xlu1 %v3971_v60  ;;  %v4178_v60 = vpack.c.b16 %v4171_v32, %v4170_v49 }
 0x9eb   :  { %v3924_v14 = vpop.f32.mrf.mxu3 }
 0x9ec   :  { %4204 = vmatpush.bf16.msra.mxu0 %v4179_v33  ;;  %v14233_v2 = vmul.f32 0.17677669, %v3924_v14 }
 0x9f0   :  { %4205 = vmatpush.bf16.msra.mxu0 %v4178_v60 }
 0x9f1   :  { %3975 = vmax.xlane.f32.xlu1 %v3974_v34 }
 0x9f3   :  { %v3926_v8 = vpop.f32.mrf.mxu3 }
 0x9f4   :  { %v14242_v21 = vmul.f32 0.17677669, %v3926_v8 }
 0xa24   :  { %v3952_v29 = vpop.xlane.xlu0 %3951 }
 0xa25   :  { %v3998_v34 = vsub.f32 %v14148_v61, %v3952_v29 }
 0xa27   :  { %v4014_v1 = vmul.f32 1.442695, %v3998_v34  ;;  %v3680_v34 = vpop.f32.mrf.mxu1 }
 0xa29   :  { %11957 = vpow2.f32 %v4014_v1 }
 0xa2c   :  { %v3955_v24 = vpop.xlane.xlu1 %3954 }
 0xa2d   :  { %v3999_v9 = vsub.f32 %v14153_v35, %v3955_v24  ;;  %v3977_v35 = vsel %vm733_vm1, %v14206_v31, -inf }
 0xa2f   :  { %v14202_v25 = vpop.eup %11957  ;;  %v4016_v41 = vmul.f32 1.442695, %v3999_v9  ;;  %v3929_v9 = vpop.f32.mrf.mxu3 }
 0xa30   :  { %v4046_v58 = vsel %vm733_vm1, %v14202_v25, 0.0 }
 0xa31   :  { %11959 = vpow2.f32 %v4016_v41  ;;  %4047 = vadd.xlane.f32.xlu2 %v4046_v58 }
 0xa34   :  { %v3958_v13 = vpop.xlane.xlu2 %3957 }
 0xa35   :  { %v4000_v61 = vsub.f32 %v14159_v57, %v3958_v13  ;;  %v3980_v57 = vsel %vm733_vm1, %v14215_v30, -inf  ;;  %v3682_v13 = vpop.f32.mrf.mxu1 }
 0xa37   :  { %v14209_v17 = vpop.eup %11959  ;;  %v4018_v39 = vmul.f32 1.442695, %v4000_v61  ;;  %v14251_v61 = vmul.f32 0.17677669, %v3929_v9 }
 0xa38   :  { %v4049_v7 = vsel %vm733_vm1, %v14209_v17, 0.0 }
 0xa39   :  { %11961 = vpow2.f32 %v4018_v39  ;;  %3978 = vmax.xlane.f32.xlu2 %v3977_v35  ;;  %4050 = vadd.xlane.f32.xlu0 %v4049_v7 }
 0xa3c   :  { %v3961_v26 = vpop.xlane.xlu0 %3960 }
 0xa3d   :  { %v4001_v54 = vsub.f32 %v14163_v19, %v3961_v26  ;;  %v3983_v19 = vsel %vm733_vm1, %v14224_v36, -inf  ;;  %v3931_v26 = vpop.f32.mrf.mxu3 }
 0xa3f   :  { %v14220_v44 = vpop.eup %11961  ;;  %v4020_v62 = vmul.f32 1.442695, %v4001_v54 }
 0xa40   :  { %v4052_v12 = vsel %vm733_vm1, %v14220_v44, 0.0 }
 0xa41   :  { %11963 = vpow2.f32 %v4020_v62  ;;  %3981 = vmax.xlane.f32.xlu2 %v3980_v57  ;;  %4053 = vadd.xlane.f32.xlu0 %v4052_v12  ;;  %v3685_v57 = vpop.f32.mrf.mxu1  ;;  %v14260_v62 = vmul.f32 0.17677669, %v3931_v26 }
 0xa44   :  { %v3964_v55 = vpop.xlane.xlu1 %3963 }
 0xa45   :  { %v4002_v47 = vsub.f32 %v14167_v11, %v3964_v55  ;;  %v3986_v11 = vsel %vm733_vm1, %v14233_v2, -inf }
 0xa47   :  { %v14229_v23 = vpop.eup %11963  ;;  %v4022_v48 = vmul.f32 1.442695, %v4002_v47 }
 0xa48   :  { %v4055_v50 = vsel %vm733_vm1, %v14229_v23, 0.0 }
 0xa49   :  { %11965 = vpow2.f32 %v4022_v48  ;;  %3984 = vmax.xlane.f32.xlu0 %v3983_v19  ;;  %4056 = vadd.xlane.f32.xlu1 %v4055_v50  ;;  %v3687_v48 = vpop.f32.mrf.mxu1 }
 0xa4c   :  { %v3967_v33 = vpop.xlane.xlu2 %3966 }
 0xa4d   :  { %v4003_v49 = vsub.f32 %v14171_v0, %v3967_v33  ;;  %v3989_v0 = vsel %vm733_vm1, %v14242_v21, -inf }
 0xa4f   :  { %v14238_v32 = vpop.eup %11965  ;;  %v4024_v60 = vmul.f32 1.442695, %v4003_v49 }
 0xa50   :  { %v4058_v29 = vsel %vm733_vm1, %v14238_v32, 0.0 }
 0xa51   :  { %11967 = vpow2.f32 %v4024_v60  ;;  %3987 = vmax.xlane.f32.xlu0 %v3986_v11  ;;  %4059 = vadd.xlane.f32.xlu1 %v4058_v29 }
 0xa54   :  { %v3970_v1 = vpop.xlane.xlu0 %3969 }
 0xa55   :  { %v4004_v24 = vsub.f32 %v14175_v20, %v3970_v1  ;;  %v3992_v20 = vsel %vm733_vm1, %v14251_v61, -inf }
 0xa57   :  { %v14247_v45 = vpop.eup %11967  ;;  %v4026_v41 = vmul.f32 1.442695, %v4004_v24 }
 0xa58   :  { %v4061_v58 = vsel %vm733_vm1, %v14247_v45, 0.0 }
 0xa59   :  { %11969 = vpow2.f32 %v4026_v41  ;;  %4062 = vadd.xlane.f32.xlu2 %v4061_v58  ;;  %3990 = vmax.xlane.f32.xlu1 %v3989_v0  ;;  %v3686_v58 = vadd.f32 %v14190_v27, %v3685_v57 }
 0xa5c   :  { %v3973_v39 = vpop.xlane.xlu1 %3972 }
 0xa5d   :  { %v4005_v6 = vsub.f32 %v14179_v38, %v3973_v39  ;;  %v3995_v38 = vsel %vm733_vm1, %v14260_v62, -inf  ;;  %v3688_v39 = vadd.f32 %v14190_v27, %v3687_v48 }
 0xa5f   :  { %v14256_v35 = vpop.eup %11969  ;;  %v4028_v7 = vmul.f32 1.442695, %v4005_v6 }
 0xa60   :  { %v4064_v54 = vsel %vm733_vm1, %v14256_v35, 0.0 }
 0xa61   :  { %11971 = vpow2.f32 %v4028_v7  ;;  %4065 = vadd.xlane.f32.xlu2 %v4064_v54  ;;  %3993 = vmax.xlane.f32.xlu1 %v3992_v20  ;;  %v3742_v54 = vpack.c.bf16 %v3686_v58, %v3686_v58 }
 0xa64   :  { %v3976_v12 = vpop.xlane.xlu1 %3975 }
 0xa65   :  { %v4006_v14 = vsub.f32 %v14183_v52, %v3976_v12  ;;  %v3690_v52 = vpop.f32.mrf.mxu1  ;;  %v3743_v12 = vpack.c.bf16 %v3688_v39, %v3688_v39 }
 0xa66   :  { %v3691_v24 = vadd.f32 %v14190_v27, %v3690_v52 }
 0xa67   :  { %v14265_v55 = vpop.eup %11971  ;;  %v4030_v47 = vmul.f32 1.442695, %v4006_v14  ;;  %v3681_v14 = vadd.f32 %v14190_v27, %v3680_v34  ;;  %v4258_v52 = vunpack.c.l.b16 %v3743_v12 }
 0xa68   :  { %v4067_v19 = vsel %vm733_vm1, %v14265_v55, 0.0  ;;  %v3744_v20 = vpack.c.bf16 %v3691_v24, %v3691_v24 }
 0xa69   :  { %11973 = vpow2.f32 %v4030_v47  ;;  %3996 = vmax.xlane.f32.xlu2 %v3995_v38  ;;  %4068 = vadd.xlane.f32.xlu0 %v4067_v19  ;;  %v3683_v38 = vadd.f32 %v14190_v27, %v3682_v13 }
 0xa6a   :  { %v4259_v47 = vunpack.c.l.b16 %v3744_v20 }
 0xa6d   :  { %v3692_v33 = vpop.f32.mrf.mxu1 }
 0xa6e   :  { %v3693_v9 = vadd.f32 %v14190_v27, %v3692_v33  ;;  %v3740_v33 = vpack.c.bf16 %v3681_v14, %v3681_v14 }
 0xa6f   :  { %v14269_v50 = vpop.eup %11973 }
 0xa70   :  { %v4070_v8 = vsel %vm733_vm1, %v14269_v50, 0.0  ;;  %v3745_v7 = vpack.c.bf16 %v3693_v9, %v3693_v9 }
 0xa71   :  { %4071 = vadd.xlane.f32.xlu0 %v4070_v8  ;;  %v4257_v8 = vunpack.c.l.b16 %v3742_v54 }
 0xa72   :  { %v4260_v19 = vunpack.c.l.b16 %v3745_v7 }
 0xa73   :  { %v4264_v48 = vpack.c.b16 %v4258_v52, %v4257_v8 }
 0xa74   :  { %v4265_v57 = vpack.c.b16 %v4260_v19, %v4259_v47 }
 0xa75   :  { %v3695_v49 = vpop.f32.mrf.mxu1 }
 0xa76   :  { %v3696_v11 = vadd.f32 %v14190_v27, %v3695_v49  ;;  %v3741_v49 = vpack.c.bf16 %v3683_v38, %v3683_v38 }
 0xa78   :  { %v3746_v60 = vpack.c.bf16 %v3696_v11, %v3696_v11  ;;  %v4255_v11 = vunpack.c.l.b16 %v3740_v33 }
 0xa7a   :  { %v4261_v0 = vunpack.c.l.b16 %v3746_v60  ;;  %v4256_v60 = vunpack.c.l.b16 %v3741_v49 }
 0xa7d   :  { %v3697_v29 = vpop.f32.mrf.mxu1 }
 0xa7e   :  { %v3698_v1 = vadd.f32 %v14190_v27, %v3697_v29 }
 0xa80   :  { %v3747_v41 = vpack.c.bf16 %v3698_v1, %v3698_v1  ;;  %v4263_v1 = vpack.c.b16 %v4256_v60, %v4255_v11 }
 0xa82   :  { %v4262_v6 = vunpack.c.l.b16 %v3747_v41 }
 0xa84   :  { %v4266_v26 = vpack.c.b16 %v4262_v6, %v4261_v0 }
 0xa86   :  { %4287 = vmatpush.bf16.msra.mxu1 %v4266_v26 }
 0xa8a   :  { %4288 = vmatpush.bf16.msra.mxu1 %v4265_v57 }
 0xa8e   :  { %4289 = vmatpush.bf16.msra.mxu1 %v4264_v48 }
 0xa92   :  { %4290 = vmatpush.bf16.msra.mxu1 %v4263_v1 }
 0xaa4   :  { %v4048_v29 = vpop.xlane.xlu2 %4047 }
 0xaa5   :  { %11975 = vrcp.f32 %v4048_v29 }
 0xaab   :  { %v11976_v9 = vpop.eup %11975 }
 0xaac   :  { %v3979_v24 = vpop.xlane.xlu2 %3978  ;;  %v4051_v34 = vpop.xlane.xlu0 %4050  ;;  %v4110_v0 = vmul.f32 %v11976_v9, %v14202_v25 }
 0xaad   :  { %v4007_v27 = vsub.f32 %v14206_v31, %v3979_v24  ;;  %11977 = vrcp.f32 %v4051_v34 }
 0xaae   :  { %v4126_v58 = vpack.c.bf16 %v4110_v0, %v4110_v0 }
 0xaaf   :  { %v4032_v13 = vmul.f32 1.442695, %v4007_v27 }
 0xab0   :  { %v4150_v14 = vunpack.c.l.b16 %v4126_v58 }
 0xab1   :  { %11979 = vpow2.f32 %v4032_v13 }
 0xab3   :  { %v11978_v41 = vpop.eup %11977 }
 0xab4   :  { %v4111_v39 = vmul.f32 %v11978_v41, %v14209_v17  ;;  %v3982_v6 = vpop.xlane.xlu2 %3981  ;;  %v4054_v20 = vpop.xlane.xlu0 %4053 }
 0xab5   :  { %v4008_v7 = vsub.f32 %v14215_v30, %v3982_v6  ;;  %11981 = vrcp.f32 %v4054_v20 }
 0xab6   :  { %v4127_v26 = vpack.c.bf16 %v4111_v39, %v4111_v39 }
 0xab7   :  { %v14285_v54 = vpop.eup %11979  ;;  %v4034_v12 = vmul.f32 1.442695, %v4008_v7 }
 0xab8   :  { %v4151_v31 = vunpack.c.l.b16 %v4127_v26  ;;  %v4073_v38 = vsel %vm733_vm1, %v14285_v54, 0.0 }
 0xab9   :  { %11983 = vpow2.f32 %v4034_v12  ;;  %4074 = vadd.xlane.f32.xlu1 %v4073_v38 }
 0xaba   :  { %v4158_v25 = vpack.c.b16 %v4151_v31, %v4150_v14 }
 0xabb   :  { %v11982_v19 = vpop.eup %11981 }
 0xabc   :  { %10647 = vmatmul.msk.bf16.vlgmr.msra.gmra.mxu0 %vm733_vm1, %v4158_v25  ;;  %v3985_v17 = vpop.xlane.xlu0 %3984  ;;  %v4057_v47 = vpop.xlane.xlu1 %4056  ;;  %v4112_v33 = vmul.f32 %v11982_v19, %v14220_v44 }
 0xabd   :  { %v4009_v30 = vsub.f32 %v14224_v36, %v3985_v17  ;;  %11985 = vrcp.f32 %v4057_v47 }
 0xabe   :  { %v4128_v48 = vpack.c.bf16 %v4112_v33, %v4112_v33 }
 0xabf   :  { %v14291_v8 = vpop.eup %11983  ;;  %v4036_v52 = vmul.f32 1.442695, %v4009_v30 }
 0xac0   :  { %v4076_v49 = vsel %vm733_vm1, %v14291_v8, 0.0  ;;  %v4152_v9 = vunpack.c.l.b16 %v4128_v48 }
 0xac1   :  { %11987 = vpow2.f32 %v4036_v52  ;;  %4077 = vadd.xlane.f32.xlu2 %v4076_v49 }
 0xac3   :  { %v11986_v57 = vpop.eup %11985 }
 0xac4   :  { %v4113_v11 = vmul.f32 %v11986_v57, %v14229_v23  ;;  %v3988_v60 = vpop.xlane.xlu0 %3987  ;;  %v4060_v29 = vpop.xlane.xlu1 %4059 }
 0xac5   :  { %v4010_v1 = vsub.f32 %v14233_v2, %v3988_v60  ;;  %11989 = vrcp.f32 %v4060_v29 }
 0xac6   :  { %v4129_v36 = vpack.c.bf16 %v4113_v11, %v4113_v11 }
 0xac7   :  { %v14298_v24 = vpop.eup %11987  ;;  %v4038_v34 = vmul.f32 1.442695, %v4010_v1 }
 0xac8   :  { %v4079_v44 = vsel %vm733_vm1, %v14298_v24, 0.0  ;;  %v4153_v27 = vunpack.c.l.b16 %v4129_v36 }
 0xac9   :  { %11991 = vpow2.f32 %v4038_v34  ;;  %4080 = vadd.xlane.f32.xlu0 %v4079_v44 }
 0xaca   :  { %v4159_v13 = vpack.c.b16 %v4153_v27, %v4152_v9 }
 0xacb   :  { %v11990_v41 = vpop.eup %11989 }
 0xacc   :  { %v4063_v0 = vpop.xlane.xlu2 %4062  ;;  %10648 = vmatmul.msk.bf16.gmra.mxu0 %vm733_vm1, %v4159_v13  ;;  %v3991_v23 = vpop.xlane.xlu1 %3990  ;;  %v4114_v6 = vmul.f32 %v11990_v41, %v14238_v32 }
 0xacd   :  { %11993 = vrcp.f32 %v4063_v0  ;;  %v4011_v2 = vsub.f32 %v14242_v21, %v3991_v23 }
 0xace   :  { %v4130_v26 = vpack.c.bf16 %v4114_v6, %v4114_v6 }
 0xacf   :  { %v14304_v58 = vpop.eup %11991  ;;  %v4040_v39 = vmul.f32 1.442695, %v4011_v2 }
 0xad0   :  { %v4082_v20 = vsel %vm733_vm1, %v14304_v58, 0.0  ;;  %v4154_v47 = vunpack.c.l.b16 %v4130_v26 }
 0xad1   :  { %11995 = vpow2.f32 %v4040_v39  ;;  %4083 = vadd.xlane.f32.xlu1 %v4082_v20 }
 0xad3   :  { %v11994_v7 = vpop.eup %11993 }
 0xad4   :  { %v4115_v12 = vmul.f32 %v11994_v7, %v14247_v45  ;;  %v4066_v14 = vpop.xlane.xlu2 %4065  ;;  %v3994_v31 = vpop.xlane.xlu1 %3993 }
 0xad5   :  { %v4012_v38 = vsub.f32 %v14251_v61, %v3994_v31  ;;  %11997 = vrcp.f32 %v4066_v14 }
 0xad6   :  { %v4131_v25 = vpack.c.bf16 %v4115_v12, %v4115_v12 }
 0xad7   :  { %v14311_v21 = vpop.eup %11995  ;;  %v4042_v17 = vmul.f32 1.442695, %v4012_v38 }
 0xad8   :  { %v4085_v32 = vsel %vm733_vm1, %v14311_v21, 0.0  ;;  %v4155_v19 = vunpack.c.l.b16 %v4131_v25 }
 0xad9   :  { %11999 = vpow2.f32 %v4042_v17  ;;  %4086 = vadd.xlane.f32.xlu2 %v4085_v32 }
 0xada   :  { %v4160_v30 = vpack.c.b16 %v4155_v19, %v4154_v47 }
 0xadb   :  { %v11998_v45 = vpop.eup %11997 }
 0xadc   :  { %v3997_v52 = vpop.xlane.xlu2 %3996  ;;  %v4069_v33 = vpop.xlane.xlu0 %4068  ;;  %10649 = vmatmul.msk.bf16.gmra.mxu0 %vm733_vm1, %v4160_v30  ;;  %v4116_v48 = vmul.f32 %v11998_v45, %v14256_v35  ;;  %v11583_v35 = vld [vmem:[%s17311_s0 + $0x38] sm:$0xff] }
 0xadd   :  { %v4013_v61 = vsub.f32 %v14260_v62, %v3997_v52  ;;  %12001 = vrcp.f32 %v4069_v33  ;;  %4367 = vmatpush.bf16.msrb.mxu2 %v11583_v35 }
 0xade   :  { %v4132_v29 = vpack.c.bf16 %v4116_v48, %v4116_v48 }
 0xadf   :  { %v14317_v49 = vpop.eup %11999  ;;  %v4044_v57 = vmul.f32 1.442695, %v4013_v61 }
 0xae0   :  { %v4088_v11 = vsel %vm733_vm1, %v14317_v49, 0.0  ;;  %v4156_v44 = vunpack.c.l.b16 %v4132_v29 }
 0xae1   :  { %12003 = vpow2.f32 %v4044_v57  ;;  %4089 = vadd.xlane.f32.xlu0 %v4088_v11 }
 0xae3   :  { %v12002_v60 = vpop.eup %12001 }
 0xae4   :  { %v4117_v1 = vmul.f32 %v12002_v60, %v14265_v55  ;;  %v11582_v55 = vld [vmem:[%s17311_s0 + $0x30] sm:$0xff]  ;;  %v4072_v13 = vpop.xlane.xlu0 %4071  ;;  %s17337_s0 = sld [smem:[#allocation44_spill]] }
 0xae5   :  { %4368 = vmatpush.bf16.msrb.mxu2 %v11582_v55  ;;  %12005 = vrcp.f32 %v4072_v13 }
 0xae6   :  { %v4133_v36 = vpack.c.bf16 %v4117_v1, %v4117_v1 }
 0xae7   :  { %v14323_v34 = vpop.eup %12003 }
 0xae8   :  { %v4091_v62 = vsel %vm733_vm1, %v14323_v34, 0.0  ;;  %v4157_v9 = vunpack.c.l.b16 %v4133_v36 }
 0xae9   :  { %4092 = vadd.xlane.f32.xlu1 %v4091_v62 }
 0xaea   :  { %v4161_v27 = vpack.c.b16 %v4157_v9, %v4156_v44 }
 0xaeb   :  { %v12006_v23 = vpop.eup %12005 }
 0xaec   :  { %10650 = vmatmul.msk.bf16.gmra.mxu0 %vm733_vm1, %v4161_v27  ;;  %v4118_v41 = vmul.f32 %v12006_v23, %v14269_v50 }
 0xaee   :  { %v4134_v39 = vpack.c.bf16 %v4118_v41, %v4118_v41 }
 0xaf0   :  { %v4235_v26 = vunpack.c.l.b16 %v4134_v39 }
 0xb2c   :  { %v4075_v0 = vpop.xlane.xlu1 %4074 }
 0xb2d   :  { %12007 = vrcp.f32 %v4075_v0 }
 0xb33   :  { %v12008_v2 = vpop.eup %12007 }
 0xb34   :  { %v4119_v6 = vmul.f32 %v12008_v2, %v14285_v54  ;;  %v4078_v20 = vpop.xlane.xlu2 %4077 }
 0xb35   :  { %12009 = vrcp.f32 %v4078_v20 }
 0xb36   :  { %v4135_v7 = vpack.c.bf16 %v4119_v6, %v4119_v6 }
 0xb38   :  { %v4236_v12 = vunpack.c.l.b16 %v4135_v7 }
 0xb39   :  { %v4207_v14 = vpop.f32.mrf.mxu0 }
 0xb3a   :  { %v4243_v31 = vpack.c.b16 %v4236_v12, %v4235_v26 }
 0xb3b   :  { %v12010_v25 = vpop.eup %12009 }
 0xb3c   :  { %v4081_v38 = vpop.xlane.xlu0 %4080  ;;  %10651 = vmatmul.msk.bf16.vlgmr.msra.gmra.mxu1 %vm733_vm1, %v4243_v31  ;;  %v4120_v17 = vmul.f32 %v12010_v25, %v14291_v8 }
 0xb3d   :  { %12011 = vrcp.f32 %v4081_v38 }
 0xb3e   :  { %v4136_v19 = vpack.c.bf16 %v4120_v17, %v4120_v17 }
 0xb40   :  { %v4237_v33 = vunpack.c.l.b16 %v4136_v19  ;;  %v2223_v19 = vadd.f32 %v13577_v43, %v13650_v3  ;;  %v12376_v43 = vld [vmem:[%s17305_s6 + $0x8] sm:$0xff] }
 0xb41   :  { %v4209_v32 = vpop.f32.mrf.mxu0 }
 0xb42   :  { %v4312_v50 = vpack.c.bf16 %v4209_v32, %v4207_v14 }
 0xb43   :  { %v12012_v47 = vpop.eup %12011 }
 0xb44   :  { %v4121_v54 = vmul.f32 %v12012_v47, %v14298_v24  ;;  %10667 = vmatmul.msk.bf16.vlgmr.msrb.gmra.mxu2 %vm570_vm0, %v4312_v50  ;;  %v4084_v30 = vpop.xlane.xlu1 %4083 }
 0xb45   :  { %12013 = vrcp.f32 %v4084_v30 }
 0xb46   :  { %v4137_v52 = vpack.c.bf16 %v4121_v54, %v4121_v54  ;;  %v12375_v54 = vld [vmem:[%s17305_s6] sm:$0xff] }
 0xb48   :  { %v4238_v45 = vunpack.c.l.b16 %v4137_v52  ;;  %v3328_v52 = vadd.f32 %v14032_v37, %v2223_v19 }
 0xb49   :  { %v4212_v61 = vpop.f32.mrf.mxu0 }
 0xb4a   :  { %v4244_v57 = vpack.c.b16 %v4238_v45, %v4237_v33 }
 0xb4b   :  { %v12014_v11 = vpop.eup %12013 }
 0xb4c   :  { %v4087_v48 = vpop.xlane.xlu2 %4086  ;;  %10652 = vmatmul.msk.bf16.gmra.mxu1 %vm733_vm1, %v4244_v57  ;;  %v4122_v8 = vmul.f32 %v12014_v11, %v14304_v58 }
 0xb4d   :  { %12015 = vrcp.f32 %v4087_v48 }
 0xb4e   :  { %v4138_v24 = vpack.c.bf16 %v4122_v8, %v4122_v8 }
 0xb50   :  { %v4239_v9 = vunpack.c.l.b16 %v4138_v24 }
 0xb51   :  { %v4214_v60 = vpop.f32.mrf.mxu0 }
 0xb52   :  { %v4313_v29 = vpack.c.bf16 %v4214_v60, %v4212_v61  ;;  %v17326_v60 = vld [vmem:[#allocation5_spill] sm:$0xff] }
 0xb53   :  { %v12016_v1 = vpop.eup %12015 }
 0xb54   :  { %v4123_v36 = vmul.f32 %v12016_v1, %v14311_v21  ;;  %10668 = vmatmul.msk.bf16.gmra.mxu2 %vm570_vm0, %v4313_v29  ;;  %v4090_v62 = vpop.xlane.xlu0 %4089  ;;  %v2228_v29 = vadd.f32 %v17326_v60, %v13677_v53  ;;  %v12377_v1 = vld [vmem:[%s17305_s6 + $0x10] sm:$0xff]  ;;  %v12378_v53 = vld [vmem:[%s17305_s6 + $0x18] sm:$0xff] }
 0xb55   :  { %12017 = vrcp.f32 %v4090_v62 }
 0xb56   :  { %v4139_v44 = vpack.c.bf16 %v4123_v36, %v4123_v36  ;;  %v3330_v36 = vadd.f32 %v14045_v51, %v2228_v29 }
 0xb58   :  { %v4240_v27 = vunpack.c.l.b16 %v4139_v44 }
 0xb59   :  { %v4217_v35 = vpop.f32.mrf.mxu0 }
 0xb5a   :  { %v4245_v55 = vpack.c.b16 %v4240_v27, %v4239_v9 }
 0xb5b   :  { %v12018_v0 = vpop.eup %12017 }
 0xb5c   :  { %10653 = vmatmul.msk.bf16.gmra.mxu1 %vm733_vm1, %v4245_v55  ;;  %v4093_v13 = vpop.xlane.xlu1 %4092  ;;  %v4124_v58 = vmul.f32 %v12018_v0, %v14317_v49 }
 0xb5d   :  { %12019 = vrcp.f32 %v4093_v13 }
 0xb5e   :  { %v4140_v21 = vpack.c.bf16 %v4124_v58, %v4124_v58  ;;  %v17327_v58 = vld [vmem:[#allocation12_spill] sm:$0xff] }
 0xb60   :  { %v4241_v20 = vunpack.c.l.b16 %v4140_v21 }
 0xb61   :  { %v4219_v23 = vpop.f32.mrf.mxu0 }
 0xb62   :  { %v4314_v41 = vpack.c.bf16 %v4219_v23, %v4217_v35  ;;  %v17328_v23 = vld [vmem:[#allocation6_spill] sm:$0xff] }
 0xb63   :  { %v12020_v2 = vpop.eup %12019 }
 0xb64   :  { %v4125_v39 = vmul.f32 %v12020_v2, %v14323_v34  ;;  %10669 = vmatmul.msk.bf16.gmra.mxu2 %vm570_vm0, %v4314_v41  ;;  %v14354_v34 = vld [vmem:[%s17325_s12] ss:$0 sm:$0xff]  ;;  %v2233_v41 = vadd.f32 %v17328_v23, %v17327_v58 }
 0xb65   :  { %v12379_v2 = vld [vmem:[%s17305_s6 + $0x20] sm:$0xff] }
 0xb66   :  { %v4141_v6 = vpack.c.bf16 %v4125_v39, %v4125_v39  ;;  %v3332_v39 = vadd.f32 %v14056_v63, %v2233_v41 }
 0xb68   :  { %v4242_v7 = vunpack.c.l.b16 %v4141_v6 }
 0xb69   :  { %v4222_v26 = vpop.f32.mrf.mxu0 }
 0xb6a   :  { %v4246_v12 = vpack.c.b16 %v4242_v7, %v4241_v20 }
 0xb6c   :  { %10654 = vmatmul.msk.bf16.gmra.mxu1 %vm733_vm1, %v4246_v12  ;;  %v12380_v12 = vld [vmem:[%s17305_s6 + $0x28] sm:$0xff] }
 0xb71   :  { %v4224_v14 = vpop.f32.mrf.mxu0 }
 0xb72   :  { %v4315_v31 = vpack.c.bf16 %v4224_v14, %v4222_v26 }
 0xb74   :  { %10670 = vmatmul.msk.bf16.gmra.mxu2 %vm570_vm0, %v4315_v31 }
 0xbb9   :  { %v4292_v49 = vpop.f32.mrf.mxu1 }
 0xbc1   :  { %v4294_v38 = vpop.f32.mrf.mxu1 }
 0xbc2   :  { %v4316_v25 = vpack.c.bf16 %v4294_v38, %v4292_v49  ;;  %v12381_v38 = vld [vmem:[%s17305_s6 + $0x30] sm:$0xff] }
 0xbc4   :  { %10671 = vmatmul.msk.bf16.gmra.mxu2 %vm570_vm0, %v4316_v25 }
 0xbc7   :  { %v4370_v17 = vpop.f32.mrf.mxu2 }
 0xbc8   :  { %v4410_v32 = vadd.f32 %v4370_v17, %v14028_v28  ;;  %v12417_v17 = vmov 128.0  }
 0xbc9   :  { %v4297_v50 = vpop.f32.mrf.mxu1  ;;  %12021 = vrcp.f32 %v12417_v17 }
 0xbca   :  { %v4430_v47 = vadd.f32 %v14354_v34, %v4410_v32 }
 0xbcc   :  { %v14363_v30 = vadd.f32 %v12375_v54, %v4430_v47 }
 0xbce   :  { %4464 = vadd.xlane.f32.xlu2 %v14363_v30 }
 0xbcf   :  { %v4372_v33 = vpop.f32.mrf.mxu2  ;;  %v12022_v32 = vpop.eup %12021 }
 0xbd0   :  { %v4411_v45 = vadd.f32 %v4372_v33, %v3328_v52  ;;  %vm4501_vm2 = vweird.f32 %v12022_v32 }
 0xbd1   :  { %v4299_v61 = vpop.f32.mrf.mxu1 }
 0xbd2   :  { %v4317_v28 = vpack.c.bf16 %v4299_v61, %v4297_v50  ;;  %v4431_v57 = vadd.f32 %v14354_v34, %v4411_v45  ;;  %v4497_v50 = vmul.f32 128.0, %v12022_v32  ;;  %v17330_v45 = vld [vmem:[#allocation13_spill] sm:$0xff]  ;;  %v17331_v61 = vld [vmem:[#allocation7_spill] sm:$0xff] }
 0xbd4   :  { %10672 = vmatmul.msk.bf16.gmra.mxu2 %vm570_vm0, %v4317_v28  ;;  %v14372_v3 = vadd.f32 %v12376_v43, %v4431_v57  ;;  %v4498_v47 = vsub.f32 1.0, %v4497_v50  ;;  %v2238_v28 = vadd.f32 %v17331_v61, %v17330_v45  ;;  %v17336_v50 = vld [vmem:[#allocation9_spill] sm:$0xff] }
 0xbd6   :  { %4466 = vadd.xlane.f32.xlu0 %v14372_v3  ;;  %v4499_v19 = vmul.f32 %v12022_v32, %v4498_v47  ;;  %v3334_v43 = vadd.f32 %v14110_v40, %v2238_v28 }
 0xbd7   :  { %v4375_v48 = vpop.f32.mrf.mxu2 }
 0xbd8   :  { %v4412_v37 = vadd.f32 %v4375_v48, %v14040_v56  ;;  %v4500_v54 = vadd.f32 %v12022_v32, %v4499_v19 }
 0xbd9   :  { %v4302_v11 = vpop.f32.mrf.mxu1 }
 0xbda   :  { %v4432_v8 = vadd.f32 %v14354_v34, %v4412_v37 }
 0xbdc   :  { %v14382_v24 = vadd.f32 %v12377_v1, %v4432_v8 }
 0xbde   :  { %4468 = vadd.xlane.f32.xlu1 %v14382_v24 }
 0xbdf   :  { %v4377_v62 = vpop.f32.mrf.mxu2 }
 0xbe0   :  { %v4413_v44 = vadd.f32 %v4377_v62, %v3330_v36  ;;  %v11599_v36 = vld [vmem:[%s17332_s5 + $0x38] sm:$0xff] }
 0xbe1   :  { %v4304_v9 = vpop.f32.mrf.mxu1  ;;  %4886 = vmatpush.bf16.msrb.mxu0 %v11599_v36  ;;  %v12382_v62 = vld [vmem:[%s17305_s6 + $0x38] sm:$0xff] }
 0xbe2   :  { %v4318_v56 = vpack.c.bf16 %v4304_v9, %v4302_v11  ;;  %v4433_v27 = vadd.f32 %v14354_v34, %v4413_v44 }
 0xbe4   :  { %10673 = vmatmul.msk.bf16.gmra.mxu2 %vm570_vm0, %v4318_v56  ;;  %v14391_v35 = vadd.f32 %v12378_v53, %v4433_v27  ;;  %v17333_v53 = vld [vmem:[#allocation14_spill] sm:$0xff] }
 0xbe6   :  { %4470 = vadd.xlane.f32.xlu2 %v14391_v35 }
 0xbe7   :  { %v4380_v55 = vpop.f32.mrf.mxu2 }
 0xbe8   :  { %v4414_v51 = vadd.f32 %v4380_v55, %v14052_v46 }
 0xbe9   :  { %v4307_v13 = vpop.f32.mrf.mxu1 }
 0xbea   :  { %v4434_v0 = vadd.f32 %v14354_v34, %v4414_v51 }
 0xbec   :  { %v14401_v21 = vadd.f32 %v12379_v2, %v4434_v0  ;;  %v11597_v0 = vld [vmem:[%s17332_s5 + $0x28] sm:$0xff]  ;;  %v12383_v2 = vld [vmem:[%s17305_s6 + $0x40] sm:$0xff] }
 0xbee   :  { %4472 = vadd.xlane.f32.xlu0 %v14401_v21 }
 0xbef   :  { %v4382_v6 = vpop.f32.mrf.mxu2 }
 0xbf0   :  { %v4415_v20 = vadd.f32 %v4382_v6, %v3332_v39 }
 0xbf1   :  { %v4309_v7 = vpop.f32.mrf.mxu1 }
 0xbf2   :  { %v4319_v46 = vpack.c.bf16 %v4309_v7, %v4307_v13  ;;  %v4435_v26 = vadd.f32 %v14354_v34, %v4415_v20 }
 0xbf4   :  { %10674 = vmatmul.msk.bf16.gmra.mxu2 %vm570_vm0, %v4319_v46  ;;  %v14410_v14 = vadd.f32 %v12380_v12, %v4435_v26  ;;  %v11595_v26 = vld [vmem:[%s17332_s5 + $0x18] sm:$0xff] }
 0xbf6   :  { %4474 = vadd.xlane.f32.xlu1 %v14410_v14 }
 0xbf7   :  { %v4385_v31 = vpop.f32.mrf.mxu2 }
 0xbf8   :  { %v4416_v63 = vadd.f32 %v4385_v31, %v14061_v59  ;;  %v14421_v59 = vsel %vm4501_vm2, %v12022_v32, %v4500_v54 }
 0xbf9   :  { %17329 = vst [vmem:[#allocation5_spill] sm:$0xff] %v14421_v59 }
 0xbfa   :  { %v4436_v49 = vadd.f32 %v14354_v34, %v4416_v63 }
 0xbfc   :  { %v14418_v25 = vadd.f32 %v12381_v38, %v4436_v49  ;;  %v12384_v49 = vld [vmem:[%s17305_s6 + $0x48] sm:$0xff] }
 0xbfe   :  { %4476 = vadd.xlane.f32.xlu1 %v14418_v25 }
 0xbff   :  { %v4387_v52 = vpop.f32.mrf.mxu2 }
 0xc00   :  { %v4417_v37 = vadd.f32 %v4387_v52, %v3334_v43  ;;  %v11593_v52 = vld [vmem:[%s17332_s5 + $0x8] sm:$0xff] }
 0xc02   :  { %v4437_v1 = vadd.f32 %v14354_v34, %v4417_v37 }
 0xc04   :  { %v14444_v44 = vadd.f32 %v12382_v62, %v4437_v1 }
 0xc41   :  { %v4465_v33 = vpop.xlane.xlu2 %4464 }
 0xc42   :  { %v4503_v57 = vmul.f32 %v14421_v59, %v4465_v33 }
 0xc44   :  { %v14428_v48 = vsub.f32 %v14363_v30, %v4503_v57  ;;  %v12385_v57 = vld [vmem:[%s17305_s6 + $0x50] sm:$0xff] }
 0xc46   :  { %v4535_v11 = vmul.f32 %v14428_v48, %v14428_v48 }
 0xc47   :  { %v4390_v8 = vpop.f32.mrf.mxu2 }
 0xc48   :  { %4551 = vadd.xlane.f32.xlu2 %v4535_v11  ;;  %v4418_v30 = vadd.f32 %v4390_v8, %v14115_v18  ;;  %v17334_v18 = vld [vmem:[#allocation8_spill] sm:$0xff]  ;;  %v108_v11 = vld [vmem:[%s17337_s0 + $0x8] sm:$0xff] }
 0xc49   :  { %v4467_v60 = vpop.xlane.xlu0 %4466  ;;  %v2243_v55 = vadd.f32 %v17334_v18, %v17333_v53  ;;  %v17339_v53 = vld [vmem:[#allocation16_spill] sm:$0xff]  ;;  %v17340_v18 = vld [vmem:[#allocation10_spill] sm:$0xff] }
 0xc4a   :  { %v4504_v29 = vmul.f32 %v14421_v59, %v4467_v60  ;;  %v4438_v51 = vadd.f32 %v14354_v34, %v4418_v30  ;;  %v11591_v30 = vld [vmem:[%s17338_s1 + $0x38] sm:$0xff] }
 0xc4b   :  { %v3336_v58 = vadd.f32 %v14117_v10, %v2243_v55  ;;  %v11596_v10 = vld [vmem:[%s17332_s5 + $0x20] sm:$0xff]  ;;  %4769 = vmatpush.bf16.msrb.mxu3 %v11591_v30  ;;  %v2253_v55 = vadd.f32 %v17340_v18, %v17339_v53 }
 0xc4c   :  { %v14438_v40 = vsub.f32 %v14372_v3, %v4504_v29  ;;  %v11598_v3 = vld [vmem:[%s17332_s5 + $0x30] sm:$0xff]  ;;  %v14466_v39 = vadd.f32 %v12383_v2, %v4438_v51 }
 0xc4d   :  { %4887 = vmatpush.bf16.msrb.mxu0 %v11598_v3 }
 0xc4e   :  { %v4536_v9 = vmul.f32 %v14438_v40, %v14438_v40 }
 0xc4f   :  { %v4392_v56 = vpop.f32.mrf.mxu2 }
 0xc50   :  { %4478 = vadd.xlane.f32.xlu2 %v14444_v44  ;;  %4553 = vadd.xlane.f32.xlu0 %v4536_v9  ;;  %v4419_v41 = vadd.f32 %v4392_v56, %v3336_v58  ;;  %v12386_v9 = vld [vmem:[%s17305_s6 + $0x58] sm:$0xff] }
 0xc51   :  { %v4469_v27 = vpop.xlane.xlu1 %4468  ;;  %4888 = vmatpush.bf16.msrb.mxu0 %v11597_v0 }
 0xc52   :  { %v4505_v13 = vmul.f32 %v14421_v59, %v4469_v27  ;;  %v4439_v46 = vadd.f32 %v14354_v34, %v4419_v41  ;;  %v12387_v41 = vld [vmem:[%s17305_s6 + $0x60] sm:$0xff] }
 0xc54   :  { %v14461_v23 = vsub.f32 %v14382_v24, %v4505_v13  ;;  %v14488_v38 = vadd.f32 %v12384_v49, %v4439_v46  ;;  %v3340_v13 = vadd.f32 %v14133_v5, %v2253_v55  ;;  %v110_v5 = vld [vmem:[%s17337_s0 + $0x18] sm:$0xff]  ;;  %v12388_v46 = vld [vmem:[%s17305_s6 + $0x68] sm:$0xff]  ;;  %v17341_v55 = vld [vmem:[#allocation17_spill] sm:$0xff] }
 0xc55   :  { %4889 = vmatpush.bf16.msrb.mxu0 %v11596_v10 }
 0xc56   :  { %v4537_v6 = vmul.f32 %v14461_v23, %v14461_v23 }
 0xc57   :  { %v4395_v20 = vpop.f32.mrf.mxu2 }
 0xc58   :  { %4480 = vadd.xlane.f32.xlu2 %v14466_v39  ;;  %4555 = vadd.xlane.f32.xlu0 %v4537_v6  ;;  %v4420_v31 = vadd.f32 %v4395_v20, %v14122_v42  ;;  %v17335_v42 = vld [vmem:[#allocation15_spill] sm:$0xff] }
 0xc59   :  { %v4471_v24 = vpop.xlane.xlu2 %4470  ;;  %4890 = vmatpush.bf16.msrb.mxu0 %v11595_v26  ;;  %v2248_v47 = vadd.f32 %v17336_v50, %v17335_v42  ;;  %v109_v20 = vld [vmem:[%s17337_s0 + $0x10] sm:$0xff]  ;;  %v114_v50 = vld [vmem:[%s17337_s0 + $0x38] sm:$0xff] }
 0xc5a   :  { %v4506_v7 = vmul.f32 %v14421_v59, %v4471_v24  ;;  %v4440_v19 = vadd.f32 %v14354_v34, %v4420_v31  ;;  %v113_v42 = vld [vmem:[%s17337_s0 + $0x30] sm:$0xff] }
 0xc5b   :  { %v3338_v33 = vadd.f32 %v14124_v15, %v2248_v47  ;;  %v11592_v15 = vld [vmem:[%s17332_s5] sm:$0xff]  ;;  %v14600_v47 = vpack.c.bf16 %v114_v50, %v113_v42 }
 0xc5c   :  { %v14480_v12 = vsub.f32 %v14391_v35, %v4506_v7  ;;  %v11594_v35 = vld [vmem:[%s17332_s5 + $0x10] sm:$0xff]  ;;  %v14510_v43 = vadd.f32 %v12385_v57, %v4440_v19  ;;  %v11589_v19 = vld [vmem:[%s17338_s1 + $0x28] sm:$0xff] }
 0xc5d   :  { %4891 = vmatpush.bf16.msrb.mxu0 %v11594_v35 }
 0xc5e   :  { %v4538_v63 = vmul.f32 %v14480_v12, %v14480_v12 }
 0xc5f   :  { %v4397_v17 = vpop.f32.mrf.mxu2 }
 0xc60   :  { %4557 = vadd.xlane.f32.xlu1 %v4538_v63  ;;  %4482 = vadd.xlane.f32.xlu0 %v14488_v38  ;;  %v4421_v61 = vadd.f32 %v4397_v17, %v3338_v33  ;;  %v12389_v63 = vld [vmem:[%s17305_s6 + $0x70] sm:$0xff]  ;;  %v112_v17 = vld [vmem:[%s17337_s0 + $0x28] sm:$0xff] }
 0xc61   :  { %v4473_v32 = vpop.xlane.xlu0 %4472  ;;  %4892 = vmatpush.bf16.msrb.mxu0 %v11593_v52  ;;  %v11587_v52 = vld [vmem:[%s17338_s1 + $0x18] sm:$0xff]  ;;  %v11586_v33 = vld [vmem:[%s17338_s1 + $0x10] sm:$0xff] }
 0xc62   :  { %v4507_v54 = vmul.f32 %v14421_v59, %v4473_v32  ;;  %v4441_v1 = vadd.f32 %v14354_v34, %v4421_v61  ;;  %v11590_v32 = vld [vmem:[%s17338_s1 + $0x30] sm:$0xff]  ;;  %v11585_v61 = vld [vmem:[%s17338_s1 + $0x8] sm:$0xff] }
 0xc63   :  { %4770 = vmatpush.bf16.msrb.mxu3 %v11590_v32 }
 0xc64   :  { %v14503_v45 = vsub.f32 %v14401_v21, %v4507_v54  ;;  %v107_v21 = vld [vmem:[%s17337_s0] sm:$0xff]  ;;  %v14537_v56 = vadd.f32 %v12386_v9, %v4441_v1  ;;  %v116_v9 = vld [vmem:[%s17337_s0 + $0x48] sm:$0xff] }
 0xc65   :  { %v14522_v60 = vpack.c.bf16 %v108_v11, %v107_v21  ;;  %4893 = vmatpush.bf16.msrb.mxu0 %v11592_v15  ;;  %v11588_v54 = vld [vmem:[%s17338_s1 + $0x20] sm:$0xff] }
 0xc66   :  { %v4539_v28 = vmul.f32 %v14503_v45, %v14503_v45 }
 0xc67   :  { %v4400_v37 = vpop.f32.mrf.mxu2  ;;  %4771 = vmatpush.bf16.msrb.mxu3 %v11589_v19 }
 0xc68   :  { %4559 = vadd.xlane.f32.xlu1 %v4539_v28  ;;  %4484 = vadd.xlane.f32.xlu0 %v14510_v43  ;;  %v4422_v62 = vadd.f32 %v4400_v37, %v14130_v4  ;;  %v11584_v28 = vld [vmem:[%s17338_s1] sm:$0xff] }
 0xc69   :  { %v4475_v8 = vpop.xlane.xlu1 %4474  ;;  %4894 = vmatmul.bf16.vlgmr.msrb.gmra.mxu0 %v14522_v60 }
 0xc6a   :  { %v4508_v29 = vmul.f32 %v14421_v59, %v4475_v8  ;;  %v4442_v4 = vadd.f32 %v14354_v34, %v4422_v62  ;;  %v115_v62 = vld [vmem:[%s17337_s0 + $0x40] sm:$0xff] }
 0xc6b   :  { %4772 = vmatpush.bf16.msrb.mxu3 %v11588_v54 }
 0xc6c   :  { %v14527_v36 = vsub.f32 %v14410_v14, %v4508_v29  ;;  %v14553_v2 = vadd.f32 %v12387_v41, %v4442_v4  ;;  %v17342_v4 = vld [vmem:[#allocation11_spill] sm:$0xff] }
 0xc6e   :  { %v4540_v3 = vmul.f32 %v14527_v36, %v14527_v36 }
 0xc6f   :  { %v4402_v14 = vpop.f32.mrf.mxu2  ;;  %4773 = vmatpush.bf16.msrb.mxu3 %v11587_v52 }
 0xc70   :  { %4486 = vadd.xlane.f32.xlu1 %v14537_v56  ;;  %4561 = vadd.xlane.f32.xlu2 %v4540_v3  ;;  %v4423_v58 = vadd.f32 %v4402_v14, %v3340_v13  ;;  %v14634_v14 = vpack.c.bf16 %v116_v9, %v115_v62 }
 0xc71   :  { %v4477_v27 = vpop.xlane.xlu1 %4476 }
 0xc72   :  { %v4509_v51 = vmul.f32 %v14421_v59, %v4477_v27  ;;  %v4443_v10 = vadd.f32 %v14354_v34, %v4423_v58 }
 0xc73   :  { %4774 = vmatpush.bf16.msrb.mxu3 %v11586_v33  ;;  %v117_v33 = vld [vmem:[%s17337_s0 + $0x50] sm:$0xff] }
 0xc74   :  { %v14548_v0 = vsub.f32 %v14418_v25, %v4509_v51  ;;  %v14564_v25 = vpack.c.bf16 %v110_v5, %v109_v20  ;;  %v14572_v26 = vadd.f32 %v12388_v46, %v4443_v10  ;;  %v2258_v51 = vadd.f32 %v17342_v4, %v17341_v55  ;;  %v14653_v10 = vld [vmem:[%s17254_s23] ss:$0 sm:$0xff] }
 0xc76   :  { %v4541_v6 = vmul.f32 %v14548_v0, %v14548_v0  ;;  %v3342_v20 = vadd.f32 %v14143_v16, %v2258_v51  ;;  %v119_v51 = vld [vmem:[%s17337_s0 + $0x60] sm:$0xff] }
 0xc77   :  { %v4405_v24 = vpop.f32.mrf.mxu2  ;;  %4775 = vmatpush.bf16.msrb.mxu3 %v11585_v61 }
 0xc78   :  { %4488 = vadd.xlane.f32.xlu1 %v14553_v2  ;;  %4563 = vadd.xlane.f32.xlu2 %v4541_v6  ;;  %v4424_v7 = vadd.f32 %v4405_v24, %v14140_v22  ;;  %v111_v22 = vld [vmem:[%s17337_s0 + $0x20] sm:$0xff] }
 0xc79   :  { %4899 = vmatmul.bf16.gmra.mxu0 %v14564_v25  ;;  %v14588_v35 = vpack.c.bf16 %v112_v17, %v111_v22 }
 0xc7a   :  { %v4444_v31 = vadd.f32 %v14354_v34, %v4424_v7 }
 0xc7b   :  { %4776 = vmatpush.bf16.msrb.mxu3 %v11584_v28 }
 0xc7c   :  { %v14579_v49 = vadd.f32 %v12389_v63, %v4444_v31 }
 0xc7f   :  { %v4407_v41 = vpop.f32.mrf.mxu2 }
 0xc80   :  { %4490 = vadd.xlane.f32.xlu2 %v14572_v26  ;;  %v4425_v46 = vadd.f32 %v4407_v41, %v3342_v20 }
 0xc82   :  { %v4445_v32 = vadd.f32 %v14354_v34, %v4425_v46  ;;  %v118_v34 = vld [vmem:[%s17337_s0 + $0x58] sm:$0xff] }
 0xc88   :  { %4492 = vadd.xlane.f32.xlu2 %v14579_v49 }
 0xc89   :  { %4904 = vmatmul.bf16.gmra.mxu0 %v14588_v35 }
 0xc99   :  { %4909 = vmatmul.bf16.gmra.mxu0 %v14600_v47 }
 0xca9   :  { %4914 = vmatmul.bf16.gmra.mxu0 %v14634_v14 }
 0xcbb   :  { %v4552_v57 = vpop.xlane.xlu2 %4551 }
 0xcbc   :  { %v4583_v37 = vmul.f32 0.007874016, %v4552_v57 }
 0xcbe   :  { %12023 = vrcp.f32 %v4583_v37 }
 0xcc3   :  { %v4479_v15 = vpop.xlane.xlu2 %4478  ;;  %v4554_v21 = vpop.xlane.xlu0 %4553 }
 0xcc4   :  { %v12024_v11 = vpop.eup %12023  ;;  %v4510_v8 = vmul.f32 %v14421_v59, %v4479_v15  ;;  %v4584_v29 = vmul.f32 0.007874016, %v4554_v21 }
 0xcc5   :  { %v4615_v30 = vmul.f32 %v12024_v11, %v14428_v48  ;;  %v14640_v48 = vld [vmem:[%s17253_s22] ss:$0 sm:$0xff] }
 0xcc6   :  { %v14623_v1 = vsub.f32 %v14444_v44, %v4510_v8  ;;  %12025 = vrcp.f32 %v4584_v29 }
 0xcc7   :  { %v4631_v44 = vadd.f32 1e-12, %v4615_v30 }
 0xcc8   :  { %v4542_v3 = vmul.f32 %v14623_v1, %v14623_v1 }
 0xcc9   :  { %v4650_v24 = vmul.f32 %v14640_v48, %v4631_v44 }
 0xcca   :  { %4565 = vadd.xlane.f32.xlu0 %v4542_v3 }
 0xccb   :  { %v4481_v27 = vpop.xlane.xlu2 %4480  ;;  %v4556_v53 = vpop.xlane.xlu0 %4555  ;;  %v14660_v16 = vadd.f32 %v14653_v10, %v4650_v24 }
 0xccc   :  { %v12026_v18 = vpop.eup %12025  ;;  %v4511_v13 = vmul.f32 %v14421_v59, %v4481_v27  ;;  %v4585_v58 = vmul.f32 0.007874016, %v4556_v53 }
 0xccd   :  { %v4616_v6 = vmul.f32 %v12026_v18, %v14438_v40  ;;  %17343 = vst [vmem:[#allocation12_spill] sm:$0xff] %v14660_v16 }
 0xcce   :  { %v14648_v5 = vsub.f32 %v14466_v39, %v4511_v13  ;;  %12027 = vrcp.f32 %v4585_v58  ;;  %v120_v13 = vld [vmem:[%s17337_s0 + $0x68] sm:$0xff] }
 0xccf   :  { %v4632_v7 = vadd.f32 1e-12, %v4616_v6  ;;  %v14724_v20 = vpack.c.bf16 %v120_v13, %v119_v51 }
 0xcd0   :  { %v4543_v31 = vmul.f32 %v14648_v5, %v14648_v5 }
 0xcd1   :  { %v4651_v40 = vmul.f32 %v14640_v48, %v4632_v7 }
 0xcd2   :  { %4567 = vadd.xlane.f32.xlu0 %v4543_v31 }
 0xcd3   :  { %v14663_v39 = vadd.f32 %v14653_v10, %v4651_v40  ;;  %v4483_v63 = vpop.xlane.xlu0 %4482  ;;  %v4558_v22 = vpop.xlane.xlu1 %4557 }
 0xcd4   :  { %v12028_v17 = vpop.eup %12027  ;;  %v4512_v42 = vmul.f32 %v14421_v59, %v4483_v63  ;;  %v4586_v50 = vmul.f32 0.007874016, %v4558_v22 }
 0xcd5   :  { %17344 = vst [vmem:[#allocation6_spill] sm:$0xff] %v14663_v39  ;;  %v14669_v19 = vpack.c.bf16 %v14663_v39, %v14660_v16  ;;  %v4617_v52 = vmul.f32 %v12028_v17, %v14461_v23  ;;  %v14689_v23 = vpack.c.bf16 %v118_v34, %v117_v33 }
 0xcd6   :  { %v14672_v54 = vsub.f32 %v14488_v38, %v4512_v42  ;;  %12029 = vrcp.f32 %v4586_v50  ;;  %v12390_v38 = vld [vmem:[%s17305_s6 + $0x78] sm:$0xff] }
 0xcd7   :  { %4777 = vmatmul.bf16.vlgmr.msrb.gmra.mxu3 %v14669_v19  ;;  %v14687_v28 = vadd.f32 %v12390_v38, %v4445_v32  ;;  %v4633_v57 = vadd.f32 1e-12, %v4617_v52  ;;  %4919 = vmatmul.bf16.gmra.mxu0 %v14689_v23  ;;  %v122_v38 = vld [vmem:[%s17337_s0 + $0x78] sm:$0xff] }
 0xcd8   :  { %v4544_v61 = vmul.f32 %v14672_v54, %v14672_v54 }
 0xcd9   :  { %v4652_v9 = vmul.f32 %v14640_v48, %v4633_v57 }
 0xcda   :  { %4569 = vadd.xlane.f32.xlu1 %v4544_v61  ;;  %4494 = vadd.xlane.f32.xlu0 %v14687_v28 }
 0xcdb   :  { %v4485_v37 = vpop.xlane.xlu0 %4484  ;;  %v4560_v15 = vpop.xlane.xlu1 %4559  ;;  %v14703_v18 = vadd.f32 %v14653_v10, %v4652_v9 }
 0xcdc   :  { %v12030_v21 = vpop.eup %12029  ;;  %v4513_v11 = vmul.f32 %v14421_v59, %v4485_v37  ;;  %v4587_v8 = vmul.f32 0.007874016, %v4560_v15 }
 0xcdd   :  { %v4618_v29 = vmul.f32 %v12030_v21, %v14480_v12  ;;  %17345 = vst [vmem:[#allocation13_spill] sm:$0xff] %v14703_v18 }
 0xcde   :  { %v14696_v30 = vsub.f32 %v14510_v43, %v4513_v11  ;;  %12031 = vrcp.f32 %v4587_v8 }
 0xcdf   :  { %v4634_v62 = vadd.f32 1e-12, %v4618_v29 }
 0xce0   :  { %v4545_v3 = vmul.f32 %v14696_v30, %v14696_v30 }
 0xce1   :  { %v4653_v44 = vmul.f32 %v14640_v48, %v4634_v62 }
 0xce2   :  { %4571 = vadd.xlane.f32.xlu1 %v4545_v3 }
 0xce3   :  { %v4562_v27 = vpop.xlane.xlu2 %4561  ;;  %v4487_v53 = vpop.xlane.xlu1 %4486  ;;  %v14706_v12 = vadd.f32 %v14653_v10, %v4653_v44 }
 0xce4   :  { %v12032_v43 = vpop.eup %12031  ;;  %v4588_v55 = vmul.f32 0.007874016, %v4562_v27  ;;  %v4514_v4 = vmul.f32 %v14421_v59, %v4487_v53  ;;  %v14775_v27 = vld [vmem:[%s17244_s13] ss:$0 sm:$0xff] }
 0xce5   :  { %17346 = vst [vmem:[#allocation7_spill] sm:$0xff] %v14706_v12  ;;  %v14717_v58 = vpack.c.bf16 %v14706_v12, %v14703_v18  ;;  %v4619_v6 = vmul.f32 %v12032_v43, %v14503_v45 }
 0xce6   :  { %12033 = vrcp.f32 %v4588_v55  ;;  %v14720_v41 = vsub.f32 %v14537_v56, %v4514_v4  ;;  %v14728_v7 = vpop.f32.mrf.mxu0 }
 0xce7   :  { %4782 = vmatmul.bf16.gmra.mxu3 %v14717_v58  ;;  %v4635_v46 = vadd.f32 1e-12, %v4619_v6  ;;  %4924 = vmatmul.bf16.gmra.mxu0 %v14724_v20 }
 0xce8   :  { %v4546_v24 = vmul.f32 %v14720_v41, %v14720_v41 }
 0xce9   :  { %v4654_v32 = vmul.f32 %v14640_v48, %v4635_v46 }
 0xcea   :  { %4573 = vadd.xlane.f32.xlu2 %v4546_v24 }
 0xceb   :  { %v4564_v31 = vpop.xlane.xlu2 %4563  ;;  %v4489_v40 = vpop.xlane.xlu1 %4488  ;;  %v14741_v34 = vadd.f32 %v14653_v10, %v4654_v32 }
 0xcec   :  { %v12034_v63 = vpop.eup %12033  ;;  %v4515_v56 = vmul.f32 %v14421_v59, %v4489_v40 }
 0xced   :  { %v4620_v45 = vmul.f32 %v12034_v63, %v14527_v36  ;;  %17347 = vst [vmem:[#allocation14_spill] sm:$0xff] %v14741_v34 }
 0xcee   :  { %v14734_v22 = vsub.f32 %v14553_v2, %v4515_v56  ;;  %v4897_v52 = vpop.f32.mrf.mxu0  ;;  %v121_v2 = vld [vmem:[%s17337_s0 + $0x70] sm:$0xff] }
 0xcef   :  { %v4636_v17 = vadd.f32 1e-12, %v4620_v45  ;;  %v14761_v15 = vpack.c.bf16 %v122_v38, %v121_v2 }
 0xcf0   :  { %v4547_v42 = vmul.f32 %v14734_v22, %v14734_v22 }
 0xcf1   :  { %v4655_v50 = vmul.f32 %v14640_v48, %v4636_v17 }
 0xcf2   :  { %4575 = vadd.xlane.f32.xlu0 %v4547_v42 }
 0xcf3   :  { %v4491_v33 = vpop.xlane.xlu2 %4490  ;;  %v14744_v61 = vadd.f32 %v14653_v10, %v4655_v50 }
 0xcf4   :  { %v4516_v36 = vmul.f32 %v14421_v59, %v4491_v33 }
 0xcf5   :  { %17348 = vst [vmem:[#allocation8_spill] sm:$0xff] %v14744_v61  ;;  %v14755_v57 = vpack.c.bf16 %v14744_v61, %v14741_v34 }
 0xcf6   :  { %v14758_v37 = vsub.f32 %v14572_v26, %v4516_v36  ;;  %v4900_v11 = vpop.f32.mrf.mxu0 }
 0xcf7   :  { %4787 = vmatmul.bf16.gmra.mxu3 %v14755_v57  ;;  %4929 = vmatmul.bf16.gmra.mxu0 %v14761_v15  ;;  %v4901_v17 = vadd.f32 %v14775_v27, %v4900_v11 }
 0xcf8   :  { %v4548_v21 = vmul.f32 %v14758_v37, %v14758_v37 }
 0xcf9   :  { %v5070_v33 = vpack.c.bf16 %v4901_v17, %v4901_v17 }
 0xcfa   :  { %4577 = vadd.xlane.f32.xlu1 %v4548_v21  ;;  %v4589_v21 = vmul.f32 0.007874016, %v4564_v31 }
 0xcfb   :  { %v4493_v8 = vpop.xlane.xlu2 %4492 }
 0xcfc   :  { %v4517_v29 = vmul.f32 %v14421_v59, %v4493_v8  ;;  %v4896_v8 = vadd.f32 %v14775_v27, %v14728_v7  ;;  %12035 = vrcp.f32 %v4589_v21 }
 0xcfe   :  { %v14768_v62 = vsub.f32 %v14579_v49, %v4517_v29  ;;  %v4902_v9 = vpop.f32.mrf.mxu0  ;;  %v4898_v29 = vadd.f32 %v14775_v27, %v4897_v52  ;;  %v5068_v11 = vpack.c.bf16 %v4896_v8, %v4896_v8 }
 0xcff   :  { %v4903_v32 = vadd.f32 %v14775_v27, %v4902_v9 }
 0xd00   :  { %v4549_v26 = vmul.f32 %v14768_v62, %v14768_v62 }
 0xd01   :  { %v5071_v36 = vpack.c.bf16 %v4903_v32, %v4903_v32 }
 0xd02   :  { %4579 = vadd.xlane.f32.xlu2 %v4549_v26  ;;  %v5130_v26 = vunpack.c.l.b16 %v5070_v33 }
 0xd06   :  { %v4905_v3 = vpop.f32.mrf.mxu0 }
 0xd07   :  { %v4906_v51 = vadd.f32 %v14775_v27, %v4905_v3  ;;  %v5131_v3 = vunpack.c.l.b16 %v5071_v36 }
 0xd09   :  { %v5072_v40 = vpack.c.bf16 %v4906_v51, %v4906_v51  ;;  %v5137_v9 = vpack.c.b16 %v5131_v3, %v5130_v26 }
 0xd0b   :  { %v5132_v42 = vunpack.c.l.b16 %v5072_v40 }
 0xd0e   :  { %v4907_v44 = vpop.f32.mrf.mxu0 }
 0xd0f   :  { %v4908_v13 = vadd.f32 %v14775_v27, %v4907_v44  ;;  %v5069_v44 = vpack.c.bf16 %v4898_v29, %v4898_v29 }
 0xd11   :  { %v5073_v63 = vpack.c.bf16 %v4908_v13, %v4908_v13 }
 0xd13   :  { %v5133_v50 = vunpack.c.l.b16 %v5073_v63 }
 0xd15   :  { %v5138_v2 = vpack.c.b16 %v5133_v50, %v5132_v42 }
 0xd16   :  { %v4910_v53 = vpop.f32.mrf.mxu0 }
 0xd17   :  { %v4911_v43 = vadd.f32 %v14775_v27, %v4910_v53  ;;  %v5159_v38 = vsel %vm570_vm0, %v5138_v2, 0  ;;  %v5156_v53 = vsel %vm570_vm0, %v5137_v9, 0 }
 0xd19   :  { %v5074_v55 = vpack.c.bf16 %v4911_v43, %v4911_v43  ;;  %v5128_v43 = vunpack.c.l.b16 %v5068_v11 }
 0xd1b   :  { %v5134_v6 = vunpack.c.l.b16 %v5074_v55  ;;  %v5129_v55 = vunpack.c.l.b16 %v5069_v44 }
 0xd1d   :  { %v5136_v7 = vpack.c.b16 %v5129_v55, %v5128_v43  ;;  %v14823_v55 = vld [vmem:[%s17351_s28] ss:$0 sm:$0xff] }
 0xd1e   :  { %v4912_v4 = vpop.f32.mrf.mxu0 }
 0xd1f   :  { %v4913_v49 = vadd.f32 %v14775_v27, %v4912_v4  ;;  %v5153_v52 = vsel %vm570_vm0, %v5136_v7, 0 }
 0xd21   :  { %v5075_v24 = vpack.c.bf16 %v4913_v49, %v4913_v49  ;;  %v12036_v49 = vpop.eup %12035 }
 0xd22   :  { %v4621_v51 = vmul.f32 %v12036_v49, %v14548_v0 }
 0xd23   :  { %v5135_v46 = vunpack.c.l.b16 %v5075_v24 }
 0xd24   :  { %v4637_v13 = vadd.f32 1e-12, %v4621_v51 }
 0xd25   :  { %v5139_v56 = vpack.c.b16 %v5135_v46, %v5134_v6 }
 0xd27   :  { %v5162_v45 = vsel %vm570_vm0, %v5139_v56, 0  ;;  %v4656_v56 = vmul.f32 %v14640_v48, %v4637_v13 }
 0xd28   :  { %5168 = vmatpush.bf16.xpose.msra.mxu2 %v5162_v45  ;;  %v14793_v45 = vpop.f32.mrf.mxu0 }
 0xd29   :  { %v14797_v42 = vadd.f32 %v14653_v10, %v4656_v56 }
 0xd2b   :  { %17349 = vst [vmem:[#allocation15_spill] sm:$0xff] %v14797_v42 }
 0xd30   :  { %5169 = vmatpush.bf16.xpose.msra.mxu2 %v5159_v38  ;;  %v14812_v8 = vpop.f32.mrf.mxu0 }
 0xd38   :  { %5170 = vmatpush.bf16.xpose.msra.mxu2 %v5156_v53 }
 0xd3d   :  { %v4566_v4 = vpop.xlane.xlu0 %4565 }
 0xd3e   :  { %v4590_v31 = vmul.f32 0.007874016, %v4566_v4 }
 0xd40   :  { %12037 = vrcp.f32 %v4590_v31  ;;  %5171 = vmatpush.bf16.xpose.msra.mxu2 %v5153_v52 }
 0xd45   :  { %v4568_v6 = vpop.xlane.xlu0 %4567 }
 0xd46   :  { %v12038_v24 = vpop.eup %12037  ;;  %v4591_v46 = vmul.f32 0.007874016, %v4568_v6 }
 0xd47   :  { %v4622_v40 = vmul.f32 %v12038_v24, %v14623_v1 }
 0xd48   :  { %12039 = vrcp.f32 %v4591_v46 }
 0xd49   :  { %v4638_v63 = vadd.f32 1e-12, %v4622_v40 }
 0xd4b   :  { %v4657_v17 = vmul.f32 %v14640_v48, %v4638_v63 }
 0xd4d   :  { %v4570_v32 = vpop.xlane.xlu1 %4569  ;;  %v4495_v0 = vpop.xlane.xlu0 %4494  ;;  %v14800_v50 = vadd.f32 %v14653_v10, %v4657_v17 }
 0xd4e   :  { %v12040_v33 = vpop.eup %12039  ;;  %v4592_v36 = vmul.f32 0.007874016, %v4570_v32  ;;  %v4518_v1 = vmul.f32 %v14421_v59, %v4495_v0 }
 0xd4f   :  { %17350 = vst [vmem:[#allocation9_spill] sm:$0xff] %v14800_v50  ;;  %v14805_v2 = vpack.c.bf16 %v14800_v50, %v14797_v42  ;;  %v4623_v21 = vmul.f32 %v12040_v33, %v14648_v5 }
 0xd50   :  { %12041 = vrcp.f32 %v4592_v36  ;;  %v14808_v38 = vsub.f32 %v14687_v28, %v4518_v1 }
 0xd51   :  { %4792 = vmatmul.bf16.gmra.mxu3 %v14805_v2  ;;  %v4639_v26 = vadd.f32 1e-12, %v4623_v21 }
 0xd52   :  { %v4550_v29 = vmul.f32 %v14808_v38, %v14808_v38 }
 0xd53   :  { %v4658_v28 = vmul.f32 %v14640_v48, %v4639_v26 }
 0xd54   :  { %4581 = vadd.xlane.f32.xlu0 %v4550_v29  ;;  %v14818_v43 = vpop.f32.mrf.mxu0 }
 0xd55   :  { %v4572_v3 = vpop.xlane.xlu1 %4571  ;;  %v14827_v31 = vadd.f32 %v14653_v10, %v4658_v28 }
 0xd56   :  { %v12042_v11 = vpop.eup %12041  ;;  %v4593_v44 = vmul.f32 0.007874016, %v4572_v3 }
 0xd57   :  { %v4624_v9 = vmul.f32 %v12042_v11, %v14672_v54  ;;  %17352 = vst [vmem:[#allocation16_spill] sm:$0xff] %v14827_v31 }
 0xd58   :  { %12043 = vrcp.f32 %v4593_v44 }
 0xd59   :  { %v4640_v53 = vadd.f32 1e-12, %v4624_v9 }
 0xd5a   :  { %v4778_v5 = vpop.f32.mrf.mxu3 }
 0xd5b   :  { %v4659_v4 = vmul.f32 %v14640_v48, %v4640_v53  ;;  %v4779_v52 = vadd.f32 %v14823_v55, %v4778_v5 }
 0xd5c   :  { %v14839_v24 = vpop.f32.mrf.mxu0 }
 0xd5d   :  { %v4574_v49 = vpop.xlane.xlu2 %4573  ;;  %v14830_v54 = vadd.f32 %v14653_v10, %v4659_v4  ;;  %v5052_v40 = vpack.c.bf16 %v4779_v52, %v4779_v52 }
 0xd5e   :  { %v12044_v51 = vpop.eup %12043  ;;  %v4594_v7 = vmul.f32 0.007874016, %v4574_v49 }
 0xd5f   :  { %17353 = vst [vmem:[#allocation10_spill] sm:$0xff] %v14830_v54  ;;  %v14835_v13 = vpack.c.bf16 %v14830_v54, %v14827_v31  ;;  %v4625_v6 = vmul.f32 %v12044_v51, %v14696_v30  ;;  %v5108_v36 = vunpack.c.l.b16 %v5052_v40 }
 0xd60   :  { %12045 = vrcp.f32 %v4594_v7 }
 0xd61   :  { %4797 = vmatmul.bf16.gmra.mxu3 %v14835_v13  ;;  %v4641_v56 = vadd.f32 1e-12, %v4625_v6 }
 0xd62   :  { %v4780_v46 = vpop.f32.mrf.mxu3 }
 0xd63   :  { %v4781_v63 = vadd.f32 %v14823_v55, %v4780_v46  ;;  %v4660_v26 = vmul.f32 %v14640_v48, %v4641_v56 }
 0xd64   :  { %v4925_v3 = vpop.f32.mrf.mxu0 }
 0xd65   :  { %v5053_v17 = vpack.c.bf16 %v4781_v63, %v4781_v63  ;;  %v4576_v32 = vpop.xlane.xlu0 %4575  ;;  %v14847_v53 = vadd.f32 %v14653_v10, %v4660_v26 }
 0xd66   :  { %v12046_v0 = vpop.eup %12045  ;;  %v4595_v33 = vmul.f32 0.007874016, %v4576_v32 }
 0xd67   :  { %v4626_v1 = vmul.f32 %v12046_v0, %v14720_v41  ;;  %v5109_v21 = vunpack.c.l.b16 %v5053_v17  ;;  %17354 = vst [vmem:[#allocation17_spill] sm:$0xff] %v14847_v53 }
 0xd68   :  { %12047 = vrcp.f32 %v4595_v33 }
 0xd69   :  { %v4642_v29 = vadd.f32 1e-12, %v4626_v1  ;;  %v5116_v30 = vpack.c.b16 %v5109_v21, %v5108_v36 }
 0xd6a   :  { %v4783_v11 = vpop.f32.mrf.mxu3 }
 0xd6b   :  { %10771 = vmatmul.msk.bf16.vlgmr.msra.gmra.mxu2 %vm570_vm0, %v5116_v30  ;;  %v4661_v44 = vmul.f32 %v14640_v48, %v4642_v29  ;;  %v4784_v4 = vadd.f32 %v14823_v55, %v4783_v11 }
 0xd6c   :  { %v4927_v7 = vpop.f32.mrf.mxu0 }
 0xd6d   :  { %v4578_v9 = vpop.xlane.xlu1 %4577  ;;  %v14850_v28 = vadd.f32 %v14653_v10, %v4661_v44  ;;  %v5054_v6 = vpack.c.bf16 %v4784_v4, %v4784_v4 }
 0xd6e   :  { %v12048_v41 = vpop.eup %12047  ;;  %v4596_v5 = vmul.f32 0.007874016, %v4578_v9  ;;  %v4926_v9 = vadd.f32 %v14775_v27, %v4925_v3  ;;  %v4921_v3 = vadd.f32 %v14775_v27, %v14818_v43  ;;  %v4916_v43 = vadd.f32 %v14775_v27, %v14793_v45  ;;  %v11616_v45 = vld [vmem:[%s17338_s1 + $0x70] sm:$0xff] }
 0xd6f   :  { %17355 = vst [vmem:[#allocation11_spill] sm:$0xff] %v14850_v28  ;;  %v14855_v49 = vpack.c.bf16 %v14850_v28, %v14847_v53  ;;  %v4627_v51 = vmul.f32 %v12048_v41, %v14734_v22  ;;  %v5110_v17 = vunpack.c.l.b16 %v5054_v6  ;;  %v4928_v41 = vadd.f32 %v14775_v27, %v4927_v7 }
 0xd70   :  { %12049 = vrcp.f32 %v4596_v5 }
 0xd71   :  { %4802 = vmatmul.bf16.gmra.mxu3 %v14855_v49  ;;  %v4643_v40 = vadd.f32 1e-12, %v4627_v51 }
 0xd72   :  { %v4785_v52 = vpop.f32.mrf.mxu3 }
 0xd73   :  { %v4786_v46 = vadd.f32 %v14823_v55, %v4785_v52  ;;  %v4662_v1 = vmul.f32 %v14640_v48, %v4643_v40  ;;  %v5080_v40 = vpack.c.bf16 %v4926_v9, %v4926_v9 }
 0xd74   :  { %v4930_v21 = vpop.f32.mrf.mxu0 }
 0xd75   :  { %v5055_v63 = vpack.c.bf16 %v4786_v46, %v4786_v46  ;;  %v4931_v30 = vadd.f32 %v14775_v27, %v4930_v21  ;;  %v14866_v26 = vadd.f32 %v14653_v10, %v4662_v1  ;;  %v5225_v1 = vunpack.c.l.b16 %v5080_v40 }
 0xd76   :  { %v12050_v56 = vpop.eup %12049 }
 0xd77   :  { %v4628_v32 = vmul.f32 %v12050_v56, %v14758_v37  ;;  %v5111_v0 = vunpack.c.l.b16 %v5055_v63  ;;  %17356 = vst [vmem:[#allocation18_spill] sm:$0xff] %v14866_v26  ;;  %v5082_v5 = vpack.c.bf16 %v4931_v30, %v4931_v30  ;;  %v5081_v63 = vpack.c.bf16 %v4928_v41, %v4928_v41 }
 0xd79   :  { %v4644_v33 = vadd.f32 1e-12, %v4628_v32  ;;  %v5117_v36 = vpack.c.b16 %v5111_v0, %v5110_v17  ;;  %v5227_v56 = vunpack.c.l.b16 %v5082_v5  ;;  %v5226_v21 = vunpack.c.l.b16 %v5081_v63 }
 0xd7a   :  { %v4788_v22 = vpop.f32.mrf.mxu3  ;;  %v4918_v5 = vadd.f32 %v14775_v27, %v14812_v8  ;;  %v4580_v8 = vpop.xlane.xlu2 %4579 }
 0xd7b   :  { %10772 = vmatmul.msk.bf16.gmra.mxu2 %vm570_vm0, %v5117_v36  ;;  %v4663_v29 = vmul.f32 %v14640_v48, %v4644_v33  ;;  %v4789_v37 = vadd.f32 %v14823_v55, %v4788_v22  ;;  %v4923_v36 = vadd.f32 %v14775_v27, %v14839_v24  ;;  %v5231_v41 = vpack.c.b16 %v5226_v21, %v5225_v1 }
 0xd7c   :  { %v4932_v4 = vpop.f32.mrf.mxu0 }
 0xd7d   :  { %v14869_v11 = vadd.f32 %v14653_v10, %v4663_v29  ;;  %v4933_v52 = vadd.f32 %v14775_v27, %v4932_v4  ;;  %v5056_v6 = vpack.c.bf16 %v4789_v37, %v4789_v37  ;;  %v5078_v37 = vpack.c.bf16 %v4921_v3, %v4921_v3  ;;  %v11617_v27 = vld [vmem:[%s17338_s1 + $0x78] sm:$0xff] }
 0xd7e   :  { %v5079_v9 = vpack.c.bf16 %v4923_v36, %v4923_v36  ;;  %5746 = vmatpush.bf16.msrb.mxu2 %v11617_v27  ;;  %v4597_v3 = vmul.f32 0.007874016, %v4580_v8 }
 0xd7f   :  { %17357 = vst [vmem:[#allocation19_spill] sm:$0xff] %v14869_v11  ;;  %v14874_v44 = vpack.c.bf16 %v14869_v11, %v14866_v26  ;;  %v5083_v17 = vpack.c.bf16 %v4933_v52, %v4933_v52  ;;  %v5112_v7 = vunpack.c.l.b16 %v5056_v6  ;;  %v5223_v4 = vunpack.c.l.b16 %v5078_v37 }
 0xd80   :  { %v5224_v24 = vunpack.c.l.b16 %v5079_v9  ;;  %v5076_v52 = vpack.c.bf16 %v4916_v43, %v4916_v43  ;;  %v5077_v6 = vpack.c.bf16 %v4918_v5, %v4918_v5  ;;  %12051 = vrcp.f32 %v4597_v3 }
 0xd81   :  { %4807 = vmatmul.bf16.gmra.mxu3 %v14874_v44  ;;  %v5228_v0 = vunpack.c.l.b16 %v5083_v17 }
 0xd82   :  { %v4790_v51 = vpop.f32.mrf.mxu3  ;;  %v5221_v40 = vunpack.c.l.b16 %v5076_v52  ;;  %v5222_v63 = vunpack.c.l.b16 %v5077_v6  ;;  %5747 = vmatpush.bf16.msrb.mxu2 %v11616_v45 }
 0xd83   :  { %v4791_v46 = vadd.f32 %v14823_v55, %v4790_v51  ;;  %v5232_v22 = vpack.c.b16 %v5228_v0, %v5227_v56  ;;  %v5252_v51 = vsel %vm570_vm0, %v5231_v41, 0  ;;  %v11615_v0 = vld [vmem:[%s17338_s1 + $0x68] sm:$0xff]  ;;  %v11610_v41 = vld [vmem:[%s17338_s1 + $0x40] sm:$0xff] }
 0xd84   :  { %v5229_v17 = vpack.c.b16 %v5222_v63, %v5221_v40 }
 0xd85   :  { %v5057_v32 = vpack.c.bf16 %v4791_v46, %v4791_v46  ;;  %v5255_v30 = vsel %vm570_vm0, %v5232_v22, 0  ;;  %v5230_v46 = vpack.c.b16 %v5224_v24, %v5223_v4  ;;  %v11612_v22 = vld [vmem:[%s17338_s1 + $0x50] sm:$0xff] }
 0xd86   :  { %5261 = vmatpush.bf16.xpose.msra.mxu3 %v5255_v30  ;;  %5748 = vmatpush.bf16.msrb.mxu2 %v11615_v0  ;;  %v12052_v1 = vpop.eup %12051  ;;  %v11611_v30 = vld [vmem:[%s17338_s1 + $0x48] sm:$0xff] }
 0xd87   :  { %v5113_v33 = vunpack.c.l.b16 %v5057_v32  ;;  %v5249_v56 = vsel %vm570_vm0, %v5230_v46, 0  ;;  %v5246_v32 = vsel %vm570_vm0, %v5229_v17, 0 }
 0xd89   :  { %v5118_v29 = vpack.c.b16 %v5113_v33, %v5112_v7  ;;  %v11614_v7 = vld [vmem:[%s17338_s1 + $0x60] sm:$0xff]  ;;  %v11613_v33 = vld [vmem:[%s17338_s1 + $0x58] sm:$0xff] }
 0xd8a   :  { %5749 = vmatpush.bf16.msrb.mxu2 %v11614_v7 }
 0xd8b   :  { %10773 = vmatmul.msk.bf16.gmra.mxu2 %vm570_vm0, %v5118_v29  ;;  %v4629_v29 = vmul.f32 %v12052_v1, %v14768_v62 }
 0xd8d   :  { %v4645_v37 = vadd.f32 1e-12, %v4629_v29  ;;  %v11606_v29 = vld [vmem:[%s17245_s14 + $0x30] sm:$0xff] }
 0xd8e   :  { %5262 = vmatpush.bf16.xpose.msra.mxu3 %v5252_v51  ;;  %5750 = vmatpush.bf16.msrb.mxu2 %v11613_v33 }
 0xd8f   :  { %v4664_v4 = vmul.f32 %v14640_v48, %v4645_v37 }
 0xd91   :  { %v14923_v51 = vadd.f32 %v14653_v10, %v4664_v4 }
 0xd92   :  { %5751 = vmatpush.bf16.msrb.mxu2 %v11612_v22 }
 0xd93   :  { %17358 = vst [vmem:[#allocation20_spill] sm:$0xff] %v14923_v51 }
 0xd96   :  { %5263 = vmatpush.bf16.xpose.msra.mxu3 %v5249_v56  ;;  %5752 = vmatpush.bf16.msrb.mxu2 %v11611_v30 }
 0xd9a   :  { %5753 = vmatpush.bf16.msrb.mxu2 %v11610_v41 }
 0xd9e   :  { %5264 = vmatpush.bf16.xpose.msra.mxu3 %v5246_v32 }
 0xdc7   :  { %v4582_v36 = vpop.xlane.xlu0 %4581 }
 0xdc8   :  { %v4598_v21 = vmul.f32 0.007874016, %v4582_v36 }
 0xdca   :  { %12053 = vrcp.f32 %v4598_v21  ;;  %v11607_v21 = vld [vmem:[%s17245_s14 + $0x38] sm:$0xff] }
 0xdcb   :  { %5003 = vmatpush.bf16.msrb.mxu1 %v11607_v21 }
 0xdcf   :  { %5004 = vmatpush.bf16.msrb.mxu1 %v11606_v29 }
 0xdd0   :  { %v12054_v9 = vpop.eup %12053 }
 0xdd1   :  { %v4630_v43 = vmul.f32 %v12054_v9, %v14808_v38 }
 0xdd3   :  { %v4646_v5 = vadd.f32 1e-12, %v4630_v43 }
 0xdd4   :  { %v4793_v24 = vpop.f32.mrf.mxu3 }
 0xdd5   :  { %v4665_v62 = vmul.f32 %v14640_v48, %v4646_v5  ;;  %v4794_v6 = vadd.f32 %v14823_v55, %v4793_v24 }
 0xdd7   :  { %v14926_v52 = vadd.f32 %v14653_v10, %v4665_v62  ;;  %v5058_v40 = vpack.c.bf16 %v4794_v6, %v4794_v6  ;;  %v11605_v62 = vld [vmem:[%s17245_s14 + $0x28] sm:$0xff]  ;;  %v11604_v6 = vld [vmem:[%s17245_s14 + $0x20] sm:$0xff] }
 0xdd8   :  { %5005 = vmatpush.bf16.msrb.mxu1 %v11605_v62 }
 0xdd9   :  { %17359 = vst [vmem:[#allocation21_spill] sm:$0xff] %v14926_v52  ;;  %v14931_v46 = vpack.c.bf16 %v14926_v52, %v14923_v51  ;;  %v5114_v48 = vunpack.c.l.b16 %v5058_v40  ;;  %v11603_v40 = vld [vmem:[%s17245_s14 + $0x18] sm:$0xff] }
 0xddb   :  { %4812 = vmatmul.bf16.gmra.mxu3 %v14931_v46 }
 0xddc   :  { %v4795_v38 = vpop.f32.mrf.mxu3  ;;  %5006 = vmatpush.bf16.msrb.mxu1 %v11604_v6 }
 0xddd   :  { %v4796_v63 = vadd.f32 %v14823_v55, %v4795_v38 }
 0xddf   :  { %v5059_v56 = vpack.c.bf16 %v4796_v63, %v4796_v63 }
 0xde0   :  { %5007 = vmatpush.bf16.msrb.mxu1 %v11603_v40 }
 0xde1   :  { %v5115_v17 = vunpack.c.l.b16 %v5059_v56 }
 0xde3   :  { %v5119_v32 = vpack.c.b16 %v5115_v17, %v5114_v48 }
 0xde4   :  { %v4798_v27 = vpop.f32.mrf.mxu3 }
 0xde5   :  { %10774 = vmatmul.msk.bf16.gmra.mxu2 %vm570_vm0, %v5119_v32  ;;  %v4799_v10 = vadd.f32 %v14823_v55, %v4798_v27  ;;  %v11602_v32 = vld [vmem:[%s17245_s14 + $0x10] sm:$0xff] }
 0xde6   :  { %5008 = vmatpush.bf16.msrb.mxu1 %v11602_v32 }
 0xde7   :  { %v5060_v8 = vpack.c.bf16 %v4799_v10, %v4799_v10 }
 0xde9   :  { %v5201_v7 = vunpack.c.l.b16 %v5060_v8  ;;  %v11601_v8 = vld [vmem:[%s17245_s14 + $0x8] sm:$0xff] }
 0xdea   :  { %5009 = vmatpush.bf16.msrb.mxu1 %v11601_v8 }
 0xdec   :  { %v4800_v45 = vpop.f32.mrf.mxu3 }
 0xded   :  { %v4801_v0 = vadd.f32 %v14823_v55, %v4800_v45 }
 0xdee   :  { %v5173_v40 = vpop.f32.mrf.mxu2 }
 0xdef   :  { %v5061_v3 = vpack.c.bf16 %v4801_v0, %v4801_v0  ;;  %v11600_v0 = vld [vmem:[%s17245_s14] sm:$0xff] }
 0xdf0   :  { %5010 = vmatpush.bf16.msrb.mxu1 %v11600_v0 }
 0xdf1   :  { %v5202_v33 = vunpack.c.l.b16 %v5061_v3 }
 0xdf3   :  { %v5209_v36 = vpack.c.b16 %v5202_v33, %v5201_v7  ;;  %5011 = vmatmul.bf16.vlgmr.msrb.gmra.mxu1 %v14522_v60 }
 0xdf4   :  { %v4803_v1 = vpop.f32.mrf.mxu3 }
 0xdf5   :  { %10775 = vmatmul.msk.bf16.vlgmr.msra.gmra.mxu3 %vm570_vm0, %v5209_v36  ;;  %5754 = vmatmul.bf16.vlgmr.msrb.gmra.mxu2 %v14669_v19  ;;  %v4804_v22 = vadd.f32 %v14823_v55, %v4803_v1 }
 0xdf7   :  { %v5062_v37 = vpack.c.bf16 %v4804_v22, %v4804_v22 }
 0xdf9   :  { %v5203_v43 = vunpack.c.l.b16 %v5062_v37 }
 0xdfc   :  { %v4805_v30 = vpop.f32.mrf.mxu3 }
 0xdfd   :  { %v4806_v9 = vadd.f32 %v14823_v55, %v4805_v30 }
 0xdff   :  { %v5063_v41 = vpack.c.bf16 %v4806_v9, %v4806_v9 }
 0xe01   :  { %v5204_v5 = vunpack.c.l.b16 %v5063_v41 }
 0xe03   :  { %v5210_v4 = vpack.c.b16 %v5204_v5, %v5203_v43  ;;  %5016 = vmatmul.bf16.gmra.mxu1 %v14564_v25 }
 0xe04   :  { %v4808_v24 = vpop.f32.mrf.mxu3 }
 0xe05   :  { %10776 = vmatmul.msk.bf16.gmra.mxu3 %vm570_vm0, %v5210_v4  ;;  %5759 = vmatmul.bf16.gmra.mxu2 %v14717_v58  ;;  %v4809_v38 = vadd.f32 %v14823_v55, %v4808_v24 }
 0xe07   :  { %v5064_v56 = vpack.c.bf16 %v4809_v38, %v4809_v38 }
 0xe09   :  { %v5205_v27 = vunpack.c.l.b16 %v5064_v56  ;;  %v15004_v56 = vmul.f32 0.17677669, %v5173_v40  ;;  %v15049_v40 = vld [vmem:[%s17246_s15] ss:$0 sm:$0xff] }
 0xe0b   :  { %v5302_v32 = vsel %vm733_vm1, %v15004_v56, -inf }
 0xe0c   :  { %v4810_v63 = vpop.f32.mrf.mxu3 }
 0xe0d   :  { %v4811_v48 = vadd.f32 %v14823_v55, %v4810_v63 }
 0xe0f   :  { %v5065_v17 = vpack.c.bf16 %v4811_v48, %v4811_v48 }
 0xe11   :  { %v5206_v10 = vunpack.c.l.b16 %v5065_v17 }
 0xe13   :  { %v5211_v45 = vpack.c.b16 %v5206_v10, %v5205_v27  ;;  %5021 = vmatmul.bf16.gmra.mxu1 %v14588_v35  ;;  %v5175_v10 = vpop.f32.mrf.mxu2 }
 0xe14   :  { %v15015_v0 = vmul.f32 0.17677669, %v5175_v10 }
 0xe15   :  { %10777 = vmatmul.msk.bf16.gmra.mxu3 %vm570_vm0, %v5211_v45  ;;  %5764 = vmatmul.bf16.gmra.mxu2 %v14755_v57  ;;  %v11625_v45 = vld [vmem:[%s17332_s5 + $0x78] sm:$0xff] }
 0xe16   :  { %5865 = vmatpush.bf16.msrb.mxu3 %v11625_v45 }
 0xe23   :  { %5026 = vmatmul.bf16.gmra.mxu1 %v14600_v47 }
 0xe25   :  { %5769 = vmatmul.bf16.gmra.mxu2 %v14805_v2 }
 0xe33   :  { %5031 = vmatmul.bf16.gmra.mxu1 %v14634_v14 }
 0xe35   :  { %5774 = vmatmul.bf16.gmra.mxu2 %v14835_v13 }
 0xe43   :  { %5036 = vmatmul.bf16.gmra.mxu1 %v14689_v23 }
 0xe45   :  { %5779 = vmatmul.bf16.gmra.mxu2 %v14855_v49 }
 0xe53   :  { %5041 = vmatmul.bf16.gmra.mxu1 %v14724_v20 }
 0xe55   :  { %5784 = vmatmul.bf16.gmra.mxu2 %v14874_v44 }
 0xe5e   :  { %v4813_v3 = vpop.f32.mrf.mxu3 }
 0xe5f   :  { %v4814_v7 = vadd.f32 %v14823_v55, %v4813_v3 }
 0xe61   :  { %v5066_v36 = vpack.c.bf16 %v4814_v7, %v4814_v7  ;;  %v11624_v7 = vld [vmem:[%s17332_s5 + $0x70] sm:$0xff] }
 0xe62   :  { %5866 = vmatpush.bf16.msrb.mxu3 %v11624_v7 }
 0xe63   :  { %v5207_v22 = vunpack.c.l.b16 %v5066_v36  ;;  %5046 = vmatmul.bf16.gmra.mxu1 %v14761_v15  ;;  %v5305_v36 = vsel %vm733_vm1, %v15015_v0, -inf }
 0xe65   :  { %5789 = vmatmul.bf16.gmra.mxu2 %v14931_v46 }
 0xe66   :  { %v4815_v33 = vpop.f32.mrf.mxu3 }
 0xe67   :  { %v4816_v1 = vadd.f32 %v14823_v55, %v4815_v33 }
 0xe69   :  { %v5067_v21 = vpack.c.bf16 %v4816_v1, %v4816_v1 }
 0xe6b   :  { %v5208_v29 = vunpack.c.l.b16 %v5067_v21  ;;  %v11623_v21 = vld [vmem:[%s17332_s5 + $0x68] sm:$0xff] }
 0xe6c   :  { %5867 = vmatpush.bf16.msrb.mxu3 %v11623_v21 }
 0xe6d   :  { %v5212_v30 = vpack.c.b16 %v5208_v29, %v5207_v22  ;;  %v11622_v29 = vld [vmem:[%s17332_s5 + $0x60] sm:$0xff] }
 0xe6f   :  { %10778 = vmatmul.msk.bf16.gmra.mxu3 %vm570_vm0, %v5212_v30  ;;  %v11621_v30 = vld [vmem:[%s17332_s5 + $0x58] sm:$0xff] }
 0xe70   :  { %v5012_v8 = vpop.f32.mrf.mxu1  ;;  %5868 = vmatpush.bf16.msrb.mxu3 %v11622_v29 }
 0xe74   :  { %5869 = vmatpush.bf16.msrb.mxu3 %v11621_v30 }
 0xe78   :  { %v5266_v37 = vpop.f32.mrf.mxu3  ;;  %v5014_v22 = vpop.f32.mrf.mxu1 }
 0xe79   :  { %v14986_v9 = vmul.f32 0.17677669, %v5266_v37 }
 0xe7b   :  { %v5326_v41 = vsel %vm733_vm1, %v14986_v9, -inf }
 0xe7c   :  { %5327 = vmax.xlane.f32.xlu1 %v5326_v41  ;;  %v11620_v41 = vld [vmem:[%s17332_s5 + $0x50] sm:$0xff] }
 0xe7d   :  { %5870 = vmatpush.bf16.msrb.mxu3 %v11620_v41 }
 0xe80   :  { %v5268_v43 = vpop.f32.mrf.mxu3  ;;  %v5017_v37 = vpop.f32.mrf.mxu1 }
 0xe81   :  { %v14991_v5 = vmul.f32 0.17677669, %v5268_v43  ;;  %v11619_v43 = vld [vmem:[%s17332_s5 + $0x48] sm:$0xff]  ;;  %v5018_v7 = vadd.f32 %v15049_v40, %v5017_v37 }
 0xe82   :  { %5871 = vmatpush.bf16.msrb.mxu3 %v11619_v43 }
 0xe83   :  { %v5329_v55 = vsel %vm733_vm1, %v14991_v5, -inf  ;;  %v5086_v43 = vpack.c.bf16 %v5018_v7, %v5018_v7 }
 0xe84   :  { %5330 = vmax.xlane.f32.xlu2 %v5329_v55 }
 0xe88   :  { %v5271_v4 = vpop.f32.mrf.mxu3  ;;  %v5019_v55 = vpop.f32.mrf.mxu1 }
 0xe89   :  { %v14995_v24 = vmul.f32 0.17677669, %v5271_v4  ;;  %v11618_v4 = vld [vmem:[%s17332_s5 + $0x40] sm:$0xff] }
 0xe8a   :  { %5872 = vmatpush.bf16.msrb.mxu3 %v11618_v4 }
 0xe8b   :  { %v5332_v62 = vsel %vm733_vm1, %v14995_v24, -inf }
 0xe8c   :  { %5333 = vmax.xlane.f32.xlu0 %v5332_v62 }
 0xe8d   :  { %5873 = vmatmul.bf16.vlgmr.msrb.gmra.mxu3 %v14522_v60 }
 0xe90   :  { %v5273_v6 = vpop.f32.mrf.mxu3  ;;  %v5022_v62 = vpop.f32.mrf.mxu1 }
 0xe91   :  { %v15000_v38 = vmul.f32 0.17677669, %v5273_v6  ;;  %v5023_v10 = vadd.f32 %v15049_v40, %v5022_v62  ;;  %v5013_v62 = vadd.f32 %v15049_v40, %v5012_v8 }
 0xe93   :  { %v5335_v63 = vsel %vm733_vm1, %v15000_v38, -inf  ;;  %v5088_v29 = vpack.c.bf16 %v5023_v10, %v5023_v10 }
 0xe94   :  { %5336 = vmax.xlane.f32.xlu1 %v5335_v63 }
 0xe98   :  { %v5276_v48 = vpop.f32.mrf.mxu3  ;;  %v5024_v6 = vpop.f32.mrf.mxu1 }
 0xe99   :  { %v15006_v17 = vmul.f32 0.17677669, %v5276_v48  ;;  %v5025_v45 = vadd.f32 %v15049_v40, %v5024_v6  ;;  %v5015_v6 = vadd.f32 %v15049_v40, %v5014_v22 }
 0xe9b   :  { %v5338_v27 = vsel %vm733_vm1, %v15006_v17, -inf  ;;  %v5089_v30 = vpack.c.bf16 %v5025_v45, %v5025_v45  ;;  %v5085_v10 = vpack.c.bf16 %v5015_v6, %v5015_v6 }
 0xe9c   :  { %5303 = vmax.xlane.f32.xlu1 %v5302_v32  ;;  %5339 = vmax.xlane.f32.xlu2 %v5338_v27 }
 0xe9d   :  { %5878 = vmatmul.bf16.gmra.mxu3 %v14564_v25  ;;  %v5527_v37 = vunpack.c.l.b16 %v5089_v30 }
 0xea0   :  { %v5278_v3 = vpop.f32.mrf.mxu3  ;;  %v5027_v63 = vpop.f32.mrf.mxu1 }
 0xea1   :  { %v15020_v33 = vmul.f32 0.17677669, %v5278_v3  ;;  %v5028_v48 = vadd.f32 %v15049_v40, %v5027_v63 }
 0xea3   :  { %v5341_v1 = vsel %vm733_vm1, %v15020_v33, -inf  ;;  %v5090_v32 = vpack.c.bf16 %v5028_v48, %v5028_v48 }
 0xea4   :  { %5306 = vmax.xlane.f32.xlu2 %v5305_v36  ;;  %5342 = vmax.xlane.f32.xlu0 %v5341_v1  ;;  %v5020_v36 = vadd.f32 %v15049_v40, %v5019_v55  ;;  %v5524_v55 = vunpack.c.l.b16 %v5086_v43 }
 0xea5   :  { %v5528_v1 = vunpack.c.l.b16 %v5090_v32 }
 0xea6   :  { %v5087_v4 = vpack.c.bf16 %v5020_v36, %v5020_v36  ;;  %v5523_v36 = vunpack.c.l.b16 %v5085_v10 }
 0xea8   :  { %v5029_v27 = vpop.f32.mrf.mxu1  ;;  %v5525_v32 = vunpack.c.l.b16 %v5087_v4 }
 0xea9   :  { %v5030_v3 = vadd.f32 %v15049_v40, %v5029_v27  ;;  %v5526_v27 = vunpack.c.l.b16 %v5088_v29 }
 0xeab   :  { %v5091_v21 = vpack.c.bf16 %v5030_v3, %v5030_v3  ;;  %v5084_v3 = vpack.c.bf16 %v5013_v62, %v5013_v62  ;;  %v5532_v45 = vpack.c.b16 %v5527_v37, %v5526_v27 }
 0xead   :  { %v5529_v41 = vunpack.c.l.b16 %v5091_v21  ;;  %5883 = vmatmul.bf16.gmra.mxu3 %v14588_v35  ;;  %v5531_v21 = vpack.c.b16 %v5525_v32, %v5524_v55  ;;  %v5522_v7 = vunpack.c.l.b16 %v5084_v3 }
 0xeaf   :  { %v5533_v63 = vpack.c.b16 %v5529_v41, %v5528_v1  ;;  %v5178_v1 = vpop.f32.mrf.mxu2  ;;  %v5530_v41 = vpack.c.b16 %v5523_v36, %v5522_v7 }
 0xeb0   :  { %v15058_v48 = vpop.f32.mrf.mxu1 }
 0xeb1   :  { %5554 = vmatpush.bf16.msra.mxu0 %v5533_v63 }
 0xeb5   :  { %5555 = vmatpush.bf16.msra.mxu0 %v5532_v45 }
 0xeb7   :  { %v5180_v62 = vpop.f32.mrf.mxu2 }
 0xeb8   :  { %v15062_v52 = vpop.f32.mrf.mxu1 }
 0xeb9   :  { %5556 = vmatpush.bf16.msra.mxu0 %v5531_v21  ;;  %v15084_v21 = vmul.f32 0.17677669, %v5180_v62 }
 0xebd   :  { %5888 = vmatmul.bf16.gmra.mxu3 %v14600_v47  ;;  %5557 = vmatpush.bf16.msra.mxu0 %v5530_v41  ;;  %v15087_v41 = vmul.f32 0.17677669, %v5178_v1 }
 0xebf   :  { %v5308_v62 = vsel %vm733_vm1, %v15087_v41, -inf }
 0xec0   :  { %v15065_v22 = vpop.f32.mrf.mxu1 }
 0xec8   :  { %v15072_v27 = vpop.f32.mrf.mxu1 }
 0xecd   :  { %5893 = vmatmul.bf16.gmra.mxu3 %v14634_v14 }
 0xed0   :  { %v5042_v7 = vpop.f32.mrf.mxu1 }
 0xedd   :  { %5898 = vmatmul.bf16.gmra.mxu3 %v14689_v23 }
 0xeed   :  { %5903 = vmatmul.bf16.gmra.mxu3 %v14724_v20 }
 0xeef   :  { %v5328_v8 = vpop.xlane.xlu1 %5327 }
 0xef0   :  { %v5358_v29 = vsub.f32 %v14986_v9, %v5328_v8  ;;  %v5183_v8 = vpop.f32.mrf.mxu2 }
 0xef2   :  { %v5382_v30 = vmul.f32 1.442695, %v5358_v29  ;;  %v5281_v43 = vpop.f32.mrf.mxu3 }
 0xef3   :  { %v15068_v4 = vmul.f32 0.17677669, %v5281_v43  ;;  %v5311_v43 = vsel %vm733_vm1, %v15084_v21, -inf }
 0xef4   :  { %12055 = vpow2.f32 %v5382_v30 }
 0xef5   :  { %v5344_v63 = vsel %vm733_vm1, %v15068_v4, -inf }
 0xef6   :  { %5345 = vmax.xlane.f32.xlu0 %v5344_v63 }
 0xef7   :  { %v5331_v6 = vpop.xlane.xlu2 %5330 }
 0xef8   :  { %v5359_v37 = vsub.f32 %v14991_v5, %v5331_v6  ;;  %v5044_v6 = vpop.f32.mrf.mxu1 }
 0xefa   :  { %v15075_v55 = vpop.eup %12055  ;;  %v5384_v32 = vmul.f32 1.442695, %v5359_v37  ;;  %v5283_v3 = vpop.f32.mrf.mxu3 }
 0xefb   :  { %v15077_v9 = vmul.f32 0.17677669, %v5283_v3  ;;  %v5422_v10 = vsel %vm733_vm1, %v15075_v55, 0.0 }
 0xefc   :  { %12057 = vpow2.f32 %v5384_v32  ;;  %5423 = vadd.xlane.f32.xlu2 %v5422_v10  ;;  %v5185_v10 = vpop.f32.mrf.mxu2 }
 0xefd   :  { %v5347_v45 = vsel %vm733_vm1, %v15077_v9, -inf  ;;  %5908 = vmatmul.bf16.gmra.mxu3 %v14761_v15 }
 0xefe   :  { %5348 = vmax.xlane.f32.xlu1 %v5347_v45 }
 0xeff   :  { %v5334_v5 = vpop.xlane.xlu0 %5333 }
 0xf00   :  { %v5360_v36 = vsub.f32 %v14995_v24, %v5334_v5  ;;  %v15097_v24 = vmul.f32 0.17677669, %v5183_v8 }
 0xf02   :  { %v15089_v29 = vpop.eup %12057  ;;  %v5386_v30 = vmul.f32 1.442695, %v5360_v36  ;;  %v5314_v45 = vsel %vm733_vm1, %v15097_v24, -inf  ;;  %v15107_v36 = vmul.f32 0.17677669, %v5185_v10  ;;  %v5043_v10 = vadd.f32 %v15049_v40, %v5042_v7 }
 0xf03   :  { %v5425_v63 = vsel %vm733_vm1, %v15089_v29, 0.0 }
 0xf04   :  { %12059 = vpow2.f32 %v5386_v30  ;;  %5312 = vmax.xlane.f32.xlu2 %v5311_v43  ;;  %5426 = vadd.xlane.f32.xlu0 %v5425_v63  ;;  %v5047_v30 = vpop.f32.mrf.mxu1 }
 0xf06   :  { %5309 = vmax.xlane.f32.xlu1 %v5308_v62  ;;  %v5188_v62 = vpop.f32.mrf.mxu2 }
 0xf07   :  { %v5337_v1 = vpop.xlane.xlu1 %5336 }
 0xf08   :  { %v5361_v37 = vsub.f32 %v15000_v38, %v5337_v1  ;;  %v5317_v1 = vsel %vm733_vm1, %v15107_v36, -inf }
 0xf0a   :  { %v15100_v32 = vpop.eup %12059  ;;  %v5388_v3 = vmul.f32 1.442695, %v5361_v37 }
 0xf0b   :  { %v5428_v5 = vsel %vm733_vm1, %v15100_v32, 0.0 }
 0xf0c   :  { %12061 = vpow2.f32 %v5388_v3  ;;  %5315 = vmax.xlane.f32.xlu2 %v5314_v45  ;;  %5429 = vadd.xlane.f32.xlu0 %v5428_v5  ;;  %v5048_v3 = vadd.f32 %v15049_v40, %v5047_v30  ;;  %v15119_v45 = vmul.f32 0.17677669, %v5188_v62  ;;  %v5049_v28 = vpop.f32.mrf.mxu1  ;;  %v5038_v30 = vadd.f32 %v15049_v40, %v15065_v22 }
 0xf0d   :  { %v5050_v7 = vadd.f32 %v15049_v40, %v5049_v28  ;;  %v5033_v28 = vadd.f32 %v15049_v40, %v15058_v48 }
 0xf0f   :  { %v5340_v8 = vpop.xlane.xlu2 %5339  ;;  %v5304_v51 = vpop.xlane.xlu1 %5303 }
 0xf10   :  { %v5362_v38 = vsub.f32 %v15006_v17, %v5340_v8  ;;  %v5045_v17 = vadd.f32 %v15049_v40, %v5044_v6 }
 0xf12   :  { %v15110_v43 = vpop.eup %12061  ;;  %v5390_v63 = vmul.f32 1.442695, %v5362_v38  ;;  %v5098_v38 = vpack.c.bf16 %v5048_v3, %v5048_v3  ;;  %v5350_v3 = vsub.f32 %v15004_v56, %v5304_v51  ;;  %v5094_v51 = vpack.c.bf16 %v5038_v30, %v5038_v30 }
 0xf13   :  { %v5431_v37 = vsel %vm733_vm1, %v15110_v43, 0.0 }
 0xf14   :  { %5318 = vmax.xlane.f32.xlu0 %v5317_v1  ;;  %5432 = vadd.xlane.f32.xlu1 %v5431_v37  ;;  %12063 = vpow2.f32 %v5390_v63  ;;  %v5040_v63 = vadd.f32 %v15049_v40, %v15072_v27  ;;  %v5096_v1 = vpack.c.bf16 %v5043_v10, %v5043_v10  ;;  %v5097_v37 = vpack.c.bf16 %v5045_v17, %v5045_v17  ;;  %v5190_v27 = vpop.f32.mrf.mxu2 }
 0xf15   :  { %v5609_v54 = vunpack.c.l.b16 %v5094_v51 }
 0xf16   :  { %v5095_v56 = vpack.c.bf16 %v5040_v63, %v5040_v63  ;;  %v5611_v10 = vunpack.c.l.b16 %v5096_v1  ;;  %v5612_v17 = vunpack.c.l.b16 %v5097_v37 }
 0xf17   :  { %v5307_v5 = vpop.xlane.xlu2 %5306  ;;  %v5343_v8 = vpop.xlane.xlu0 %5342 }
 0xf18   :  { %v5351_v11 = vsub.f32 %v15015_v0, %v5307_v5  ;;  %v5363_v26 = vsub.f32 %v15020_v33, %v5343_v8  ;;  %v5320_v0 = vsel %vm733_vm1, %v15119_v45, -inf  ;;  %v5613_v33 = vunpack.c.l.b16 %v5098_v38 }
 0xf19   :  { %v5099_v5 = vpack.c.bf16 %v5050_v7, %v5050_v7  ;;  %v5366_v8 = vmul.f32 1.442695, %v5350_v3  ;;  %v15140_v7 = vmul.f32 0.17677669, %v5190_v27 }
 0xf1a   :  { %v5368_v6 = vmul.f32 1.442695, %v5351_v11  ;;  %v5392_v62 = vmul.f32 1.442695, %v5363_v26  ;;  %v15128_v53 = vpop.eup %12063  ;;  %v5035_v26 = vadd.f32 %v15049_v40, %v15062_v52  ;;  %v5610_v52 = vunpack.c.l.b16 %v5095_v56 }
 0xf1b   :  { %v5434_v22 = vsel %vm733_vm1, %v15128_v53, 0.0  ;;  %v5614_v11 = vunpack.c.l.b16 %v5099_v5  ;;  %v5617_v40 = vpack.c.b16 %v5612_v17, %v5611_v10  ;;  %v5323_v1 = vsel %vm733_vm1, %v15140_v7, -inf }
 0xf1c   :  { %12065 = vpow2.f32 %v5368_v6  ;;  %5321 = vmax.xlane.f32.xlu0 %v5320_v0  ;;  %5435 = vadd.xlane.f32.xlu1 %v5434_v22  ;;  %v5092_v6 = vpack.c.bf16 %v5033_v28, %v5033_v28  ;;  %v5093_v48 = vpack.c.bf16 %v5035_v26, %v5035_v26  ;;  %v15157_v28 = vpop.f32.mrf.mxu3 }
 0xf1d   :  { %12067 = vpow2.f32 %v5392_v62  ;;  %v5618_v38 = vpack.c.b16 %v5614_v11, %v5613_v33  ;;  %v5616_v33 = vpack.c.b16 %v5610_v52, %v5609_v54 }
 0xf1e   :  { %12069 = vpow2.f32 %v5366_v8  ;;  %v5607_v37 = vunpack.c.l.b16 %v5092_v6  ;;  %v5608_v3 = vunpack.c.l.b16 %v5093_v48 }
 0xf1f   :  { %5639 = vmatpush.bf16.msra.mxu1 %v5618_v38 }
 0xf20   :  { %v5615_v22 = vpack.c.b16 %v5608_v3, %v5607_v37 }
 0xf22   :  { %v15142_v0 = vpop.eup %12065 }
 0xf23   :  { %v15144_v62 = vpop.eup %12067  ;;  %v5401_v30 = vsel %vm733_vm1, %v15142_v0, 0.0  ;;  %5640 = vmatpush.bf16.msra.mxu1 %v5617_v40 }
 0xf24   :  { %v5437_v63 = vsel %vm733_vm1, %v15144_v62, 0.0  ;;  %5402 = vadd.xlane.f32.xlu0 %v5401_v30  ;;  %5324 = vmax.xlane.f32.xlu1 %v5323_v1  ;;  %v15152_v5 = vpop.eup %12069  ;;  %v15159_v26 = vpop.f32.mrf.mxu3  ;;  %v15172_v1 = vld [vmem:[%s17244_s13 + $0x1] ss:$0 sm:$0xff] }
 0xf25   :  { %5438 = vadd.xlane.f32.xlu2 %v5437_v63  ;;  %v5398_v27 = vsel %vm733_vm1, %v15152_v5, 0.0 }
 0xf27   :  { %5641 = vmatpush.bf16.msra.mxu1 %v5616_v33 }
 0xf2b   :  { %5642 = vmatpush.bf16.msra.mxu1 %v5615_v22 }
 0xf2c   :  { %v5879_v11 = vpop.f32.mrf.mxu3 }
 0xf2d   :  { %5399 = vadd.xlane.f32.xlu2 %v5398_v27 }
 0xf34   :  { %v15161_v51 = vpop.f32.mrf.mxu3 }
 0xf3c   :  { %v5884_v56 = vpop.f32.mrf.mxu3 }
 0xf44   :  { %v5886_v10 = vpop.f32.mrf.mxu3 }
 0xf4c   :  { %v5889_v48 = vpop.f32.mrf.mxu3 }
 0xf54   :  { %v5891_v22 = vpop.f32.mrf.mxu3 }
 0xf69   :  { %v5346_v54 = vpop.xlane.xlu0 %5345 }
 0xf6a   :  { %v5364_v17 = vsub.f32 %v15068_v4, %v5346_v54 }
 0xf6c   :  { %v5394_v8 = vmul.f32 1.442695, %v5364_v17  ;;  %v5890_v17 = vadd.f32 %v15172_v1, %v5889_v48 }
 0xf6e   :  { %12071 = vpow2.f32 %v5394_v8  ;;  %v5892_v8 = vadd.f32 %v15172_v1, %v5891_v22 }
 0xf6f   :  { %v5424_v38 = vpop.xlane.xlu2 %5423 }
 0xf70   :  { %12073 = vrcp.f32 %v5424_v38 }
 0xf71   :  { %v5349_v6 = vpop.xlane.xlu1 %5348 }
 0xf72   :  { %v5365_v52 = vsub.f32 %v15077_v9, %v5349_v6  ;;  %v5885_v6 = vadd.f32 %v15172_v1, %v5884_v56 }
 0xf74   :  { %v15165_v40 = vpop.eup %12071  ;;  %v5396_v30 = vmul.f32 1.442695, %v5365_v52  ;;  %v5887_v52 = vadd.f32 %v15172_v1, %v5886_v10  ;;  %v6053_v22 = vpack.c.bf16 %v5885_v6, %v5885_v6  ;;  %v5882_v6 = vadd.f32 %v15172_v1, %v15161_v51 }
 0xf75   :  { %v5440_v63 = vsel %vm733_vm1, %v15165_v40, 0.0 }
 0xf76   :  { %12075 = vpow2.f32 %v5396_v30  ;;  %5441 = vadd.xlane.f32.xlu1 %v5440_v63  ;;  %v12074_v3 = vpop.eup %12073  ;;  %v6055_v63 = vpack.c.bf16 %v5890_v17, %v5890_v17 }
 0xf77   :  { %v5313_v4 = vpop.xlane.xlu2 %5312  ;;  %v5427_v37 = vpop.xlane.xlu0 %5426  ;;  %v5470_v38 = vmul.f32 %v12074_v3, %v15075_v55 }
 0xf78   :  { %v5353_v33 = vsub.f32 %v15084_v21, %v5313_v4  ;;  %12077 = vrcp.f32 %v5427_v37  ;;  %v6056_v4 = vpack.c.bf16 %v5892_v8, %v5892_v8  ;;  %v6115_v48 = vunpack.c.l.b16 %v6055_v63  ;;  %v15187_v8 = vpop.f32.mrf.mxu3 }
 0xf79   :  { %v5310_v9 = vpop.xlane.xlu1 %5309 }
 0xf7a   :  { %v5372_v27 = vmul.f32 1.442695, %v5353_v33  ;;  %v5352_v54 = vsub.f32 %v15087_v41, %v5310_v9  ;;  %v6116_v33 = vunpack.c.l.b16 %v6056_v4  ;;  %v5486_v9 = vpack.c.bf16 %v5470_v38, %v5470_v38 }
 0xf7b   :  { %v5880_v38 = vadd.f32 %v15172_v1, %v5879_v11 }
 0xf7c   :  { %v15181_v30 = vpop.eup %12075  ;;  %12079 = vpow2.f32 %v5372_v27  ;;  %v5370_v21 = vmul.f32 1.442695, %v5352_v54  ;;  %v6054_v27 = vpack.c.bf16 %v5887_v52, %v5887_v52  ;;  %v6120_v54 = vpack.c.b16 %v6116_v33, %v6115_v48 }
 0xf7d   :  { %v5443_v37 = vsel %vm733_vm1, %v15181_v30, 0.0  ;;  %v5587_v4 = vunpack.c.l.b16 %v5486_v9  ;;  %v6113_v52 = vunpack.c.l.b16 %v6053_v22  ;;  %v6051_v9 = vpack.c.bf16 %v5880_v38, %v5880_v38 }
 0xf7e   :  { %v12078_v41 = vpop.eup %12077  ;;  %12081 = vpow2.f32 %v5370_v21  ;;  %5444 = vadd.xlane.f32.xlu2 %v5443_v37  ;;  %v6143_v63 = vsel %vm570_vm0, %v6120_v54, 0  ;;  %v5875_v22 = vadd.f32 %v15172_v1, %v15157_v28 }
 0xf7f   :  { %v5471_v55 = vmul.f32 %v12078_v41, %v15089_v29  ;;  %v5316_v56 = vpop.xlane.xlu2 %5315  ;;  %v5430_v3 = vpop.xlane.xlu0 %5429  ;;  %6149 = vmatpush.bf16.xpose.msrb.mxu1 %v6143_v63  ;;  %v6114_v41 = vunpack.c.l.b16 %v6054_v27  ;;  %v5877_v27 = vadd.f32 %v15172_v1, %v15159_v26  ;;  %v6111_v38 = vunpack.c.l.b16 %v6051_v9 }
 0xf80   :  { %v5354_v10 = vsub.f32 %v15097_v24, %v5316_v56  ;;  %12083 = vrcp.f32 %v5430_v3  ;;  %v6052_v3 = vpack.c.bf16 %v5882_v6, %v5882_v6  ;;  %v15207_v54 = vpop.f32.mrf.mxu3  ;;  %v6049_v28 = vpack.c.bf16 %v5875_v22, %v5875_v22 }
 0xf81   :  { %v5487_v17 = vpack.c.bf16 %v5471_v55, %v5471_v55  ;;  %v6119_v51 = vpack.c.b16 %v6114_v41, %v6113_v52 }
 0xf82   :  { %v15189_v31 = vpop.eup %12079  ;;  %v5374_v21 = vmul.f32 1.442695, %v5354_v10 }
 0xf83   :  { %v5588_v29 = vunpack.c.l.b16 %v5487_v17  ;;  %v5407_v37 = vsel %vm733_vm1, %v15189_v31, 0.0 }
 0xf84   :  { %v15195_v24 = vpop.eup %12081  ;;  %12085 = vpow2.f32 %v5374_v21  ;;  %5408 = vadd.xlane.f32.xlu1 %v5407_v37  ;;  %v6050_v37 = vpack.c.bf16 %v5877_v27, %v5877_v27 }
 0xf85   :  { %v5595_v48 = vpack.c.b16 %v5588_v29, %v5587_v4  ;;  %v5404_v33 = vsel %vm733_vm1, %v15195_v24, 0.0  ;;  %v6140_v4 = vsel %vm570_vm0, %v6119_v51, 0  ;;  %v6112_v29 = vunpack.c.l.b16 %v6052_v3 }
 0xf86   :  { %5405 = vadd.xlane.f32.xlu0 %v5404_v33  ;;  %v12084_v11 = vpop.eup %12083 }
 0xf87   :  { %10783 = vmatmul.msk.bf16.vlgmr.msra.gmra.mxu1 %vm733_vm1, %v5595_v48  ;;  %v5319_v55 = vpop.xlane.xlu0 %5318  ;;  %v5433_v56 = vpop.xlane.xlu1 %5432  ;;  %v5472_v21 = vmul.f32 %v12084_v11, %v15100_v32  ;;  %v6118_v33 = vpack.c.b16 %v6112_v29, %v6111_v38  ;;  %v6109_v11 = vunpack.c.l.b16 %v6049_v28 }
 0xf88   :  { %v5355_v10 = vsub.f32 %v15107_v36, %v5319_v55  ;;  %12087 = vrcp.f32 %v5433_v56  ;;  %6150 = vmatpush.bf16.xpose.msrb.mxu1 %v6140_v4  ;;  %v6110_v55 = vunpack.c.l.b16 %v6050_v37 }
 0xf89   :  { %v5488_v6 = vpack.c.bf16 %v5472_v21, %v5472_v21 }
 0xf8a   :  { %v15209_v17 = vpop.eup %12085  ;;  %v5376_v63 = vmul.f32 1.442695, %v5355_v10  ;;  %v15217_v10 = vpop.f32.mrf.mxu3  ;;  %v6117_v21 = vpack.c.b16 %v6110_v55, %v6109_v11 }
 0xf8b   :  { %v5410_v36 = vsel %vm733_vm1, %v15209_v17, 0.0  ;;  %v5589_v51 = vunpack.c.l.b16 %v5488_v6 }
 0xf8c   :  { %12089 = vpow2.f32 %v5376_v63  ;;  %5411 = vadd.xlane.f32.xlu2 %v5410_v36  ;;  %v6134_v37 = vsel %vm570_vm0, %v6117_v21, 0 }
 0xf8e   :  { %v12088_v26 = vpop.eup %12087 }
 0xf8f   :  { %v5473_v52 = vmul.f32 %v12088_v26, %v15110_v43  ;;  %v5322_v41 = vpop.xlane.xlu0 %5321  ;;  %v5436_v48 = vpop.xlane.xlu1 %5435  ;;  %v6137_v43 = vsel %vm570_vm0, %v6118_v33, 0 }
 0xf90   :  { %v5356_v32 = vsub.f32 %v15119_v45, %v5322_v41  ;;  %12091 = vrcp.f32 %v5436_v48  ;;  %6151 = vmatpush.bf16.xpose.msrb.mxu1 %v6137_v43 }
 0xf91   :  { %v5489_v56 = vpack.c.bf16 %v5473_v52, %v5473_v52 }
 0xf92   :  { %v15219_v9 = vpop.eup %12089  ;;  %v5378_v3 = vmul.f32 1.442695, %v5356_v32  ;;  %v5901_v28 = vpop.f32.mrf.mxu3 }
 0xf93   :  { %v5413_v22 = vsel %vm733_vm1, %v15219_v9, 0.0  ;;  %v5590_v27 = vunpack.c.l.b16 %v5489_v56 }
 0xf94   :  { %12093 = vpow2.f32 %v5378_v3  ;;  %5414 = vadd.xlane.f32.xlu0 %v5413_v22 }
 0xf95   :  { %v5596_v45 = vpack.c.b16 %v5590_v27, %v5589_v51 }
 0xf96   :  { %v12092_v38 = vpop.eup %12091 }
 0xf97   :  { %v5403_v63 = vpop.xlane.xlu0 %5402  ;;  %10784 = vmatmul.msk.bf16.gmra.mxu1 %vm733_vm1, %v5596_v45  ;;  %v5325_v36 = vpop.xlane.xlu1 %5324  ;;  %v5474_v41 = vmul.f32 %v12092_v38, %v15128_v53 }
 0xf98   :  { %v5439_v4 = vpop.xlane.xlu2 %5438  ;;  %v5357_v29 = vsub.f32 %v15140_v7, %v5325_v36  ;;  %6152 = vmatpush.bf16.xpose.msrb.mxu1 %v6134_v37 }
 0xf99   :  { %12095 = vrcp.f32 %v5439_v4  ;;  %v5490_v48 = vpack.c.bf16 %v5474_v41, %v5474_v41 }
 0xf9a   :  { %v15227_v26 = vpop.eup %12093  ;;  %12097 = vrcp.f32 %v5403_v63  ;;  %v5380_v6 = vmul.f32 1.442695, %v5357_v29  ;;  %v5904_v55 = vpop.f32.mrf.mxu3 }
 0xf9b   :  { %v5416_v52 = vsel %vm733_vm1, %v15227_v26, 0.0  ;;  %v5591_v53 = vunpack.c.l.b16 %v5490_v48 }
 0xf9c   :  { %5417 = vadd.xlane.f32.xlu1 %v5416_v52  ;;  %12099 = vpow2.f32 %v5380_v6 }
 0xf9f   :  { %v12096_v32 = vpop.eup %12095 }
 0xfa0   :  { %v5475_v33 = vmul.f32 %v12096_v32, %v15144_v62  ;;  %v5400_v7 = vpop.xlane.xlu2 %5399  ;;  %v12098_v11 = vpop.eup %12097  ;;  %v5905_v32 = vadd.f32 %v15172_v1, %v5904_v55 }
 0xfa1   :  { %12101 = vrcp.f32 %v5400_v7  ;;  %v5463_v51 = vmul.f32 %v12098_v11, %v15142_v0 }
 0xfa2   :  { %v5491_v56 = vpack.c.bf16 %v5475_v33, %v5475_v33  ;;  %v15233_v3 = vpop.eup %12099  ;;  %v5906_v63 = vpop.f32.mrf.mxu3  ;;  %v6061_v11 = vpack.c.bf16 %v5905_v32, %v5905_v32 }
 0xfa3   :  { %v5419_v22 = vsel %vm733_vm1, %v15233_v3, 0.0  ;;  %v5479_v21 = vpack.c.bf16 %v5463_v51, %v5463_v51  ;;  %v5755_v32 = vpop.f32.mrf.mxu2 }
 0xfa4   :  { %v5592_v27 = vunpack.c.l.b16 %v5491_v56  ;;  %5420 = vadd.xlane.f32.xlu2 %v5419_v22 }
 0xfa5   :  { %v5503_v36 = vunpack.c.l.b16 %v5479_v21 }
 0xfa6   :  { %v5597_v43 = vpack.c.b16 %v5592_v27, %v5591_v53  ;;  %v5900_v53 = vadd.f32 %v15172_v1, %v15217_v10  ;;  %v5902_v27 = vadd.f32 %v15172_v1, %v5901_v28 }
 0xfa7   :  { %v12102_v45 = vpop.eup %12101 }
 0xfa8   :  { %v5462_v62 = vmul.f32 %v12102_v45, %v15152_v5  ;;  %10785 = vmatmul.msk.bf16.gmra.mxu1 %vm733_vm1, %v5597_v43  ;;  %v5907_v5 = vadd.f32 %v15172_v1, %v5906_v63  ;;  %v6206_v43 = vunpack.c.l.b16 %v6061_v11  ;;  %v6059_v21 = vpack.c.bf16 %v5900_v53, %v5900_v53 }
 0xfa9   :  { %v6060_v55 = vpack.c.bf16 %v5902_v27, %v5902_v27 }
 0xfaa   :  { %v5478_v4 = vpack.c.bf16 %v5462_v62, %v5462_v62  ;;  %v5909_v0 = vpop.f32.mrf.mxu3  ;;  %v6062_v56 = vpack.c.bf16 %v5907_v5, %v5907_v5 }
 0xfab   :  { %v5910_v37 = vadd.f32 %v15172_v1, %v5909_v0 }
 0xfac   :  { %v5502_v38 = vunpack.c.l.b16 %v5478_v4  ;;  %v6207_v45 = vunpack.c.l.b16 %v6062_v56  ;;  %v5895_v4 = vadd.f32 %v15172_v1, %v15187_v8 }
 0xfad   :  { %v6063_v6 = vpack.c.bf16 %v5910_v37, %v5910_v37 }
 0xfae   :  { %v5510_v29 = vpack.c.b16 %v5503_v36, %v5502_v38  ;;  %v6212_v62 = vpack.c.b16 %v6207_v45, %v6206_v43  ;;  %v5897_v36 = vadd.f32 %v15172_v1, %v15207_v54  ;;  %v6204_v38 = vunpack.c.l.b16 %v6059_v21 }
 0xfaf   :  { %v6208_v48 = vunpack.c.l.b16 %v6063_v6  ;;  %v6057_v0 = vpack.c.bf16 %v5895_v4, %v5895_v4 }
 0xfb0   :  { %10779 = vmatmul.msk.bf16.vlgmr.msra.gmra.mxu0 %vm733_vm1, %v5510_v29  ;;  %v6233_v63 = vsel %vm570_vm0, %v6212_v62, 0  ;;  %v6205_v29 = vunpack.c.l.b16 %v6060_v55  ;;  %v6058_v10 = vpack.c.bf16 %v5897_v36, %v5897_v36 }
 0xfb1   :  { %v6202_v6 = vunpack.c.l.b16 %v6057_v0 }
 0xfb2   :  { %v5911_v52 = vpop.f32.mrf.mxu3  ;;  %v6211_v37 = vpack.c.b16 %v6205_v29, %v6204_v38 }
 0xfb3   :  { %v5912_v41 = vadd.f32 %v15172_v1, %v5911_v52  ;;  %v6203_v52 = vunpack.c.l.b16 %v6058_v10 }
 0xfb4   :  { %v6230_v28 = vsel %vm570_vm0, %v6211_v37, 0 }
 0xfb5   :  { %v6064_v33 = vpack.c.bf16 %v5912_v41, %v5912_v41  ;;  %v6210_v41 = vpack.c.b16 %v6203_v52, %v6202_v6 }
 0xfb7   :  { %v6209_v7 = vunpack.c.l.b16 %v6064_v33  ;;  %v6227_v5 = vsel %vm570_vm0, %v6210_v41, 0 }
 0xfb9   :  { %v6213_v51 = vpack.c.b16 %v6209_v7, %v6208_v48  ;;  %v5757_v48 = vpop.f32.mrf.mxu2 }
 0xfbb   :  { %v6236_v22 = vsel %vm570_vm0, %v6213_v51, 0 }
 0xfbc   :  { %6242 = vmatpush.bf16.xpose.msra.mxu1 %v6236_v22 }
 0xfc1   :  { %v5760_v33 = vpop.f32.mrf.mxu2 }
 0xfc4   :  { %6243 = vmatpush.bf16.xpose.msra.mxu1 %v6233_v63 }
 0xfc9   :  { %v5762_v51 = vpop.f32.mrf.mxu2 }
 0xfcc   :  { %6244 = vmatpush.bf16.xpose.msra.mxu1 %v6230_v28 }
 0xfd4   :  { %6245 = vmatpush.bf16.xpose.msra.mxu1 %v6227_v5 }
 0xfe9   :  { %v5442_v8 = vpop.xlane.xlu1 %5441 }
 0xfea   :  { %12103 = vrcp.f32 %v5442_v8 }
 0xff0   :  { %v12104_v54 = vpop.eup %12103 }
 0xff1   :  { %v5445_v1 = vpop.xlane.xlu2 %5444  ;;  %v5476_v7 = vmul.f32 %v12104_v54, %v15165_v40  ;;  %v15262_v40 = vld [vmem:[%s17351_s28 + $0x1] ss:$0 sm:$0xff] }
 0xff2   :  { %12105 = vrcp.f32 %v5445_v1  ;;  %v5758_v0 = vadd.f32 %v15262_v40, %v5757_v48 }
 0xff3   :  { %v5492_v22 = vpack.c.bf16 %v5476_v7, %v5476_v7 }
 0xff4   :  { %v6034_v6 = vpack.c.bf16 %v5758_v0, %v5758_v0 }
 0xff5   :  { %v5593_v45 = vunpack.c.l.b16 %v5492_v22 }
 0xff6   :  { %v6090_v8 = vunpack.c.l.b16 %v6034_v6 }
 0xff7   :  { %v5409_v11 = vpop.xlane.xlu1 %5408 }
 0xff8   :  { %v12106_v56 = vpop.eup %12105  ;;  %12107 = vrcp.f32 %v5409_v11 }
 0xff9   :  { %v5477_v53 = vmul.f32 %v12106_v56, %v15181_v30  ;;  %v5406_v27 = vpop.xlane.xlu0 %5405  ;;  %v5765_v30 = vpop.f32.mrf.mxu2 }
 0xffa   :  { %12109 = vrcp.f32 %v5406_v27  ;;  %v5763_v27 = vadd.f32 %v15262_v40, %v5762_v51 }
 0xffb   :  { %v5493_v43 = vpack.c.bf16 %v5477_v53, %v5477_v53 }
 0xffd   :  { %v5594_v21 = vunpack.c.l.b16 %v5493_v43 }
 0xffe   :  { %v12108_v55 = vpop.eup %12107 }
 0xfff   :  { %v5465_v62 = vmul.f32 %v12108_v55, %v15189_v31  ;;  %v5598_v63 = vpack.c.b16 %v5594_v21, %v5593_v45  ;;  %v5412_v29 = vpop.xlane.xlu2 %5411  ;;  %v5756_v31 = vadd.f32 %v15262_v40, %v5755_v32  ;;  %v5761_v45 = vadd.f32 %v15262_v40, %v5760_v33 }
0x1000   :  { %v12110_v4 = vpop.eup %12109  ;;  %12111 = vrcp.f32 %v5412_v29 }
0x1001   :  { %v5481_v36 = vpack.c.bf16 %v5465_v62, %v5465_v62  ;;  %v5464_v38 = vmul.f32 %v12110_v4, %v15195_v24  ;;  %10786 = vmatmul.msk.bf16.gmra.mxu1 %vm733_vm1, %v5598_v63  ;;  %v6033_v5 = vpack.c.bf16 %v5756_v31, %v5756_v31  ;;  %v5767_v1 = vpop.f32.mrf.mxu2  ;;  %v6036_v62 = vpack.c.bf16 %v5763_v27, %v5763_v27 }
0x1002   :  { %v6035_v4 = vpack.c.bf16 %v5761_v45, %v5761_v45 }
0x1003   :  { %v5480_v10 = vpack.c.bf16 %v5464_v38, %v5464_v38  ;;  %v5505_v28 = vunpack.c.l.b16 %v5481_v36  ;;  %v6089_v54 = vunpack.c.l.b16 %v6033_v5  ;;  %v6092_v36 = vunpack.c.l.b16 %v6036_v62 }
0x1004   :  { %v6091_v38 = vunpack.c.l.b16 %v6035_v4 }
0x1005   :  { %v5504_v37 = vunpack.c.l.b16 %v5480_v10  ;;  %v6097_v11 = vpack.c.b16 %v6090_v8, %v6089_v54 }
0x1006   :  { %v12112_v24 = vpop.eup %12111  ;;  %v6098_v51 = vpack.c.b16 %v6092_v36, %v6091_v38 }
0x1007   :  { %v5415_v52 = vpop.xlane.xlu0 %5414  ;;  %v5511_v41 = vpack.c.b16 %v5505_v28, %v5504_v37  ;;  %v5466_v7 = vmul.f32 %v12112_v24, %v15209_v17  ;;  %v5768_v28 = vadd.f32 %v15262_v40, %v5767_v1 }
0x1008   :  { %12113 = vrcp.f32 %v5415_v52  ;;  %v5766_v52 = vadd.f32 %v15262_v40, %v5765_v30  ;;  %v11632_v30 = vld [vmem:[%s17245_s14 + $0x70] sm:$0xff] }
0x1009   :  { %10780 = vmatmul.msk.bf16.gmra.mxu0 %vm733_vm1, %v5511_v41  ;;  %v5482_v32 = vpack.c.bf16 %v5466_v7, %v5466_v7  ;;  %v5770_v55 = vpop.f32.mrf.mxu2  ;;  %v6038_v5 = vpack.c.bf16 %v5768_v28, %v5768_v28 }
0x100a   :  { %v6037_v8 = vpack.c.bf16 %v5766_v52, %v5766_v52 }
0x100b   :  { %v5506_v21 = vunpack.c.l.b16 %v5482_v32  ;;  %v6094_v54 = vunpack.c.l.b16 %v6038_v5 }
0x100c   :  { %v6093_v7 = vunpack.c.l.b16 %v6037_v8 }
0x100e   :  { %v12114_v48 = vpop.eup %12113 }
0x100f   :  { %v5467_v56 = vmul.f32 %v12114_v48, %v15219_v9  ;;  %v5418_v53 = vpop.xlane.xlu1 %5417  ;;  %v6099_v48 = vpack.c.b16 %v6094_v54, %v6093_v7 }
0x1010   :  { %12115 = vrcp.f32 %v5418_v53 }
0x1011   :  { %v5483_v22 = vpack.c.bf16 %v5467_v56, %v5467_v56  ;;  %10934 = vmatmul.msk.bf16.vlgmr.msrb.gmra.mxu1 %vm570_vm0, %v6097_v11  ;;  %v5772_v10 = vpop.f32.mrf.mxu2  ;;  %v5771_v56 = vadd.f32 %v15262_v40, %v5770_v55  ;;  %v11630_v55 = vld [vmem:[%s17245_s14 + $0x60] sm:$0xff] }
0x1012   :  { %v5773_v1 = vadd.f32 %v15262_v40, %v5772_v10 }
0x1013   :  { %v5507_v43 = vunpack.c.l.b16 %v5483_v22  ;;  %v6039_v22 = vpack.c.bf16 %v5771_v56, %v5771_v56  ;;  %v11609_v56 = vld [vmem:[%s17247_s16 + $0x8] sm:$0xff] }
0x1014   :  { %v6040_v32 = vpack.c.bf16 %v5773_v1, %v5773_v1  ;;  %6785 = vmatpush.bf16.msrb.mxu1 %v11609_v56 }
0x1015   :  { %v5512_v63 = vpack.c.b16 %v5507_v43, %v5506_v21  ;;  %v6095_v27 = vunpack.c.l.b16 %v6039_v22  ;;  %v11631_v21 = vld [vmem:[%s17245_s14 + $0x68] sm:$0xff] }
0x1016   :  { %v12116_v9 = vpop.eup %12115  ;;  %v6096_v53 = vunpack.c.l.b16 %v6040_v32 }
0x1017   :  { %v5421_v17 = vpop.xlane.xlu2 %5420  ;;  %v5468_v29 = vmul.f32 %v12116_v9, %v15227_v26  ;;  %v11629_v9 = vld [vmem:[%s17245_s14 + $0x58] sm:$0xff] }
0x1018   :  { %12117 = vrcp.f32 %v5421_v17  ;;  %v6100_v45 = vpack.c.b16 %v6096_v53, %v6095_v27 }
0x1019   :  { %10781 = vmatmul.msk.bf16.gmra.mxu0 %vm733_vm1, %v5512_v63  ;;  %v5484_v33 = vpack.c.bf16 %v5468_v29, %v5468_v29  ;;  %v5775_v26 = vpop.f32.mrf.mxu2  ;;  %v15298_v63 = vpop.f32.mrf.mxu1 }
0x101a   :  { %v5776_v17 = vadd.f32 %v15262_v40, %v5775_v26 }
0x101b   :  { %v5508_v41 = vunpack.c.l.b16 %v5484_v33  ;;  %v11627_v33 = vld [vmem:[%s17245_s14 + $0x48] sm:$0xff] }
0x101c   :  { %v6041_v38 = vpack.c.bf16 %v5776_v17, %v5776_v17 }
0x101e   :  { %v12118_v0 = vpop.eup %12117 }
0x101f   :  { %v5469_v31 = vmul.f32 %v12118_v0, %v15233_v3  ;;  %v11633_v3 = vld [vmem:[%s17245_s14 + $0x78] sm:$0xff]  ;;  %v11628_v0 = vld [vmem:[%s17245_s14 + $0x50] sm:$0xff] }
0x1020   :  { %5984 = vmatpush.bf16.msrb.mxu0 %v11633_v3 }
0x1021   :  { %10935 = vmatmul.msk.bf16.gmra.mxu1 %vm570_vm0, %v6098_v51  ;;  %v5485_v37 = vpack.c.bf16 %v5469_v31, %v5469_v31  ;;  %v5777_v11 = vpop.f32.mrf.mxu2  ;;  %v6182_v51 = vunpack.c.l.b16 %v6041_v38  ;;  %v15307_v10 = vpop.f32.mrf.mxu1 }
0x1022   :  { %v5778_v62 = vadd.f32 %v15262_v40, %v5777_v11 }
0x1023   :  { %v5509_v6 = vunpack.c.l.b16 %v5485_v37 }
0x1024   :  { %5985 = vmatpush.bf16.msrb.mxu0 %v11632_v30  ;;  %v6042_v4 = vpack.c.bf16 %v5778_v62, %v5778_v62 }
0x1025   :  { %v5513_v24 = vpack.c.b16 %v5509_v6, %v5508_v41  ;;  %v11626_v6 = vld [vmem:[%s17245_s14 + $0x40] sm:$0xff] }
0x1026   :  { %v6183_v29 = vunpack.c.l.b16 %v6042_v4 }
0x1028   :  { %5986 = vmatpush.bf16.msrb.mxu0 %v11631_v21  ;;  %v6190_v31 = vpack.c.b16 %v6183_v29, %v6182_v51 }
0x1029   :  { %10782 = vmatmul.msk.bf16.gmra.mxu0 %vm733_vm1, %v5513_v24  ;;  %v5780_v43 = vpop.f32.mrf.mxu2  ;;  %v15318_v5 = vpop.f32.mrf.mxu1 }
0x102a   :  { %v5781_v52 = vadd.f32 %v15262_v40, %v5780_v43  ;;  %v11608_v43 = vld [vmem:[%s17247_s16] sm:$0xff] }
0x102b   :  { %6786 = vmatpush.bf16.msrb.mxu1 %v11608_v43 }
0x102c   :  { %5987 = vmatpush.bf16.msrb.mxu0 %v11630_v55  ;;  %v6043_v24 = vpack.c.bf16 %v5781_v52, %v5781_v52 }
0x102e   :  { %v6184_v54 = vunpack.c.l.b16 %v6043_v24 }
0x1030   :  { %5988 = vmatpush.bf16.msrb.mxu0 %v11629_v9  ;;  %v5559_v9 = vpop.f32.mrf.mxu0 }
0x1031   :  { %10936 = vmatmul.msk.bf16.gmra.mxu1 %vm570_vm0, %v6099_v48  ;;  %v5782_v36 = vpop.f32.mrf.mxu2  ;;  %v15322_v48 = vpop.f32.mrf.mxu1 }
0x1032   :  { %v5783_v28 = vadd.f32 %v15262_v40, %v5782_v36 }
0x1034   :  { %5989 = vmatpush.bf16.msrb.mxu0 %v11628_v0  ;;  %v6044_v41 = vpack.c.bf16 %v5783_v28, %v5783_v28 }
0x1036   :  { %v6185_v8 = vunpack.c.l.b16 %v6044_v41 }
0x1038   :  { %5990 = vmatpush.bf16.msrb.mxu0 %v11627_v33  ;;  %v6191_v7 = vpack.c.b16 %v6185_v8, %v6184_v54 }
0x1039   :  { %v5785_v37 = vpop.f32.mrf.mxu2  ;;  %v15330_v53 = vpop.f32.mrf.mxu1 }
0x103a   :  { %v5786_v1 = vadd.f32 %v15262_v40, %v5785_v37 }
0x103c   :  { %5991 = vmatpush.bf16.msrb.mxu0 %v11626_v6  ;;  %v6045_v32 = vpack.c.bf16 %v5786_v1, %v5786_v1 }
0x103e   :  { %v6186_v27 = vunpack.c.l.b16 %v6045_v32 }
0x103f   :  { %5992 = vmatmul.bf16.vlgmr.msrb.gmra.mxu0 %v14522_v60 }
0x1041   :  { %10937 = vmatmul.msk.bf16.gmra.mxu1 %vm570_vm0, %v6100_v45  ;;  %v5787_v26 = vpop.f32.mrf.mxu2  ;;  %v15338_v17 = vpop.f32.mrf.mxu1 }
0x1042   :  { %v5788_v3 = vadd.f32 %v15262_v40, %v5787_v26 }
0x1044   :  { %v6046_v11 = vpack.c.bf16 %v5788_v3, %v5788_v3 }
0x1046   :  { %v6187_v22 = vunpack.c.l.b16 %v6046_v11 }
0x1048   :  { %v6192_v45 = vpack.c.b16 %v6187_v22, %v6186_v27 }
0x1049   :  { %v5790_v30 = vpop.f32.mrf.mxu2 }
0x104a   :  { %v5791_v55 = vadd.f32 %v15262_v40, %v5790_v30 }
0x104c   :  { %v6047_v36 = vpack.c.bf16 %v5791_v55, %v5791_v55 }
0x104e   :  { %v6188_v29 = vunpack.c.l.b16 %v6047_v36 }
0x104f   :  { %5997 = vmatmul.bf16.gmra.mxu0 %v14564_v25 }
0x1051   :  { %10938 = vmatmul.msk.bf16.vlgmr.msra.gmra.mxu1 %vm570_vm0, %v6190_v31  ;;  %v5792_v21 = vpop.f32.mrf.mxu2  ;;  %v5561_v31 = vpop.f32.mrf.mxu0 }
0x1052   :  { %v5793_v62 = vadd.f32 %v15262_v40, %v5792_v21  ;;  %v5664_v6 = vpack.c.bf16 %v5561_v31, %v5559_v9 }
0x1054   :  { %v6048_v4 = vpack.c.bf16 %v5793_v62, %v5793_v62 }
0x1056   :  { %v6189_v38 = vunpack.c.l.b16 %v6048_v4 }
0x1058   :  { %v6193_v51 = vpack.c.b16 %v6189_v38, %v6188_v29 }
0x105f   :  { %6002 = vmatmul.bf16.gmra.mxu0 %v14588_v35 }
0x1061   :  { %10939 = vmatmul.msk.bf16.gmra.mxu1 %vm570_vm0, %v6191_v7 }
0x106f   :  { %6007 = vmatmul.bf16.gmra.mxu0 %v14600_v47 }
0x1071   :  { %10940 = vmatmul.msk.bf16.gmra.mxu1 %vm570_vm0, %v6192_v45  ;;  %v5668_v45 = vpack.c.bf16 %v15307_v10, %v15298_v63  ;;  %v5669_v63 = vpack.c.bf16 %v15322_v48, %v15318_v5  ;;  %v5670_v5 = vpack.c.bf16 %v15338_v17, %v15330_v53 }
0x107e   :  { %v15341_v0 = vpop.f32.mrf.mxu1 }
0x107f   :  { %6012 = vmatmul.bf16.gmra.mxu0 %v14634_v14 }
0x1081   :  { %10941 = vmatmul.msk.bf16.gmra.mxu1 %vm570_vm0, %v6193_v51 }
0x1086   :  { %v15344_v33 = vpop.f32.mrf.mxu1  ;;  %v5564_v37 = vpop.f32.mrf.mxu0 }
0x1087   :  { %v5671_v40 = vpack.c.bf16 %v15344_v33, %v15341_v0 }
0x108e   :  { %v15349_v28 = vpop.f32.mrf.mxu1  ;;  %v5566_v52 = vpop.f32.mrf.mxu0 }
0x108f   :  { %v5665_v26 = vpack.c.bf16 %v5566_v52, %v5564_v37  ;;  %6017 = vmatmul.bf16.gmra.mxu0 %v14689_v23 }
0x1091   :  { %10978 = vmatmul.msk.bf16.vlgmr.msrb.gmra.mxu1 %vm570_vm0, %v5664_v6 }
0x1096   :  { %v15352_v41 = vpop.f32.mrf.mxu1  ;;  %v5569_v24 = vpop.f32.mrf.mxu0 }
0x109e   :  { %v15355_v8 = vpop.f32.mrf.mxu1  ;;  %v5571_v7 = vpop.f32.mrf.mxu0 }
0x109f   :  { %v5666_v1 = vpack.c.bf16 %v5571_v7, %v5569_v24  ;;  %6022 = vmatmul.bf16.gmra.mxu0 %v14724_v20 }
0x10a1   :  { %10979 = vmatmul.msk.bf16.gmra.mxu1 %vm570_vm0, %v5665_v26 }
0x10a6   :  { %v15358_v54 = vpop.f32.mrf.mxu1  ;;  %v5574_v30 = vpop.f32.mrf.mxu0 }
0x10ae   :  { %v15361_v3 = vpop.f32.mrf.mxu1  ;;  %v5576_v56 = vpop.f32.mrf.mxu0 }
0x10af   :  { %v5667_v22 = vpack.c.bf16 %v5576_v56, %v5574_v30  ;;  %6027 = vmatmul.bf16.gmra.mxu0 %v14761_v15 }
0x10b1   :  { %10980 = vmatmul.msk.bf16.gmra.mxu1 %vm570_vm0, %v5666_v1 }
0x10b6   :  { %v15364_v11 = vpop.f32.mrf.mxu1 }
0x10bc   :  { %v15382_v9 = vpop.f32.mrf.mxu0 }
0x10be   :  { %v15367_v32 = vpop.f32.mrf.mxu1 }
0x10c1   :  { %10981 = vmatmul.msk.bf16.gmra.mxu1 %vm570_vm0, %v5667_v22 }
0x10c4   :  { %v5995_v29 = vpop.f32.mrf.mxu0 }
0x10c6   :  { %v15370_v27 = vpop.f32.mrf.mxu1 }
0x10cc   :  { %v5998_v6 = vpop.f32.mrf.mxu0 }
0x10ce   :  { %v6247_v43 = vpop.f32.mrf.mxu1 }
0x10cf   :  { %v15375_v21 = vmul.f32 0.17677669, %v6247_v43 }
0x10d1   :  { %10982 = vmatmul.msk.bf16.gmra.mxu1 %vm570_vm0, %v5668_v45  ;;  %v6307_v62 = vsel %vm733_vm1, %v15375_v21, -inf }
0x10d2   :  { %6308 = vmax.xlane.f32.xlu0 %v6307_v62  ;;  %v15419_v62 = vld [vmem:[%s17246_s15 + $0x1] ss:$0 sm:$0xff] }
0x10d4   :  { %v6000_v26 = vpop.f32.mrf.mxu0 }
0x10d6   :  { %v6249_v55 = vpop.f32.mrf.mxu1 }
0x10d7   :  { %v15380_v4 = vmul.f32 0.17677669, %v6249_v55 }
0x10d9   :  { %v6310_v36 = vsel %vm733_vm1, %v15380_v4, -inf }
0x10da   :  { %6311 = vmax.xlane.f32.xlu1 %v6310_v36 }
0x10dc   :  { %v6003_v56 = vpop.f32.mrf.mxu0 }
0x10dd   :  { %v6004_v33 = vadd.f32 %v15419_v62, %v6003_v56 }
0x10de   :  { %v6252_v38 = vpop.f32.mrf.mxu1 }
0x10df   :  { %v15388_v10 = vmul.f32 0.17677669, %v6252_v38 }
0x10e1   :  { %10983 = vmatmul.msk.bf16.gmra.mxu1 %vm570_vm0, %v5669_v63  ;;  %v6313_v51 = vsel %vm733_vm1, %v15388_v10, -inf }
0x10e2   :  { %6314 = vmax.xlane.f32.xlu2 %v6313_v51  ;;  %v15429_v51 = vmul.f32 0.17677669, %v15349_v28 }
0x10e4   :  { %v6005_v53 = vpop.f32.mrf.mxu0 }
0x10e6   :  { %v6254_v31 = vpop.f32.mrf.mxu1 }
0x10e7   :  { %v15393_v37 = vmul.f32 0.17677669, %v6254_v31 }
0x10e9   :  { %v6316_v52 = vsel %vm733_vm1, %v15393_v37, -inf }
0x10ea   :  { %6317 = vmax.xlane.f32.xlu0 %v6316_v52 }
0x10ec   :  { %v6008_v38 = vpop.f32.mrf.mxu0 }
0x10ed   :  { %v6009_v0 = vadd.f32 %v15419_v62, %v6008_v38 }
0x10ee   :  { %v6257_v24 = vpop.f32.mrf.mxu1 }
0x10ef   :  { %v15399_v48 = vmul.f32 0.17677669, %v6257_v24  ;;  %v6071_v31 = vpack.c.bf16 %v6009_v0, %v6009_v0  ;;  %v6069_v24 = vpack.c.bf16 %v6004_v33, %v6004_v33 }
0x10f1   :  { %10984 = vmatmul.msk.bf16.gmra.mxu1 %vm570_vm0, %v5670_v5  ;;  %v6319_v7 = vsel %vm733_vm1, %v15399_v48, -inf  ;;  %v6509_v56 = vunpack.c.l.b16 %v6071_v31 }
0x10f2   :  { %6320 = vmax.xlane.f32.xlu1 %v6319_v7 }
0x10f4   :  { %v6010_v52 = vpop.f32.mrf.mxu0 }
0x10f5   :  { %v6011_v7 = vadd.f32 %v15419_v62, %v6010_v52 }
0x10f6   :  { %v6259_v1 = vpop.f32.mrf.mxu1 }
0x10f7   :  { %v15404_v30 = vmul.f32 0.17677669, %v6259_v1  ;;  %v6283_v1 = vsel %vm733_vm1, %v15429_v51, -inf }
0x10f9   :  { %v6322_v22 = vsel %vm733_vm1, %v15404_v30, -inf }
0x10fa   :  { %6323 = vmax.xlane.f32.xlu2 %v6322_v22  ;;  %v5999_v22 = vadd.f32 %v15419_v62, %v5998_v6  ;;  %v5994_v6 = vadd.f32 %v15419_v62, %v15382_v9 }
0x10fc   :  { %v6067_v38 = vpack.c.bf16 %v5999_v22, %v5999_v22  ;;  %v6013_v33 = vpop.f32.mrf.mxu0 }
0x10fe   :  { %v6262_v43 = vpop.f32.mrf.mxu1  ;;  %v6505_v52 = vunpack.c.l.b16 %v6067_v38 }
0x10ff   :  { %v15408_v45 = vmul.f32 0.17677669, %v6262_v43  ;;  %v6001_v43 = vadd.f32 %v15419_v62, %v6000_v26  ;;  %v5996_v26 = vadd.f32 %v15419_v62, %v5995_v29 }
0x1101   :  { %10985 = vmatmul.msk.bf16.gmra.mxu1 %vm570_vm0, %v5671_v40  ;;  %v6325_v17 = vsel %vm733_vm1, %v15408_v45, -inf  ;;  %v6006_v40 = vadd.f32 %v15419_v62, %v6005_v53  ;;  %v6507_v53 = vunpack.c.l.b16 %v6069_v24  ;;  %v6065_v24 = vpack.c.bf16 %v5994_v6, %v5994_v6 }
0x1102   :  { %6326 = vmax.xlane.f32.xlu0 %v6325_v17  ;;  %v6072_v17 = vpack.c.bf16 %v6011_v7, %v6011_v7 }
0x1103   :  { %v6070_v5 = vpack.c.bf16 %v6006_v40, %v6006_v40  ;;  %v6503_v7 = vunpack.c.l.b16 %v6065_v24  ;;  %v15448_v24 = vmul.f32 0.17677669, %v15352_v41 }
0x1104   :  { %v6510_v28 = vunpack.c.l.b16 %v6072_v17  ;;  %v6015_v31 = vpop.f32.mrf.mxu0 }
0x1105   :  { %v6286_v41 = vsel %vm733_vm1, %v15448_v24, -inf }
0x1106   :  { %v6264_v55 = vpop.f32.mrf.mxu1  ;;  %v6514_v0 = vpack.c.b16 %v6510_v28, %v6509_v56 }
0x1107   :  { %v15421_v36 = vmul.f32 0.17677669, %v6264_v55  ;;  %v6508_v55 = vunpack.c.l.b16 %v6070_v5  ;;  %v6066_v5 = vpack.c.bf16 %v5996_v26, %v5996_v26 }
0x1108   :  { %6535 = vmatpush.bf16.msra.mxu2 %v6514_v0 }
0x1109   :  { %v6328_v63 = vsel %vm733_vm1, %v15421_v36, -inf  ;;  %v6513_v40 = vpack.c.b16 %v6508_v55, %v6507_v53  ;;  %v6504_v22 = vunpack.c.l.b16 %v6066_v5 }
0x110a   :  { %6329 = vmax.xlane.f32.xlu1 %v6328_v63  ;;  %v6068_v63 = vpack.c.bf16 %v6001_v43, %v6001_v43 }
0x110b   :  { %v6511_v43 = vpack.c.b16 %v6504_v22, %v6503_v7 }
0x110c   :  { %v6506_v50 = vunpack.c.l.b16 %v6068_v63  ;;  %6536 = vmatpush.bf16.msra.mxu2 %v6513_v40  ;;  %v6018_v56 = vpop.f32.mrf.mxu0 }
0x1112   :  { %6284 = vmax.xlane.f32.xlu1 %v6283_v1  ;;  %v6512_v1 = vpack.c.b16 %v6506_v50, %v6505_v52 }
0x1114   :  { %6537 = vmatpush.bf16.msra.mxu2 %v6512_v1  ;;  %v6020_v17 = vpop.f32.mrf.mxu0 }
0x1118   :  { %6538 = vmatpush.bf16.msra.mxu2 %v6511_v43 }
0x111c   :  { %v6023_v53 = vpop.f32.mrf.mxu0 }
0x111d   :  { %v6024_v43 = vadd.f32 %v15419_v62, %v6023_v53 }
0x1124   :  { %v6025_v55 = vpop.f32.mrf.mxu0 }
0x112c   :  { %v6028_v9 = vpop.f32.mrf.mxu0 }
0x112d   :  { %v6029_v50 = vadd.f32 %v15419_v62, %v6028_v9  ;;  %v6019_v9 = vadd.f32 %v15419_v62, %v6018_v56  ;;  %v15462_v56 = vmul.f32 0.17677669, %v15355_v8 }
0x112f   :  { %v6079_v26 = vpack.c.bf16 %v6029_v50, %v6029_v50 }
0x1131   :  { %v6594_v7 = vunpack.c.l.b16 %v6079_v26 }
0x1134   :  { %v6030_v1 = vpop.f32.mrf.mxu0 }
0x1145   :  { %v6309_v28 = vpop.xlane.xlu0 %6308 }
0x1146   :  { %v6339_v38 = vsub.f32 %v15375_v21, %v6309_v28  ;;  %v6031_v21 = vadd.f32 %v15419_v62, %v6030_v1  ;;  %v6026_v28 = vadd.f32 %v15419_v62, %v6025_v55  ;;  %v6075_v55 = vpack.c.bf16 %v6019_v9, %v6019_v9 }
0x1147   :  { %v6016_v1 = vadd.f32 %v15419_v62, %v6015_v31  ;;  %v15474_v31 = vmul.f32 0.17677669, %v15358_v54 }
0x1148   :  { %v6363_v63 = vmul.f32 1.442695, %v6339_v38  ;;  %v6080_v22 = vpack.c.bf16 %v6031_v21, %v6031_v21  ;;  %v6078_v53 = vpack.c.bf16 %v6026_v28, %v6026_v28 }
0x114a   :  { %12119 = vpow2.f32 %v6363_v63  ;;  %v6595_v38 = vunpack.c.l.b16 %v6080_v22 }
0x114d   :  { %v6312_v29 = vpop.xlane.xlu1 %6311 }
0x114e   :  { %v6340_v0 = vsub.f32 %v15380_v4, %v6312_v29  ;;  %v6021_v29 = vadd.f32 %v15419_v62, %v6020_v17  ;;  %v6014_v17 = vadd.f32 %v15419_v62, %v6013_v33  ;;  %v6074_v33 = vpack.c.bf16 %v6016_v1, %v6016_v1 }
0x1150   :  { %v15442_v40 = vpop.eup %12119  ;;  %v6365_v52 = vmul.f32 1.442695, %v6340_v0  ;;  %v6073_v9 = vpack.c.bf16 %v6014_v17, %v6014_v17 }
0x1151   :  { %v6403_v6 = vsel %vm733_vm1, %v15442_v40, 0.0 }
0x1152   :  { %12121 = vpow2.f32 %v6365_v52  ;;  %6404 = vadd.xlane.f32.xlu2 %v6403_v6  ;;  %v6599_v52 = vpack.c.b16 %v6595_v38, %v6594_v7  ;;  %v6076_v6 = vpack.c.bf16 %v6021_v29, %v6021_v29  ;;  %v6593_v7 = vunpack.c.l.b16 %v6078_v53 }
0x1153   :  { %v6289_v38 = vsel %vm733_vm1, %v15462_v56, -inf }
0x1154   :  { %6620 = vmatpush.bf16.msra.mxu3 %v6599_v52 }
0x1155   :  { %v6315_v5 = vpop.xlane.xlu2 %6314 }
0x1156   :  { %v6341_v4 = vsub.f32 %v15388_v10, %v6315_v5  ;;  %v6077_v10 = vpack.c.bf16 %v6024_v43, %v6024_v43  ;;  %v6591_v43 = vunpack.c.l.b16 %v6076_v6  ;;  %v15484_v6 = vmul.f32 0.17677669, %v15361_v3 }
0x1158   :  { %v15453_v63 = vpop.eup %12121  ;;  %v6367_v50 = vmul.f32 1.442695, %v6341_v4  ;;  %v6592_v21 = vunpack.c.l.b16 %v6077_v10  ;;  %v6590_v4 = vunpack.c.l.b16 %v6075_v55  ;;  %v6292_v55 = vsel %vm733_vm1, %v15474_v31, -inf }
0x1159   :  { %v6406_v0 = vsel %vm733_vm1, %v15453_v63, 0.0 }
0x115a   :  { %12123 = vpow2.f32 %v6367_v50  ;;  %6287 = vmax.xlane.f32.xlu2 %v6286_v41  ;;  %6407 = vadd.xlane.f32.xlu0 %v6406_v0  ;;  %v6598_v62 = vpack.c.b16 %v6593_v7, %v6592_v21  ;;  %v6588_v50 = vunpack.c.l.b16 %v6073_v9  ;;  %v6589_v41 = vunpack.c.l.b16 %v6074_v33 }
0x115b   :  { %v6295_v21 = vsel %vm733_vm1, %v15484_v6, -inf  ;;  %v15494_v7 = vmul.f32 0.17677669, %v15364_v11 }
0x115c   :  { %6621 = vmatpush.bf16.msra.mxu3 %v6598_v62  ;;  %v6596_v54 = vpack.c.b16 %v6589_v41, %v6588_v50 }
0x115d   :  { %v6318_v26 = vpop.xlane.xlu0 %6317 }
0x115e   :  { %v6342_v5 = vsub.f32 %v15393_v37, %v6318_v26  ;;  %v6597_v37 = vpack.c.b16 %v6591_v43, %v6590_v4 }
0x1160   :  { %v15467_v22 = vpop.eup %12123  ;;  %v6369_v28 = vmul.f32 1.442695, %v6342_v5  ;;  %6622 = vmatpush.bf16.msra.mxu3 %v6597_v37 }
0x1161   :  { %v6409_v8 = vsel %vm733_vm1, %v15467_v22, 0.0 }
0x1162   :  { %12125 = vpow2.f32 %v6369_v28  ;;  %6290 = vmax.xlane.f32.xlu2 %v6289_v38  ;;  %6410 = vadd.xlane.f32.xlu0 %v6409_v8  ;;  %v6298_v38 = vsel %vm733_vm1, %v15494_v7, -inf  ;;  %v15504_v8 = vmul.f32 0.17677669, %v15367_v32 }
0x1164   :  { %6623 = vmatpush.bf16.msra.mxu3 %v6596_v54  ;;  %v6301_v37 = vsel %vm733_vm1, %v15504_v8, -inf }
0x1165   :  { %v6321_v29 = vpop.xlane.xlu1 %6320 }
0x1166   :  { %v6343_v0 = vsub.f32 %v15399_v48, %v6321_v29  ;;  %v15514_v29 = vmul.f32 0.17677669, %v15370_v27 }
0x1168   :  { %v15477_v52 = vpop.eup %12125  ;;  %v6371_v10 = vmul.f32 1.442695, %v6343_v0  ;;  %v6304_v0 = vsel %vm733_vm1, %v15514_v29, -inf }
0x1169   :  { %v6412_v53 = vsel %vm733_vm1, %v15477_v52, 0.0 }
0x116a   :  { %12127 = vpow2.f32 %v6371_v10  ;;  %6413 = vadd.xlane.f32.xlu1 %v6412_v53  ;;  %6293 = vmax.xlane.f32.xlu0 %v6292_v55 }
0x116d   :  { %v6324_v17 = vpop.xlane.xlu2 %6323 }
0x116e   :  { %v6344_v48 = vsub.f32 %v15404_v30, %v6324_v17 }
0x1170   :  { %v15487_v26 = vpop.eup %12127  ;;  %v6373_v1 = vmul.f32 1.442695, %v6344_v48 }
0x1171   :  { %v6415_v5 = vsel %vm733_vm1, %v15487_v26, 0.0 }
0x1172   :  { %12129 = vpow2.f32 %v6373_v1  ;;  %6296 = vmax.xlane.f32.xlu0 %v6295_v21  ;;  %6416 = vadd.xlane.f32.xlu1 %v6415_v5 }
0x1175   :  { %v6327_v3 = vpop.xlane.xlu0 %6326 }
0x1176   :  { %v6345_v4 = vsub.f32 %v15408_v45, %v6327_v3 }
0x1178   :  { %v15497_v43 = vpop.eup %12129  ;;  %v6375_v30 = vmul.f32 1.442695, %v6345_v4 }
0x1179   :  { %v6418_v28 = vsel %vm733_vm1, %v15497_v43, 0.0 }
0x117a   :  { %12131 = vpow2.f32 %v6375_v30  ;;  %6419 = vadd.xlane.f32.xlu2 %v6418_v28  ;;  %6299 = vmax.xlane.f32.xlu1 %v6298_v38 }
0x117d   :  { %v6330_v11 = vpop.xlane.xlu1 %6329 }
0x117e   :  { %v6346_v9 = vsub.f32 %v15421_v36, %v6330_v11 }
0x1180   :  { %v15507_v33 = vpop.eup %12131  ;;  %v6377_v45 = vmul.f32 1.442695, %v6346_v9 }
0x1181   :  { %v6421_v62 = vsel %vm733_vm1, %v15507_v33, 0.0 }
0x1182   :  { %12133 = vpow2.f32 %v6377_v45  ;;  %6422 = vadd.xlane.f32.xlu2 %v6421_v62  ;;  %6302 = vmax.xlane.f32.xlu1 %v6301_v37 }
0x1185   :  { %v6285_v32 = vpop.xlane.xlu1 %6284 }
0x1186   :  { %v6331_v50 = vsub.f32 %v15429_v51, %v6285_v32 }
0x1188   :  { %v15517_v41 = vpop.eup %12133  ;;  %v6347_v36 = vmul.f32 1.442695, %v6331_v50 }
0x1189   :  { %v6424_v10 = vsel %vm733_vm1, %v15517_v41, 0.0 }
0x118a   :  { %12135 = vpow2.f32 %v6347_v36  ;;  %6305 = vmax.xlane.f32.xlu2 %v6304_v0  ;;  %6425 = vadd.xlane.f32.xlu0 %v6424_v10 }
0x1190   :  { %v15523_v53 = vpop.eup %12135 }
0x1191   :  { %v6379_v27 = vsel %vm733_vm1, %v15523_v53, 0.0 }
0x1192   :  { %6380 = vadd.xlane.f32.xlu0 %v6379_v27 }
0x11c5   :  { %v6405_v55 = vpop.xlane.xlu2 %6404 }
0x11c6   :  { %12137 = vrcp.f32 %v6405_v55 }
0x11cc   :  { %v12138_v17 = vpop.eup %12137 }
0x11cd   :  { %v6288_v51 = vpop.xlane.xlu2 %6287  ;;  %v6408_v54 = vpop.xlane.xlu0 %6407  ;;  %v6451_v21 = vmul.f32 %v12138_v17, %v15442_v40 }
0x11ce   :  { %v6332_v48 = vsub.f32 %v15448_v24, %v6288_v51  ;;  %12139 = vrcp.f32 %v6408_v54  ;;  %v11650_v51 = vld [vmem:[%s17332_s5 + $0xb0] sm:$0xff] }
0x11cf   :  { %v6467_v3 = vpack.c.bf16 %v6451_v21, %v6451_v21 }
0x11d0   :  { %v6349_v1 = vmul.f32 1.442695, %v6332_v48 }
0x11d1   :  { %v6568_v62 = vunpack.c.l.b16 %v6467_v3 }
0x11d2   :  { %12141 = vpow2.f32 %v6349_v1 }
0x11d4   :  { %v12140_v5 = vpop.eup %12139 }
0x11d5   :  { %v6452_v4 = vmul.f32 %v12140_v5, %v15453_v63  ;;  %v6291_v30 = vpop.xlane.xlu2 %6290  ;;  %v6411_v28 = vpop.xlane.xlu0 %6410 }
0x11d6   :  { %v6333_v38 = vsub.f32 %v15462_v56, %v6291_v30  ;;  %12143 = vrcp.f32 %v6411_v28  ;;  %v11651_v56 = vld [vmem:[%s17332_s5 + $0xb8] sm:$0xff] }
0x11d7   :  { %v6468_v11 = vpack.c.bf16 %v6452_v4, %v6452_v4  ;;  %7017 = vmatpush.bf16.msrb.mxu3 %v11651_v56 }
0x11d8   :  { %v15531_v9 = vpop.eup %12141  ;;  %v6351_v45 = vmul.f32 1.442695, %v6333_v38 }
0x11d9   :  { %v6569_v24 = vunpack.c.l.b16 %v6468_v11  ;;  %v6382_v37 = vsel %vm733_vm1, %v15531_v9, 0.0 }
0x11da   :  { %12145 = vpow2.f32 %v6351_v45  ;;  %6383 = vadd.xlane.f32.xlu1 %v6382_v37 }
0x11db   :  { %v6576_v40 = vpack.c.b16 %v6569_v24, %v6568_v62  ;;  %7018 = vmatpush.bf16.msrb.mxu3 %v11650_v51  ;;  %v11647_v62 = vld [vmem:[%s17332_s5 + $0x98] sm:$0xff] }
0x11dc   :  { %v12144_v50 = vpop.eup %12143 }
0x11dd   :  { %10946 = vmatmul.msk.bf16.vlgmr.msra.gmra.mxu3 %vm733_vm1, %v6576_v40  ;;  %v6294_v63 = vpop.xlane.xlu0 %6293  ;;  %v6414_v32 = vpop.xlane.xlu1 %6413  ;;  %v6453_v27 = vmul.f32 %v12144_v50, %v15467_v22  ;;  %v11649_v22 = vld [vmem:[%s17332_s5 + $0xa8] sm:$0xff]  ;;  %v11646_v50 = vld [vmem:[%s17332_s5 + $0x90] sm:$0xff] }
0x11de   :  { %v6334_v36 = vsub.f32 %v15474_v31, %v6294_v63  ;;  %12147 = vrcp.f32 %v6414_v32 }
0x11df   :  { %v6469_v17 = vpack.c.bf16 %v6453_v27, %v6453_v27  ;;  %7019 = vmatpush.bf16.msrb.mxu3 %v11649_v22 }
0x11e0   :  { %v15540_v0 = vpop.eup %12145  ;;  %v6353_v10 = vmul.f32 1.442695, %v6334_v36 }
0x11e1   :  { %v6385_v55 = vsel %vm733_vm1, %v15540_v0, 0.0  ;;  %v6570_v38 = vunpack.c.l.b16 %v6469_v17  ;;  %v11644_v17 = vld [vmem:[%s17332_s5 + $0x80] sm:$0xff] }
0x11e2   :  { %12149 = vpow2.f32 %v6353_v10  ;;  %6386 = vadd.xlane.f32.xlu2 %v6385_v55 }
0x11e4   :  { %v12148_v54 = vpop.eup %12147 }
0x11e5   :  { %v6454_v31 = vmul.f32 %v12148_v54, %v15477_v52  ;;  %v6297_v48 = vpop.xlane.xlu0 %6296  ;;  %v6417_v1 = vpop.xlane.xlu1 %6416  ;;  %v11648_v52 = vld [vmem:[%s17332_s5 + $0xa0] sm:$0xff] }
0x11e6   :  { %v6335_v21 = vsub.f32 %v15484_v6, %v6297_v48  ;;  %12151 = vrcp.f32 %v6417_v1  ;;  %7020 = vmatpush.bf16.msrb.mxu3 %v11648_v52 }
0x11e7   :  { %v6470_v5 = vpack.c.bf16 %v6454_v31, %v6454_v31 }
0x11e8   :  { %v15553_v3 = vpop.eup %12149  ;;  %v6355_v4 = vmul.f32 1.442695, %v6335_v21 }
0x11e9   :  { %v6571_v30 = vunpack.c.l.b16 %v6470_v5  ;;  %v6388_v28 = vsel %vm733_vm1, %v15553_v3, 0.0 }
0x11ea   :  { %12153 = vpow2.f32 %v6355_v4  ;;  %6389 = vadd.xlane.f32.xlu0 %v6388_v28  ;;  %7021 = vmatpush.bf16.msrb.mxu3 %v11647_v62 }
0x11eb   :  { %v6577_v11 = vpack.c.b16 %v6571_v30, %v6570_v38 }
0x11ec   :  { %v12152_v24 = vpop.eup %12151 }
0x11ed   :  { %v6420_v6 = vpop.xlane.xlu2 %6419  ;;  %10947 = vmatmul.msk.bf16.gmra.mxu3 %vm733_vm1, %v6577_v11  ;;  %v6300_v45 = vpop.xlane.xlu1 %6299  ;;  %v6455_v32 = vmul.f32 %v12152_v24, %v15487_v26 }
0x11ee   :  { %12155 = vrcp.f32 %v6420_v6  ;;  %v6336_v37 = vsub.f32 %v15494_v7, %v6300_v45  ;;  %7022 = vmatpush.bf16.msrb.mxu3 %v11646_v50  ;;  %v11645_v7 = vld [vmem:[%s17332_s5 + $0x88] sm:$0xff] }
0x11ef   :  { %v6471_v10 = vpack.c.bf16 %v6455_v32, %v6455_v32 }
0x11f0   :  { %v15565_v40 = vpop.eup %12153  ;;  %v6357_v63 = vmul.f32 1.442695, %v6336_v37 }
0x11f1   :  { %v6391_v56 = vsel %vm733_vm1, %v15565_v40, 0.0  ;;  %v6572_v1 = vunpack.c.l.b16 %v6471_v10 }
0x11f2   :  { %12157 = vpow2.f32 %v6357_v63  ;;  %6392 = vadd.xlane.f32.xlu1 %v6391_v56  ;;  %7023 = vmatpush.bf16.msrb.mxu3 %v11645_v7 }
0x11f4   :  { %v12156_v36 = vpop.eup %12155 }
0x11f5   :  { %v6456_v27 = vmul.f32 %v12156_v36, %v15497_v43  ;;  %v6423_v55 = vpop.xlane.xlu2 %6422  ;;  %v6303_v26 = vpop.xlane.xlu1 %6302 }
0x11f6   :  { %v6337_v51 = vsub.f32 %v15504_v8, %v6303_v26  ;;  %12159 = vrcp.f32 %v6423_v55  ;;  %7024 = vmatpush.bf16.msrb.mxu3 %v11644_v17 }
0x11f7   :  { %v6472_v54 = vpack.c.bf16 %v6456_v27, %v6456_v27 }
0x11f8   :  { %v15581_v31 = vpop.eup %12157  ;;  %v6359_v48 = vmul.f32 1.442695, %v6337_v51 }
0x11f9   :  { %v6573_v22 = vunpack.c.l.b16 %v6472_v54  ;;  %v6394_v21 = vsel %vm733_vm1, %v15581_v31, 0.0 }
0x11fa   :  { %12161 = vpow2.f32 %v6359_v48  ;;  %6395 = vadd.xlane.f32.xlu2 %v6394_v21  ;;  %v11642_v21 = vld [vmem:[%s17338_s1 + $0xb0] sm:$0xff] }
0x11fb   :  { %v6578_v43 = vpack.c.b16 %v6573_v22, %v6572_v1  ;;  %v11643_v1 = vld [vmem:[%s17338_s1 + $0xb8] sm:$0xff] }
0x11fc   :  { %v12160_v4 = vpop.eup %12159  ;;  %6898 = vmatpush.bf16.msrb.mxu2 %v11643_v1 }
0x11fd   :  { %v6306_v8 = vpop.xlane.xlu2 %6305  ;;  %v6426_v5 = vpop.xlane.xlu0 %6425  ;;  %10948 = vmatmul.msk.bf16.gmra.mxu3 %vm733_vm1, %v6578_v43  ;;  %v6457_v52 = vmul.f32 %v12160_v4, %v15507_v33 }
0x11fe   :  { %v6338_v30 = vsub.f32 %v15514_v29, %v6306_v8  ;;  %12163 = vrcp.f32 %v6426_v5 }
0x11ff   :  { %v6473_v45 = vpack.c.bf16 %v6457_v52, %v6457_v52 }
0x1200   :  { %v15587_v28 = vpop.eup %12161  ;;  %v6361_v38 = vmul.f32 1.442695, %v6338_v30  ;;  %6899 = vmatpush.bf16.msrb.mxu2 %v11642_v21  ;;  %v11641_v30 = vld [vmem:[%s17338_s1 + $0xa8] sm:$0xff] }
0x1201   :  { %v6397_v11 = vsel %vm733_vm1, %v15587_v28, 0.0  ;;  %v6574_v63 = vunpack.c.l.b16 %v6473_v45 }
0x1202   :  { %12165 = vpow2.f32 %v6361_v38  ;;  %6398 = vadd.xlane.f32.xlu0 %v6397_v11 }
0x1204   :  { %v12164_v6 = vpop.eup %12163  ;;  %6900 = vmatpush.bf16.msrb.mxu2 %v11641_v30 }
0x1205   :  { %v6458_v62 = vmul.f32 %v12164_v6, %v15517_v41  ;;  %v6381_v33 = vpop.xlane.xlu0 %6380  ;;  %v11640_v6 = vld [vmem:[%s17338_s1 + $0xa0] sm:$0xff] }
0x1206   :  { %12167 = vrcp.f32 %v6381_v33 }
0x1207   :  { %v6474_v24 = vpack.c.bf16 %v6458_v62, %v6458_v62  ;;  %v11639_v62 = vld [vmem:[%s17338_s1 + $0x98] sm:$0xff] }
0x1208   :  { %v15593_v37 = vpop.eup %12165  ;;  %6901 = vmatpush.bf16.msrb.mxu2 %v11640_v6  ;;  %v11635_v6 = vld [vmem:[%s17247_s16 + $0x18] sm:$0xff] }
0x1209   :  { %v6575_v29 = vunpack.c.l.b16 %v6474_v24  ;;  %v6400_v32 = vsel %vm733_vm1, %v15593_v37, 0.0  ;;  %6700 = vmatpush.bf16.msra.mxu0 %v11635_v6 }
0x120a   :  { %6401 = vadd.xlane.f32.xlu1 %v6400_v32 }
0x120b   :  { %v6579_v56 = vpack.c.b16 %v6575_v29, %v6574_v63  ;;  %v11638_v29 = vld [vmem:[%s17338_s1 + $0x90] sm:$0xff] }
0x120c   :  { %v12168_v50 = vpop.eup %12167  ;;  %6902 = vmatpush.bf16.msrb.mxu2 %v11639_v62 }
0x120d   :  { %10949 = vmatmul.msk.bf16.gmra.mxu3 %vm733_vm1, %v6579_v56  ;;  %v6443_v7 = vmul.f32 %v12168_v50, %v15523_v53  ;;  %v11637_v56 = vld [vmem:[%s17338_s1 + $0x88] sm:$0xff] }
0x120f   :  { %v6459_v10 = vpack.c.bf16 %v6443_v7, %v6443_v7 }
0x1210   :  { %6903 = vmatpush.bf16.msrb.mxu2 %v11638_v29 }
0x1211   :  { %v6483_v51 = vunpack.c.l.b16 %v6459_v10 }
0x1214   :  { %6904 = vmatpush.bf16.msrb.mxu2 %v11637_v56 }
0x121d   :  { %7025 = vmatmul.bf16.vlgmr.msrb.gmra.mxu3 %v14522_v60 }
0x122d   :  { %7030 = vmatmul.bf16.gmra.mxu3 %v14564_v25 }
0x123d   :  { %7035 = vmatmul.bf16.gmra.mxu3 %v14588_v35 }
0x124d   :  { %7040 = vmatmul.bf16.gmra.mxu3 %v14600_v47  ;;  %v6384_v41 = vpop.xlane.xlu1 %6383 }
0x124e   :  { %12169 = vrcp.f32 %v6384_v41 }
0x1254   :  { %v12170_v36 = vpop.eup %12169 }
0x1255   :  { %v6444_v27 = vmul.f32 %v12170_v36, %v15531_v9  ;;  %v6387_v55 = vpop.xlane.xlu2 %6386 }
0x1256   :  { %12171 = vrcp.f32 %v6387_v55 }
0x1257   :  { %v6460_v26 = vpack.c.bf16 %v6444_v27, %v6444_v27 }
0x1259   :  { %v6484_v54 = vunpack.c.l.b16 %v6460_v26 }
0x125b   :  { %v6491_v17 = vpack.c.b16 %v6484_v54, %v6483_v51 }
0x125c   :  { %v12172_v53 = vpop.eup %12171 }
0x125d   :  { %v6390_v48 = vpop.xlane.xlu0 %6389  ;;  %10942 = vmatmul.msk.bf16.vlgmr.msra.gmra.mxu2 %vm733_vm1, %v6491_v17  ;;  %7045 = vmatmul.bf16.gmra.mxu3 %v14634_v14  ;;  %v6445_v9 = vmul.f32 %v12172_v53, %v15540_v0 }
0x125e   :  { %12173 = vrcp.f32 %v6390_v48 }
0x125f   :  { %v6461_v8 = vpack.c.bf16 %v6445_v9, %v6445_v9 }
0x1260   :  { %v15609_v22 = vpop.f32.mrf.mxu3 }
0x1261   :  { %v6485_v0 = vunpack.c.l.b16 %v6461_v8 }
0x1264   :  { %v12174_v43 = vpop.eup %12173 }
0x1265   :  { %v6446_v5 = vmul.f32 %v12174_v43, %v15553_v3  ;;  %v6393_v4 = vpop.xlane.xlu1 %6392 }
0x1266   :  { %12175 = vrcp.f32 %v6393_v4 }
0x1267   :  { %v6462_v38 = vpack.c.bf16 %v6446_v5, %v6446_v5 }
0x1268   :  { %v15619_v52 = vpop.f32.mrf.mxu3 }
0x1269   :  { %v6486_v11 = vunpack.c.l.b16 %v6462_v38 }
0x126b   :  { %v6492_v45 = vpack.c.b16 %v6486_v11, %v6485_v0 }
0x126c   :  { %v12176_v24 = vpop.eup %12175 }
0x126d   :  { %7050 = vmatmul.bf16.gmra.mxu3 %v14689_v23  ;;  %v6396_v3 = vpop.xlane.xlu2 %6395  ;;  %10943 = vmatmul.msk.bf16.gmra.mxu2 %vm733_vm1, %v6492_v45  ;;  %v6447_v32 = vmul.f32 %v12176_v24, %v15565_v40  ;;  %v11636_v40 = vld [vmem:[%s17338_s1 + $0x80] sm:$0xff]  ;;  %v11634_v45 = vld [vmem:[%s17247_s16 + $0x10] sm:$0xff] }
0x126e   :  { %12177 = vrcp.f32 %v6396_v3  ;;  %6905 = vmatpush.bf16.msrb.mxu2 %v11636_v40  ;;  %6701 = vmatpush.bf16.msra.mxu0 %v11634_v45  ;;  %v15671_v24 = vld [vmem:[%s17244_s13 + $0x2] ss:$0 sm:$0xff] }
0x126f   :  { %v6463_v41 = vpack.c.bf16 %v6447_v32, %v6447_v32 }
0x1270   :  { %v15629_v63 = vpop.f32.mrf.mxu3 }
0x1271   :  { %v6487_v27 = vunpack.c.l.b16 %v6463_v41 }
0x1274   :  { %v12178_v33 = vpop.eup %12177 }
0x1275   :  { %v6448_v50 = vmul.f32 %v12178_v33, %v15581_v31  ;;  %v6399_v7 = vpop.xlane.xlu0 %6398 }
0x1276   :  { %12179 = vrcp.f32 %v6399_v7 }
0x1277   :  { %v6464_v36 = vpack.c.bf16 %v6448_v50, %v6448_v50 }
0x1278   :  { %v15639_v10 = vpop.f32.mrf.mxu3 }
0x1279   :  { %v6488_v55 = vunpack.c.l.b16 %v6464_v36 }
0x127b   :  { %v6493_v26 = vpack.c.b16 %v6488_v55, %v6487_v27 }
0x127c   :  { %v12180_v31 = vpop.eup %12179 }
0x127d   :  { %10944 = vmatmul.msk.bf16.gmra.mxu2 %vm733_vm1, %v6493_v26  ;;  %7055 = vmatmul.bf16.gmra.mxu3 %v14724_v20  ;;  %v6402_v51 = vpop.xlane.xlu1 %6401  ;;  %v6449_v17 = vmul.f32 %v12180_v31, %v15587_v28 }
0x127e   :  { %12181 = vrcp.f32 %v6402_v51 }
0x127f   :  { %v6465_v1 = vpack.c.bf16 %v6449_v17, %v6449_v17 }
0x1280   :  { %v15646_v54 = vpop.f32.mrf.mxu3 }
0x1281   :  { %v6489_v43 = vunpack.c.l.b16 %v6465_v1 }
0x1284   :  { %v12182_v48 = vpop.eup %12181 }
0x1285   :  { %v6450_v53 = vmul.f32 %v12182_v48, %v15593_v37 }
0x1287   :  { %v6466_v9 = vpack.c.bf16 %v6450_v53, %v6450_v53 }
0x1288   :  { %v15650_v21 = vpop.f32.mrf.mxu3 }
0x1289   :  { %v6490_v8 = vunpack.c.l.b16 %v6466_v9 }
0x128b   :  { %v6494_v5 = vpack.c.b16 %v6490_v8, %v6489_v43 }
0x128d   :  { %10945 = vmatmul.msk.bf16.gmra.mxu2 %vm733_vm1, %v6494_v5  ;;  %7060 = vmatmul.bf16.gmra.mxu3 %v14761_v15 }
0x1290   :  { %v15654_v4 = vpop.f32.mrf.mxu3 }
0x1298   :  { %v15656_v30 = vpop.f32.mrf.mxu3 }
0x129d   :  { %6906 = vmatmul.bf16.vlgmr.msrb.gmra.mxu2 %v14669_v19 }
0x12a0   :  { %v7026_v28 = vpop.f32.mrf.mxu3 }
0x12a1   :  { %v7027_v6 = vadd.f32 %v15671_v24, %v7026_v28 }
0x12a8   :  { %v7028_v38 = vpop.f32.mrf.mxu3 }
0x12ad   :  { %6911 = vmatmul.bf16.gmra.mxu2 %v14717_v58 }
0x12b0   :  { %v7031_v37 = vpop.f32.mrf.mxu3 }
0x12b1   :  { %v7032_v1 = vadd.f32 %v15671_v24, %v7031_v37 }
0x12b3   :  { %v7203_v8 = vpack.c.bf16 %v7032_v1, %v7032_v1 }
0x12b8   :  { %v7033_v0 = vpop.f32.mrf.mxu3 }
0x12b9   :  { %v7034_v53 = vadd.f32 %v15671_v24, %v7033_v0  ;;  %v7201_v0 = vpack.c.bf16 %v7027_v6, %v7027_v6 }
0x12bb   :  { %v7204_v5 = vpack.c.bf16 %v7034_v53, %v7034_v53 }
0x12bd   :  { %6916 = vmatmul.bf16.gmra.mxu2 %v14755_v57 }
0x12c0   :  { %v7036_v11 = vpop.f32.mrf.mxu3 }
0x12c1   :  { %v7037_v32 = vadd.f32 %v15671_v24, %v7036_v11 }
0x12c3   :  { %v7205_v7 = vpack.c.bf16 %v7037_v32, %v7037_v32  ;;  %v7264_v32 = vunpack.c.l.b16 %v7204_v5 }
0x12c5   :  { %v7265_v26 = vunpack.c.l.b16 %v7205_v7  ;;  %v7261_v7 = vunpack.c.l.b16 %v7201_v0 }
0x12c8   :  { %v7038_v3 = vpop.f32.mrf.mxu3 }
0x12c9   :  { %v7039_v56 = vadd.f32 %v15671_v24, %v7038_v3 }
0x12cb   :  { %v7206_v36 = vpack.c.bf16 %v7039_v56, %v7039_v56 }
0x12cd   :  { %6921 = vmatmul.bf16.gmra.mxu2 %v14805_v2  ;;  %v7266_v51 = vunpack.c.l.b16 %v7206_v36 }
0x12cf   :  { %v7271_v43 = vpack.c.b16 %v7266_v51, %v7265_v26 }
0x12d0   :  { %v7041_v62 = vpop.f32.mrf.mxu3 }
0x12d1   :  { %v7042_v29 = vadd.f32 %v15671_v24, %v7041_v62  ;;  %v7292_v11 = vsel %vm570_vm0, %v7271_v43, 0  ;;  %v7029_v62 = vadd.f32 %v15671_v24, %v7028_v38 }
0x12d3   :  { %v7207_v33 = vpack.c.bf16 %v7042_v29, %v7042_v29  ;;  %v7263_v29 = vunpack.c.l.b16 %v7203_v8  ;;  %v7202_v56 = vpack.c.bf16 %v7029_v62, %v7029_v62 }
0x12d5   :  { %v7267_v27 = vunpack.c.l.b16 %v7207_v33  ;;  %v7270_v33 = vpack.c.b16 %v7264_v32, %v7263_v29  ;;  %v7262_v28 = vunpack.c.l.b16 %v7202_v56 }
0x12d7   :  { %v7289_v36 = vsel %vm570_vm0, %v7270_v33, 0 }
0x12d8   :  { %v7043_v41 = vpop.f32.mrf.mxu3 }
0x12d9   :  { %v7044_v50 = vadd.f32 %v15671_v24, %v7043_v41 }
0x12db   :  { %v7208_v55 = vpack.c.bf16 %v7044_v50, %v7044_v50 }
0x12dd   :  { %v7268_v40 = vunpack.c.l.b16 %v7208_v55  ;;  %6926 = vmatmul.bf16.gmra.mxu2 %v14835_v13 }
0x12df   :  { %v7272_v31 = vpack.c.b16 %v7268_v40, %v7267_v27  ;;  %v7269_v27 = vpack.c.b16 %v7262_v28, %v7261_v7 }
0x12e0   :  { %v6540_v17 = vpop.f32.mrf.mxu2  ;;  %v15678_v48 = vpop.f32.mrf.mxu3 }
0x12e1   :  { %v7295_v9 = vsel %vm570_vm0, %v7272_v31, 0  ;;  %v7286_v26 = vsel %vm570_vm0, %v7269_v27, 0 }
0x12e2   :  { %7301 = vmatpush.bf16.xpose.msra.mxu1 %v7295_v9  ;;  %v15696_v9 = vpop.f32.mrf.mxu1 }
0x12e8   :  { %v6542_v45 = vpop.f32.mrf.mxu2  ;;  %v15685_v3 = vpop.f32.mrf.mxu3 }
0x12e9   :  { %v6645_v37 = vpack.c.bf16 %v6542_v45, %v6540_v17 }
0x12ea   :  { %7302 = vmatpush.bf16.xpose.msra.mxu1 %v7292_v11  ;;  %v15702_v0 = vpop.f32.mrf.mxu1 }
0x12eb   :  { %10962 = vmatmul.msk.bf16.vlgmr.msra.gmra.mxu0 %vm570_vm0, %v6645_v37  ;;  %17360 = vst [vmem:[#allocation22_spill] sm:$0xff] %v15702_v0 }
0x12ed   :  { %6931 = vmatmul.bf16.gmra.mxu2 %v14855_v49 }
0x12f0   :  { %v6545_v41 = vpop.f32.mrf.mxu2  ;;  %v7051_v50 = vpop.f32.mrf.mxu3 }
0x12f2   :  { %7303 = vmatpush.bf16.xpose.msra.mxu1 %v7289_v36  ;;  %v7052_v36 = vadd.f32 %v15671_v24, %v7051_v50 }
0x12f8   :  { %v6547_v38 = vpop.f32.mrf.mxu2  ;;  %v7053_v55 = vpop.f32.mrf.mxu3 }
0x12f9   :  { %v6646_v40 = vpack.c.bf16 %v6547_v38, %v6545_v41  ;;  %v7054_v27 = vadd.f32 %v15671_v24, %v7053_v55  ;;  %v7047_v55 = vadd.f32 %v15671_v24, %v15678_v48 }
0x12fa   :  { %7304 = vmatpush.bf16.xpose.msra.mxu1 %v7286_v26 }
0x12fb   :  { %10963 = vmatmul.msk.bf16.gmra.mxu0 %vm570_vm0, %v6646_v40 }
0x12fd   :  { %6936 = vmatmul.bf16.gmra.mxu2 %v14874_v44 }
0x1300   :  { %v6550_v51 = vpop.f32.mrf.mxu2  ;;  %v7056_v31 = vpop.f32.mrf.mxu3 }
0x1301   :  { %v7057_v11 = vadd.f32 %v15671_v24, %v7056_v31  ;;  %v15710_v31 = vld [vmem:[%s17351_s28 + $0x2] ss:$0 sm:$0xff] }
0x1303   :  { %v7213_v56 = vpack.c.bf16 %v7057_v11, %v7057_v11 }
0x1305   :  { %v7358_v38 = vunpack.c.l.b16 %v7213_v56  ;;  %v7209_v56 = vpack.c.bf16 %v7047_v55, %v7047_v55 }
0x1308   :  { %v6552_v17 = vpop.f32.mrf.mxu2  ;;  %v7058_v1 = vpop.f32.mrf.mxu3 }
0x1309   :  { %v6647_v53 = vpack.c.bf16 %v6552_v17, %v6550_v51  ;;  %v7059_v6 = vadd.f32 %v15671_v24, %v7058_v1  ;;  %v7211_v1 = vpack.c.bf16 %v7052_v36, %v7052_v36 }
0x130b   :  { %10964 = vmatmul.msk.bf16.gmra.mxu0 %vm570_vm0, %v6647_v53  ;;  %v7214_v33 = vpack.c.bf16 %v7059_v6, %v7059_v6  ;;  %v7212_v53 = vpack.c.bf16 %v7054_v27, %v7054_v27  ;;  %v7356_v11 = vunpack.c.l.b16 %v7211_v1  ;;  %v6650_v1 = vpack.c.bf16 %v15639_v10, %v15629_v63 }
0x130c   :  { %v6651_v63 = vpack.c.bf16 %v15650_v21, %v15646_v54  ;;  %v6652_v54 = vpack.c.bf16 %v15656_v30, %v15654_v4 }
0x130d   :  { %6941 = vmatmul.bf16.gmra.mxu2 %v14931_v46  ;;  %v7359_v40 = vunpack.c.l.b16 %v7214_v33  ;;  %v7357_v6 = vunpack.c.l.b16 %v7212_v53 }
0x130f   :  { %v7363_v48 = vpack.c.b16 %v7357_v6, %v7356_v11 }
0x1310   :  { %v6555_v43 = vpop.f32.mrf.mxu2  ;;  %v7061_v8 = vpop.f32.mrf.mxu3 }
0x1311   :  { %v7062_v5 = vadd.f32 %v15671_v24, %v7061_v8  ;;  %v15713_v8 = vpop.f32.mrf.mxu1 }
0x1313   :  { %v7215_v45 = vpack.c.bf16 %v7062_v5, %v7062_v5  ;;  %v7049_v5 = vadd.f32 %v15671_v24, %v15685_v3 }
0x1315   :  { %v7360_v41 = vunpack.c.l.b16 %v7215_v45  ;;  %v7210_v33 = vpack.c.bf16 %v7049_v5, %v7049_v5 }
0x1317   :  { %v7355_v36 = vunpack.c.l.b16 %v7210_v33 }
0x1318   :  { %v6557_v62 = vpop.f32.mrf.mxu2  ;;  %v7063_v29 = vpop.f32.mrf.mxu3 }
0x1319   :  { %v6648_v32 = vpack.c.bf16 %v6557_v62, %v6555_v43  ;;  %v7064_v37 = vadd.f32 %v15671_v24, %v7063_v29  ;;  %v7364_v43 = vpack.c.b16 %v7359_v40, %v7358_v38  ;;  %v6649_v29 = vpack.c.bf16 %v15619_v52, %v15609_v22  ;;  %v15725_v3 = vpop.f32.mrf.mxu1 }
0x131a   :  { %17361 = vst [vmem:[#allocation23_spill] sm:$0xff] %v15725_v3  ;;  %v7382_v38 = vsel %vm570_vm0, %v7363_v48, 0 }
0x131b   :  { %v7216_v7 = vpack.c.bf16 %v7064_v37, %v7064_v37  ;;  %10965 = vmatmul.msk.bf16.gmra.mxu0 %vm570_vm0, %v6648_v32  ;;  %v7385_v45 = vsel %vm570_vm0, %v7364_v43, 0 }
0x131d   :  { %v7361_v28 = vunpack.c.l.b16 %v7216_v7 }
0x131f   :  { %v7365_v26 = vpack.c.b16 %v7361_v28, %v7360_v41  ;;  %v7354_v28 = vunpack.c.l.b16 %v7209_v56 }
0x1320   :  { %v6907_v51 = vpop.f32.mrf.mxu2 }
0x1321   :  { %v7388_v17 = vsel %vm570_vm0, %v7365_v26, 0  ;;  %v6908_v50 = vadd.f32 %v15710_v31, %v6907_v51  ;;  %v7362_v52 = vpack.c.b16 %v7355_v36, %v7354_v28  ;;  %v15731_v51 = vpop.f32.mrf.mxu1 }
0x1322   :  { %7394 = vmatpush.bf16.xpose.msra.mxu2 %v7388_v17 }
0x1323   :  { %v7185_v32 = vpack.c.bf16 %v6908_v50, %v6908_v50  ;;  %v7379_v26 = vsel %vm570_vm0, %v7362_v52, 0 }
0x1325   :  { %v7241_v7 = vunpack.c.l.b16 %v7185_v32 }
0x1328   :  { %v6909_v62 = vpop.f32.mrf.mxu2 }
0x1329   :  { %v6910_v37 = vadd.f32 %v15710_v31, %v6909_v62 }
0x132a   :  { %7395 = vmatpush.bf16.xpose.msra.mxu2 %v7385_v45  ;;  %v15738_v45 = vpop.f32.mrf.mxu1 }
0x132b   :  { %v7186_v41 = vpack.c.bf16 %v6910_v37, %v6910_v37  ;;  %10966 = vmatmul.msk.bf16.gmra.mxu0 %vm570_vm0, %v6649_v29  ;;  %17362 = vst [vmem:[#allocation24_spill] sm:$0xff] %v15738_v45 }
0x132d   :  { %v7242_v24 = vunpack.c.l.b16 %v7186_v41 }
0x132f   :  { %v7249_v27 = vpack.c.b16 %v7242_v24, %v7241_v7 }
0x1330   :  { %v6912_v22 = vpop.f32.mrf.mxu2 }
0x1331   :  { %11133 = vmatmul.msk.bf16.vlgmr.msra.gmra.mxu1 %vm570_vm0, %v7249_v27  ;;  %v6913_v40 = vadd.f32 %v15710_v31, %v6912_v22 }
0x1332   :  { %7396 = vmatpush.bf16.xpose.msra.mxu2 %v7382_v38  ;;  %v15745_v56 = vpop.f32.mrf.mxu1 }
0x1333   :  { %v7187_v53 = vpack.c.bf16 %v6913_v40, %v6913_v40 }
0x1335   :  { %v7243_v55 = vunpack.c.l.b16 %v7187_v53 }
0x1338   :  { %v6914_v17 = vpop.f32.mrf.mxu2 }
0x1339   :  { %v6915_v43 = vadd.f32 %v15710_v31, %v6914_v17 }
0x133a   :  { %7397 = vmatpush.bf16.xpose.msra.mxu2 %v7379_v26  ;;  %v15749_v28 = vpop.f32.mrf.mxu1 }
0x133b   :  { %v7188_v50 = vpack.c.bf16 %v6915_v43, %v6915_v43  ;;  %10967 = vmatmul.msk.bf16.gmra.mxu0 %vm570_vm0, %v6650_v1  ;;  %17363 = vst [vmem:[#allocation25_spill] sm:$0xff] %v15749_v28 }
0x133d   :  { %v7244_v5 = vunpack.c.l.b16 %v7188_v50 }
0x133f   :  { %v7250_v11 = vpack.c.b16 %v7244_v5, %v7243_v55 }
0x1340   :  { %v6917_v6 = vpop.f32.mrf.mxu2 }
0x1341   :  { %11134 = vmatmul.msk.bf16.gmra.mxu1 %vm570_vm0, %v7250_v11  ;;  %v6918_v62 = vadd.f32 %v15710_v31, %v6917_v6 }
0x1342   :  { %v15755_v26 = vpop.f32.mrf.mxu1 }
0x1343   :  { %v7189_v10 = vpack.c.bf16 %v6918_v62, %v6918_v62 }
0x1345   :  { %v7245_v33 = vunpack.c.l.b16 %v7189_v10 }
0x1348   :  { %v6919_v29 = vpop.f32.mrf.mxu2 }
0x1349   :  { %v6920_v32 = vadd.f32 %v15710_v31, %v6919_v29 }
0x134a   :  { %v15760_v30 = vpop.f32.mrf.mxu1 }
0x134b   :  { %v7190_v37 = vpack.c.bf16 %v6920_v32, %v6920_v32  ;;  %10968 = vmatmul.msk.bf16.gmra.mxu0 %vm570_vm0, %v6651_v63  ;;  %17364 = vst [vmem:[#allocation26_spill] sm:$0xff] %v15760_v30  ;;  %v11659_v63 = vld [vmem:[%s17245_s14 + $0xb8] sm:$0xff] }
0x134c   :  { %7136 = vmatpush.bf16.msrb.mxu0 %v11659_v63  ;;  %v11653_v63 = vld [vmem:[%s17245_s14 + $0x88] sm:$0xff] }
0x134d   :  { %v7246_v41 = vunpack.c.l.b16 %v7190_v37 }
0x134f   :  { %v7251_v48 = vpack.c.b16 %v7246_v41, %v7245_v33 }
0x1350   :  { %v6922_v7 = vpop.f32.mrf.mxu2 }
0x1351   :  { %11135 = vmatmul.msk.bf16.gmra.mxu1 %vm570_vm0, %v7251_v48  ;;  %v6923_v24 = vadd.f32 %v15710_v31, %v6922_v7 }
0x1352   :  { %v15763_v62 = vpop.f32.mrf.mxu1 }
0x1353   :  { %v7191_v21 = vpack.c.bf16 %v6923_v24, %v6923_v24  ;;  %17365 = vst [vmem:[#allocation27_spill] sm:$0xff] %v15763_v62 }
0x1355   :  { %v7247_v22 = vunpack.c.l.b16 %v7191_v21 }
0x1358   :  { %v6924_v36 = vpop.f32.mrf.mxu2 }
0x1359   :  { %v6925_v27 = vadd.f32 %v15710_v31, %v6924_v36 }
0x135a   :  { %v15772_v24 = vpop.f32.mrf.mxu1 }
0x135b   :  { %v7192_v38 = vpack.c.bf16 %v6925_v27, %v6925_v27  ;;  %10969 = vmatmul.msk.bf16.gmra.mxu0 %vm570_vm0, %v6652_v54  ;;  %17366 = vst [vmem:[#allocation28_spill] sm:$0xff] %v15772_v24  ;;  %v11658_v54 = vld [vmem:[%s17245_s14 + $0xb0] sm:$0xff]  ;;  %v11657_v27 = vld [vmem:[%s17245_s14 + $0xa8] sm:$0xff] }
0x135c   :  { %7137 = vmatpush.bf16.msrb.mxu0 %v11658_v54 }
0x135d   :  { %v7248_v52 = vunpack.c.l.b16 %v7192_v38 }
0x135f   :  { %v7252_v40 = vpack.c.b16 %v7248_v52, %v7247_v22  ;;  %v11656_v52 = vld [vmem:[%s17245_s14 + $0xa0] sm:$0xff] }
0x1360   :  { %v6927_v17 = vpop.f32.mrf.mxu2  ;;  %7138 = vmatpush.bf16.msrb.mxu0 %v11657_v27 }
0x1361   :  { %11136 = vmatmul.msk.bf16.gmra.mxu1 %vm570_vm0, %v7252_v40  ;;  %v6928_v1 = vadd.f32 %v15710_v31, %v6927_v17 }
0x1362   :  { %v15787_v40 = vpop.f32.mrf.mxu1 }
0x1363   :  { %v7193_v43 = vpack.c.bf16 %v6928_v1, %v6928_v1  ;;  %17368 = vst [vmem:[#allocation30_spill] sm:$0xff] %v15787_v40 }
0x1364   :  { %7139 = vmatpush.bf16.msrb.mxu0 %v11656_v52 }
0x1365   :  { %v7334_v55 = vunpack.c.l.b16 %v7193_v43  ;;  %v11655_v43 = vld [vmem:[%s17245_s14 + $0x98] sm:$0xff] }
0x1368   :  { %v6929_v53 = vpop.f32.mrf.mxu2  ;;  %v15770_v33 = vpop.f32.mrf.mxu0  ;;  %7140 = vmatpush.bf16.msrb.mxu0 %v11655_v43 }
0x1369   :  { %v6930_v4 = vadd.f32 %v15710_v31, %v6929_v53 }
0x136b   :  { %v7194_v50 = vpack.c.bf16 %v6930_v4, %v6930_v4 }
0x136d   :  { %v7335_v5 = vunpack.c.l.b16 %v7194_v50 }
0x136f   :  { %v7342_v11 = vpack.c.b16 %v7335_v5, %v7334_v55  ;;  %v11654_v5 = vld [vmem:[%s17245_s14 + $0x90] sm:$0xff] }
0x1370   :  { %v6932_v6 = vpop.f32.mrf.mxu2  ;;  %v15781_v38 = vpop.f32.mrf.mxu0  ;;  %7141 = vmatpush.bf16.msrb.mxu0 %v11654_v5 }
0x1371   :  { %11137 = vmatmul.msk.bf16.vlgmr.msra.gmra.mxu2 %vm570_vm0, %v7342_v11  ;;  %v6933_v29 = vadd.f32 %v15710_v31, %v6932_v6  ;;  %17367 = vst [vmem:[#allocation29_spill] sm:$0xff] %v15781_v38 }
0x1373   :  { %v7195_v32 = vpack.c.bf16 %v6933_v29, %v6933_v29 }
0x1374   :  { %7142 = vmatpush.bf16.msrb.mxu0 %v11653_v63 }
0x1375   :  { %v7336_v48 = vunpack.c.l.b16 %v7195_v32 }
0x1378   :  { %v6934_v10 = vpop.f32.mrf.mxu2  ;;  %v15796_v11 = vpop.f32.mrf.mxu0 }
0x1379   :  { %v6935_v37 = vadd.f32 %v15710_v31, %v6934_v10  ;;  %v15802_v10 = vpop.f32.mrf.mxu1 }
0x137a   :  { %17369 = vst [vmem:[#allocation31_spill] sm:$0xff] %v15802_v10 }
0x137b   :  { %v7196_v41 = vpack.c.bf16 %v6935_v37, %v6935_v37  ;;  %v11652_v37 = vld [vmem:[%s17245_s14 + $0x80] sm:$0xff] }
0x137c   :  { %7143 = vmatpush.bf16.msrb.mxu0 %v11652_v37 }
0x137d   :  { %v7337_v7 = vunpack.c.l.b16 %v7196_v41 }
0x137f   :  { %v7343_v36 = vpack.c.b16 %v7337_v7, %v7336_v48  ;;  %7144 = vmatmul.bf16.vlgmr.msrb.gmra.mxu0 %v14522_v60 }
0x1380   :  { %v6937_v21 = vpop.f32.mrf.mxu2  ;;  %v15808_v48 = vpop.f32.mrf.mxu0 }
0x1381   :  { %11138 = vmatmul.msk.bf16.gmra.mxu2 %vm570_vm0, %v7343_v36  ;;  %v6938_v22 = vadd.f32 %v15710_v31, %v6937_v21  ;;  %17370 = vst [vmem:[#allocation32_spill] sm:$0xff] %v15808_v48  ;;  %v15811_v21 = vpop.f32.mrf.mxu1 }
0x1382   :  { %17371 = vst [vmem:[#allocation33_spill] sm:$0xff] %v15811_v21 }
0x1383   :  { %v7197_v1 = vpack.c.bf16 %v6938_v22, %v6938_v22 }
0x1385   :  { %v7338_v50 = vunpack.c.l.b16 %v7197_v1 }
0x1388   :  { %v6939_v17 = vpop.f32.mrf.mxu2 }
0x1389   :  { %v6940_v53 = vadd.f32 %v15710_v31, %v6939_v17  ;;  %v15815_v17 = vpop.f32.mrf.mxu0  ;;  %v15817_v1 = vpop.f32.mrf.mxu1 }
0x138a   :  { %17372 = vst [vmem:[#allocation34_spill] sm:$0xff] %v15817_v1 }
0x138b   :  { %v7198_v4 = vpack.c.bf16 %v6940_v53, %v6940_v53 }
0x138d   :  { %v7339_v55 = vunpack.c.l.b16 %v7198_v4 }
0x138f   :  { %v7344_v6 = vpack.c.b16 %v7339_v55, %v7338_v50  ;;  %7149 = vmatmul.bf16.gmra.mxu0 %v14564_v25 }
0x1390   :  { %v6942_v29 = vpop.f32.mrf.mxu2 }
0x1391   :  { %11139 = vmatmul.msk.bf16.gmra.mxu2 %vm570_vm0, %v7344_v6  ;;  %v6943_v32 = vadd.f32 %v15710_v31, %v6942_v29  ;;  %v15820_v53 = vpop.f32.mrf.mxu0 }
0x1392   :  { %17373 = vst [vmem:[#allocation35_spill] sm:$0xff] %v15820_v53 }
0x1393   :  { %v7199_v7 = vpack.c.bf16 %v6943_v32, %v6943_v32 }
0x1395   :  { %v7340_v27 = vunpack.c.l.b16 %v7199_v7 }
0x1398   :  { %v6944_v41 = vpop.f32.mrf.mxu2 }
0x1399   :  { %v6945_v36 = vadd.f32 %v15710_v31, %v6944_v41  ;;  %v15823_v55 = vpop.f32.mrf.mxu0 }
0x139b   :  { %v7200_v54 = vpack.c.bf16 %v6945_v36, %v6945_v36 }
0x139d   :  { %v7341_v22 = vunpack.c.l.b16 %v7200_v54 }
0x139f   :  { %v7345_v52 = vpack.c.b16 %v7341_v22, %v7340_v27  ;;  %7154 = vmatmul.bf16.gmra.mxu0 %v14588_v35 }
0x13a1   :  { %11140 = vmatmul.msk.bf16.gmra.mxu2 %vm570_vm0, %v7345_v52  ;;  %v15827_v32 = vpop.f32.mrf.mxu0 }
0x13a2   :  { %17374 = vst [vmem:[#allocation36_spill] sm:$0xff] %v15827_v32 }
0x13a9   :  { %v15834_v54 = vpop.f32.mrf.mxu0 }
0x13ae   :  { %v7306_v31 = vpop.f32.mrf.mxu1 }
0x13af   :  { %v7419_v43 = vmul.f32 0.17677669, %v7306_v31  ;;  %7159 = vmatmul.bf16.gmra.mxu0 %v14600_v47 }
0x13b1   :  { %v7435_v4 = vsel %vm733_vm1, %v7419_v43, -inf  ;;  %v15841_v31 = vpop.f32.mrf.mxu0 }
0x13b2   :  { %7436 = vmax.xlane.f32.xlu2 %v7435_v4  ;;  %17375 = vst [vmem:[#allocation37_spill] sm:$0xff] %v15841_v31 }
0x13b6   :  { %v7308_v50 = vpop.f32.mrf.mxu1 }
0x13b7   :  { %v7420_v5 = vmul.f32 0.17677669, %v7308_v50 }
0x13b9   :  { %v7438_v6 = vsel %vm733_vm1, %v7420_v5, -inf }
0x13ba   :  { %7439 = vmax.xlane.f32.xlu0 %v7438_v6 }
0x13be   :  { %v7311_v29 = vpop.f32.mrf.mxu1 }
0x13bf   :  { %v7421_v63 = vmul.f32 0.17677669, %v7311_v29  ;;  %7164 = vmatmul.bf16.gmra.mxu0 %v14634_v14 }
0x13c1   :  { %v7441_v37 = vsel %vm733_vm1, %v7421_v63, -inf }
0x13c2   :  { %7442 = vmax.xlane.f32.xlu1 %v7441_v37  ;;  %v15848_v37 = vpop.f32.mrf.mxu0 }
0x13c6   :  { %v7313_v41 = vpop.f32.mrf.mxu1 }
0x13c7   :  { %v15830_v7 = vmul.f32 0.17677669, %v7313_v41 }
0x13c9   :  { %v7444_v36 = vsel %vm733_vm1, %v15830_v7, -inf }
0x13ca   :  { %7445 = vmax.xlane.f32.xlu2 %v7444_v36 }
0x13ce   :  { %v7316_v27 = vpop.f32.mrf.mxu1 }
0x13cf   :  { %v15837_v22 = vmul.f32 0.17677669, %v7316_v27  ;;  %7169 = vmatmul.bf16.gmra.mxu0 %v14689_v23 }
0x13d1   :  { %v7447_v52 = vsel %vm733_vm1, %v15837_v22, -inf }
0x13d2   :  { %7448 = vmax.xlane.f32.xlu0 %v7447_v52 }
0x13d6   :  { %v7318_v4 = vpop.f32.mrf.mxu1 }
0x13d7   :  { %v15843_v50 = vmul.f32 0.17677669, %v7318_v4  ;;  %v15856_v4 = vpop.f32.mrf.mxu0 }
0x13d8   :  { %17376 = vst [vmem:[#allocation38_spill] sm:$0xff] %v15856_v4 }
0x13d9   :  { %v7450_v6 = vsel %vm733_vm1, %v15843_v50, -inf }
0x13da   :  { %7451 = vmax.xlane.f32.xlu1 %v7450_v6 }
0x13de   :  { %v7321_v29 = vpop.f32.mrf.mxu1 }
0x13df   :  { %v15850_v41 = vmul.f32 0.17677669, %v7321_v29  ;;  %v15861_v6 = vpop.f32.mrf.mxu0  ;;  %7174 = vmatmul.bf16.gmra.mxu0 %v14724_v20 }
0x13e0   :  { %17377 = vst [vmem:[#allocation39_spill] sm:$0xff] %v15861_v6 }
0x13e1   :  { %v7453_v36 = vsel %vm733_vm1, %v15850_v41, -inf }
0x13e2   :  { %7454 = vmax.xlane.f32.xlu2 %v7453_v36 }
0x13e6   :  { %v7323_v27 = vpop.f32.mrf.mxu1 }
0x13e7   :  { %v15854_v52 = vmul.f32 0.17677669, %v7323_v27  ;;  %v15864_v29 = vpop.f32.mrf.mxu0 }
0x13e8   :  { %17378 = vst [vmem:[#allocation40_spill] sm:$0xff] %v15864_v29 }
0x13e9   :  { %v7456_v1 = vsel %vm733_vm1, %v15854_v52, -inf }
0x13ea   :  { %7457 = vmax.xlane.f32.xlu0 %v7456_v1 }
0x13ef   :  { %v15866_v10 = vpop.f32.mrf.mxu0  ;;  %7179 = vmatmul.bf16.gmra.mxu0 %v14761_v15 }
0x13f0   :  { %17379 = vst [vmem:[#allocation41_spill] sm:$0xff] %v15866_v10 }
0x13f4   :  { %v7399_v24 = vpop.f32.mrf.mxu2 }
0x13f7   :  { %v15869_v36 = vpop.f32.mrf.mxu0 }
0x13f8   :  { %17380 = vst [vmem:[#allocation42_spill] sm:$0xff] %v15869_v36 }
0x13fc   :  { %v7401_v30 = vpop.f32.mrf.mxu2 }
0x13ff   :  { %v15871_v27 = vpop.f32.mrf.mxu0 }
0x1404   :  { %v7404_v61 = vpop.f32.mrf.mxu2 }
0x1407   :  { %v15873_v4 = vpop.f32.mrf.mxu0 }
0x140f   :  { %v7150_v28 = vpop.f32.mrf.mxu0 }
0x1417   :  { %v7152_v45 = vpop.f32.mrf.mxu0 }
0x1425   :  { %v7437_v1 = vpop.xlane.xlu2 %7436 }
0x1426   :  { %v7483_v31 = vsub.f32 %v7419_v43, %v7437_v1 }
0x1428   :  { %v7499_v59 = vmul.f32 1.442695, %v7483_v31  ;;  %v7155_v31 = vpop.f32.mrf.mxu0 }
0x142a   :  { %12183 = vpow2.f32 %v7499_v59 }
0x142d   :  { %v7440_v32 = vpop.xlane.xlu0 %7439 }
0x142e   :  { %v7484_v42 = vsub.f32 %v7420_v5, %v7440_v32  ;;  %v7406_v5 = vpop.f32.mrf.mxu2  ;;  %v15883_v32 = vmul.f32 0.17677669, %v7399_v24  ;;  %v15894_v24 = vmul.f32 0.17677669, %v7401_v30 }
0x142f   :  { %v15928_v10 = vmul.f32 0.17677669, %v7406_v5 }
0x1430   :  { %v15875_v29 = vpop.eup %12183  ;;  %v7501_v34 = vmul.f32 1.442695, %v7484_v42 }
0x1431   :  { %v7531_v36 = vsel %vm733_vm1, %v15875_v29, 0.0  ;;  %v7468_v62 = vsel %vm733_vm1, %v15928_v10, -inf }
0x1432   :  { %12185 = vpow2.f32 %v7501_v34  ;;  %7532 = vadd.xlane.f32.xlu1 %v7531_v36 }
0x1435   :  { %v7443_v53 = vpop.xlane.xlu1 %7442 }
0x1436   :  { %v7485_v12 = vsub.f32 %v7421_v63, %v7443_v53  ;;  %v7459_v53 = vsel %vm733_vm1, %v15883_v32, -inf  ;;  %v7157_v63 = vpop.f32.mrf.mxu0  ;;  %v15892_v36 = vpop.f32.mrf.mxu2 }
0x1438   :  { %v15879_v18 = vpop.eup %12185  ;;  %v7503_v43 = vmul.f32 1.442695, %v7485_v12 }
0x1439   :  { %v7534_v59 = vsel %vm733_vm1, %v15879_v18, 0.0 }
0x143a   :  { %12187 = vpow2.f32 %v7503_v43  ;;  %7535 = vadd.xlane.f32.xlu2 %v7534_v59 }
0x143d   :  { %v7446_v42 = vpop.xlane.xlu2 %7445 }
0x143e   :  { %v7486_v1 = vsub.f32 %v15830_v7, %v7446_v42  ;;  %v15902_v42 = vld [vmem:[%s17246_s15 + $0x2] ss:$0 sm:$0xff]  ;;  %v15911_v48 = vpop.f32.mrf.mxu2 }
0x143f   :  { %v7158_v16 = vadd.f32 %v15902_v42, %v7157_v63  ;;  %v7153_v63 = vadd.f32 %v15902_v42, %v7152_v45 }
0x1440   :  { %v15886_v3 = vpop.eup %12187  ;;  %v7505_v34 = vmul.f32 1.442695, %v7486_v1 }
0x1441   :  { %v7537_v12 = vsel %vm733_vm1, %v15886_v3, 0.0 }
0x1442   :  { %12189 = vpow2.f32 %v7505_v34  ;;  %7460 = vmax.xlane.f32.xlu2 %v7459_v53  ;;  %7538 = vadd.xlane.f32.xlu0 %v7537_v12  ;;  %v7462_v53 = vsel %vm733_vm1, %v15894_v24, -inf  ;;  %v7160_v12 = vpop.f32.mrf.mxu0 }
0x1443   :  { %v7161_v30 = vadd.f32 %v15902_v42, %v7160_v12  ;;  %v7222_v12 = vpack.c.bf16 %v7158_v16, %v7158_v16  ;;  %v7148_v16 = vadd.f32 %v15902_v42, %v15873_v4 }
0x1445   :  { %v7449_v43 = vpop.xlane.xlu0 %7448  ;;  %v7223_v21 = vpack.c.bf16 %v7161_v30, %v7161_v30  ;;  %v7660_v5 = vunpack.c.l.b16 %v7222_v12  ;;  %v7218_v4 = vpack.c.bf16 %v7148_v16, %v7148_v16  ;;  %v15948_v12 = vmul.f32 0.17677669, %v15892_v36 }
0x1446   :  { %v7487_v7 = vsub.f32 %v15837_v22, %v7449_v43  ;;  %v15909_v22 = vmul.f32 0.17677669, %v7404_v61 }
0x1447   :  { %v7661_v30 = vunpack.c.l.b16 %v7223_v21  ;;  %v7220_v21 = vpack.c.bf16 %v7153_v63, %v7153_v63 }
0x1448   :  { %v15897_v59 = vpop.eup %12189  ;;  %v7507_v1 = vmul.f32 1.442695, %v7487_v7  ;;  %v7156_v7 = vadd.f32 %v15902_v42, %v7155_v31  ;;  %v7465_v61 = vsel %vm733_vm1, %v15909_v22, -inf  ;;  %v7151_v31 = vadd.f32 %v15902_v42, %v7150_v28 }
0x1449   :  { %v7540_v34 = vsel %vm733_vm1, %v15897_v59, 0.0  ;;  %v7146_v28 = vadd.f32 %v15902_v42, %v15871_v27  ;;  %v7658_v63 = vunpack.c.l.b16 %v7220_v21 }
0x144a   :  { %12191 = vpow2.f32 %v7507_v1  ;;  %7541 = vadd.xlane.f32.xlu1 %v7540_v34  ;;  %7463 = vmax.xlane.f32.xlu0 %v7462_v53  ;;  %v7162_v34 = vpop.f32.mrf.mxu0  ;;  %v7221_v53 = vpack.c.bf16 %v7156_v7, %v7156_v7 }
0x144d   :  { %v7452_v43 = vpop.xlane.xlu1 %7451 }
0x144e   :  { %v7488_v39 = vsub.f32 %v15843_v50, %v7452_v43  ;;  %v7163_v50 = vadd.f32 %v15902_v42, %v7162_v34 }
0x1450   :  { %v15916_v0 = vpop.eup %12191  ;;  %v7509_v38 = vmul.f32 1.442695, %v7488_v39  ;;  %v11677_v39 = vld [vmem:[%s17332_s5 + $0xf8] sm:$0xff]  ;;  %v7224_v43 = vpack.c.bf16 %v7163_v50, %v7163_v50  ;;  %v7414_v50 = vpop.f32.mrf.mxu2 }
0x1451   :  { %v7543_v1 = vsel %vm733_vm1, %v15916_v0, 0.0  ;;  %8100 = vmatpush.bf16.msra.mxu0 %v11677_v39 }
0x1452   :  { %12193 = vpow2.f32 %v7509_v38  ;;  %7544 = vadd.xlane.f32.xlu1 %v7543_v1  ;;  %7466 = vmax.xlane.f32.xlu0 %v7465_v61  ;;  %v11676_v38 = vld [vmem:[%s17332_s5 + $0xf0] sm:$0xff]  ;;  %v7662_v7 = vunpack.c.l.b16 %v7224_v43  ;;  %v7219_v1 = vpack.c.bf16 %v7151_v31, %v7151_v31  ;;  %v7659_v61 = vunpack.c.l.b16 %v7221_v53  ;;  %v11674_v43 = vld [vmem:[%s17332_s5 + $0xe0] sm:$0xff] }
0x1454   :  { %v7666_v6 = vpack.c.b16 %v7662_v7, %v7661_v30  ;;  %v7657_v31 = vunpack.c.l.b16 %v7219_v1  ;;  %v7665_v53 = vpack.c.b16 %v7660_v5, %v7659_v61  ;;  %v11673_v1 = vld [vmem:[%s17332_s5 + $0xd8] sm:$0xff]  ;;  %v15964_v61 = vmul.f32 0.17677669, %v15911_v48 }
0x1455   :  { %v7455_v40 = vpop.xlane.xlu2 %7454  ;;  %8101 = vmatpush.bf16.msra.mxu0 %v11676_v38  ;;  %v15976_v48 = vmul.f32 0.17677669, %v7414_v50  ;;  %v15990_v50 = vpop.f32.mrf.mxu0 }
0x1456   :  { %v7489_v45 = vsub.f32 %v15850_v41, %v7455_v40  ;;  %v11675_v40 = vld [vmem:[%s17332_s5 + $0xe8] sm:$0xff]  ;;  %v7217_v41 = vpack.c.bf16 %v7146_v28, %v7146_v28  ;;  %7687 = vmatpush.bf16.msra.mxu3 %v7666_v6  ;;  %v7471_v6 = vsel %vm733_vm1, %v15948_v12, -inf }
0x1458   :  { %v15938_v34 = vpop.eup %12193  ;;  %v7511_v39 = vmul.f32 1.442695, %v7489_v45  ;;  %v7655_v28 = vunpack.c.l.b16 %v7217_v41  ;;  %v7656_v45 = vunpack.c.l.b16 %v7218_v4  ;;  %v7416_v21 = vpop.f32.mrf.mxu2  ;;  %v7477_v4 = vsel %vm733_vm1, %v15976_v48, -inf }
0x1459   :  { %v7546_v27 = vsel %vm733_vm1, %v15938_v34, 0.0  ;;  %8102 = vmatpush.bf16.msra.mxu0 %v11675_v40  ;;  %v15966_v5 = vmul.f32 0.17677669, %v7416_v21  ;;  %v7474_v40 = vsel %vm733_vm1, %v15964_v61, -inf }
0x145a   :  { %12195 = vpow2.f32 %v7511_v39  ;;  %7469 = vmax.xlane.f32.xlu1 %v7468_v62  ;;  %7547 = vadd.xlane.f32.xlu2 %v7546_v27  ;;  %v7664_v62 = vpack.c.b16 %v7658_v63, %v7657_v31  ;;  %v11672_v31 = vld [vmem:[%s17332_s5 + $0xd0] sm:$0xff]  ;;  %v11671_v63 = vld [vmem:[%s17332_s5 + $0xc8] sm:$0xff] }
0x145b   :  { %7688 = vmatpush.bf16.msra.mxu3 %v7665_v53  ;;  %v7480_v27 = vsel %vm733_vm1, %v15966_v5, -inf  ;;  %v11670_v53 = vld [vmem:[%s17332_s5 + $0xc0] sm:$0xff]  ;;  %s12419_s5 = smov 128  }
0x145d   :  { %v7458_v30 = vpop.xlane.xlu0 %7457  ;;  %8103 = vmatpush.bf16.msra.mxu0 %v11674_v43 }
0x145e   :  { %v7490_v38 = vsub.f32 %v15854_v52, %v7458_v30  ;;  %v7663_v52 = vpack.c.b16 %v7656_v45, %v7655_v28  ;;  %v15992_v30 = vpop.f32.mrf.mxu0 }
0x145f   :  { %7689 = vmatpush.bf16.msra.mxu3 %v7664_v62 }
0x1460   :  { %v15954_v16 = vpop.eup %12195  ;;  %v7513_v7 = vmul.f32 1.442695, %v7490_v38 }
0x1461   :  { %v7549_v36 = vsel %vm733_vm1, %v15954_v16, 0.0  ;;  %8104 = vmatpush.bf16.msra.mxu0 %v11673_v1 }
0x1462   :  { %12197 = vpow2.f32 %v7513_v7  ;;  %7472 = vmax.xlane.f32.xlu1 %v7471_v6  ;;  %7550 = vadd.xlane.f32.xlu2 %v7549_v36 }
0x1463   :  { %7690 = vmatpush.bf16.msra.mxu3 %v7663_v52 }
0x1465   :  { %8105 = vmatpush.bf16.msra.mxu0 %v11672_v31 }
0x1466   :  { %v15995_v38 = vpop.f32.mrf.mxu0 }
0x1468   :  { %v15968_v39 = vpop.eup %12197 }
0x1469   :  { %v7552_v41 = vsel %vm733_vm1, %v15968_v39, 0.0  ;;  %8106 = vmatpush.bf16.msra.mxu0 %v11671_v63 }
0x146a   :  { %7481 = vmax.xlane.f32.xlu1 %v7480_v27  ;;  %7475 = vmax.xlane.f32.xlu2 %v7474_v40 }
0x146b   :  { %7553 = vadd.xlane.f32.xlu0 %v7552_v41 }
0x146d   :  { %8107 = vmatpush.bf16.msra.mxu0 %v11670_v53 }
0x146e   :  { %v15998_v7 = vpop.f32.mrf.mxu0 }
0x1470   :  { %8108 = vmatmul.bf16.vlgmr.msra.gmra.mxu0 %v14522_v60 }
0x1473   :  { %7478 = vmax.xlane.f32.xlu0 %v7477_v4 }
0x1476   :  { %v7175_v63 = vpop.f32.mrf.mxu0 }
0x1480   :  { %8113 = vmatmul.bf16.gmra.mxu0 %v14564_v25 }
0x1490   :  { %8118 = vmatmul.bf16.gmra.mxu0 %v14588_v35 }
0x14a0   :  { %8123 = vmatmul.bf16.gmra.mxu0 %v14600_v47 }
0x14a5   :  { %v7533_v43 = vpop.xlane.xlu1 %7532 }
0x14a6   :  { %12199 = vrcp.f32 %v7533_v43 }
0x14ac   :  { %v12200_v45 = vpop.eup %12199 }
0x14ad   :  { %v7536_v28 = vpop.xlane.xlu2 %7535  ;;  %v7595_v62 = vmul.f32 %v12200_v45, %v15875_v29 }
0x14ae   :  { %12201 = vrcp.f32 %v7536_v28 }
0x14af   :  { %v7611_v36 = vpack.c.bf16 %v7595_v62, %v7595_v62 }
0x14b0   :  { %8128 = vmatmul.bf16.gmra.mxu0 %v14634_v14 }
0x14b1   :  { %v7635_v4 = vunpack.c.l.b16 %v7611_v36 }
0x14b4   :  { %v12202_v6 = vpop.eup %12201 }
0x14b5   :  { %v7596_v1 = vmul.f32 %v12202_v6, %v15879_v18  ;;  %v7461_v21 = vpop.xlane.xlu2 %7460  ;;  %v7539_v52 = vpop.xlane.xlu0 %7538  ;;  %v11669_v18 = vld [vmem:[%s17338_s1 + $0xf8] sm:$0xff] }
0x14b6   :  { %v7491_v27 = vsub.f32 %v15883_v32, %v7461_v21  ;;  %12203 = vrcp.f32 %v7539_v52  ;;  %7981 = vmatpush.bf16.msrb.mxu3 %v11669_v18  ;;  %v7177_v21 = vpop.f32.mrf.mxu0 }
0x14b7   :  { %v7612_v40 = vpack.c.bf16 %v7596_v1, %v7596_v1  ;;  %v11668_v1 = vld [vmem:[%s17338_s1 + $0xf0] sm:$0xff] }
0x14b8   :  { %v7515_v41 = vmul.f32 1.442695, %v7491_v27 }
0x14b9   :  { %v7636_v31 = vunpack.c.l.b16 %v7612_v40 }
0x14ba   :  { %12205 = vpow2.f32 %v7515_v41  ;;  %7982 = vmatpush.bf16.msrb.mxu3 %v11668_v1 }
0x14bb   :  { %v7643_v29 = vpack.c.b16 %v7636_v31, %v7635_v4 }
0x14bc   :  { %v12204_v28 = vpop.eup %12203 }
0x14bd   :  { %v7542_v53 = vpop.xlane.xlu1 %7541  ;;  %v7464_v43 = vpop.xlane.xlu0 %7463  ;;  %11141 = vmatmul.msk.bf16.vlgmr.msra.gmra.mxu3 %vm733_vm1, %v7643_v29  ;;  %v7597_v6 = vmul.f32 %v12204_v28, %v15886_v3  ;;  %v11667_v3 = vld [vmem:[%s17338_s1 + $0xe8] sm:$0xff] }
0x14be   :  { %12207 = vrcp.f32 %v7542_v53  ;;  %v7492_v32 = vsub.f32 %v15894_v24, %v7464_v43  ;;  %7983 = vmatpush.bf16.msrb.mxu3 %v11667_v3  ;;  %v7176_v3 = vadd.f32 %v15902_v42, %v7175_v63 }
0x14bf   :  { %v7613_v24 = vpack.c.bf16 %v7597_v6, %v7597_v6 }
0x14c0   :  { %v16008_v45 = vpop.eup %12205  ;;  %v7517_v62 = vmul.f32 1.442695, %v7492_v32  ;;  %v7180_v32 = vpop.f32.mrf.mxu0  ;;  %8133 = vmatmul.bf16.gmra.mxu0 %v14689_v23 }
0x14c1   :  { %v7555_v36 = vsel %vm733_vm1, %v16008_v45, 0.0  ;;  %v7637_v43 = vunpack.c.l.b16 %v7613_v24  ;;  %v7181_v1 = vadd.f32 %v15902_v42, %v7180_v32  ;;  %v7229_v32 = vpack.c.bf16 %v7176_v3, %v7176_v3 }
0x14c2   :  { %12209 = vpow2.f32 %v7517_v62  ;;  %7556 = vadd.xlane.f32.xlu2 %v7555_v36 }
0x14c4   :  { %v12208_v52 = vpop.eup %12207 }
0x14c5   :  { %v7598_v27 = vmul.f32 %v12208_v52, %v15897_v59  ;;  %v7545_v40 = vpop.xlane.xlu1 %7544  ;;  %v7467_v41 = vpop.xlane.xlu0 %7466  ;;  %v11666_v59 = vld [vmem:[%s17338_s1 + $0xe0] sm:$0xff]  ;;  %v11665_v52 = vld [vmem:[%s17338_s1 + $0xd8] sm:$0xff] }
0x14c6   :  { %v7493_v4 = vsub.f32 %v15909_v22, %v7467_v41  ;;  %12211 = vrcp.f32 %v7545_v40  ;;  %7984 = vmatpush.bf16.msrb.mxu3 %v11666_v59 }
0x14c7   :  { %v7614_v31 = vpack.c.bf16 %v7598_v27, %v7598_v27 }
0x14c8   :  { %v16022_v29 = vpop.eup %12209  ;;  %v7519_v53 = vmul.f32 1.442695, %v7493_v4  ;;  %v7178_v4 = vadd.f32 %v15902_v42, %v7177_v21  ;;  %v11663_v21 = vld [vmem:[%s17338_s1 + $0xc8] sm:$0xff] }
0x14c9   :  { %v7638_v18 = vunpack.c.l.b16 %v7614_v31  ;;  %v7558_v28 = vsel %vm733_vm1, %v16022_v29, 0.0 }
0x14ca   :  { %12213 = vpow2.f32 %v7519_v53  ;;  %7559 = vadd.xlane.f32.xlu0 %v7558_v28  ;;  %7985 = vmatpush.bf16.msrb.mxu3 %v11665_v52  ;;  %v7231_v53 = vpack.c.bf16 %v7181_v1, %v7181_v1  ;;  %v7168_v52 = vadd.f32 %v15902_v42, %v15992_v30 }
0x14cb   :  { %v7644_v62 = vpack.c.b16 %v7638_v18, %v7637_v43  ;;  %v11664_v43 = vld [vmem:[%s17338_s1 + $0xd0] sm:$0xff]  ;;  %v7171_v18 = vadd.f32 %v15902_v42, %v15995_v38 }
0x14cc   :  { %v12212_v22 = vpop.eup %12211 }
0x14cd   :  { %v7470_v6 = vpop.xlane.xlu1 %7469  ;;  %v7548_v36 = vpop.xlane.xlu2 %7547  ;;  %11142 = vmatmul.msk.bf16.gmra.mxu3 %vm733_vm1, %v7644_v62  ;;  %v7599_v40 = vmul.f32 %v12212_v22, %v15916_v0  ;;  %v7173_v0 = vadd.f32 %v15902_v42, %v15998_v7  ;;  %v7230_v62 = vpack.c.bf16 %v7178_v4, %v7178_v4  ;;  %v7166_v7 = vadd.f32 %v15902_v42, %v15990_v50 }
0x14ce   :  { %v7494_v24 = vsub.f32 %v15928_v10, %v7470_v6  ;;  %12215 = vrcp.f32 %v7548_v36  ;;  %v7182_v10 = vpop.f32.mrf.mxu0  ;;  %7986 = vmatpush.bf16.msrb.mxu3 %v11664_v43  ;;  %v7746_v36 = vunpack.c.l.b16 %v7231_v53 }
0x14cf   :  { %v7183_v63 = vadd.f32 %v15902_v42, %v7182_v10  ;;  %v7615_v59 = vpack.c.bf16 %v7599_v40, %v7599_v40  ;;  %v7228_v3 = vpack.c.bf16 %v7173_v0, %v7173_v0  ;;  %v7744_v10 = vunpack.c.l.b16 %v7229_v32 }
0x14d0   :  { %v16035_v27 = vpop.eup %12213  ;;  %v7521_v41 = vmul.f32 1.442695, %v7494_v24  ;;  %v7745_v50 = vunpack.c.l.b16 %v7230_v62  ;;  %v7225_v30 = vpack.c.bf16 %v7166_v7, %v7166_v7  ;;  %8138 = vmatmul.bf16.gmra.mxu0 %v14724_v20 }
0x14d1   :  { %v7561_v31 = vsel %vm733_vm1, %v16035_v27, 0.0  ;;  %v7232_v1 = vpack.c.bf16 %v7183_v63, %v7183_v63  ;;  %v7639_v53 = vunpack.c.l.b16 %v7615_v59 }
0x14d2   :  { %12217 = vpow2.f32 %v7521_v41  ;;  %7562 = vadd.xlane.f32.xlu1 %v7561_v31  ;;  %v7227_v41 = vpack.c.bf16 %v7171_v18, %v7171_v18  ;;  %7987 = vmatpush.bf16.msrb.mxu3 %v11663_v21  ;;  %v7226_v18 = vpack.c.bf16 %v7168_v52, %v7168_v52  ;;  %v7743_v21 = vunpack.c.l.b16 %v7228_v3 }
0x14d3   :  { %v7747_v4 = vunpack.c.l.b16 %v7232_v1  ;;  %v7750_v32 = vpack.c.b16 %v7745_v50, %v7744_v10  ;;  %v7740_v1 = vunpack.c.l.b16 %v7225_v30 }
0x14d4   :  { %v12216_v28 = vpop.eup %12215  ;;  %v7742_v0 = vunpack.c.l.b16 %v7227_v41  ;;  %v7741_v7 = vunpack.c.l.b16 %v7226_v18 }
0x14d5   :  { %v7600_v22 = vmul.f32 %v12216_v28, %v15938_v34  ;;  %v7473_v6 = vpop.xlane.xlu1 %7472  ;;  %v7551_v38 = vpop.xlane.xlu2 %7550  ;;  %v11662_v34 = vld [vmem:[%s17338_s1 + $0xc0] sm:$0xff]  ;;  %s9986_s1 = sshll.u32 %s17419_s3, 4  ;;  %s9987_s1 = int_to_ptr.hbm [resolvable:$true] %s9986_s1 }
0x14d6   :  { %v7495_v24 = vsub.f32 %v15948_v12, %v7473_v6  ;;  %12219 = vrcp.f32 %v7551_v38  ;;  %v7751_v12 = vpack.c.b16 %v7747_v4, %v7746_v36  ;;  %7988 = vmatpush.bf16.msrb.mxu3 %v11662_v34  ;;  %v7749_v52 = vpack.c.b16 %v7743_v21, %v7742_v0 }
0x14d7   :  { %v7616_v40 = vpack.c.bf16 %v7600_v22, %v7600_v22 }
0x14d8   :  { %v16063_v31 = vpop.eup %12217  ;;  %v7523_v43 = vmul.f32 1.442695, %v7495_v24  ;;  %7772 = vmatpush.bf16.msrb.mxu1 %v7751_v12 }
0x14d9   :  { %v7640_v63 = vunpack.c.l.b16 %v7616_v40  ;;  %v7564_v42 = vsel %vm733_vm1, %v16063_v31, 0.0 }
0x14da   :  { %12221 = vpow2.f32 %v7523_v43  ;;  %7565 = vadd.xlane.f32.xlu2 %v7564_v42 }
0x14db   :  { %v7645_v28 = vpack.c.b16 %v7640_v63, %v7639_v53 }
0x14dc   :  { %v12220_v36 = vpop.eup %12219  ;;  %7773 = vmatpush.bf16.msrb.mxu1 %v7750_v32  ;;  %v11661_v32 = vld [vmem:[%s17247_s16 + $0x28] sm:$0xff] }
0x14dd   :  { %v7482_v22 = vpop.xlane.xlu1 %7481  ;;  %v7476_v59 = vpop.xlane.xlu2 %7475  ;;  %11143 = vmatmul.msk.bf16.gmra.mxu3 %vm733_vm1, %v7645_v28  ;;  %v7601_v4 = vmul.f32 %v12220_v36, %v15954_v16  ;;  %7852 = vmatpush.bf16.msrb.mxu2 %v11661_v32 }
0x14de   :  { %v7498_v62 = vsub.f32 %v15966_v5, %v7482_v22  ;;  %v7496_v6 = vsub.f32 %v15964_v61, %v7476_v59  ;;  %v7554_v38 = vpop.xlane.xlu0 %7553  ;;  %v7748_v61 = vpack.c.b16 %v7741_v7, %v7740_v1 }
0x14df   :  { %12223 = vrcp.f32 %v7554_v38  ;;  %v7617_v34 = vpack.c.bf16 %v7601_v4, %v7601_v4 }
0x14e0   :  { %v16070_v24 = vpop.eup %12221  ;;  %v7529_v41 = vmul.f32 1.442695, %v7498_v62  ;;  %v7525_v40 = vmul.f32 1.442695, %v7496_v6  ;;  %7774 = vmatpush.bf16.msrb.mxu1 %v7749_v52  ;;  %8143 = vmatmul.bf16.gmra.mxu0 %v14761_v15 }
0x14e1   :  { %v7567_v3 = vsel %vm733_vm1, %v16070_v24, 0.0  ;;  %v7641_v30 = vunpack.c.l.b16 %v7617_v34 }
0x14e2   :  { %12225 = vpow2.f32 %v7529_v41  ;;  %7568 = vadd.xlane.f32.xlu0 %v7567_v3 }
0x14e3   :  { %12227 = vpow2.f32 %v7525_v40 }
0x14e4   :  { %7775 = vmatpush.bf16.msrb.mxu1 %v7748_v61 }
0x14e5   :  { %v12224_v5 = vpop.eup %12223 }
0x14e6   :  { %v7602_v53 = vmul.f32 %v12224_v5, %v15968_v39  ;;  %v7479_v43 = vpop.xlane.xlu0 %7478 }
0x14e7   :  { %v7497_v10 = vsub.f32 %v15976_v48, %v7479_v43 }
0x14e8   :  { %v16078_v50 = vpop.eup %12225  ;;  %v7618_v63 = vpack.c.bf16 %v7602_v53, %v7602_v53 }
0x14e9   :  { %v16080_v42 = vpop.eup %12227  ;;  %v7527_v16 = vmul.f32 1.442695, %v7497_v10  ;;  %v7576_v12 = vsel %vm733_vm1, %v16078_v50, 0.0 }
0x14ea   :  { %v7642_v18 = vunpack.c.l.b16 %v7618_v63  ;;  %7577 = vadd.xlane.f32.xlu0 %v7576_v12  ;;  %v7570_v0 = vsel %vm733_vm1, %v16080_v42, 0.0 }
0x14eb   :  { %12229 = vpow2.f32 %v7527_v16  ;;  %7571 = vadd.xlane.f32.xlu1 %v7570_v0 }
0x14ec   :  { %v7646_v39 = vpack.c.b16 %v7642_v18, %v7641_v30 }
0x14ed   :  { %v16095_v28 = vpop.f32.mrf.mxu0 }
0x14ee   :  { %11144 = vmatmul.msk.bf16.gmra.mxu3 %vm733_vm1, %v7646_v39 }
0x14f1   :  { %v16087_v48 = vpop.eup %12229 }
0x14f2   :  { %v7573_v21 = vsel %vm733_vm1, %v16087_v48, 0.0 }
0x14f3   :  { %7574 = vadd.xlane.f32.xlu2 %v7573_v21 }
0x14f5   :  { %v16097_v22 = vpop.f32.mrf.mxu0 }
0x14fd   :  { %v8114_v59 = vpop.f32.mrf.mxu0 }
0x14fe   :  { %7989 = vmatmul.bf16.vlgmr.msrb.gmra.mxu3 %v14669_v19  ;;  %v11660_v19 = vld [vmem:[%s17247_s16 + $0x20] sm:$0xff] }
0x14ff   :  { %7853 = vmatpush.bf16.msrb.mxu2 %v11660_v19 }
0x1505   :  { %v8116_v62 = vpop.f32.mrf.mxu0 }
0x150e   :  { %7994 = vmatmul.bf16.gmra.mxu3 %v14717_v58  ;;  %v8119_v58 = vpop.f32.mrf.mxu0 }
0x1516   :  { %v8121_v38 = vpop.f32.mrf.mxu0 }
0x151e   :  { %7999 = vmatmul.bf16.gmra.mxu3 %v14755_v57  ;;  %v8124_v52 = vpop.f32.mrf.mxu0 }
0x1526   :  { %v8126_v43 = vpop.f32.mrf.mxu0 }
0x152e   :  { %8004 = vmatmul.bf16.gmra.mxu3 %v14805_v2  ;;  %v16113_v2 = vld [vmem:[%s17244_s13 + $0x3] ss:$0 sm:$0xff]  ;;  %v16120_v18 = vpop.f32.mrf.mxu0 }
0x152f   :  { %v8120_v0 = vadd.f32 %v16113_v2, %v8119_v58  ;;  %v8122_v39 = vadd.f32 %v16113_v2, %v8121_v38  ;;  %v8127_v21 = vadd.f32 %v16113_v2, %v8126_v43 }
0x1535   :  { %v7557_v6 = vpop.xlane.xlu2 %7556 }
0x1536   :  { %12231 = vrcp.f32 %v7557_v6  ;;  %v8291_v6 = vpack.c.bf16 %v8127_v21, %v8127_v21  ;;  %v8112_v21 = vadd.f32 %v16113_v2, %v16097_v22 }
0x153c   :  { %v12232_v57 = vpop.eup %12231 }
0x153d   :  { %v7560_v36 = vpop.xlane.xlu0 %7559  ;;  %v7603_v7 = vmul.f32 %v12232_v57, %v16008_v45  ;;  %v8125_v45 = vadd.f32 %v16113_v2, %v8124_v52  ;;  %v8351_v52 = vunpack.c.l.b16 %v8291_v6 }
0x153e   :  { %12233 = vrcp.f32 %v7560_v36  ;;  %8009 = vmatmul.bf16.gmra.mxu3 %v14835_v13 }
0x153f   :  { %v7619_v40 = vpack.c.bf16 %v7603_v7, %v7603_v7  ;;  %v8290_v12 = vpack.c.bf16 %v8125_v45, %v8125_v45  ;;  %v8289_v7 = vpack.c.bf16 %v8122_v39, %v8122_v39  ;;  %v8110_v39 = vadd.f32 %v16113_v2, %v16095_v28 }
0x1540   :  { %v7692_v1 = vpop.f32.mrf.mxu3 }
0x1541   :  { %v7720_v34 = vunpack.c.l.b16 %v7619_v40  ;;  %v8350_v19 = vunpack.c.l.b16 %v8290_v12 }
0x1544   :  { %v12234_v41 = vpop.eup %12233 }
0x1545   :  { %v7604_v3 = vmul.f32 %v12234_v41, %v16022_v29  ;;  %v7563_v4 = vpop.xlane.xlu1 %7562 }
0x1546   :  { %12235 = vrcp.f32 %v7563_v4 }
0x1547   :  { %v7620_v61 = vpack.c.bf16 %v7604_v3, %v7604_v3  ;;  %v8355_v3 = vpack.c.b16 %v8351_v52, %v8350_v19 }
0x1548   :  { %v7694_v5 = vpop.f32.mrf.mxu3 }
0x1549   :  { %v7721_v53 = vunpack.c.l.b16 %v7620_v61  ;;  %v7797_v13 = vpack.c.bf16 %v7694_v5, %v7692_v1  ;;  %v8288_v1 = vpack.c.bf16 %v8120_v0, %v8120_v0  ;;  %v16127_v61 = vpop.f32.mrf.mxu0  ;;  %v8117_v5 = vadd.f32 %v16113_v2, %v8116_v62 }
0x154b   :  { %v7728_v10 = vpack.c.b16 %v7721_v53, %v7720_v34  ;;  %11161 = vmatmul.msk.bf16.vlgmr.msrb.gmra.mxu2 %vm570_vm0, %v7797_v13  ;;  %v8348_v34 = vunpack.c.l.b16 %v8288_v1  ;;  %v8349_v53 = vunpack.c.l.b16 %v8289_v7  ;;  %v8287_v43 = vpack.c.bf16 %v8117_v5, %v8117_v5 }
0x154c   :  { %v12236_v29 = vpop.eup %12235  ;;  %v8284_v1 = vpack.c.bf16 %v8110_v39, %v8110_v39 }
0x154d   :  { %v7566_v63 = vpop.xlane.xlu2 %7565  ;;  %11145 = vmatmul.msk.bf16.vlgmr.msrb.gmra.mxu1 %vm733_vm1, %v7728_v10  ;;  %v7605_v30 = vmul.f32 %v12236_v29, %v16035_v27  ;;  %v8115_v27 = vadd.f32 %v16113_v2, %v8114_v59  ;;  %v8354_v45 = vpack.c.b16 %v8349_v53, %v8348_v34 }
0x154e   :  { %12237 = vrcp.f32 %v7566_v63  ;;  %8014 = vmatmul.bf16.gmra.mxu3 %v14855_v49 }
0x154f   :  { %v7621_v36 = vpack.c.bf16 %v7605_v30, %v7605_v30  ;;  %v8286_v59 = vpack.c.bf16 %v8115_v27, %v8115_v27  ;;  %v8375_v62 = vsel %vm570_vm0, %v8354_v45, 0  ;;  %v8347_v30 = vunpack.c.l.b16 %v8287_v43 }
0x1550   :  { %v7697_v16 = vpop.f32.mrf.mxu3 }
0x1551   :  { %v7722_v58 = vunpack.c.l.b16 %v7621_v36  ;;  %v8346_v12 = vunpack.c.l.b16 %v8286_v59 }
0x1554   :  { %v12238_v32 = vpop.eup %12237 }
0x1555   :  { %v7606_v57 = vmul.f32 %v12238_v32, %v16063_v31  ;;  %v7569_v49 = vpop.xlane.xlu0 %7568  ;;  %v8378_v31 = vsel %vm570_vm0, %v8355_v3, 0 }
0x1556   :  { %12239 = vrcp.f32 %v7569_v49  ;;  %8384 = vmatpush.bf16.xpose.msra.mxu2 %v8378_v31  ;;  %v8285_v49 = vpack.c.bf16 %v8112_v21, %v8112_v21 }
0x1557   :  { %v7622_v41 = vpack.c.bf16 %v7606_v57, %v7606_v57  ;;  %v8353_v57 = vpack.c.b16 %v8347_v30, %v8346_v12 }
0x1558   :  { %v7699_v40 = vpop.f32.mrf.mxu3  ;;  %v8345_v3 = vunpack.c.l.b16 %v8285_v49 }
0x1559   :  { %v7723_v4 = vunpack.c.l.b16 %v7622_v41  ;;  %v7798_v38 = vpack.c.bf16 %v7699_v40, %v7697_v16  ;;  %v16135_v16 = vpop.f32.mrf.mxu0  ;;  %v8372_v28 = vsel %vm570_vm0, %v8353_v57, 0  ;;  %v8344_v40 = vunpack.c.l.b16 %v8284_v1 }
0x155b   :  { %11162 = vmatmul.msk.bf16.gmra.mxu2 %vm570_vm0, %v7798_v38  ;;  %v7729_v13 = vpack.c.b16 %v7723_v4, %v7722_v58  ;;  %v8352_v5 = vpack.c.b16 %v8345_v3, %v8344_v40 }
0x155c   :  { %v12240_v63 = vpop.eup %12239 }
0x155d   :  { %11146 = vmatmul.msk.bf16.gmra.mxu1 %vm733_vm1, %v7729_v13  ;;  %v7607_v0 = vmul.f32 %v12240_v63, %v16070_v24  ;;  %v7578_v6 = vpop.xlane.xlu0 %7577  ;;  %v8369_v13 = vsel %vm570_vm0, %v8352_v5, 0  ;;  %v8132_v5 = vadd.f32 %v16113_v2, %v16127_v61 }
0x155e   :  { %v7572_v10 = vpop.xlane.xlu1 %7571  ;;  %8019 = vmatmul.bf16.gmra.mxu3 %v14874_v44  ;;  %8385 = vmatpush.bf16.xpose.msra.mxu2 %v8375_v62 }
0x155f   :  { %12241 = vrcp.f32 %v7572_v10  ;;  %v7623_v32 = vpack.c.bf16 %v7607_v0, %v7607_v0 }
0x1560   :  { %v7702_v29 = vpop.f32.mrf.mxu3 }
0x1561   :  { %v8136_v41 = vpop.f32.mrf.mxu0  ;;  %v7724_v27 = vunpack.c.l.b16 %v7623_v32 }
0x1565   :  { %v12242_v44 = vpop.eup %12241 }
0x1566   :  { %v7608_v19 = vmul.f32 %v12242_v44, %v16080_v42  ;;  %v7575_v36 = vpop.xlane.xlu2 %7574  ;;  %8386 = vmatpush.bf16.xpose.msra.mxu2 %v8372_v28  ;;  %v8137_v28 = vadd.f32 %v16113_v2, %v8136_v41  ;;  %v8293_v41 = vpack.c.bf16 %v8132_v5, %v8132_v5 }
0x1567   :  { %12243 = vrcp.f32 %v7575_v36 }
0x1568   :  { %v7624_v7 = vpack.c.bf16 %v7608_v19, %v7608_v19  ;;  %v7704_v52 = vpop.f32.mrf.mxu3  ;;  %12245 = vrcp.f32 %v7578_v6  ;;  %v8295_v3 = vpack.c.bf16 %v8137_v28, %v8137_v28 }
0x1569   :  { %v7799_v24 = vpack.c.bf16 %v7704_v52, %v7702_v29  ;;  %v8139_v53 = vpop.f32.mrf.mxu0 }
0x156a   :  { %v7725_v22 = vunpack.c.l.b16 %v7624_v7  ;;  %v8140_v44 = vadd.f32 %v16113_v2, %v8139_v53 }
0x156b   :  { %11163 = vmatmul.msk.bf16.gmra.mxu2 %vm570_vm0, %v7799_v24  ;;  %v8135_v24 = vadd.f32 %v16113_v2, %v16135_v16  ;;  %v8440_v16 = vunpack.c.l.b16 %v8295_v3  ;;  %v6794_v3 = vadd.f32 %v15713_v8, %v15796_v11 }
0x156c   :  { %v7730_v42 = vpack.c.b16 %v7725_v22, %v7724_v27  ;;  %v8296_v57 = vpack.c.bf16 %v8140_v44, %v8140_v44  ;;  %v6789_v44 = vadd.f32 %v15696_v9, %v15770_v33 }
0x156d   :  { %v12244_v58 = vpop.eup %12243  ;;  %v8294_v40 = vpack.c.bf16 %v8135_v24, %v8135_v24 }
0x156e   :  { %11147 = vmatmul.msk.bf16.gmra.mxu1 %vm733_vm1, %v7730_v42  ;;  %8024 = vmatmul.bf16.gmra.mxu3 %v14931_v46  ;;  %v12246_v4 = vpop.eup %12245  ;;  %v7609_v38 = vmul.f32 %v12244_v58, %v16087_v48  ;;  %v8441_v27 = vunpack.c.l.b16 %v8296_v57 }
0x156f   :  { %v7610_v31 = vmul.f32 %v12246_v4, %v16078_v50  ;;  %8387 = vmatpush.bf16.xpose.msra.mxu2 %v8369_v13 }
0x1570   :  { %v7625_v59 = vpack.c.bf16 %v7609_v38, %v7609_v38  ;;  %v8130_v38 = vadd.f32 %v16113_v2, %v16120_v18 }
0x1571   :  { %v7707_v34 = vpop.f32.mrf.mxu3  ;;  %v7626_v43 = vpack.c.bf16 %v7610_v31, %v7610_v31  ;;  %v8141_v63 = vpop.f32.mrf.mxu0 }
0x1572   :  { %v7726_v10 = vunpack.c.l.b16 %v7625_v59  ;;  %v8142_v32 = vadd.f32 %v16113_v2, %v8141_v63  ;;  %v8292_v53 = vpack.c.bf16 %v8130_v38, %v8130_v38 }
0x1573   :  { %v7727_v29 = vunpack.c.l.b16 %v7626_v43 }
0x1574   :  { %v8297_v1 = vpack.c.bf16 %v8142_v32, %v8142_v32  ;;  %v8437_v43 = vunpack.c.l.b16 %v8292_v53 }
0x1575   :  { %v7731_v46 = vpack.c.b16 %v7727_v29, %v7726_v10  ;;  %v8438_v10 = vunpack.c.l.b16 %v8293_v41 }
0x1576   :  { %v8442_v22 = vunpack.c.l.b16 %v8297_v1 }
0x1578   :  { %v8447_v42 = vpack.c.b16 %v8442_v22, %v8441_v27 }
0x1579   :  { %v7709_v45 = vpop.f32.mrf.mxu3  ;;  %v8144_v12 = vpop.f32.mrf.mxu0 }
0x157a   :  { %v7800_v62 = vpack.c.bf16 %v7709_v45, %v7707_v34  ;;  %v8145_v50 = vadd.f32 %v16113_v2, %v8144_v12  ;;  %v8468_v4 = vsel %vm570_vm0, %v8447_v42, 0  ;;  %v8439_v34 = vunpack.c.l.b16 %v8294_v40 }
0x157b   :  { %v8445_v45 = vpack.c.b16 %v8438_v10, %v8437_v43 }
0x157c   :  { %11164 = vmatmul.msk.bf16.gmra.mxu2 %vm570_vm0, %v7800_v62  ;;  %v8298_v30 = vpack.c.bf16 %v8145_v50, %v8145_v50  ;;  %v8446_v31 = vpack.c.b16 %v8440_v16, %v8439_v34  ;;  %v16186_v62 = vld [vmem:[%s17351_s28 + $0x3] ss:$0 sm:$0xff] }
0x157d   :  { %v8462_v18 = vsel %vm570_vm0, %v8445_v45, 0 }
0x157e   :  { %11148 = vmatmul.msk.bf16.gmra.mxu1 %vm733_vm1, %v7731_v46  ;;  %v8443_v19 = vunpack.c.l.b16 %v8298_v30  ;;  %v8465_v59 = vsel %vm570_vm0, %v8446_v31, 0 }
0x1581   :  { %v16152_v48 = vpop.f32.mrf.mxu3  ;;  %v8146_v39 = vpop.f32.mrf.mxu0 }
0x1582   :  { %v8147_v21 = vadd.f32 %v16113_v2, %v8146_v39 }
0x1584   :  { %v8299_v6 = vpack.c.bf16 %v8147_v21, %v8147_v21 }
0x1586   :  { %v8444_v36 = vunpack.c.l.b16 %v8299_v6 }
0x1588   :  { %v8448_v49 = vpack.c.b16 %v8444_v36, %v8443_v19 }
0x1589   :  { %v16155_v0 = vpop.f32.mrf.mxu3 }
0x158a   :  { %v8471_v52 = vsel %vm570_vm0, %v8448_v49, 0 }
0x158b   :  { %8477 = vmatpush.bf16.xpose.msra.mxu3 %v8471_v52 }
0x1591   :  { %v16160_v7 = vpop.f32.mrf.mxu3 }
0x1593   :  { %8478 = vmatpush.bf16.xpose.msra.mxu3 %v8468_v4 }
0x1599   :  { %v16166_v58 = vpop.f32.mrf.mxu3 }
0x159b   :  { %8479 = vmatpush.bf16.xpose.msra.mxu3 %v8465_v59 }
0x15a1   :  { %v16173_v13 = vpop.f32.mrf.mxu3 }
0x15a3   :  { %8480 = vmatpush.bf16.xpose.msra.mxu3 %v8462_v18  ;;  %v6799_v18 = vadd.f32 %v15731_v51, %v15815_v17 }
0x15a9   :  { %v16176_v63 = vpop.f32.mrf.mxu3 }
0x15b1   :  { %v16179_v29 = vpop.f32.mrf.mxu3 }
0x15b9   :  { %v16181_v2 = vpop.f32.mrf.mxu3 }
0x15c1   :  { %v8010_v61 = vpop.f32.mrf.mxu3 }
0x15c2   :  { %v8011_v46 = vadd.f32 %v16186_v62, %v8010_v61 }
0x15c4   :  { %v8276_v50 = vpack.c.bf16 %v8011_v46, %v8011_v46 }
0x15c6   :  { %v8417_v32 = vunpack.c.l.b16 %v8276_v50 }
0x15c9   :  { %v8012_v12 = vpop.f32.mrf.mxu3 }
0x15ca   :  { %v8013_v30 = vadd.f32 %v16186_v62, %v8012_v12  ;;  %v7777_v39 = vpop.f32.mrf.mxu1 }
0x15cc   :  { %v8277_v21 = vpack.c.bf16 %v8013_v30, %v8013_v30 }
0x15ce   :  { %v8418_v19 = vunpack.c.l.b16 %v8277_v21  ;;  %v7855_v6 = vpop.f32.mrf.mxu2 }
0x15cf   :  { %v16192_v36 = vadd.f32 %v7855_v6, %v6789_v44 }
0x15d0   :  { %v8425_v57 = vpack.c.b16 %v8418_v19, %v8417_v32 }
0x15d1   :  { %v8015_v1 = vpop.f32.mrf.mxu3 }
0x15d2   :  { %11320 = vmatmul.msk.bf16.vlgmr.msra.gmra.mxu3 %vm570_vm0, %v8425_v57  ;;  %v7779_v49 = vpop.f32.mrf.mxu1  ;;  %v8016_v24 = vadd.f32 %v16186_v62, %v8015_v1 }
0x15d3   :  { %v7801_v52 = vpack.c.bf16 %v7779_v49, %v7777_v39  ;;  %v6804_v49 = vadd.f32 %v15745_v56, %v15823_v55 }
0x15d4   :  { %v8278_v22 = vpack.c.bf16 %v8016_v24, %v8016_v24 }
0x15d5   :  { %11165 = vmatmul.msk.bf16.gmra.mxu2 %vm570_vm0, %v7801_v52 }
0x15d6   :  { %v16197_v28 = vpop.f32.mrf.mxu2  ;;  %v8419_v42 = vunpack.c.l.b16 %v8278_v22 }
0x15d9   :  { %v8017_v27 = vpop.f32.mrf.mxu3 }
0x15da   :  { %v8018_v9 = vadd.f32 %v16186_v62, %v8017_v27  ;;  %v7782_v33 = vpop.f32.mrf.mxu1 }
0x15dc   :  { %v8279_v40 = vpack.c.bf16 %v8018_v9, %v8018_v9 }
0x15de   :  { %v8420_v4 = vunpack.c.l.b16 %v8279_v40  ;;  %v7860_v38 = vpop.f32.mrf.mxu2 }
0x15df   :  { %v16202_v5 = vadd.f32 %v7860_v38, %v6794_v3  ;;  %v7993_v3 = vadd.f32 %v16186_v62, %v16155_v0  ;;  %v11684_v0 = vld [vmem:[%s17245_s14 + $0xf0] sm:$0xff] }
0x15e0   :  { %v8426_v34 = vpack.c.b16 %v8420_v4, %v8419_v42  ;;  %v7991_v42 = vadd.f32 %v16186_v62, %v16152_v48  ;;  %v7996_v48 = vadd.f32 %v16186_v62, %v16160_v7  ;;  %v11681_v7 = vld [vmem:[%s17245_s14 + $0xd8] sm:$0xff] }
0x15e1   :  { %v8020_v16 = vpop.f32.mrf.mxu3  ;;  %v8269_v4 = vpack.c.bf16 %v7993_v3, %v7993_v3 }
0x15e2   :  { %11321 = vmatmul.msk.bf16.gmra.mxu3 %vm570_vm0, %v8426_v34  ;;  %v7784_v53 = vpop.f32.mrf.mxu1  ;;  %v8021_v31 = vadd.f32 %v16186_v62, %v8020_v16  ;;  %v8268_v56 = vpack.c.bf16 %v7991_v42, %v7991_v42  ;;  %v11685_v16 = vld [vmem:[%s17245_s14 + $0xf8] sm:$0xff]  ;;  %v17385_v42 = vld [vmem:[#allocation33_spill] sm:$0xff] }
0x15e3   :  { %v7802_v41 = vpack.c.bf16 %v7784_v53, %v7782_v33  ;;  %v8325_v55 = vunpack.c.l.b16 %v8269_v4  ;;  %v7998_v53 = vadd.f32 %v16186_v62, %v16166_v58  ;;  %8219 = vmatpush.bf16.msra.mxu1 %v11685_v16  ;;  %v11682_v58 = vld [vmem:[%s17245_s14 + $0xe0] sm:$0xff] }
0x15e4   :  { %v8280_v10 = vpack.c.bf16 %v8021_v31, %v8021_v31  ;;  %v8324_v38 = vunpack.c.l.b16 %v8268_v56  ;;  %v11683_v31 = vld [vmem:[%s17245_s14 + $0xe8] sm:$0xff] }
0x15e5   :  { %11166 = vmatmul.msk.bf16.gmra.mxu2 %vm570_vm0, %v7802_v41  ;;  %v8271_v41 = vpack.c.bf16 %v7998_v53, %v7998_v53 }
0x15e6   :  { %v16207_v59 = vpop.f32.mrf.mxu2  ;;  %v8421_v61 = vunpack.c.l.b16 %v8280_v10  ;;  %v8332_v34 = vpack.c.b16 %v8325_v55, %v8324_v38 }
0x15e7   :  { %8220 = vmatpush.bf16.msra.mxu1 %v11684_v0  ;;  %v8327_v10 = vunpack.c.l.b16 %v8271_v41 }
0x15e9   :  { %v8022_v43 = vpop.f32.mrf.mxu3 }
0x15ea   :  { %v8023_v8 = vadd.f32 %v16186_v62, %v8022_v43  ;;  %v8270_v43 = vpack.c.bf16 %v7996_v48, %v7996_v48 }
0x15eb   :  { %v7787_v11 = vpop.f32.mrf.mxu1  ;;  %8221 = vmatpush.bf16.msra.mxu1 %v11683_v31 }
0x15ec   :  { %v8281_v45 = vpack.c.bf16 %v8023_v8, %v8023_v8  ;;  %v8326_v8 = vunpack.c.l.b16 %v8270_v43 }
0x15ee   :  { %v8422_v46 = vunpack.c.l.b16 %v8281_v45  ;;  %v7865_v12 = vpop.f32.mrf.mxu2  ;;  %v8003_v45 = vadd.f32 %v16186_v62, %v16176_v63  ;;  %v11678_v63 = vld [vmem:[%s17245_s14 + $0xc0] sm:$0xff] }
0x15ef   :  { %v16212_v50 = vadd.f32 %v7865_v12, %v6799_v18  ;;  %8222 = vmatpush.bf16.msra.mxu1 %v11682_v58  ;;  %v11680_v18 = vld [vmem:[%s17245_s14 + $0xd0] sm:$0xff]  ;;  %v11679_v12 = vld [vmem:[%s17245_s14 + $0xc8] sm:$0xff] }
0x15f0   :  { %v8427_v30 = vpack.c.b16 %v8422_v46, %v8421_v61  ;;  %v8001_v61 = vadd.f32 %v16186_v62, %v16173_v13  ;;  %v8273_v46 = vpack.c.bf16 %v8003_v45, %v8003_v45  ;;  %v8008_v13 = vadd.f32 %v16186_v62, %v16181_v2 }
0x15f1   :  { %v8025_v39 = vpop.f32.mrf.mxu3 }
0x15f2   :  { %11322 = vmatmul.msk.bf16.gmra.mxu3 %vm570_vm0, %v8427_v30  ;;  %v8026_v32 = vadd.f32 %v16186_v62, %v8025_v39  ;;  %v8272_v30 = vpack.c.bf16 %v8001_v61, %v8001_v61  ;;  %v8329_v39 = vunpack.c.l.b16 %v8273_v46 }
0x15f3   :  { %v7789_v21 = vpop.f32.mrf.mxu1  ;;  %8223 = vmatpush.bf16.msra.mxu1 %v11681_v7 }
0x15f4   :  { %v7803_v44 = vpack.c.bf16 %v7789_v21, %v7787_v11  ;;  %v8282_v57 = vpack.c.bf16 %v8026_v32, %v8026_v32  ;;  %v8333_v11 = vpack.c.b16 %v8327_v10, %v8326_v8  ;;  %v8328_v21 = vunpack.c.l.b16 %v8272_v30 }
0x15f5   :  { %v8006_v32 = vadd.f32 %v16186_v62, %v16179_v29 }
0x15f6   :  { %11167 = vmatmul.msk.bf16.gmra.mxu2 %vm570_vm0, %v7803_v44  ;;  %v16217_v19 = vpop.f32.mrf.mxu2  ;;  %v8423_v52 = vunpack.c.l.b16 %v8282_v57  ;;  %v8334_v44 = vpack.c.b16 %v8329_v39, %v8328_v21 }
0x15f7   :  { %8224 = vmatpush.bf16.msra.mxu1 %v11680_v18  ;;  %v8274_v57 = vpack.c.bf16 %v8006_v32, %v8006_v32 }
0x15f9   :  { %v8027_v6 = vpop.f32.mrf.mxu3 }
0x15fa   :  { %v8028_v51 = vadd.f32 %v16186_v62, %v8027_v6  ;;  %v8275_v6 = vpack.c.bf16 %v8008_v13, %v8008_v13  ;;  %v17381_v62 = vld [vmem:[#allocation27_spill] sm:$0xff] }
0x15fb   :  { %v7792_v17 = vpop.f32.mrf.mxu1  ;;  %8225 = vmatpush.bf16.msra.mxu1 %v11679_v12 }
0x15fc   :  { %v8283_v1 = vpack.c.bf16 %v8028_v51, %v8028_v51  ;;  %v8331_v51 = vunpack.c.l.b16 %v8275_v6 }
0x15fe   :  { %v8424_v24 = vunpack.c.l.b16 %v8283_v1 }
0x15ff   :  { %v7870_v27 = vpop.f32.mrf.mxu2  ;;  %8226 = vmatpush.bf16.msra.mxu1 %v11678_v63 }
0x1600   :  { %v8428_v22 = vpack.c.b16 %v8424_v24, %v8423_v52  ;;  %v16222_v9 = vadd.f32 %v7870_v27, %v6804_v49  ;;  %v6814_v24 = vadd.f32 %v17381_v62, %v15848_v37  ;;  %v17384_v37 = vld [vmem:[#allocation41_spill] sm:$0xff] }
0x1602   :  { %11323 = vmatmul.msk.bf16.gmra.mxu3 %vm570_vm0, %v8428_v22  ;;  %8227 = vmatmul.bf16.vlgmr.msra.gmra.mxu1 %v14522_v60  ;;  %v6809_v60 = vadd.f32 %v15755_v26, %v15834_v54  ;;  %v17382_v26 = vld [vmem:[#allocation39_spill] sm:$0xff]  ;;  %v17383_v54 = vld [vmem:[#allocation30_spill] sm:$0xff] }
0x1603   :  { %v7794_v33 = vpop.f32.mrf.mxu1 }
0x1604   :  { %v7804_v40 = vpack.c.bf16 %v7794_v33, %v7792_v17  ;;  %v8330_v17 = vunpack.c.l.b16 %v8274_v57 }
0x1606   :  { %11168 = vmatmul.msk.bf16.gmra.mxu2 %vm570_vm0, %v7804_v40  ;;  %v8335_v1 = vpack.c.b16 %v8331_v51, %v8330_v17  ;;  %v16343_v17 = vld [vmem:[%s17246_s15 + $0x3] ss:$0 sm:$0xff] }
0x1607   :  { %v16272_v49 = vpop.f32.mrf.mxu2 }
0x1612   :  { %8232 = vmatmul.bf16.gmra.mxu1 %v14564_v25 }
0x1616   :  { %11316 = vmatmul.msk.bf16.vlgmr.msra.gmra.mxu2 %vm570_vm0, %v8332_v34 }
0x1622   :  { %8237 = vmatmul.bf16.gmra.mxu1 %v14588_v35  ;;  %v6819_v35 = vadd.f32 %v17383_v54, %v17382_v26 }
0x1626   :  { %11317 = vmatmul.msk.bf16.gmra.mxu2 %vm570_vm0, %v8333_v11 }
0x1632   :  { %8242 = vmatmul.bf16.gmra.mxu1 %v14600_v47  ;;  %v6824_v47 = vadd.f32 %v17385_v42, %v17384_v37 }
0x1636   :  { %11318 = vmatmul.msk.bf16.gmra.mxu2 %vm570_vm0, %v8334_v44 }
0x1642   :  { %8247 = vmatmul.bf16.gmra.mxu1 %v14634_v14 }
0x1646   :  { %11319 = vmatmul.msk.bf16.gmra.mxu2 %vm570_vm0, %v8335_v1 }
0x1652   :  { %8252 = vmatmul.bf16.gmra.mxu1 %v14689_v23 }
0x1655   :  { %v8482_v32 = vpop.f32.mrf.mxu3 }
0x1656   :  { %v16336_v6 = vmul.f32 0.17677669, %v8482_v32 }
0x1658   :  { %v7875_v2 = vpop.f32.mrf.mxu2  ;;  %v8542_v57 = vsel %vm733_vm1, %v16336_v6, -inf }
0x1659   :  { %v16277_v52 = vadd.f32 %v7875_v2, %v6809_v60 }
0x1660   :  { %v16279_v29 = vpop.f32.mrf.mxu2 }
0x1662   :  { %8257 = vmatmul.bf16.gmra.mxu1 %v14724_v20 }
0x1668   :  { %v7880_v27 = vpop.f32.mrf.mxu2 }
0x1669   :  { %v16284_v22 = vadd.f32 %v7880_v27, %v6814_v24 }
0x1670   :  { %v16286_v25 = vpop.f32.mrf.mxu2 }
0x1672   :  { %8262 = vmatmul.bf16.gmra.mxu1 %v14761_v15 }
0x1679   :  { %v7885_v33 = vpop.f32.mrf.mxu2 }
0x167a   :  { %v16291_v40 = vadd.f32 %v7885_v33, %v6819_v35 }
0x167f   :  { %v8228_v10 = vpop.f32.mrf.mxu1 }
0x1681   :  { %v16293_v3 = vpop.f32.mrf.mxu2 }
0x1687   :  { %v8230_v11 = vpop.f32.mrf.mxu1 }
0x1689   :  { %v7890_v4 = vpop.f32.mrf.mxu2 }
0x168a   :  { %v16298_v56 = vadd.f32 %v7890_v4, %v6824_v47 }
0x168f   :  { %v8233_v61 = vpop.f32.mrf.mxu1 }
0x1690   :  { %v8234_v37 = vadd.f32 %v16343_v17, %v8233_v61 }
0x1691   :  { %v16300_v55 = vpop.f32.mrf.mxu2 }
0x1697   :  { %v8235_v39 = vpop.f32.mrf.mxu1 }
0x1698   :  { %v8236_v42 = vadd.f32 %v16343_v17, %v8235_v39 }
0x1699   :  { %v8389_v14 = vpop.f32.mrf.mxu2 }
0x169a   :  { %v16303_v38 = vmul.f32 0.17677669, %v8389_v14 }
0x169c   :  { %v8518_v34 = vsel %vm733_vm1, %v16303_v38, -inf }
0x169d   :  { %8519 = vmax.xlane.f32.xlu1 %v8518_v34  ;;  %v8302_v34 = vpack.c.bf16 %v8234_v37, %v8234_v37 }
0x169f   :  { %v8238_v13 = vpop.f32.mrf.mxu1 }
0x16a0   :  { %v8239_v54 = vadd.f32 %v16343_v17, %v8238_v13 }
0x16a1   :  { %v8391_v16 = vpop.f32.mrf.mxu2 }
0x16a2   :  { %v16307_v53 = vmul.f32 0.17677669, %v8391_v16  ;;  %v8304_v4 = vpack.c.bf16 %v8239_v54, %v8239_v54  ;;  %v8303_v16 = vpack.c.bf16 %v8236_v42, %v8236_v42 }
0x16a4   :  { %v8521_v23 = vsel %vm733_vm1, %v16307_v53, -inf }
0x16a5   :  { %8522 = vmax.xlane.f32.xlu2 %v8521_v23  ;;  %v8229_v23 = vadd.f32 %v16343_v17, %v8228_v10 }
0x16a7   :  { %v8240_v51 = vpop.f32.mrf.mxu1 }
0x16a8   :  { %v8241_v35 = vadd.f32 %v16343_v17, %v8240_v51 }
0x16a9   :  { %v8394_v0 = vpop.f32.mrf.mxu2 }
0x16aa   :  { %v16312_v48 = vmul.f32 0.17677669, %v8394_v0  ;;  %v8305_v14 = vpack.c.bf16 %v8241_v35, %v8241_v35  ;;  %v8231_v0 = vadd.f32 %v16343_v17, %v8230_v11 }
0x16ac   :  { %v8524_v20 = vsel %vm733_vm1, %v16312_v48, -inf }
0x16ad   :  { %8525 = vmax.xlane.f32.xlu0 %v8524_v20  ;;  %v8742_v20 = vunpack.c.l.b16 %v8304_v4 }
0x16af   :  { %v8243_v1 = vpop.f32.mrf.mxu1 }
0x16b0   :  { %v8244_v60 = vadd.f32 %v16343_v17, %v8243_v1 }
0x16b1   :  { %v8396_v41 = vpop.f32.mrf.mxu2 }
0x16b2   :  { %v16316_v31 = vmul.f32 0.17677669, %v8396_v41  ;;  %v8306_v2 = vpack.c.bf16 %v8244_v60, %v8244_v60  ;;  %v8743_v41 = vunpack.c.l.b16 %v8305_v14 }
0x16b4   :  { %v8527_v43 = vsel %vm733_vm1, %v16316_v31, -inf  ;;  %v8744_v27 = vunpack.c.l.b16 %v8306_v2 }
0x16b5   :  { %8528 = vmax.xlane.f32.xlu1 %v8527_v43  ;;  %v8740_v43 = vunpack.c.l.b16 %v8302_v34 }
0x16b7   :  { %v8245_v62 = vpop.f32.mrf.mxu1 }
0x16b8   :  { %v8246_v24 = vadd.f32 %v16343_v17, %v8245_v62 }
0x16b9   :  { %v8399_v58 = vpop.f32.mrf.mxu2 }
0x16ba   :  { %v16320_v8 = vmul.f32 0.17677669, %v8399_v58  ;;  %v8307_v26 = vpack.c.bf16 %v8246_v24, %v8246_v24  ;;  %v8741_v58 = vunpack.c.l.b16 %v8303_v16 }
0x16bc   :  { %v8530_v15 = vsel %vm733_vm1, %v16320_v8, -inf  ;;  %v8745_v33 = vunpack.c.l.b16 %v8307_v26  ;;  %v8747_v61 = vpack.c.b16 %v8741_v58, %v8740_v43 }
0x16bd   :  { %8531 = vmax.xlane.f32.xlu2 %v8530_v15  ;;  %v8300_v15 = vpack.c.bf16 %v8229_v23, %v8229_v23 }
0x16be   :  { %v8749_v47 = vpack.c.b16 %v8745_v33, %v8744_v27 }
0x16c0   :  { %8770 = vmatpush.bf16.msrb.mxu0 %v8749_v47 }
0x16c1   :  { %v8401_v7 = vpop.f32.mrf.mxu2 }
0x16c2   :  { %v16324_v45 = vmul.f32 0.17677669, %v8401_v7  ;;  %v8301_v7 = vpack.c.bf16 %v8231_v0, %v8231_v0 }
0x16c4   :  { %v8533_v18 = vsel %vm733_vm1, %v16324_v45, -inf }
0x16c5   :  { %8534 = vmax.xlane.f32.xlu0 %v8533_v18  ;;  %v8748_v18 = vpack.c.b16 %v8743_v41, %v8742_v20 }
0x16c7   :  { %8771 = vmatpush.bf16.msrb.mxu0 %v8748_v18 }
0x16c9   :  { %v8404_v46 = vpop.f32.mrf.mxu2 }
0x16ca   :  { %v16328_v12 = vmul.f32 0.17677669, %v8404_v46  ;;  %v8738_v46 = vunpack.c.l.b16 %v8300_v15 }
0x16cb   :  { %8772 = vmatpush.bf16.msrb.mxu0 %v8747_v61 }
0x16cc   :  { %v8536_v30 = vsel %vm733_vm1, %v16328_v12, -inf }
0x16cd   :  { %8537 = vmax.xlane.f32.xlu1 %v8536_v30  ;;  %v8739_v30 = vunpack.c.l.b16 %v8301_v7 }
0x16cf   :  { %v8746_v39 = vpack.c.b16 %v8739_v30, %v8738_v46  ;;  %v8248_v30 = vpop.f32.mrf.mxu1 }
0x16d1   :  { %v8406_v63 = vpop.f32.mrf.mxu2  ;;  %8773 = vmatpush.bf16.msrb.mxu0 %v8746_v39 }
0x16d2   :  { %v16332_v21 = vmul.f32 0.17677669, %v8406_v63 }
0x16d4   :  { %v8539_v44 = vsel %vm733_vm1, %v16332_v21, -inf }
0x16d5   :  { %8540 = vmax.xlane.f32.xlu2 %v8539_v44  ;;  %v8484_v44 = vpop.f32.mrf.mxu3 }
0x16d6   :  { %v16359_v2 = vmul.f32 0.17677669, %v8484_v44 }
0x16dd   :  { %8543 = vmax.xlane.f32.xlu2 %v8542_v57  ;;  %v8487_v51 = vpop.f32.mrf.mxu3 }
0x16de   :  { %v16368_v35 = vmul.f32 0.17677669, %v8487_v51  ;;  %v8250_v51 = vpop.f32.mrf.mxu1 }
0x16e0   :  { %v8548_v47 = vsel %vm733_vm1, %v16368_v35, -inf }
0x16e5   :  { %v8489_v54 = vpop.f32.mrf.mxu3 }
0x16e6   :  { %v16377_v34 = vmul.f32 0.17677669, %v8489_v54  ;;  %v8253_v54 = vpop.f32.mrf.mxu1 }
0x16e8   :  { %v8551_v20 = vsel %vm733_vm1, %v16377_v34, -inf }
0x16ed   :  { %v8492_v14 = vpop.f32.mrf.mxu3 }
0x16ee   :  { %v16386_v43 = vmul.f32 0.17677669, %v8492_v14 }
0x16f0   :  { %v8554_v61 = vsel %vm733_vm1, %v16386_v43, -inf }
0x16f5   :  { %v8494_v15 = vpop.f32.mrf.mxu3 }
0x16f6   :  { %v16395_v39 = vmul.f32 0.17677669, %v8494_v15 }
0x1710   :  { %v8520_v63 = vpop.xlane.xlu1 %8519 }
0x1711   :  { %v8566_v10 = vsub.f32 %v16303_v38, %v8520_v63 }
0x1713   :  { %v8582_v13 = vmul.f32 1.442695, %v8566_v10 }
0x1715   :  { %12247 = vpow2.f32 %v8582_v13 }
0x1718   :  { %v8523_v11 = vpop.xlane.xlu2 %8522 }
0x1719   :  { %v8567_v32 = vsub.f32 %v16307_v53, %v8523_v11  ;;  %v8545_v53 = vsel %vm733_vm1, %v16359_v2, -inf }
0x171b   :  { %v16355_v57 = vpop.eup %12247  ;;  %v8584_v1 = vmul.f32 1.442695, %v8567_v32  ;;  %v8557_v32 = vsel %vm733_vm1, %v16395_v39, -inf }
0x171c   :  { %v8614_v60 = vsel %vm733_vm1, %v16355_v57, 0.0 }
0x171d   :  { %12249 = vpow2.f32 %v8584_v1  ;;  %8615 = vadd.xlane.f32.xlu0 %v8614_v60 }
0x1720   :  { %v8526_v62 = vpop.xlane.xlu0 %8525 }
0x1721   :  { %v8568_v24 = vsub.f32 %v16312_v48, %v8526_v62 }
0x1723   :  { %v16362_v38 = vpop.eup %12249  ;;  %v8586_v27 = vmul.f32 1.442695, %v8568_v24 }
0x1724   :  { %v8617_v26 = vsel %vm733_vm1, %v16362_v38, 0.0 }
0x1725   :  { %12251 = vpow2.f32 %v8586_v27  ;;  %8546 = vmax.xlane.f32.xlu0 %v8545_v53  ;;  %8618 = vadd.xlane.f32.xlu1 %v8617_v26 }
0x1728   :  { %v8529_v33 = vpop.xlane.xlu1 %8528 }
0x1729   :  { %v8569_v37 = vsub.f32 %v16316_v31, %v8529_v33 }
0x172b   :  { %v16371_v42 = vpop.eup %12251  ;;  %v8588_v48 = vmul.f32 1.442695, %v8569_v37 }
0x172c   :  { %v8620_v4 = vsel %vm733_vm1, %v16371_v42, 0.0 }
0x172d   :  { %12253 = vpow2.f32 %v8588_v48  ;;  %8549 = vmax.xlane.f32.xlu0 %v8548_v47  ;;  %8621 = vadd.xlane.f32.xlu1 %v8620_v4 }
0x1730   :  { %v8532_v16 = vpop.xlane.xlu2 %8531 }
0x1731   :  { %v8570_v23 = vsub.f32 %v16320_v8, %v8532_v16  ;;  %v8255_v16 = vpop.f32.mrf.mxu1 }
0x1733   :  { %v16380_v0 = vpop.eup %12253  ;;  %v8590_v31 = vmul.f32 1.442695, %v8570_v23 }
0x1734   :  { %v8623_v41 = vsel %vm733_vm1, %v16380_v0, 0.0 }
0x1735   :  { %12255 = vpow2.f32 %v8590_v31  ;;  %8552 = vmax.xlane.f32.xlu1 %v8551_v20  ;;  %8624 = vadd.xlane.f32.xlu2 %v8623_v41 }
0x1738   :  { %v8535_v58 = vpop.xlane.xlu0 %8534 }
0x1739   :  { %v8571_v7 = vsub.f32 %v16324_v45, %v8535_v58  ;;  %v8497_v45 = vpop.f32.mrf.mxu3 }
0x173a   :  { %v16404_v1 = vmul.f32 0.17677669, %v8497_v45 }
0x173b   :  { %v16389_v18 = vpop.eup %12255  ;;  %v8592_v8 = vmul.f32 1.442695, %v8571_v7 }
0x173c   :  { %v8626_v46 = vsel %vm733_vm1, %v16389_v18, 0.0  ;;  %v8560_v53 = vsel %vm733_vm1, %v16404_v1, -inf }
0x173d   :  { %12257 = vpow2.f32 %v8592_v8  ;;  %8555 = vmax.xlane.f32.xlu1 %v8554_v61  ;;  %8627 = vadd.xlane.f32.xlu2 %v8626_v46 }
0x1740   :  { %v8538_v63 = vpop.xlane.xlu1 %8537 }
0x1741   :  { %v8572_v44 = vsub.f32 %v16328_v12, %v8538_v63  ;;  %v8499_v26 = vpop.f32.mrf.mxu3 }
0x1742   :  { %v16413_v33 = vmul.f32 0.17677669, %v8499_v26  ;;  %v8251_v26 = vadd.f32 %v16343_v17, %v8250_v51 }
0x1743   :  { %v16398_v10 = vpop.eup %12257  ;;  %v8594_v13 = vmul.f32 1.442695, %v8572_v44 }
0x1744   :  { %v8629_v11 = vsel %vm733_vm1, %v16398_v10, 0.0  ;;  %v8563_v4 = vsel %vm733_vm1, %v16413_v33, -inf }
0x1745   :  { %12259 = vpow2.f32 %v8594_v13  ;;  %8630 = vadd.xlane.f32.xlu0 %v8629_v11  ;;  %8558 = vmax.xlane.f32.xlu2 %v8557_v32  ;;  %v8254_v13 = vadd.f32 %v16343_v17, %v8253_v54  ;;  %v8256_v11 = vadd.f32 %v16343_v17, %v8255_v16 }
0x1748   :  { %v8541_v60 = vpop.xlane.xlu2 %8540 }
0x1749   :  { %v8573_v62 = vsub.f32 %v16332_v21, %v8541_v60 }
0x174b   :  { %v16407_v12 = vpop.eup %12259  ;;  %v8596_v24 = vmul.f32 1.442695, %v8573_v62 }
0x174c   :  { %v8632_v27 = vsel %vm733_vm1, %v16407_v12, 0.0 }
0x174d   :  { %12261 = vpow2.f32 %v8596_v24  ;;  %8633 = vadd.xlane.f32.xlu0 %v8632_v27  ;;  %8561 = vmax.xlane.f32.xlu2 %v8560_v53  ;;  %v8310_v24 = vpack.c.bf16 %v8254_v13, %v8254_v13  ;;  %v8311_v27 = vpack.c.bf16 %v8256_v11, %v8256_v11  ;;  %v8249_v53 = vadd.f32 %v16343_v17, %v8248_v30 }
0x1750   :  { %v8544_v37 = vpop.xlane.xlu2 %8543 }
0x1751   :  { %v8574_v48 = vsub.f32 %v16336_v6, %v8544_v37  ;;  %v8258_v6 = vpop.f32.mrf.mxu1 }
0x1752   :  { %v8259_v63 = vadd.f32 %v16343_v17, %v8258_v6 }
0x1753   :  { %v16416_v21 = vpop.eup %12261  ;;  %v8598_v47 = vmul.f32 1.442695, %v8574_v48 }
0x1754   :  { %v8635_v14 = vsel %vm733_vm1, %v16416_v21, 0.0  ;;  %v8312_v60 = vpack.c.bf16 %v8259_v63, %v8259_v63 }
0x1755   :  { %12263 = vpow2.f32 %v8598_v47  ;;  %8564 = vmax.xlane.f32.xlu0 %v8563_v4  ;;  %8636 = vadd.xlane.f32.xlu1 %v8635_v14  ;;  %v8825_v47 = vunpack.c.l.b16 %v8310_v24  ;;  %v8826_v4 = vunpack.c.l.b16 %v8311_v27  ;;  %v8308_v14 = vpack.c.bf16 %v8249_v53, %v8249_v53 }
0x1756   :  { %v8827_v37 = vunpack.c.l.b16 %v8312_v60 }
0x1757   :  { %v8832_v54 = vpack.c.b16 %v8826_v4, %v8825_v47  ;;  %v8823_v16 = vunpack.c.l.b16 %v8308_v14 }
0x1759   :  { %v8260_v20 = vpop.f32.mrf.mxu1 }
0x175a   :  { %v8261_v44 = vadd.f32 %v16343_v17, %v8260_v20 }
0x175b   :  { %v16422_v23 = vpop.eup %12263 }
0x175c   :  { %v8638_v31 = vsel %vm733_vm1, %v16422_v23, 0.0  ;;  %v8313_v62 = vpack.c.bf16 %v8261_v44, %v8261_v44 }
0x175d   :  { %8639 = vadd.xlane.f32.xlu1 %v8638_v31  ;;  %v8309_v31 = vpack.c.bf16 %v8251_v26, %v8251_v26 }
0x175e   :  { %v8828_v48 = vunpack.c.l.b16 %v8313_v62 }
0x175f   :  { %v8824_v20 = vunpack.c.l.b16 %v8309_v31 }
0x1760   :  { %v8833_v6 = vpack.c.b16 %v8828_v48, %v8827_v37 }
0x1761   :  { %v8263_v41 = vpop.f32.mrf.mxu1 }
0x1762   :  { %v8264_v58 = vadd.f32 %v16343_v17, %v8263_v41 }
0x1764   :  { %v8314_v15 = vpack.c.bf16 %v8264_v58, %v8264_v58  ;;  %v8831_v58 = vpack.c.b16 %v8824_v20, %v8823_v16 }
0x1766   :  { %v8829_v61 = vunpack.c.l.b16 %v8314_v15 }
0x1769   :  { %v8265_v7 = vpop.f32.mrf.mxu1 }
0x176a   :  { %v8266_v8 = vadd.f32 %v16343_v17, %v8265_v7 }
0x176c   :  { %v8315_v46 = vpack.c.bf16 %v8266_v8, %v8266_v8 }
0x176e   :  { %v8830_v45 = vunpack.c.l.b16 %v8315_v46 }
0x1770   :  { %v8834_v32 = vpack.c.b16 %v8830_v45, %v8829_v61 }
0x1772   :  { %8855 = vmatpush.bf16.msrb.mxu1 %v8834_v32 }
0x1776   :  { %8856 = vmatpush.bf16.msrb.mxu1 %v8833_v6 }
0x177a   :  { %8857 = vmatpush.bf16.msrb.mxu1 %v8832_v54 }
0x177e   :  { %8858 = vmatpush.bf16.msrb.mxu1 %v8831_v58 }
0x1790   :  { %v8616_v41 = vpop.xlane.xlu0 %8615 }
0x1791   :  { %12265 = vrcp.f32 %v8616_v41 }
0x1797   :  { %v12266_v7 = vpop.eup %12265 }
0x1798   :  { %v8547_v15 = vpop.xlane.xlu0 %8546  ;;  %v8619_v30 = vpop.xlane.xlu1 %8618  ;;  %v8678_v8 = vmul.f32 %v12266_v7, %v16355_v57 }
0x1799   :  { %v8575_v17 = vsub.f32 %v16359_v2, %v8547_v15  ;;  %12267 = vrcp.f32 %v8619_v30 }
0x179a   :  { %v8694_v46 = vpack.c.bf16 %v8678_v8, %v8678_v8 }
0x179b   :  { %v8600_v51 = vmul.f32 1.442695, %v8575_v17 }
0x179c   :  { %v8718_v62 = vunpack.c.l.b16 %v8694_v46 }
0x179d   :  { %12269 = vpow2.f32 %v8600_v51 }
0x179f   :  { %v12268_v61 = vpop.eup %12267 }
0x17a0   :  { %v8679_v63 = vmul.f32 %v12268_v61, %v16362_v38  ;;  %v8550_v44 = vpop.xlane.xlu0 %8549  ;;  %v8622_v45 = vpop.xlane.xlu1 %8621 }
0x17a1   :  { %v8576_v13 = vsub.f32 %v16368_v35, %v8550_v44  ;;  %12271 = vrcp.f32 %v8622_v45 }
0x17a2   :  { %v8695_v11 = vpack.c.bf16 %v8679_v63, %v8679_v63 }
0x17a3   :  { %v16438_v32 = vpop.eup %12269  ;;  %v8602_v60 = vmul.f32 1.442695, %v8576_v13 }
0x17a4   :  { %v8719_v2 = vunpack.c.l.b16 %v8695_v11  ;;  %v8641_v24 = vsel %vm733_vm1, %v16438_v32, 0.0 }
0x17a5   :  { %12273 = vpow2.f32 %v8602_v60  ;;  %8642 = vadd.xlane.f32.xlu2 %v8641_v24 }
0x17a6   :  { %v8726_v57 = vpack.c.b16 %v8719_v2, %v8718_v62 }
0x17a7   :  { %v12272_v53 = vpop.eup %12271 }
0x17a8   :  { %11324 = vmatmul.msk.bf16.vlgmr.msrb.gmra.mxu0 %vm733_vm1, %v8726_v57  ;;  %v8553_v38 = vpop.xlane.xlu1 %8552  ;;  %v8625_v27 = vpop.xlane.xlu2 %8624  ;;  %v8680_v48 = vmul.f32 %v12272_v53, %v16371_v42 }
0x17a9   :  { %v8577_v35 = vsub.f32 %v16377_v34, %v8553_v38  ;;  %12275 = vrcp.f32 %v8625_v27 }
0x17aa   :  { %v8696_v14 = vpack.c.bf16 %v8680_v48, %v8680_v48 }
0x17ab   :  { %v16444_v26 = vpop.eup %12273  ;;  %v8604_v37 = vmul.f32 1.442695, %v8577_v35 }
0x17ac   :  { %v8644_v47 = vsel %vm733_vm1, %v16444_v26, 0.0  ;;  %v8720_v58 = vunpack.c.l.b16 %v8696_v14 }
0x17ad   :  { %12277 = vpow2.f32 %v8604_v37  ;;  %8645 = vadd.xlane.f32.xlu0 %v8644_v47 }
0x17af   :  { %v12276_v4 = vpop.eup %12275 }
0x17b0   :  { %v8681_v31 = vmul.f32 %v12276_v4, %v16380_v0  ;;  %v8556_v6 = vpop.xlane.xlu1 %8555  ;;  %v8628_v54 = vpop.xlane.xlu2 %8627 }
0x17b1   :  { %v8578_v16 = vsub.f32 %v16386_v43, %v8556_v6  ;;  %12279 = vrcp.f32 %v8628_v54 }
0x17b2   :  { %v8697_v34 = vpack.c.bf16 %v8681_v31, %v8681_v31 }
0x17b3   :  { %v16451_v20 = vpop.eup %12277  ;;  %v8606_v41 = vmul.f32 1.442695, %v8578_v16 }
0x17b4   :  { %v8721_v42 = vunpack.c.l.b16 %v8697_v34  ;;  %v8647_v15 = vsel %vm733_vm1, %v16451_v20, 0.0 }
0x17b5   :  { %12281 = vpow2.f32 %v8606_v41  ;;  %8648 = vadd.xlane.f32.xlu1 %v8647_v15 }
0x17b6   :  { %v8727_v30 = vpack.c.b16 %v8721_v42, %v8720_v58 }
0x17b7   :  { %v12280_v17 = vpop.eup %12279 }
0x17b8   :  { %v8631_v7 = vpop.xlane.xlu0 %8630  ;;  %11325 = vmatmul.msk.bf16.gmra.mxu0 %vm733_vm1, %v8727_v30  ;;  %v8559_v0 = vpop.xlane.xlu2 %8558  ;;  %v8682_v61 = vmul.f32 %v12280_v17, %v16389_v18 }
0x17b9   :  { %12283 = vrcp.f32 %v8631_v7  ;;  %v8579_v43 = vsub.f32 %v16395_v39, %v8559_v0 }
0x17ba   :  { %v8698_v44 = vpack.c.bf16 %v8682_v61, %v8682_v61 }
0x17bb   :  { %v16457_v51 = vpop.eup %12281  ;;  %v8608_v8 = vmul.f32 1.442695, %v8579_v43 }
0x17bc   :  { %v8650_v46 = vsel %vm733_vm1, %v16457_v51, 0.0  ;;  %v8722_v24 = vunpack.c.l.b16 %v8698_v44 }
0x17bd   :  { %12285 = vpow2.f32 %v8608_v8  ;;  %8651 = vadd.xlane.f32.xlu2 %v8650_v46 }
0x17bf   :  { %v12284_v63 = vpop.eup %12283 }
0x17c0   :  { %v8683_v45 = vmul.f32 %v12284_v63, %v16398_v10  ;;  %v8634_v13 = vpop.xlane.xlu0 %8633  ;;  %v8562_v11 = vpop.xlane.xlu2 %8561 }
0x17c1   :  { %v8580_v60 = vsub.f32 %v16404_v1, %v8562_v11  ;;  %12287 = vrcp.f32 %v8634_v13 }
0x17c2   :  { %v8699_v62 = vpack.c.bf16 %v8683_v45, %v8683_v45 }
0x17c3   :  { %v16464_v39 = vpop.eup %12285  ;;  %v8610_v2 = vmul.f32 1.442695, %v8580_v60 }
0x17c4   :  { %v8723_v18 = vunpack.c.l.b16 %v8699_v62  ;;  %v8653_v57 = vsel %vm733_vm1, %v16464_v39, 0.0 }
0x17c5   :  { %12289 = vpow2.f32 %v8610_v2  ;;  %8654 = vadd.xlane.f32.xlu0 %v8653_v57 }
0x17c6   :  { %v8728_v38 = vpack.c.b16 %v8723_v18, %v8722_v24 }
0x17c7   :  { %v12288_v10 = vpop.eup %12287 }
0x17c8   :  { %v8565_v27 = vpop.xlane.xlu0 %8564  ;;  %v8637_v53 = vpop.xlane.xlu1 %8636  ;;  %11326 = vmatmul.msk.bf16.gmra.mxu0 %vm733_vm1, %v8728_v38  ;;  %v8684_v48 = vmul.f32 %v12288_v10, %v16407_v12  ;;  %v11687_v12 = vld [vmem:[%s17247_s16 + $0x38] sm:$0xff] }
0x17c9   :  { %v8581_v1 = vsub.f32 %v16413_v33, %v8565_v27  ;;  %12291 = vrcp.f32 %v8637_v53  ;;  %8935 = vmatpush.bf16.msrb.mxu2 %v11687_v12 }
0x17ca   :  { %v8700_v14 = vpack.c.bf16 %v8684_v48, %v8684_v48 }
0x17cb   :  { %v16470_v35 = vpop.eup %12289  ;;  %v8612_v37 = vmul.f32 1.442695, %v8581_v1 }
0x17cc   :  { %v8656_v47 = vsel %vm733_vm1, %v16470_v35, 0.0  ;;  %v8724_v16 = vunpack.c.l.b16 %v8700_v14 }
0x17cd   :  { %12293 = vpow2.f32 %v8612_v37  ;;  %8657 = vadd.xlane.f32.xlu1 %v8656_v47 }
0x17cf   :  { %v12292_v4 = vpop.eup %12291 }
0x17d0   :  { %v8685_v31 = vmul.f32 %v12292_v4, %v16416_v21  ;;  %v11686_v21 = vld [vmem:[%s17247_s16 + $0x30] sm:$0xff]  ;;  %v8640_v58 = vpop.xlane.xlu1 %8639 }
0x17d1   :  { %8936 = vmatpush.bf16.msrb.mxu2 %v11686_v21  ;;  %12295 = vrcp.f32 %v8640_v58 }
0x17d2   :  { %v8701_v6 = vpack.c.bf16 %v8685_v31, %v8685_v31 }
0x17d3   :  { %v16476_v54 = vpop.eup %12293 }
0x17d4   :  { %v8725_v33 = vunpack.c.l.b16 %v8701_v6  ;;  %v8659_v34 = vsel %vm733_vm1, %v16476_v54, 0.0 }
0x17d5   :  { %8660 = vadd.xlane.f32.xlu2 %v8659_v34 }
0x17d6   :  { %v8729_v41 = vpack.c.b16 %v8725_v33, %v8724_v16 }
0x17d7   :  { %v12296_v15 = vpop.eup %12295 }
0x17d8   :  { %11327 = vmatmul.msk.bf16.gmra.mxu0 %vm733_vm1, %v8729_v41  ;;  %v8686_v30 = vmul.f32 %v12296_v15, %v16422_v23 }
0x17da   :  { %v8702_v0 = vpack.c.bf16 %v8686_v30, %v8686_v30 }
0x17dc   :  { %v8803_v61 = vunpack.c.l.b16 %v8702_v0 }
0x1818   :  { %v8643_v42 = vpop.xlane.xlu2 %8642 }
0x1819   :  { %12297 = vrcp.f32 %v8643_v42 }
0x181f   :  { %v12298_v7 = vpop.eup %12297 }
0x1820   :  { %v8687_v17 = vmul.f32 %v12298_v7, %v16438_v32  ;;  %v8646_v43 = vpop.xlane.xlu0 %8645 }
0x1821   :  { %12299 = vrcp.f32 %v8646_v43 }
0x1822   :  { %v8703_v8 = vpack.c.bf16 %v8687_v17, %v8687_v17 }
0x1824   :  { %v8804_v46 = vunpack.c.l.b16 %v8703_v8 }
0x1825   :  { %v8775_v63 = vpop.f32.mrf.mxu0 }
0x1826   :  { %v8811_v44 = vpack.c.b16 %v8804_v46, %v8803_v61 }
0x1827   :  { %v12300_v13 = vpop.eup %12299 }
0x1828   :  { %v8649_v45 = vpop.xlane.xlu1 %8648  ;;  %11328 = vmatmul.msk.bf16.vlgmr.msrb.gmra.mxu1 %vm733_vm1, %v8811_v44  ;;  %v8688_v11 = vmul.f32 %v12300_v13, %v16444_v26 }
0x1829   :  { %12301 = vrcp.f32 %v8649_v45 }
0x182a   :  { %v8704_v2 = vpack.c.bf16 %v8688_v11, %v8688_v11 }
0x182c   :  { %v8805_v57 = vunpack.c.l.b16 %v8704_v2  ;;  %v17388_v2 = vld [vmem:[#allocation12_spill] sm:$0xff] }
0x182d   :  { %v8777_v60 = vpop.f32.mrf.mxu0 }
0x182e   :  { %v8880_v23 = vpack.c.bf16 %v8777_v60, %v8775_v63  ;;  %v17386_v60 = vld [vmem:[#allocation29_spill] sm:$0xff] }
0x182f   :  { %v12302_v62 = vpop.eup %12301 }
0x1830   :  { %v8689_v32 = vmul.f32 %v12302_v62, %v16451_v20  ;;  %11344 = vmatmul.msk.bf16.vlgmr.msrb.gmra.mxu2 %vm570_vm0, %v8880_v23  ;;  %v8652_v24 = vpop.xlane.xlu2 %8651  ;;  %v17387_v23 = vld [vmem:[#allocation22_spill] sm:$0xff] }
0x1831   :  { %12303 = vrcp.f32 %v8652_v24  ;;  %v6791_v62 = vadd.f32 %v17387_v23, %v17386_v60  ;;  %v17399_v23 = vld [vmem:[#allocation36_spill] sm:$0xff] }
0x1832   :  { %v8705_v18 = vpack.c.bf16 %v8689_v32, %v8689_v32 }
0x1833   :  { %v7896_v24 = vadd.f32 %v16197_v28, %v6791_v62  ;;  %v17391_v28 = vld [vmem:[#allocation23_spill] sm:$0xff]  ;;  %v17400_v62 = vld [vmem:[#allocation25_spill] sm:$0xff] }
0x1834   :  { %v8806_v38 = vunpack.c.l.b16 %v8705_v18 }
0x1835   :  { %v8780_v27 = vpop.f32.mrf.mxu0 }
0x1836   :  { %v8812_v53 = vpack.c.b16 %v8806_v38, %v8805_v57 }
0x1837   :  { %v12304_v1 = vpop.eup %12303 }
0x1838   :  { %v8655_v10 = vpop.xlane.xlu0 %8654  ;;  %11329 = vmatmul.msk.bf16.gmra.mxu1 %vm733_vm1, %v8812_v53  ;;  %v8690_v26 = vmul.f32 %v12304_v1, %v16457_v51 }
0x1839   :  { %12305 = vrcp.f32 %v8655_v10 }
0x183a   :  { %v8706_v20 = vpack.c.bf16 %v8690_v26, %v8690_v26 }
0x183c   :  { %v8807_v6 = vunpack.c.l.b16 %v8706_v20 }
0x183d   :  { %v8782_v37 = vpop.f32.mrf.mxu0 }
0x183e   :  { %v8881_v48 = vpack.c.bf16 %v8782_v37, %v8780_v27 }
0x183f   :  { %v12306_v47 = vpop.eup %12305 }
0x1840   :  { %v8691_v4 = vmul.f32 %v12306_v47, %v16464_v39  ;;  %11345 = vmatmul.msk.bf16.gmra.mxu2 %vm570_vm0, %v8881_v48  ;;  %v8658_v14 = vpop.xlane.xlu1 %8657  ;;  %v17390_v47 = vld [vmem:[#allocation32_spill] sm:$0xff] }
0x1841   :  { %12307 = vrcp.f32 %v8658_v14  ;;  %v6796_v20 = vadd.f32 %v17391_v28, %v17390_v47  ;;  %v17402_v47 = vld [vmem:[#allocation9_spill] sm:$0xff] }
0x1842   :  { %v8707_v31 = vpack.c.bf16 %v8691_v4, %v8691_v4  ;;  %v17392_v4 = vld [vmem:[#allocation13_spill] sm:$0xff] }
0x1844   :  { %v8808_v16 = vunpack.c.l.b16 %v8707_v31  ;;  %v7898_v31 = vadd.f32 %v16207_v59, %v6796_v20  ;;  %v17395_v59 = vld [vmem:[#allocation24_spill] sm:$0xff] }
0x1845   :  { %v8785_v33 = vpop.f32.mrf.mxu0 }
0x1846   :  { %v8813_v34 = vpack.c.b16 %v8808_v16, %v8807_v6 }
0x1847   :  { %v12308_v12 = vpop.eup %12307 }
0x1848   :  { %11330 = vmatmul.msk.bf16.gmra.mxu1 %vm733_vm1, %v8813_v34  ;;  %v8661_v41 = vpop.xlane.xlu2 %8660  ;;  %v8692_v51 = vmul.f32 %v12308_v12, %v16470_v35 }
0x1849   :  { %12309 = vrcp.f32 %v8661_v41 }
0x184a   :  { %v8708_v39 = vpack.c.bf16 %v8692_v51, %v8692_v51 }
0x184c   :  { %v8809_v7 = vunpack.c.l.b16 %v8708_v39  ;;  %v17394_v39 = vld [vmem:[#allocation35_spill] sm:$0xff] }
0x184d   :  { %v8787_v21 = vpop.f32.mrf.mxu0 }
0x184e   :  { %v8882_v58 = vpack.c.bf16 %v8787_v21, %v8785_v33 }
0x184f   :  { %v12310_v42 = vpop.eup %12309 }
0x1850   :  { %v8693_v15 = vmul.f32 %v12310_v42, %v16476_v54  ;;  %11346 = vmatmul.msk.bf16.gmra.mxu2 %vm570_vm0, %v8882_v58  ;;  %v16507_v54 = vld [vmem:[%s17248_s17] ss:$0 sm:$0xff] }
0x1852   :  { %v8709_v30 = vpack.c.bf16 %v8693_v15, %v8693_v15  ;;  %v6801_v15 = vadd.f32 %v17395_v59, %v17394_v39 }
0x1854   :  { %v8810_v0 = vunpack.c.l.b16 %v8709_v30  ;;  %v17396_v30 = vld [vmem:[#allocation14_spill] sm:$0xff] }
0x1855   :  { %v8790_v17 = vpop.f32.mrf.mxu0 }
0x1856   :  { %v8814_v43 = vpack.c.b16 %v8810_v0, %v8809_v7  ;;  %v7900_v0 = vadd.f32 %v16217_v19, %v6801_v15  ;;  %v17406_v15 = vld [vmem:[#allocation10_spill] sm:$0xff] }
0x1858   :  { %11331 = vmatmul.msk.bf16.gmra.mxu1 %vm733_vm1, %v8814_v43 }
0x185d   :  { %v8792_v8 = vpop.f32.mrf.mxu0 }
0x185e   :  { %v8883_v61 = vpack.c.bf16 %v8792_v8, %v8790_v17 }
0x1860   :  { %11347 = vmatmul.msk.bf16.gmra.mxu2 %vm570_vm0, %v8883_v61 }
0x18a5   :  { %v8860_v35 = vpop.f32.mrf.mxu1 }
0x18ad   :  { %v8862_v46 = vpop.f32.mrf.mxu1 }
0x18ae   :  { %v8884_v63 = vpack.c.bf16 %v8862_v46, %v8860_v35 }
0x18b0   :  { %11348 = vmatmul.msk.bf16.gmra.mxu2 %vm570_vm0, %v8884_v63 }
0x18b3   :  { %v8938_v44 = vpop.f32.mrf.mxu2 }
0x18b4   :  { %v8978_v45 = vadd.f32 %v8938_v44, %v16192_v36  ;;  %v17389_v36 = vld [vmem:[#allocation6_spill] sm:$0xff] }
0x18b5   :  { %v8865_v13 = vpop.f32.mrf.mxu1 }
0x18b6   :  { %v8998_v11 = vadd.f32 %v16507_v54, %v8978_v45  ;;  %v17398_v45 = vld [vmem:[#allocation15_spill] sm:$0xff] }
0x18b8   :  { %v9014_v32 = vadd.f32 %v8998_v11, %v17388_v2  ;;  %v6806_v2 = vadd.f32 %v17400_v62, %v17399_v23 }
0x18ba   :  { %9032 = vadd.xlane.f32.xlu0 %v9014_v32 }
0x18bb   :  { %v8940_v18 = vpop.f32.mrf.mxu2 }
0x18bc   :  { %v8979_v57 = vadd.f32 %v8940_v18, %v7896_v24  ;;  %v17401_v24 = vld [vmem:[#allocation5_spill] sm:$0xff] }
0x18bd   :  { %v8867_v38 = vpop.f32.mrf.mxu1 }
0x18be   :  { %v8999_v27 = vadd.f32 %v16507_v54, %v8979_v57  ;;  %v8885_v53 = vpack.c.bf16 %v8867_v38, %v8865_v13  ;;  %v7902_v57 = vadd.f32 %v16272_v49, %v6806_v2  ;;  %v11412_v2 = vld [vmem:[%s17249_s18 + $0x78] sm:$0xf0] }
0x18c0   :  { %11349 = vmatmul.msk.bf16.gmra.mxu2 %vm570_vm0, %v8885_v53  ;;  %v9015_v10 = vadd.f32 %v8999_v27, %v17389_v36 }
0x18c2   :  { %9034 = vadd.xlane.f32.xlu1 %v9015_v10 }
0x18c3   :  { %v8943_v1 = vpop.f32.mrf.mxu2 }
0x18c4   :  { %v8980_v26 = vadd.f32 %v8943_v1, %v16202_v5  ;;  %v17393_v5 = vld [vmem:[#allocation7_spill] sm:$0xff] }
0x18c5   :  { %v8870_v37 = vpop.f32.mrf.mxu1 }
0x18c6   :  { %v9000_v48 = vadd.f32 %v16507_v54, %v8980_v26 }
0x18c8   :  { %v9016_v14 = vadd.f32 %v9000_v48, %v17392_v4  ;;  %v17403_v4 = vld [vmem:[#allocation37_spill] sm:$0xff] }
0x18ca   :  { %9036 = vadd.xlane.f32.xlu2 %v9016_v14 }
0x18cb   :  { %v8945_v6 = vpop.f32.mrf.mxu2 }
0x18cc   :  { %v8981_v16 = vadd.f32 %v8945_v6, %v7898_v31  ;;  %v17404_v31 = vld [vmem:[#allocation26_spill] sm:$0xff] }
0x18cd   :  { %v8872_v33 = vpop.f32.mrf.mxu1  ;;  %v6811_v6 = vadd.f32 %v17404_v31, %v17403_v4 }
0x18ce   :  { %v9001_v34 = vadd.f32 %v16507_v54, %v8981_v16  ;;  %v8886_v41 = vpack.c.bf16 %v8872_v33, %v8870_v37 }
0x18d0   :  { %11350 = vmatmul.msk.bf16.gmra.mxu2 %vm570_vm0, %v8886_v41  ;;  %v9017_v12 = vadd.f32 %v9001_v34, %v17393_v5  ;;  %v17405_v41 = vld [vmem:[#allocation16_spill] sm:$0xff] }
0x18d2   :  { %9038 = vadd.xlane.f32.xlu0 %v9017_v12 }
0x18d3   :  { %v8948_v51 = vpop.f32.mrf.mxu2 }
0x18d4   :  { %v8982_v21 = vadd.f32 %v8948_v51, %v16212_v50  ;;  %v17397_v50 = vld [vmem:[#allocation8_spill] sm:$0xff] }
0x18d5   :  { %v8875_v58 = vpop.f32.mrf.mxu1 }
0x18d6   :  { %v9002_v42 = vadd.f32 %v16507_v54, %v8982_v21 }
0x18d8   :  { %v16532_v7 = vadd.f32 %v9002_v42, %v17396_v30 }
0x18da   :  { %9040 = vadd.xlane.f32.xlu1 %v16532_v7 }
0x18db   :  { %v8950_v17 = vpop.f32.mrf.mxu2 }
0x18dc   :  { %v8983_v43 = vadd.f32 %v8950_v17, %v7900_v0 }
0x18dd   :  { %v8877_v8 = vpop.f32.mrf.mxu1 }
0x18de   :  { %v9003_v61 = vadd.f32 %v16507_v54, %v8983_v43  ;;  %v8887_v35 = vpack.c.bf16 %v8877_v8, %v8875_v58  ;;  %v17407_v43 = vld [vmem:[#allocation38_spill] sm:$0xff]  ;;  %v17408_v8 = vld [vmem:[#allocation28_spill] sm:$0xff] }
0x18e0   :  { %11351 = vmatmul.msk.bf16.gmra.mxu2 %vm570_vm0, %v8887_v35  ;;  %v16539_v46 = vadd.f32 %v9003_v61, %v17397_v50  ;;  %v6816_v61 = vadd.f32 %v17408_v8, %v17407_v43  ;;  %v11699_v43 = vld [vmem:[%s17249_s18 + $0x54] sm:$0xf0]  ;;  %v11698_v8 = vld [vmem:[%s17249_s18 + $0x54] sm:$0xf] }
0x18e2   :  { %9042 = vadd.xlane.f32.xlu2 %v16539_v46 }
0x18e3   :  { %v8953_v63 = vpop.f32.mrf.mxu2 }
0x18e4   :  { %v8984_v44 = vadd.f32 %v8953_v63, %v16222_v9 }
0x18e6   :  { %v9004_v19 = vadd.f32 %v16507_v54, %v8984_v44 }
0x18e8   :  { %v16545_v13 = vadd.f32 %v9004_v19, %v17398_v45  ;;  %v17409_v19 = vld [vmem:[#allocation17_spill] sm:$0xff] }
0x18ea   :  { %9044 = vadd.xlane.f32.xlu2 %v16545_v13 }
0x18eb   :  { %v8955_v11 = vpop.f32.mrf.mxu2 }
0x18ec   :  { %v8985_v27 = vadd.f32 %v8955_v11, %v7902_v57 }
0x18ee   :  { %v9005_v1 = vadd.f32 %v16507_v54, %v8985_v27 }
0x18f0   :  { %v16562_v28 = vadd.f32 %v9005_v1, %v17402_v47 }
0x192d   :  { %v9033_v60 = vpop.xlane.xlu0 %9032 }
0x192e   :  { %v9064_v18 = vmul.f32 %v9033_v60, %v17401_v24  ;;  %v11410_v60 = vld [vmem:[%s17249_s18 + $0x70] sm:$0xf] }
0x1930   :  { %v16552_v38 = vsub.f32 %v9014_v32, %v9064_v18 }
0x1932   :  { %v9096_v9 = vmul.f32 %v16552_v38, %v16552_v38 }
0x1933   :  { %v8958_v53 = vpop.f32.mrf.mxu2 }
0x1934   :  { %9112 = vadd.xlane.f32.xlu0 %v9096_v9  ;;  %v8986_v48 = vadd.f32 %v8958_v53, %v16277_v52  ;;  %v7904_v52 = vadd.f32 %v16279_v29, %v6811_v6 }
0x1935   :  { %v9035_v36 = vpop.xlane.xlu1 %9034 }
0x1936   :  { %v9065_v26 = vmul.f32 %v9035_v36, %v17401_v24  ;;  %v9006_v16 = vadd.f32 %v16507_v54, %v8986_v48  ;;  %v17410_v36 = vld [vmem:[#allocation11_spill] sm:$0xff] }
0x1938   :  { %v16558_v37 = vsub.f32 %v9015_v10, %v9065_v26  ;;  %v16575_v5 = vadd.f32 %v9006_v16, %v17405_v41  ;;  %v17413_v16 = vld [vmem:[#allocation18_spill] sm:$0xff] }
0x193a   :  { %v9097_v49 = vmul.f32 %v16558_v37, %v16558_v37 }
0x193b   :  { %v8960_v32 = vpop.f32.mrf.mxu2 }
0x193c   :  { %9046 = vadd.xlane.f32.xlu0 %v16562_v28  ;;  %9114 = vadd.xlane.f32.xlu1 %v9097_v49  ;;  %v8987_v34 = vadd.f32 %v8960_v32, %v7904_v52  ;;  %v17411_v49 = vld [vmem:[#allocation40_spill] sm:$0xff]  ;;  %v17412_v32 = vld [vmem:[#allocation31_spill] sm:$0xff] }
0x193d   :  { %v9037_v20 = vpop.xlane.xlu2 %9036 }
0x193e   :  { %v9066_v10 = vmul.f32 %v9037_v20, %v17401_v24  ;;  %v9007_v42 = vadd.f32 %v16507_v54, %v8987_v34  ;;  %v6821_v20 = vadd.f32 %v17412_v32, %v17411_v49  ;;  %v11691_v49 = vld [vmem:[%s17249_s18 + $0x14] sm:$0xf0]  ;;  %v11690_v32 = vld [vmem:[%s17249_s18 + $0x14] sm:$0xf] }
0x1940   :  { %v16572_v33 = vsub.f32 %v9016_v14, %v9066_v10  ;;  %v16588_v30 = vadd.f32 %v9007_v42, %v17406_v15  ;;  %v11404_v15 = vld [vmem:[%s17249_s18 + $0x68] sm:$0xf0] }
0x1942   :  { %v9098_v51 = vmul.f32 %v16572_v33, %v16572_v33 }
0x1943   :  { %v8963_v21 = vpop.f32.mrf.mxu2 }
0x1944   :  { %9048 = vadd.xlane.f32.xlu0 %v16575_v5  ;;  %9116 = vadd.xlane.f32.xlu1 %v9098_v51  ;;  %v8988_v29 = vadd.f32 %v8963_v21, %v16284_v22  ;;  %v7906_v22 = vadd.f32 %v16286_v25, %v6816_v61  ;;  %v11703_v25 = vld [vmem:[%s17249_s18 + $0x74] sm:$0xf0]  ;;  %v17414_v21 = vld [vmem:[#allocation19_spill] sm:$0xff] }
0x1945   :  { %v9039_v58 = vpop.xlane.xlu0 %9038  ;;  %v11411_v62 = vor.u32 %v11703_v25, %v11410_v60  ;;  %v11378_v25 = vld [vmem:[%s17249_s18 + $0x30] sm:$0xf] }
0x1946   :  { %v9067_v39 = vmul.f32 %v9039_v58, %v17401_v24  ;;  %v9008_v35 = vadd.f32 %v16507_v54, %v8988_v29  ;;  %v17415_v58 = vld [vmem:[#allocation20_spill] sm:$0xff]  ;;  %v11700_v29 = vld [vmem:[%s17249_s18 + $0x64] sm:$0xf] }
0x1947   :  { %9356 = vmatpush.bf16.msrb.mxu3 %v11411_v62 }
0x1948   :  { %v16582_v59 = vsub.f32 %v9017_v12, %v9067_v39  ;;  %v16602_v45 = vadd.f32 %v9008_v35, %v17409_v19  ;;  %v11402_v39 = vld [vmem:[%s17249_s18 + $0x60] sm:$0xf]  ;;  %v11396_v35 = vld [vmem:[%s17249_s18 + $0x58] sm:$0xf0] }
0x194a   :  { %v9099_v14 = vmul.f32 %v16582_v59, %v16582_v59 }
0x194b   :  { %v8965_v0 = vpop.f32.mrf.mxu2 }
0x194c   :  { %9118 = vadd.xlane.f32.xlu2 %v9099_v14  ;;  %9050 = vadd.xlane.f32.xlu1 %v16588_v30  ;;  %v8989_v63 = vadd.f32 %v8965_v0, %v7906_v22  ;;  %v11407_v0 = vor.u32 %v11700_v29, %v11404_v15  ;;  %v11386_v22 = vld [vmem:[%s17249_s18 + $0x40] sm:$0xf] }
0x194d   :  { %v9041_v17 = vpop.xlane.xlu1 %9040 }
0x194e   :  { %v9068_v12 = vmul.f32 %v9041_v17, %v17401_v24  ;;  %v9009_v18 = vadd.f32 %v16507_v54, %v8989_v63  ;;  %v11394_v17 = vld [vmem:[%s17249_s18 + $0x50] sm:$0xf]  ;;  %v11697_v63 = vld [vmem:[%s17249_s18 + $0x44] sm:$0xf0] }
0x194f   :  { %v11395_v61 = vor.u32 %v11699_v43, %v11394_v17  ;;  %v11387_v19 = vor.u32 %v11697_v63, %v11386_v22  ;;  %v16748_v17 = vld [vmem:[%s17255_s24] ss:$0 sm:$0xff]  ;;  %v17417_v22 = vld [vmem:[#allocation34_spill] sm:$0xff] }
0x1950   :  { %v16597_v50 = vsub.f32 %v16532_v7, %v9068_v12  ;;  %v11702_v7 = vld [vmem:[%s17249_s18 + $0x74] sm:$0xf]  ;;  %v16624_v1 = vadd.f32 %v9009_v18, %v17410_v36  ;;  %v11399_v12 = vor.u32 %v11698_v8, %v11396_v35 }
0x1951   :  { %v11415_v27 = vor.u32 %v11702_v7, %v11412_v2  ;;  %v11695_v7 = vld [vmem:[%s17249_s18 + $0x34] sm:$0xf0]  ;;  %v11380_v2 = vld [vmem:[%s17249_s18 + $0x38] sm:$0xf0] }
0x1952   :  { %v9100_v44 = vmul.f32 %v16597_v50, %v16597_v50  ;;  %v11379_v62 = vor.u32 %v11695_v7, %v11378_v25  ;;  %v16761_v25 = vld [vmem:[%s17256_s25] ss:$0 sm:$0xff] }
0x1953   :  { %v8968_v11 = vpop.f32.mrf.mxu2  ;;  %9405 = vmatpush.bf16.msra.mxu0 %v11415_v27  ;;  %v11693_v27 = vld [vmem:[%s17249_s18 + $0x24] sm:$0xf0] }
0x1954   :  { %9120 = vadd.xlane.f32.xlu2 %v9100_v44  ;;  %9052 = vadd.xlane.f32.xlu1 %v16602_v45  ;;  %v8990_v53 = vadd.f32 %v8968_v11, %v16291_v40  ;;  %v7908_v40 = vadd.f32 %v16293_v3, %v6821_v20  ;;  %v11696_v44 = vld [vmem:[%s17249_s18 + $0x44] sm:$0xf]  ;;  %v11388_v11 = vld [vmem:[%s17249_s18 + $0x48] sm:$0xf0] }
0x1955   :  { %v9043_v23 = vpop.xlane.xlu2 %9042  ;;  %v11391_v60 = vor.u32 %v11696_v44, %v11388_v11 }
0x1956   :  { %v9069_v57 = vmul.f32 %v9043_v23, %v17401_v24  ;;  %v11694_v23 = vld [vmem:[%s17249_s18 + $0x34] sm:$0xf] }
0x1957   :  { %9406 = vmatpush.bf16.msra.mxu0 %v11407_v0  ;;  %v11383_v18 = vor.u32 %v11694_v23, %v11380_v2 }
0x1958   :  { %v16620_v9 = vsub.f32 %v16539_v46, %v9069_v57  ;;  %v9010_v46 = vadd.f32 %v16507_v54, %v8990_v53  ;;  %v11370_v57 = vld [vmem:[%s17249_s18 + $0x20] sm:$0xf]  ;;  %v11692_v53 = vld [vmem:[%s17249_s18 + $0x24] sm:$0xf] }
0x1959   :  { %v11371_v36 = vor.u32 %v11693_v27, %v11370_v57 }
0x195a   :  { %v9101_v26 = vmul.f32 %v16620_v9, %v16620_v9  ;;  %v16638_v10 = vadd.f32 %v9010_v46, %v17413_v16  ;;  %v11364_v46 = vld [vmem:[%s17249_s18 + $0x18] sm:$0xf0]  ;;  %v11688_v16 = vld [vmem:[%s17249_s18 + $0x4] sm:$0xf] }
0x195b   :  { %v8970_v48 = vpop.f32.mrf.mxu2  ;;  %9407 = vmatpush.bf16.msra.mxu0 %v11399_v12  ;;  %v17416_v12 = vld [vmem:[#allocation42_spill] sm:$0xff] }
0x195c   :  { %9054 = vadd.xlane.f32.xlu2 %v16624_v1  ;;  %9122 = vadd.xlane.f32.xlu0 %v9101_v26  ;;  %v8991_v6 = vadd.f32 %v8970_v48, %v7908_v40  ;;  %v11372_v26 = vld [vmem:[%s17249_s18 + $0x28] sm:$0xf0]  ;;  %v11354_v40 = vld [vmem:[%s17249_s18] sm:$0xf] }
0x195d   :  { %v9045_v47 = vpop.xlane.xlu2 %9044  ;;  %v11375_v48 = vor.u32 %v11692_v53, %v11372_v26 }
0x195e   :  { %v9070_v4 = vmul.f32 %v9045_v47, %v17401_v24  ;;  %v9011_v34 = vadd.f32 %v16507_v54, %v8991_v6  ;;  %v11362_v47 = vld [vmem:[%s17249_s18 + $0x10] sm:$0xf]  ;;  %v11689_v6 = vld [vmem:[%s17249_s18 + $0x4] sm:$0xf0] }
0x195f   :  { %9408 = vmatpush.bf16.msra.mxu0 %v11391_v60  ;;  %v11363_v20 = vor.u32 %v11691_v49, %v11362_v47 }
0x1960   :  { %v16635_v31 = vsub.f32 %v16545_v13, %v9070_v4  ;;  %v16646_v3 = vadd.f32 %v9011_v34, %v17414_v21  ;;  %v11367_v4 = vor.u32 %v11690_v32, %v11364_v46  ;;  %v11356_v34 = vld [vmem:[%s17249_s18 + $0x8] sm:$0xf0] }
0x1962   :  { %v9102_v52 = vmul.f32 %v16635_v31, %v16635_v31 }
0x1963   :  { %v8973_v41 = vpop.f32.mrf.mxu2  ;;  %9409 = vmatpush.bf16.msra.mxu0 %v11383_v18 }
0x1964   :  { %9056 = vadd.xlane.f32.xlu2 %v16638_v10  ;;  %9124 = vadd.xlane.f32.xlu0 %v9102_v52  ;;  %v8992_v51 = vadd.f32 %v8973_v41, %v16298_v56  ;;  %v11701_v56 = vld [vmem:[%s17249_s18 + $0x64] sm:$0xf0]  ;;  %v11355_v52 = vor.u32 %v11689_v6, %v11354_v40  ;;  %v11359_v41 = vor.u32 %v11688_v16, %v11356_v34 }
0x1965   :  { %v11403_v14 = vor.u32 %v11701_v56, %v11402_v39 }
0x1966   :  { %v9012_v13 = vadd.f32 %v16507_v54, %v8992_v51 }
0x1967   :  { %9357 = vmatpush.bf16.msrb.mxu3 %v11403_v14  ;;  %9410 = vmatpush.bf16.msra.mxu0 %v11375_v48 }
0x1968   :  { %v16651_v42 = vadd.f32 %v9012_v13, %v17415_v58 }
0x196b   :  { %9358 = vmatpush.bf16.msrb.mxu3 %v11395_v61  ;;  %9411 = vmatpush.bf16.msra.mxu0 %v11367_v4 }
0x196c   :  { %9058 = vadd.xlane.f32.xlu0 %v16646_v3 }
0x196f   :  { %9359 = vmatpush.bf16.msrb.mxu3 %v11387_v19  ;;  %9412 = vmatpush.bf16.msra.mxu0 %v11359_v41 }
0x1973   :  { %9360 = vmatpush.bf16.msrb.mxu3 %v11379_v62 }
0x1974   :  { %9060 = vadd.xlane.f32.xlu0 %v16651_v42 }
0x1977   :  { %9361 = vmatpush.bf16.msrb.mxu3 %v11371_v36 }
0x197b   :  { %9362 = vmatpush.bf16.msrb.mxu3 %v11363_v20  ;;  %v17418_v20 = vld [vmem:[#allocation21_spill] sm:$0xff] }
0x197f   :  { %9363 = vmatpush.bf16.msrb.mxu3 %v11355_v52 }
0x19a7   :  { %v9113_v51 = vpop.xlane.xlu0 %9112 }
0x19a8   :  { %v9144_v21 = vmul.f32 0.007874016, %v9113_v51 }
0x19aa   :  { %12311 = vrcp.f32 %v9144_v21 }
0x19af   :  { %v9047_v13 = vpop.xlane.xlu0 %9046  ;;  %v9115_v58 = vpop.xlane.xlu1 %9114 }
0x19b0   :  { %v12312_v39 = vpop.eup %12311  ;;  %v9071_v56 = vmul.f32 %v9047_v13, %v17401_v24  ;;  %v9145_v29 = vmul.f32 0.007874016, %v9115_v58 }
0x19b1   :  { %v9176_v15 = vmul.f32 %v12312_v39, %v16552_v38  ;;  %v8975_v38 = vpop.f32.mrf.mxu2 }
0x19b2   :  { %v16740_v14 = vsub.f32 %v16562_v28, %v9071_v56  ;;  %12313 = vrcp.f32 %v9145_v29  ;;  %v6826_v28 = vadd.f32 %v17417_v22, %v17416_v12 }
0x19b3   :  { %v9192_v43 = vadd.f32 1e-12, %v9176_v15 }
0x19b4   :  { %v9103_v0 = vmul.f32 %v16740_v14, %v16740_v14  ;;  %v7910_v11 = vadd.f32 %v16300_v55, %v6826_v28 }
0x19b5   :  { %v9211_v7 = vmul.f32 %v16748_v17, %v9192_v43 }
0x19b6   :  { %9126 = vadd.xlane.f32.xlu1 %v9103_v0  ;;  %v8993_v62 = vadd.f32 %v8975_v38, %v7910_v11 }
0x19b7   :  { %v9049_v8 = vpop.xlane.xlu0 %9048  ;;  %v9117_v61 = vpop.xlane.xlu1 %9116  ;;  %v16768_v55 = vadd.f32 %v16761_v25, %v9211_v7 }
0x19b8   :  { %v12314_v35 = vpop.eup %12313  ;;  %v9072_v63 = vmul.f32 %v9049_v8, %v17401_v24  ;;  %v9146_v44 = vmul.f32 0.007874016, %v9117_v61  ;;  %v9013_v53 = vadd.f32 %v16507_v54, %v8993_v62 }
0x19b9   :  { %v9177_v19 = vmul.f32 %v12314_v35, %v16558_v37 }
0x19ba   :  { %v16756_v60 = vsub.f32 %v16575_v5, %v9072_v63  ;;  %12315 = vrcp.f32 %v9146_v44  ;;  %v16784_v46 = vadd.f32 %v9013_v53, %v17418_v20  ;;  %v11718_v53 = vld [vmem:[%s17251_s20 + $0x70] sm:$0xff] }
0x19bb   :  { %v9193_v23 = vadd.f32 1e-12, %v9177_v19 }
0x19bc   :  { %v9104_v2 = vmul.f32 %v16756_v60, %v16756_v60 }
0x19bd   :  { %v9212_v37 = vmul.f32 %v16748_v17, %v9193_v23 }
0x19be   :  { %9128 = vadd.xlane.f32.xlu1 %v9104_v2 }
0x19bf   :  { %v16771_v5 = vadd.f32 %v16761_v25, %v9212_v37  ;;  %v9051_v18 = vpop.xlane.xlu1 %9050  ;;  %v9119_v57 = vpop.xlane.xlu2 %9118 }
0x19c0   :  { %v12316_v27 = vpop.eup %12315  ;;  %v9073_v36 = vmul.f32 %v9051_v18, %v17401_v24  ;;  %v9147_v26 = vmul.f32 0.007874016, %v9119_v57 }
0x19c1   :  { %v9246_v48 = vpack.c.bf16 %v16771_v5, %v16768_v55  ;;  %v9178_v49 = vmul.f32 %v12316_v27, %v16572_v33 }
0x19c2   :  { %v16778_v47 = vsub.f32 %v16588_v30, %v9073_v36  ;;  %12317 = vrcp.f32 %v9147_v26  ;;  %v11711_v36 = vld [vmem:[%s17251_s20 + $0x38] sm:$0xff]  ;;  %v11710_v26 = vld [vmem:[%s17251_s20 + $0x30] sm:$0xff] }
0x19c3   :  { %9364 = vmatmul.bf16.vlgmr.msrb.gmra.mxu3 %v9246_v48  ;;  %9413 = vmatmul.bf16.vlgmr.msra.gmra.mxu0 %v9246_v48  ;;  %v9194_v54 = vadd.f32 1e-12, %v9178_v49  ;;  %v11716_v48 = vld [vmem:[%s17251_s20 + $0x60] sm:$0xff]  ;;  %v11709_v49 = vld [vmem:[%s17251_s20 + $0x28] sm:$0xff] }
0x19c4   :  { %v9105_v32 = vmul.f32 %v16778_v47, %v16778_v47  ;;  %9634 = vmatpush.bf16.msra.mxu1 %v11711_v36 }
0x19c5   :  { %v9213_v41 = vmul.f32 %v16748_v17, %v9194_v54  ;;  %v11708_v54 = vld [vmem:[%s17251_s20 + $0x20] sm:$0xff] }
0x19c6   :  { %9130 = vadd.xlane.f32.xlu2 %v9105_v32  ;;  %9062 = vadd.xlane.f32.xlu1 %v16784_v46  ;;  %v11715_v32 = vld [vmem:[%s17251_s20 + $0x58] sm:$0xff] }
0x19c7   :  { %v9053_v4 = vpop.xlane.xlu1 %9052  ;;  %v9121_v40 = vpop.xlane.xlu2 %9120  ;;  %v16797_v39 = vadd.f32 %v16761_v25, %v9213_v41  ;;  %v11712_v41 = vld [vmem:[%s17251_s20 + $0x40] sm:$0xff] }
0x19c8   :  { %v12318_v6 = vpop.eup %12317  ;;  %v9074_v30 = vmul.f32 %v9053_v4, %v17401_v24  ;;  %v9148_v16 = vmul.f32 0.007874016, %v9121_v40  ;;  %9635 = vmatpush.bf16.msra.mxu1 %v11710_v26  ;;  %v11714_v4 = vld [vmem:[%s17251_s20 + $0x50] sm:$0xff]  ;;  %v11707_v40 = vld [vmem:[%s17251_s20 + $0x18] sm:$0xff] }
0x19c9   :  { %v9179_v33 = vmul.f32 %v12318_v6, %v16582_v59  ;;  %v11713_v6 = vld [vmem:[%s17251_s20 + $0x48] sm:$0xff] }
0x19ca   :  { %v16790_v52 = vsub.f32 %v16602_v45, %v9074_v30  ;;  %12319 = vrcp.f32 %v9148_v16  ;;  %v11706_v30 = vld [vmem:[%s17251_s20 + $0x10] sm:$0xff] }
0x19cb   :  { %v9195_v34 = vadd.f32 1e-12, %v9179_v33 }
0x19cc   :  { %v9106_v51 = vmul.f32 %v16790_v52, %v16790_v52  ;;  %9636 = vmatpush.bf16.msra.mxu1 %v11709_v49 }
0x19cd   :  { %v9214_v21 = vmul.f32 %v16748_v17, %v9195_v34 }
0x19ce   :  { %9132 = vadd.xlane.f32.xlu2 %v9106_v51  ;;  %v11705_v51 = vld [vmem:[%s17251_s20 + $0x8] sm:$0xff] }
0x19cf   :  { %v9123_v13 = vpop.xlane.xlu0 %9122  ;;  %v9055_v58 = vpop.xlane.xlu2 %9054  ;;  %v16800_v59 = vadd.f32 %v16761_v25, %v9214_v21 }
0x19d0   :  { %v12320_v45 = vpop.eup %12319  ;;  %v9149_v56 = vmul.f32 0.007874016, %v9123_v13  ;;  %v9075_v29 = vmul.f32 %v9055_v58, %v17401_v24  ;;  %9637 = vmatpush.bf16.msra.mxu1 %v11708_v54  ;;  %v11704_v13 = vld [vmem:[%s17251_s20] sm:$0xff] }
0x19d1   :  { %v9247_v15 = vpack.c.bf16 %v16800_v59, %v16797_v39  ;;  %v9180_v43 = vmul.f32 %v12320_v45, %v16597_v50 }
0x19d2   :  { %12321 = vrcp.f32 %v9149_v56  ;;  %v16806_v0 = vsub.f32 %v16624_v1, %v9075_v29 }
0x19d3   :  { %9369 = vmatmul.bf16.gmra.mxu3 %v9247_v15  ;;  %9418 = vmatmul.bf16.gmra.mxu0 %v9247_v15  ;;  %v9196_v61 = vadd.f32 1e-12, %v9180_v43 }
0x19d4   :  { %v9107_v8 = vmul.f32 %v16806_v0, %v16806_v0  ;;  %9638 = vmatpush.bf16.msra.mxu1 %v11707_v40 }
0x19d5   :  { %v9215_v50 = vmul.f32 %v16748_v17, %v9196_v61 }
0x19d6   :  { %9134 = vadd.xlane.f32.xlu0 %v9107_v8 }
0x19d7   :  { %v9125_v35 = vpop.xlane.xlu0 %9124  ;;  %v9057_v12 = vpop.xlane.xlu2 %9056  ;;  %v16821_v7 = vadd.f32 %v16761_v25, %v9215_v50 }
0x19d8   :  { %v12322_v22 = vpop.eup %12321  ;;  %v9076_v28 = vmul.f32 %v9057_v12, %v17401_v24  ;;  %v9150_v20 = vmul.f32 0.007874016, %v9125_v35  ;;  %9639 = vmatpush.bf16.msra.mxu1 %v11706_v30 }
0x19d9   :  { %v9181_v63 = vmul.f32 %v12322_v22, %v16620_v9 }
0x19da   :  { %v16814_v44 = vsub.f32 %v16638_v10, %v9076_v28  ;;  %12323 = vrcp.f32 %v9150_v20 }
0x19db   :  { %v9197_v1 = vadd.f32 1e-12, %v9181_v63 }
0x19dc   :  { %v9108_v38 = vmul.f32 %v16814_v44, %v16814_v44  ;;  %9640 = vmatpush.bf16.msra.mxu1 %v11705_v51 }
0x19dd   :  { %v9216_v19 = vmul.f32 %v16748_v17, %v9197_v1 }
0x19de   :  { %9136 = vadd.xlane.f32.xlu1 %v9108_v38 }
0x19df   :  { %v9059_v11 = vpop.xlane.xlu0 %9058  ;;  %v16824_v23 = vadd.f32 %v16761_v25, %v9216_v19 }
0x19e0   :  { %v9077_v9 = vmul.f32 %v9059_v11, %v17401_v24  ;;  %v12324_v33 = vpop.eup %12323  ;;  %9641 = vmatpush.bf16.msra.mxu1 %v11704_v13  ;;  %v9270_v11 = vld [vmem:[%s17250_s19] sm:$0x3] }
0x19e1   :  { %v9248_v10 = vpack.c.bf16 %v16824_v23, %v16821_v7  ;;  %v9182_v21 = vmul.f32 %v12324_v33, %v16635_v31 }
0x19e2   :  { %v16830_v62 = vsub.f32 %v16646_v3, %v9077_v9  ;;  %v11719_v3 = vld [vmem:[%s17251_s20 + $0x78] sm:$0xff] }
0x19e3   :  { %9374 = vmatmul.bf16.gmra.mxu3 %v9248_v10  ;;  %9423 = vmatmul.bf16.gmra.mxu0 %v9248_v10  ;;  %v9198_v58 = vadd.f32 1e-12, %v9182_v21 }
0x19e4   :  { %v9109_v2 = vmul.f32 %v16830_v62, %v16830_v62  ;;  %9683 = vmatpush.bf16.msra.mxu2 %v11719_v3 }
0x19e5   :  { %v9217_v8 = vmul.f32 %v16748_v17, %v9198_v58 }
0x19e6   :  { %9138 = vadd.xlane.f32.xlu2 %v9109_v2 }
0x19e7   :  { %v9061_v37 = vpop.xlane.xlu0 %9060  ;;  %v16893_v12 = vadd.f32 %v16761_v25, %v9217_v8 }
0x19e8   :  { %v9078_v18 = vmul.f32 %v9061_v37, %v17401_v24  ;;  %9684 = vmatpush.bf16.msra.mxu2 %v11718_v53 }
0x19ea   :  { %v16836_v57 = vsub.f32 %v16651_v42, %v9078_v18  ;;  %v11717_v42 = vld [vmem:[%s17251_s20 + $0x68] sm:$0xff] }
0x19ec   :  { %v9110_v27 = vmul.f32 %v16836_v57, %v16836_v57  ;;  %9685 = vmatpush.bf16.msra.mxu2 %v11717_v42 }
0x19ee   :  { %9140 = vadd.xlane.f32.xlu0 %v9110_v27  ;;  %v16911_v27 = vperm.slane %v9270_v11, 1 }
0x19f0   :  { %9686 = vmatpush.bf16.msra.mxu2 %v11716_v48  ;;  %v16916_v48 = vperm.slane %v9270_v11, 0 }
0x19f4   :  { %9687 = vmatpush.bf16.msra.mxu2 %v11715_v32 }
0x19f8   :  { %9688 = vmatpush.bf16.msra.mxu2 %v11714_v4 }
0x19fc   :  { %9689 = vmatpush.bf16.msra.mxu2 %v11713_v6 }
0x1a00   :  { %9690 = vmatpush.bf16.msra.mxu2 %v11712_v41 }
0x1a29   :  { %v9127_v16 = vpop.xlane.xlu1 %9126 }
0x1a2a   :  { %v9151_v34 = vmul.f32 0.007874016, %v9127_v16 }
0x1a2c   :  { %12325 = vrcp.f32 %v9151_v34 }
0x1a31   :  { %v9129_v45 = vpop.xlane.xlu1 %9128 }
0x1a32   :  { %v12326_v56 = vpop.eup %12325  ;;  %v9152_v29 = vmul.f32 0.007874016, %v9129_v45 }
0x1a33   :  { %v9183_v15 = vmul.f32 %v12326_v56, %v16740_v14 }
0x1a34   :  { %12327 = vrcp.f32 %v9152_v29 }
0x1a35   :  { %v9199_v43 = vadd.f32 1e-12, %v9183_v15 }
0x1a37   :  { %v9218_v61 = vmul.f32 %v16748_v17, %v9199_v43 }
0x1a39   :  { %v9131_v35 = vpop.xlane.xlu2 %9130  ;;  %v9063_v31 = vpop.xlane.xlu1 %9062  ;;  %v16896_v22 = vadd.f32 %v16761_v25, %v9218_v61 }
0x1a3a   :  { %v12328_v28 = vpop.eup %12327  ;;  %v9153_v63 = vmul.f32 0.007874016, %v9131_v35  ;;  %v9079_v1 = vmul.f32 %v9063_v31, %v17401_v24 }
0x1a3b   :  { %v9249_v14 = vpack.c.bf16 %v16896_v22, %v16893_v12  ;;  %v9184_v38 = vmul.f32 %v12328_v28, %v16756_v60 }
0x1a3c   :  { %12329 = vrcp.f32 %v9153_v63  ;;  %v16902_v50 = vsub.f32 %v16784_v46, %v9079_v1 }
0x1a3d   :  { %9379 = vmatmul.bf16.gmra.mxu3 %v9249_v14  ;;  %9428 = vmatmul.bf16.gmra.mxu0 %v9249_v14  ;;  %v9200_v10 = vadd.f32 1e-12, %v9184_v38 }
0x1a3e   :  { %v9111_v19 = vmul.f32 %v16902_v50, %v16902_v50 }
0x1a3f   :  { %v9219_v3 = vmul.f32 %v16748_v17, %v9200_v10 }
0x1a40   :  { %v9414_v9 = vpop.f32.mrf.mxu0  ;;  %9142 = vadd.xlane.f32.xlu1 %v9111_v19 }
0x1a41   :  { %v9133_v2 = vpop.xlane.xlu2 %9132  ;;  %v9415_v36 = vadd.f32 %v9414_v9, %v16911_v27  ;;  %v16920_v20 = vadd.f32 %v16761_v25, %v9219_v3 }
0x1a42   :  { %v12330_v37 = vpop.eup %12329  ;;  %v9154_v18 = vmul.f32 0.007874016, %v9133_v2 }
0x1a43   :  { %v9185_v46 = vmul.f32 %v12330_v37, %v16778_v47  ;;  %v9455_v40 = vmax.f32 %v9415_v36, 0.0 }
0x1a44   :  { %12331 = vrcp.f32 %v9154_v18 }
0x1a45   :  { %v9201_v60 = vadd.f32 1e-12, %v9185_v46 }
0x1a46   :  { %v9365_v53 = vpop.f32.mrf.mxu3 }
0x1a47   :  { %v9220_v42 = vmul.f32 %v16748_v17, %v9201_v60  ;;  %v9366_v33 = vadd.f32 %v9365_v53, %v16916_v48 }
0x1a48   :  { %v9416_v26 = vpop.f32.mrf.mxu0 }
0x1a49   :  { %v9417_v49 = vadd.f32 %v9416_v26, %v16911_v27  ;;  %v9135_v32 = vpop.xlane.xlu0 %9134  ;;  %v16923_v47 = vadd.f32 %v16761_v25, %v9220_v42  ;;  %v9454_v58 = vmax.f32 %v9366_v33, 0.0 }
0x1a4a   :  { %v12332_v54 = vpop.eup %12331  ;;  %v9155_v4 = vmul.f32 0.007874016, %v9135_v32 }
0x1a4b   :  { %v9457_v6 = vmax.f32 %v9417_v49, 0.0  ;;  %v9250_v30 = vpack.c.bf16 %v16923_v47, %v16920_v20  ;;  %v9186_v16 = vmul.f32 %v12332_v54, %v16790_v52 }
0x1a4c   :  { %12333 = vrcp.f32 %v9155_v4 }
0x1a4d   :  { %v9487_v34 = vpack.c.bf16 %v9457_v6, %v9455_v40  ;;  %9384 = vmatmul.bf16.gmra.mxu3 %v9250_v30  ;;  %9433 = vmatmul.bf16.gmra.mxu0 %v9250_v30  ;;  %v9202_v13 = vadd.f32 1e-12, %v9186_v16 }
0x1a4e   :  { %v9367_v41 = vpop.f32.mrf.mxu3 }
0x1a4f   :  { %v9368_v51 = vadd.f32 %v9367_v41, %v16916_v48  ;;  %9691 = vmatmul.bf16.vlgmr.msra.gmra.mxu2 %v9487_v34  ;;  %v9221_v61 = vmul.f32 %v16748_v17, %v9202_v13 }
0x1a50   :  { %v9419_v21 = vpop.f32.mrf.mxu0 }
0x1a51   :  { %v9456_v45 = vmax.f32 %v9368_v51, 0.0  ;;  %v9137_v56 = vpop.xlane.xlu1 %9136  ;;  %v9420_v31 = vadd.f32 %v9419_v21, %v16911_v27  ;;  %v16936_v38 = vadd.f32 %v16761_v25, %v9221_v61 }
0x1a52   :  { %v12334_v29 = vpop.eup %12333  ;;  %v9156_v15 = vmul.f32 0.007874016, %v9137_v56 }
0x1a53   :  { %v9187_v43 = vmul.f32 %v12334_v29, %v16806_v0  ;;  %v9486_v8 = vpack.c.bf16 %v9456_v45, %v9454_v58  ;;  %v9459_v9 = vmax.f32 %v9420_v31, 0.0 }
0x1a54   :  { %12335 = vrcp.f32 %v9156_v15 }
0x1a55   :  { %v9203_v52 = vadd.f32 1e-12, %v9187_v43  ;;  %9642 = vmatmul.bf16.vlgmr.msra.gmra.mxu1 %v9486_v8 }
0x1a56   :  { %v9370_v35 = vpop.f32.mrf.mxu3 }
0x1a57   :  { %v9222_v28 = vmul.f32 %v16748_v17, %v9203_v52  ;;  %v9371_v18 = vadd.f32 %v9370_v35, %v16916_v48 }
0x1a58   :  { %v9421_v63 = vpop.f32.mrf.mxu0 }
0x1a59   :  { %v9422_v1 = vadd.f32 %v9421_v63, %v16911_v27  ;;  %v9139_v14 = vpop.xlane.xlu2 %9138  ;;  %v16939_v0 = vadd.f32 %v16761_v25, %v9222_v28  ;;  %v9458_v42 = vmax.f32 %v9371_v18, 0.0 }
0x1a5a   :  { %v12336_v19 = vpop.eup %12335  ;;  %v9157_v11 = vmul.f32 0.007874016, %v9139_v14 }
0x1a5b   :  { %v9461_v10 = vmax.f32 %v9422_v1, 0.0  ;;  %v9251_v2 = vpack.c.bf16 %v16939_v0, %v16936_v38  ;;  %v9188_v37 = vmul.f32 %v12336_v19, %v16814_v44 }
0x1a5c   :  { %12337 = vrcp.f32 %v9157_v11 }
0x1a5d   :  { %v9489_v46 = vpack.c.bf16 %v9461_v10, %v9459_v9  ;;  %9389 = vmatmul.bf16.gmra.mxu3 %v9251_v2  ;;  %9438 = vmatmul.bf16.gmra.mxu0 %v9251_v2  ;;  %v9204_v36 = vadd.f32 1e-12, %v9188_v37 }
0x1a5e   :  { %v9372_v60 = vpop.f32.mrf.mxu3 }
0x1a5f   :  { %v9373_v3 = vadd.f32 %v9372_v60, %v16916_v48  ;;  %9696 = vmatmul.bf16.gmra.mxu2 %v9489_v46  ;;  %v9223_v44 = vmul.f32 %v16748_v17, %v9204_v36 }
0x1a60   :  { %v9424_v53 = vpop.f32.mrf.mxu0 }
0x1a61   :  { %v9460_v26 = vmax.f32 %v9373_v3, 0.0  ;;  %v9425_v6 = vadd.f32 %v9424_v53, %v16911_v27  ;;  %v16952_v34 = vadd.f32 %v16761_v25, %v9223_v44  ;;  %v9141_v8 = vpop.xlane.xlu0 %9140 }
0x1a62   :  { %v12338_v49 = vpop.eup %12337  ;;  %v9158_v52 = vmul.f32 0.007874016, %v9141_v8 }
0x1a63   :  { %v9189_v32 = vmul.f32 %v12338_v49, %v16830_v62  ;;  %v9488_v54 = vpack.c.bf16 %v9460_v26, %v9458_v42  ;;  %v9463_v62 = vmax.f32 %v9425_v6, 0.0 }
0x1a64   :  { %12339 = vrcp.f32 %v9158_v52 }
0x1a65   :  { %v9205_v4 = vadd.f32 1e-12, %v9189_v32  ;;  %9647 = vmatmul.bf16.gmra.mxu1 %v9488_v54 }
0x1a66   :  { %v9375_v40 = vpop.f32.mrf.mxu3 }
0x1a67   :  { %v9224_v30 = vmul.f32 %v16748_v17, %v9205_v4  ;;  %v9376_v13 = vadd.f32 %v9375_v40, %v16916_v48 }
0x1a68   :  { %v9426_v16 = vpop.f32.mrf.mxu0 }
0x1a69   :  { %v9427_v33 = vadd.f32 %v9426_v16, %v16911_v27  ;;  %v16955_v41 = vadd.f32 %v16761_v25, %v9224_v30  ;;  %v9462_v29 = vmax.f32 %v9376_v13, 0.0 }
0x1a6a   :  { %v12340_v35 = vpop.eup %12339 }
0x1a6b   :  { %v9465_v51 = vmax.f32 %v9427_v33, 0.0  ;;  %v9252_v21 = vpack.c.bf16 %v16955_v41, %v16952_v34  ;;  %v9190_v28 = vmul.f32 %v12340_v35, %v16836_v57 }
0x1a6d   :  { %v9491_v58 = vpack.c.bf16 %v9465_v51, %v9463_v62  ;;  %9394 = vmatmul.bf16.gmra.mxu3 %v9252_v21  ;;  %9443 = vmatmul.bf16.gmra.mxu0 %v9252_v21  ;;  %v9206_v1 = vadd.f32 1e-12, %v9190_v28 }
0x1a6e   :  { %v9377_v45 = vpop.f32.mrf.mxu3 }
0x1a6f   :  { %v9378_v56 = vadd.f32 %v9377_v45, %v16916_v48  ;;  %9701 = vmatmul.bf16.gmra.mxu2 %v9491_v58  ;;  %v9225_v9 = vmul.f32 %v16748_v17, %v9206_v1 }
0x1a71   :  { %v9464_v15 = vmax.f32 %v9378_v56, 0.0  ;;  %v16968_v60 = vadd.f32 %v16761_v25, %v9225_v9 }
0x1a73   :  { %v9490_v43 = vpack.c.bf16 %v9464_v15, %v9462_v29 }
0x1a75   :  { %9652 = vmatmul.bf16.gmra.mxu1 %v9490_v43 }
0x1ab3   :  { %v9143_v61 = vpop.xlane.xlu1 %9142 }
0x1ab4   :  { %v9159_v31 = vmul.f32 0.007874016, %v9143_v61 }
0x1ab6   :  { %12341 = vrcp.f32 %v9159_v31 }
0x1aba   :  { %v9429_v63 = vpop.f32.mrf.mxu0 }
0x1abb   :  { %v9430_v2 = vadd.f32 %v9429_v63, %v16911_v27 }
0x1abc   :  { %v12342_v14 = vpop.eup %12341 }
0x1abd   :  { %v9191_v19 = vmul.f32 %v12342_v14, %v16902_v50  ;;  %v9467_v3 = vmax.f32 %v9430_v2, 0.0 }
0x1abf   :  { %v9207_v11 = vadd.f32 1e-12, %v9191_v19 }
0x1ac0   :  { %v9380_v10 = vpop.f32.mrf.mxu3 }
0x1ac1   :  { %v9226_v37 = vmul.f32 %v16748_v17, %v9207_v11  ;;  %v9381_v36 = vadd.f32 %v9380_v10, %v16916_v48 }
0x1ac2   :  { %v9431_v18 = vpop.f32.mrf.mxu0 }
0x1ac3   :  { %v9432_v46 = vadd.f32 %v9431_v18, %v16911_v27  ;;  %v16971_v57 = vadd.f32 %v16761_v25, %v9226_v37  ;;  %v9466_v32 = vmax.f32 %v9381_v36, 0.0  ;;  %v16980_v25 = vld [vmem:[%s17252_s21] ss:$0 sm:$0xff] }
0x1ac5   :  { %v9469_v53 = vmax.f32 %v9432_v46, 0.0  ;;  %v9253_v50 = vpack.c.bf16 %v16971_v57, %v16968_v60 }
0x1ac7   :  { %v9493_v42 = vpack.c.bf16 %v9469_v53, %v9467_v3  ;;  %9399 = vmatmul.bf16.gmra.mxu3 %v9253_v50  ;;  %9448 = vmatmul.bf16.gmra.mxu0 %v9253_v50 }
0x1ac8   :  { %v9382_v17 = vpop.f32.mrf.mxu3 }
0x1ac9   :  { %v9383_v26 = vadd.f32 %v9382_v17, %v16916_v48  ;;  %9706 = vmatmul.bf16.gmra.mxu2 %v9493_v42 }
0x1aca   :  { %v9434_v49 = vpop.f32.mrf.mxu0 }
0x1acb   :  { %v9468_v54 = vmax.f32 %v9383_v26, 0.0  ;;  %v9435_v40 = vadd.f32 %v9434_v49, %v16911_v27 }
0x1acd   :  { %v9492_v4 = vpack.c.bf16 %v9468_v54, %v9466_v32  ;;  %v9471_v51 = vmax.f32 %v9435_v40, 0.0 }
0x1acf   :  { %9657 = vmatmul.bf16.gmra.mxu1 %v9492_v4 }
0x1ad0   :  { %v9385_v44 = vpop.f32.mrf.mxu3 }
0x1ad1   :  { %v9386_v58 = vadd.f32 %v9385_v44, %v16916_v48 }
0x1ad2   :  { %v9436_v6 = vpop.f32.mrf.mxu0  ;;  %v9643_v30 = vpop.f32.mrf.mxu1 }
0x1ad3   :  { %v9437_v16 = vadd.f32 %v9436_v6, %v16911_v27  ;;  %v9644_v33 = vadd.f32 %v16980_v25, %v9643_v30  ;;  %v9692_v62 = vpop.f32.mrf.mxu2  ;;  %v9470_v52 = vmax.f32 %v9386_v58, 0.0 }
0x1ad5   :  { %v9473_v21 = vmax.f32 %v9437_v16, 0.0  ;;  %v9693_v13 = vadd.f32 %v9692_v62, %v9644_v33 }
0x1ad7   :  { %v9495_v45 = vpack.c.bf16 %v9473_v21, %v9471_v51  ;;  %v16987_v56 = vadd.f32 %v9693_v13, %v16768_v55 }
0x1ad8   :  { %v9387_v29 = vpop.f32.mrf.mxu3 }
0x1ad9   :  { %v9388_v15 = vadd.f32 %v9387_v29, %v16916_v48  ;;  %9750 = vadd.xlane.f32.xlu2 %v16987_v56  ;;  %9711 = vmatmul.bf16.gmra.mxu2 %v9495_v45 }
0x1ada   :  { %v9439_v43 = vpop.f32.mrf.mxu0  ;;  %v9645_v8 = vpop.f32.mrf.mxu1 }
0x1adb   :  { %v9472_v61 = vmax.f32 %v9388_v15, 0.0  ;;  %v9646_v35 = vadd.f32 %v16980_v25, %v9645_v8  ;;  %v9694_v31 = vpop.f32.mrf.mxu2  ;;  %v9440_v14 = vadd.f32 %v9439_v43, %v16911_v27 }
0x1add   :  { %v9494_v28 = vpack.c.bf16 %v9472_v61, %v9470_v52  ;;  %v9695_v63 = vadd.f32 %v9694_v31, %v9646_v35  ;;  %v9475_v37 = vmax.f32 %v9440_v14, 0.0 }
0x1adf   :  { %v16993_v1 = vadd.f32 %v9695_v63, %v16771_v5  ;;  %9662 = vmatmul.bf16.gmra.mxu1 %v9494_v28 }
0x1ae0   :  { %v9390_v55 = vpop.f32.mrf.mxu3 }
0x1ae1   :  { %9752 = vadd.xlane.f32.xlu0 %v16993_v1  ;;  %v9391_v3 = vadd.f32 %v9390_v55, %v16916_v48 }
0x1ae2   :  { %v9441_v19 = vpop.f32.mrf.mxu0  ;;  %v9648_v11 = vpop.f32.mrf.mxu1 }
0x1ae3   :  { %v9442_v9 = vadd.f32 %v9441_v19, %v16911_v27  ;;  %v9649_v10 = vadd.f32 %v16980_v25, %v9648_v11  ;;  %v9697_v2 = vpop.f32.mrf.mxu2  ;;  %v9474_v26 = vmax.f32 %v9391_v3, 0.0 }
0x1ae5   :  { %v9477_v18 = vmax.f32 %v9442_v9, 0.0  ;;  %v9698_v46 = vadd.f32 %v9697_v2, %v9649_v10 }
0x1ae7   :  { %v9497_v5 = vpack.c.bf16 %v9477_v18, %v9475_v37  ;;  %v17001_v53 = vadd.f32 %v9698_v46, %v16797_v39 }
0x1ae8   :  { %v9392_v50 = vpop.f32.mrf.mxu3 }
0x1ae9   :  { %v9393_v36 = vadd.f32 %v9392_v50, %v16916_v48  ;;  %9716 = vmatmul.bf16.gmra.mxu2 %v9497_v5  ;;  %9754 = vadd.xlane.f32.xlu1 %v17001_v53 }
0x1aea   :  { %v9444_v42 = vpop.f32.mrf.mxu0  ;;  %v9650_v17 = vpop.f32.mrf.mxu1 }
0x1aeb   :  { %v9476_v49 = vmax.f32 %v9393_v36, 0.0  ;;  %v9651_v32 = vadd.f32 %v16980_v25, %v9650_v17  ;;  %v9699_v54 = vpop.f32.mrf.mxu2  ;;  %v9445_v6 = vadd.f32 %v9444_v42, %v16911_v27 }
0x1aed   :  { %v9496_v4 = vpack.c.bf16 %v9476_v49, %v9474_v26  ;;  %v9700_v44 = vadd.f32 %v9699_v54, %v9651_v32  ;;  %v9479_v21 = vmax.f32 %v9445_v6, 0.0 }
0x1aef   :  { %v17007_v40 = vadd.f32 %v9700_v44, %v16800_v59  ;;  %9667 = vmatmul.bf16.gmra.mxu1 %v9496_v4 }
0x1af0   :  { %v9395_v39 = vpop.f32.mrf.mxu3 }
0x1af1   :  { %9756 = vadd.xlane.f32.xlu2 %v17007_v40  ;;  %v9396_v45 = vadd.f32 %v9395_v39, %v16916_v48 }
0x1af2   :  { %v9446_v30 = vpop.f32.mrf.mxu0  ;;  %v9653_v16 = vpop.f32.mrf.mxu1 }
0x1af3   :  { %v9447_v33 = vadd.f32 %v9446_v30, %v16911_v27  ;;  %v9654_v62 = vadd.f32 %v16980_v25, %v9653_v16  ;;  %v9702_v51 = vpop.f32.mrf.mxu2  ;;  %v9478_v52 = vmax.f32 %v9396_v45, 0.0 }
0x1af5   :  { %v9481_v13 = vmax.f32 %v9447_v33, 0.0  ;;  %v9703_v58 = vadd.f32 %v9702_v51, %v9654_v62 }
0x1af7   :  { %v9499_v59 = vpack.c.bf16 %v9481_v13, %v9479_v21  ;;  %v17015_v29 = vadd.f32 %v9703_v58, %v16821_v7 }
0x1af8   :  { %v9397_v15 = vpop.f32.mrf.mxu3 }
0x1af9   :  { %v9398_v43 = vadd.f32 %v9397_v15, %v16916_v48  ;;  %9758 = vadd.xlane.f32.xlu0 %v17015_v29  ;;  %9721 = vmatmul.bf16.gmra.mxu2 %v9499_v59 }
0x1afa   :  { %v9655_v8 = vpop.f32.mrf.mxu1 }
0x1afb   :  { %v9480_v61 = vmax.f32 %v9398_v43, 0.0  ;;  %v9656_v35 = vadd.f32 %v16980_v25, %v9655_v8  ;;  %v9704_v31 = vpop.f32.mrf.mxu2 }
0x1afd   :  { %v9498_v28 = vpack.c.bf16 %v9480_v61, %v9478_v52  ;;  %v9705_v63 = vadd.f32 %v9704_v31, %v9656_v35 }
0x1aff   :  { %v17021_v55 = vadd.f32 %v9705_v63, %v16824_v23  ;;  %9672 = vmatmul.bf16.gmra.mxu1 %v9498_v28 }
0x1b01   :  { %9760 = vadd.xlane.f32.xlu1 %v17021_v55 }
0x1b44   :  { %v9449_v7 = vpop.f32.mrf.mxu0 }
0x1b45   :  { %v9450_v19 = vadd.f32 %v9449_v7, %v16911_v27 }
0x1b47   :  { %v9483_v46 = vmax.f32 %v9450_v19, 0.0 }
0x1b4a   :  { %v9400_v14 = vpop.f32.mrf.mxu3 }
0x1b4b   :  { %v9401_v23 = vadd.f32 %v9400_v14, %v16916_v48 }
0x1b4c   :  { %v9658_v11 = vpop.f32.mrf.mxu1  ;;  %v9707_v9 = vpop.f32.mrf.mxu2 }
0x1b4d   :  { %v9659_v10 = vadd.f32 %v16980_v25, %v9658_v11  ;;  %v9451_v2 = vpop.f32.mrf.mxu0  ;;  %v9482_v49 = vmax.f32 %v9401_v23, 0.0  ;;  %v9751_v7 = vpop.xlane.xlu2 %9750 }
0x1b4e   :  { %v9452_v37 = vadd.f32 %v9451_v2, %v16911_v27 }
0x1b4f   :  { %v9708_v18 = vadd.f32 %v9707_v9, %v9659_v10 }
0x1b50   :  { %v9485_v3 = vmax.f32 %v9452_v37, 0.0 }
0x1b51   :  { %v17029_v5 = vadd.f32 %v9708_v18, %v16893_v12 }
0x1b52   :  { %v9501_v50 = vpack.c.bf16 %v9485_v3, %v9483_v46  ;;  %v9402_v36 = vpop.f32.mrf.mxu3 }
0x1b53   :  { %v9403_v42 = vadd.f32 %v9402_v36, %v16916_v48  ;;  %9762 = vadd.xlane.f32.xlu2 %v17029_v5 }
0x1b54   :  { %9726 = vmatmul.bf16.gmra.mxu2 %v9501_v50  ;;  %v9660_v17 = vpop.f32.mrf.mxu1  ;;  %v9709_v26 = vpop.f32.mrf.mxu2 }
0x1b55   :  { %v9484_v32 = vmax.f32 %v9403_v42, 0.0  ;;  %v9661_v27 = vadd.f32 %v16980_v25, %v9660_v17 }
0x1b57   :  { %v9500_v54 = vpack.c.bf16 %v9484_v32, %v9482_v49  ;;  %v9710_v4 = vadd.f32 %v9709_v26, %v9661_v27 }
0x1b59   :  { %v17035_v44 = vadd.f32 %v9710_v4, %v16896_v22  ;;  %9677 = vmatmul.bf16.gmra.mxu1 %v9500_v54 }
0x1b5b   :  { %9764 = vadd.xlane.f32.xlu0 %v17035_v44 }
0x1b5c   :  { %v9663_v12 = vpop.f32.mrf.mxu1  ;;  %v9712_v39 = vpop.f32.mrf.mxu2 }
0x1b5d   :  { %v9664_v48 = vadd.f32 %v16980_v25, %v9663_v12  ;;  %v9755_v4 = vpop.xlane.xlu1 %9754 }
0x1b5f   :  { %v9713_v6 = vadd.f32 %v9712_v39, %v9664_v48 }
0x1b61   :  { %v17040_v30 = vadd.f32 %v9713_v6, %v16920_v20  ;;  %v9784_v6 = vmul.f32 %v9755_v4, %v17401_v24 }
0x1b63   :  { %9766 = vadd.xlane.f32.xlu1 %v17040_v30 }
0x1b64   :  { %v9665_v16 = vpop.f32.mrf.mxu1  ;;  %v9714_v33 = vpop.f32.mrf.mxu2 }
0x1b65   :  { %v9666_v62 = vadd.f32 %v16980_v25, %v9665_v16 }
0x1b67   :  { %v9715_v51 = vadd.f32 %v9714_v33, %v9666_v62 }
0x1b69   :  { %v9741_v22 = vadd.f32 %v9715_v51, %v16923_v47 }
0x1b6b   :  { %9768 = vadd.xlane.f32.xlu2 %v9741_v22 }
0x1b6c   :  { %v9668_v21 = vpop.f32.mrf.mxu1  ;;  %v9717_v58 = vpop.f32.mrf.mxu2 }
0x1b6d   :  { %v9669_v13 = vadd.f32 %v16980_v25, %v9668_v21 }
0x1b6f   :  { %v9718_v45 = vadd.f32 %v9717_v58, %v9669_v13 }
0x1b71   :  { %v17047_v59 = vadd.f32 %v9718_v45, %v16936_v38 }
0x1b73   :  { %9770 = vadd.xlane.f32.xlu0 %v17047_v59 }
0x1b74   :  { %v9670_v20 = vpop.f32.mrf.mxu1  ;;  %v9719_v43 = vpop.f32.mrf.mxu2 }
0x1b75   :  { %v9671_v15 = vadd.f32 %v16980_v25, %v9670_v20 }
0x1b77   :  { %v9720_v8 = vadd.f32 %v9719_v43, %v9671_v15 }
0x1b79   :  { %v17052_v52 = vadd.f32 %v9720_v8, %v16939_v0  ;;  %v9782_v0 = vmul.f32 %v9751_v7, %v17401_v24 }
0x1b7b   :  { %9772 = vadd.xlane.f32.xlu1 %v17052_v52  ;;  %v17067_v9 = vsub.f32 %v16987_v56, %v9782_v0 }
0x1b7c   :  { %v9673_v47 = vpop.f32.mrf.mxu1  ;;  %v9722_v35 = vpop.f32.mrf.mxu2 }
0x1b7d   :  { %v9674_v61 = vadd.f32 %v16980_v25, %v9673_v47  ;;  %v9814_v2 = vmul.f32 %v17067_v9, %v17067_v9 }
0x1b7f   :  { %v9723_v31 = vadd.f32 %v9722_v35, %v9674_v61 }
0x1b81   :  { %v17057_v38 = vadd.f32 %v9723_v31, %v16952_v34  ;;  %v9757_v34 = vpop.xlane.xlu2 %9756 }
0x1b82   :  { %v9785_v10 = vmul.f32 %v9757_v34, %v17401_v24 }
0x1b83   :  { %9774 = vadd.xlane.f32.xlu2 %v17057_v38 }
0x1b84   :  { %v9675_v28 = vpop.f32.mrf.mxu1  ;;  %v9724_v14 = vpop.f32.mrf.mxu2  ;;  %v17073_v37 = vsub.f32 %v17007_v40, %v9785_v10 }
0x1b85   :  { %v9676_v63 = vadd.f32 %v16980_v25, %v9675_v28  ;;  %v9753_v40 = vpop.xlane.xlu0 %9752 }
0x1b86   :  { %v9817_v18 = vmul.f32 %v17073_v37, %v17073_v37  ;;  %v9783_v26 = vmul.f32 %v9753_v40, %v17401_v24 }
0x1b87   :  { %v9725_v19 = vadd.f32 %v9724_v14, %v9676_v63 }
0x1b88   :  { %v17092_v54 = vsub.f32 %v16993_v1, %v9783_v26  ;;  %v17107_v1 = vsub.f32 %v17001_v53, %v9784_v6 }
0x1b89   :  { %v17063_v11 = vadd.f32 %v9725_v19, %v16955_v41 }
0x1b8a   :  { %v9816_v13 = vmul.f32 %v17107_v1, %v17107_v1 }
0x1b8b   :  { %9776 = vadd.xlane.f32.xlu0 %v17063_v11 }
0x1b8d   :  { %v9759_v39 = vpop.xlane.xlu0 %9758 }
0x1b8e   :  { %v9786_v62 = vmul.f32 %v9759_v39, %v17401_v24 }
0x1b90   :  { %v17110_v51 = vsub.f32 %v17015_v29, %v9786_v62 }
0x1b92   :  { %v9818_v45 = vmul.f32 %v17110_v51, %v17110_v51 }
0x1b93   :  { %9830 = vadd.xlane.f32.xlu0 %v9814_v2 }
0x1b9b   :  { %9836 = vadd.xlane.f32.xlu0 %v9817_v18 }
0x1bc6   :  { %v9763_v41 = vpop.xlane.xlu2 %9762 }
0x1bc7   :  { %v9788_v46 = vmul.f32 %v9763_v41, %v17401_v24 }
0x1bc9   :  { %v17079_v56 = vsub.f32 %v17029_v5, %v9788_v46 }
0x1bcb   :  { %v9820_v3 = vmul.f32 %v17079_v56, %v17079_v56 }
0x1bcd   :  { %9842 = vadd.xlane.f32.xlu0 %v9820_v3 }
0x1bd6   :  { %v9678_v23 = vpop.f32.mrf.mxu1 }
0x1bd7   :  { %v9679_v50 = vadd.f32 %v16980_v25, %v9678_v23  ;;  %v9727_v36 = vpop.f32.mrf.mxu2  ;;  %v17161_v23 = vld [vmem:[%s17257_s26] ss:$0 sm:$0xff]  ;;  %s12418_s26 = smov [#allocation2]  }
0x1bd9   :  { %v9728_v42 = vadd.f32 %v9727_v36, %v9679_v50  ;;  %v17167_v50 = vld [vmem:[%s17258_s27] ss:$0 sm:$0xff]  ;;  %s9984_s27 = sshll.u32 %s12418_s26, 4  ;;  %s9985_s27 = int_to_ptr.vmem [resolvable:$true] %s9984_s27 }
0x1bdb   :  { %v17085_v17 = vadd.f32 %v9728_v42, %v16968_v60 }
0x1bdd   :  { %9778 = vadd.xlane.f32.xlu1 %v17085_v17 }
0x1bde   :  { %v9769_v49 = vpop.xlane.xlu2 %9768  ;;  %v9680_v5 = vpop.f32.mrf.mxu1 }
0x1bdf   :  { %v9791_v32 = vmul.f32 %v9769_v49, %v17401_v24  ;;  %v9681_v27 = vadd.f32 %v16980_v25, %v9680_v5  ;;  %v9729_v12 = vpop.f32.mrf.mxu2  ;;  %v9815_v25 = vmul.f32 %v17092_v54, %v17092_v54 }
0x1be1   :  { %v17094_v48 = vsub.f32 %v9741_v22, %v9791_v32  ;;  %v9730_v60 = vadd.f32 %v9729_v12, %v9681_v27  ;;  %v9765_v22 = vpop.xlane.xlu0 %9764 }
0x1be2   :  { %v9789_v58 = vmul.f32 %v9765_v22, %v17401_v24 }
0x1be3   :  { %v17098_v16 = vadd.f32 %v9730_v60, %v16971_v57  ;;  %v9823_v33 = vmul.f32 %v17094_v48, %v17094_v48  ;;  %v9761_v57 = vpop.xlane.xlu1 %9760 }
0x1be4   :  { %v9787_v21 = vmul.f32 %v9761_v57, %v17401_v24  ;;  %v17122_v29 = vsub.f32 %v17035_v44, %v9789_v58 }
0x1be5   :  { %9848 = vadd.xlane.f32.xlu0 %v9823_v33  ;;  %9780 = vadd.xlane.f32.xlu2 %v17098_v16 }
0x1be6   :  { %9832 = vadd.xlane.f32.xlu1 %v9815_v25  ;;  %v17119_v53 = vsub.f32 %v17021_v55, %v9787_v21  ;;  %v9821_v61 = vmul.f32 %v17122_v29, %v17122_v29 }
0x1be8   :  { %v9819_v8 = vmul.f32 %v17119_v53, %v17119_v53 }
0x1be9   :  { %v9771_v15 = vpop.xlane.xlu0 %9770 }
0x1bea   :  { %v9792_v47 = vmul.f32 %v9771_v15, %v17401_v24 }
0x1beb   :  { %v9767_v20 = vpop.xlane.xlu1 %9766 }
0x1bec   :  { %v9790_v43 = vmul.f32 %v9767_v20, %v17401_v24  ;;  %v17135_v31 = vsub.f32 %v17047_v59, %v9792_v47 }
0x1bed   :  { %9834 = vadd.xlane.f32.xlu2 %v9816_v13 }
0x1bee   :  { %9838 = vadd.xlane.f32.xlu1 %v9818_v45  ;;  %v17131_v55 = vsub.f32 %v17040_v30, %v9790_v43  ;;  %v9824_v30 = vmul.f32 %v17135_v31, %v17135_v31 }
0x1bf0   :  { %v9822_v19 = vmul.f32 %v17131_v55, %v17131_v55 }
0x1bf3   :  { %v9773_v28 = vpop.xlane.xlu1 %9772 }
0x1bf4   :  { %v9793_v7 = vmul.f32 %v9773_v28, %v17401_v24 }
0x1bf5   :  { %9840 = vadd.xlane.f32.xlu2 %v9819_v8 }
0x1bf6   :  { %9844 = vadd.xlane.f32.xlu1 %v9821_v61  ;;  %v9775_v35 = vpop.xlane.xlu2 %9774  ;;  %v17148_v0 = vsub.f32 %v17052_v52, %v9793_v7 }
0x1bf7   :  { %v9794_v44 = vmul.f32 %v9775_v35, %v17401_v24 }
0x1bf8   :  { %v9825_v2 = vmul.f32 %v17148_v0, %v17148_v0 }
0x1bf9   :  { %v17138_v63 = vsub.f32 %v17057_v38, %v9794_v44 }
0x1bfb   :  { %v9826_v14 = vmul.f32 %v17138_v63, %v17138_v63 }
0x1bfd   :  { %9854 = vadd.xlane.f32.xlu0 %v9826_v14  ;;  %9846 = vadd.xlane.f32.xlu2 %v9822_v19 }
0x1bfe   :  { %9850 = vadd.xlane.f32.xlu1 %v9824_v30  ;;  %v9777_v59 = vpop.xlane.xlu0 %9776 }
0x1bff   :  { %v9795_v38 = vmul.f32 %v9777_v59, %v17401_v24 }
0x1c01   :  { %v17152_v34 = vsub.f32 %v17063_v11, %v9795_v38 }
0x1c03   :  { %v9827_v10 = vmul.f32 %v17152_v34, %v17152_v34 }
0x1c05   :  { %9852 = vadd.xlane.f32.xlu2 %v9825_v2 }
0x1c06   :  { %9856 = vadd.xlane.f32.xlu1 %v9827_v10  ;;  %v9831_v18 = vpop.xlane.xlu0 %9830 }
0x1c07   :  { %v9862_v41 = vmul.f32 0.007874016, %v9831_v18 }
0x1c09   :  { %12343 = vrcp.f32 %v9862_v41 }
0x1c0e   :  { %v9837_v46 = vpop.xlane.xlu0 %9836 }
0x1c0f   :  { %v12344_v3 = vpop.eup %12343  ;;  %v9865_v52 = vmul.f32 0.007874016, %v9837_v46 }
0x1c10   :  { %v9894_v11 = vmul.f32 %v12344_v3, %v17067_v9 }
0x1c11   :  { %12345 = vrcp.f32 %v9865_v52 }
0x1c12   :  { %v9910_v36 = vadd.f32 1e-12, %v9894_v11 }
0x1c14   :  { %v9929_v40 = vmul.f32 %v17161_v23, %v9910_v36 }
0x1c16   :  { %v9948_v42 = vadd.f32 %v17167_v50, %v9929_v40 }
0x1c17   :  { %v12346_v26 = vpop.eup %12345 }
0x1c18   :  { %9964 = vst [vmem:[#allocation2] sm:$0xff] %v9948_v42  ;;  %v9897_v49 = vmul.f32 %v12346_v26, %v17073_v37 }
0x1c1a   :  { %v9913_v5 = vadd.f32 1e-12, %v9897_v49 }
0x1c1c   :  { %v9932_v32 = vmul.f32 %v17161_v23, %v9913_v5 }
0x1c1e   :  { %v9951_v9 = vadd.f32 %v17167_v50, %v9932_v32 }
0x1c20   :  { %9967 = vst [vmem:[#allocation2 + $0x18] sm:$0xff] %v9951_v9 }
0x1c40   :  { %v9843_v27 = vpop.xlane.xlu0 %9842 }
0x1c41   :  { %v9868_v4 = vmul.f32 0.007874016, %v9843_v27 }
0x1c43   :  { %12347 = vrcp.f32 %v9868_v4 }
0x1c49   :  { %v12348_v12 = vpop.eup %12347 }
0x1c4a   :  { %v9900_v39 = vmul.f32 %v12348_v12, %v17079_v56 }
0x1c4c   :  { %v9916_v60 = vadd.f32 1e-12, %v9900_v39 }
0x1c4e   :  { %v9935_v6 = vmul.f32 %v17161_v23, %v9916_v60 }
0x1c50   :  { %v9954_v33 = vadd.f32 %v17167_v50, %v9935_v6  ;;  %v9779_v62 = vpop.xlane.xlu1 %9778 }
0x1c51   :  { %v9796_v37 = vmul.f32 %v9779_v62, %v17401_v24 }
0x1c52   :  { %9970 = vst [vmem:[#allocation2 + $0x30] sm:$0xff] %v9954_v33 }
0x1c53   :  { %v17179_v25 = vsub.f32 %v17085_v17, %v9796_v37 }
0x1c55   :  { %v9828_v57 = vmul.f32 %v17179_v25, %v17179_v25 }
0x1c57   :  { %9858 = vadd.xlane.f32.xlu2 %v9828_v57 }
0x1c58   :  { %v9849_v22 = vpop.xlane.xlu0 %9848  ;;  %v9781_v21 = vpop.xlane.xlu2 %9780 }
0x1c59   :  { %v9871_v13 = vmul.f32 0.007874016, %v9849_v22  ;;  %v9797_v56 = vmul.f32 %v9781_v21, %v17401_v24  ;;  %v9833_v58 = vpop.xlane.xlu1 %9832 }
0x1c5a   :  { %v9863_v45 = vmul.f32 0.007874016, %v9833_v58 }
0x1c5b   :  { %12349 = vrcp.f32 %v9871_v13  ;;  %v17185_v20 = vsub.f32 %v17098_v16, %v9797_v56 }
0x1c5c   :  { %12351 = vrcp.f32 %v9863_v45 }
0x1c5d   :  { %v9829_v17 = vmul.f32 %v17185_v20, %v17185_v20 }
0x1c5f   :  { %9860 = vadd.xlane.f32.xlu0 %v9829_v17 }
0x1c60   :  { %v9835_v15 = vpop.xlane.xlu2 %9834 }
0x1c61   :  { %v12350_v43 = vpop.eup %12349  ;;  %v9864_v8 = vmul.f32 0.007874016, %v9835_v15  ;;  %v9839_v47 = vpop.xlane.xlu1 %9838 }
0x1c62   :  { %v12352_v61 = vpop.eup %12351  ;;  %v9903_v35 = vmul.f32 %v12350_v43, %v17094_v48  ;;  %v9866_v44 = vmul.f32 0.007874016, %v9839_v47 }
0x1c63   :  { %v9895_v24 = vmul.f32 %v12352_v61, %v17092_v54  ;;  %12353 = vrcp.f32 %v9864_v8 }
0x1c64   :  { %v9919_v28 = vadd.f32 1e-12, %v9903_v35  ;;  %12355 = vrcp.f32 %v9866_v44 }
0x1c65   :  { %v9911_v16 = vadd.f32 1e-12, %v9895_v24 }
0x1c66   :  { %v9938_v7 = vmul.f32 %v17161_v23, %v9919_v28 }
0x1c67   :  { %v9930_v14 = vmul.f32 %v17161_v23, %v9911_v16 }
0x1c68   :  { %v9957_v19 = vadd.f32 %v17167_v50, %v9938_v7  ;;  %v9841_v30 = vpop.xlane.xlu2 %9840 }
0x1c69   :  { %v12354_v59 = vpop.eup %12353  ;;  %v9949_v38 = vadd.f32 %v17167_v50, %v9930_v14  ;;  %v9867_v10 = vmul.f32 0.007874016, %v9841_v30  ;;  %v9845_v2 = vpop.xlane.xlu1 %9844 }
0x1c6a   :  { %v12356_v48 = vpop.eup %12355  ;;  %9973 = vst [vmem:[#allocation2 + $0x48] sm:$0xff] %v9957_v19  ;;  %v9896_v54 = vmul.f32 %v12354_v59, %v17107_v1  ;;  %v9869_v18 = vmul.f32 0.007874016, %v9845_v2 }
0x1c6b   :  { %9965 = vst [vmem:[#allocation2 + $0x8] sm:$0xff] %v9949_v38  ;;  %v9898_v41 = vmul.f32 %v12356_v48, %v17110_v51  ;;  %12357 = vrcp.f32 %v9867_v10 }
0x1c6c   :  { %v9912_v46 = vadd.f32 1e-12, %v9896_v54  ;;  %12359 = vrcp.f32 %v9869_v18 }
0x1c6d   :  { %v9914_v3 = vadd.f32 1e-12, %v9898_v41 }
0x1c6e   :  { %v9931_v52 = vmul.f32 %v17161_v23, %v9912_v46 }
0x1c6f   :  { %v9933_v11 = vmul.f32 %v17161_v23, %v9914_v3 }
0x1c70   :  { %v9950_v36 = vadd.f32 %v17167_v50, %v9931_v52  ;;  %v9855_v40 = vpop.xlane.xlu0 %9854  ;;  %v9847_v42 = vpop.xlane.xlu2 %9846 }
0x1c71   :  { %v12358_v26 = vpop.eup %12357  ;;  %v9952_v49 = vadd.f32 %v17167_v50, %v9933_v11  ;;  %v9874_v1 = vmul.f32 0.007874016, %v9855_v40  ;;  %v9870_v5 = vmul.f32 0.007874016, %v9847_v42  ;;  %v9851_v32 = vpop.xlane.xlu1 %9850 }
0x1c72   :  { %v12360_v9 = vpop.eup %12359  ;;  %9966 = vst [vmem:[#allocation2 + $0x10] sm:$0xff] %v9950_v36  ;;  %v9899_v51 = vmul.f32 %v12358_v26, %v17119_v53  ;;  %v9872_v27 = vmul.f32 0.007874016, %v9851_v32 }
0x1c73   :  { %9968 = vst [vmem:[#allocation2 + $0x20] sm:$0xff] %v9952_v49  ;;  %v9901_v4 = vmul.f32 %v12360_v9, %v17122_v29  ;;  %12361 = vrcp.f32 %v9874_v1 }
0x1c74   :  { %v9915_v12 = vadd.f32 1e-12, %v9899_v51  ;;  %12363 = vrcp.f32 %v9870_v5 }
0x1c75   :  { %v9917_v39 = vadd.f32 1e-12, %v9901_v4  ;;  %12365 = vrcp.f32 %v9872_v27 }
0x1c76   :  { %v9934_v60 = vmul.f32 %v17161_v23, %v9915_v12 }
0x1c77   :  { %v9936_v6 = vmul.f32 %v17161_v23, %v9917_v39 }
0x1c78   :  { %v9953_v33 = vadd.f32 %v17167_v50, %v9934_v60  ;;  %v9853_v62 = vpop.xlane.xlu2 %9852 }
0x1c79   :  { %v12362_v37 = vpop.eup %12361  ;;  %v9955_v57 = vadd.f32 %v17167_v50, %v9936_v6  ;;  %v9873_v53 = vmul.f32 0.007874016, %v9853_v62  ;;  %v9857_v22 = vpop.xlane.xlu1 %9856 }
0x1c7a   :  { %v12364_v21 = vpop.eup %12363  ;;  %9969 = vst [vmem:[#allocation2 + $0x28] sm:$0xff] %v9953_v33  ;;  %v9906_v29 = vmul.f32 %v12362_v37, %v17138_v63  ;;  %v9875_v13 = vmul.f32 0.007874016, %v9857_v22 }
0x1c7b   :  { %v12366_v56 = vpop.eup %12365  ;;  %9971 = vst [vmem:[#allocation2 + $0x38] sm:$0xff] %v9955_v57  ;;  %v9902_v58 = vmul.f32 %v12364_v21, %v17131_v55  ;;  %12367 = vrcp.f32 %v9873_v53 }
0x1c7c   :  { %v9922_v45 = vadd.f32 1e-12, %v9906_v29  ;;  %v9904_v17 = vmul.f32 %v12366_v56, %v17135_v31  ;;  %12369 = vrcp.f32 %v9875_v13 }
0x1c7d   :  { %v9918_v15 = vadd.f32 1e-12, %v9902_v58 }
0x1c7e   :  { %v9941_v43 = vmul.f32 %v17161_v23, %v9922_v45  ;;  %v9920_v8 = vadd.f32 1e-12, %v9904_v17 }
0x1c7f   :  { %v9937_v47 = vmul.f32 %v17161_v23, %v9918_v15 }
0x1c80   :  { %v9960_v61 = vadd.f32 %v17167_v50, %v9941_v43  ;;  %v9939_v63 = vmul.f32 %v17161_v23, %v9920_v8 }
0x1c81   :  { %v12368_v35 = vpop.eup %12367  ;;  %v9956_v44 = vadd.f32 %v17167_v50, %v9937_v47 }
0x1c82   :  { %v12370_v24 = vpop.eup %12369  ;;  %9976 = vst [vmem:[#allocation2 + $0x60] sm:$0xff] %v9960_v61  ;;  %v9958_v55 = vadd.f32 %v17167_v50, %v9939_v63  ;;  %v9905_v31 = vmul.f32 %v12368_v35, %v17148_v0 }
0x1c83   :  { %9972 = vst [vmem:[#allocation2 + $0x40] sm:$0xff] %v9956_v44  ;;  %v9907_v28 = vmul.f32 %v12370_v24, %v17152_v34 }
0x1c84   :  { %9974 = vst [vmem:[#allocation2 + $0x50] sm:$0xff] %v9958_v55  ;;  %v9921_v16 = vadd.f32 1e-12, %v9905_v31 }
0x1c85   :  { %v9923_v7 = vadd.f32 1e-12, %v9907_v28 }
0x1c86   :  { %v9940_v14 = vmul.f32 %v17161_v23, %v9921_v16 }
0x1c87   :  { %v9942_v19 = vmul.f32 %v17161_v23, %v9923_v7 }
0x1c88   :  { %v9959_v30 = vadd.f32 %v17167_v50, %v9940_v14 }
0x1c89   :  { %v9961_v59 = vadd.f32 %v17167_v50, %v9942_v19 }
0x1c8a   :  { %9975 = vst [vmem:[#allocation2 + $0x58] sm:$0xff] %v9959_v30 }
0x1c8b   :  { %9977 = vst [vmem:[#allocation2 + $0x68] sm:$0xff] %v9961_v59 }
0x1cca   :  { %v9859_v38 = vpop.xlane.xlu2 %9858 }
0x1ccb   :  { %v9876_v10 = vmul.f32 0.007874016, %v9859_v38 }
0x1ccd   :  { %12371 = vrcp.f32 %v9876_v10 }
0x1cd2   :  { %v9861_v0 = vpop.xlane.xlu0 %9860 }
0x1cd3   :  { %v12372_v2 = vpop.eup %12371  ;;  %v9877_v48 = vmul.f32 0.007874016, %v9861_v0 }
0x1cd4   :  { %v9908_v34 = vmul.f32 %v12372_v2, %v17179_v25 }
0x1cd5   :  { %12373 = vrcp.f32 %v9877_v48 }
0x1cd6   :  { %v9924_v54 = vadd.f32 1e-12, %v9908_v34 }
0x1cd8   :  { %v9943_v18 = vmul.f32 %v17161_v23, %v9924_v54 }
0x1cda   :  { %v9962_v41 = vadd.f32 %v17167_v50, %v9943_v18 }
0x1cdb   :  { %v12374_v46 = vpop.eup %12373 }
0x1cdc   :  { %9978 = vst [vmem:[#allocation2 + $0x70] sm:$0xff] %v9962_v41  ;;  %v9909_v3 = vmul.f32 %v12374_v46, %v17185_v20 }
0x1cde   :  { %v9925_v52 = vadd.f32 1e-12, %v9909_v3 }
0x1ce0   :  { %v9944_v11 = vmul.f32 %v17161_v23, %v9925_v52 }
0x1ce2   :  { %v9963_v25 = vadd.f32 %v17167_v50, %v9944_v11 }
0x1ce4   :  { %9979 = vst [vmem:[#allocation2 + $0x78] sm:$0xff] %v9963_v25 }
0x1ce5   :  { %9992 = dma.vmem_to_hbm [thread:$0]  %s9985_s27, 2048, %s9987_s1, [#allocation3], %s12419_s5, %s12419_s5, %s12420_s9  }
0x1ce6   :  { %12415 = dma.done.wait [#allocation3], 2048  }
0x1ce7   :  { %12416 = vsyncadd [#allocation3], 4294965248 }
0x1ce8   :  { %9997 = vsyncpa [#allocation3], 1 }

</bundles_post_ra>
